<compile_context>
chip_gen: v6e
topology: v6e:2x2x1
jax: 0.10.0
libtpu: 0.0.40
codegen_flags: <defaults>
</compile_context>

<pallas_src>
import functools
import math

import jax
import jax.numpy as jnp
from jax.experimental import pallas as pl
from jax.experimental.pallas import tpu as pltpu


# VMEM budget for the (double-buffered) row tiles.  Kept well under v7x's
# 64 MiB physical VMEM per TensorCore; v5e/v6e have 128 MiB so it is safe.
_TILE_VMEM_BUDGET = 32 * 1024 * 1024
_VMEM_LIMIT_BYTES = 48 * 1024 * 1024

_COMPILER_PARAMS = pltpu.CompilerParams(
    dimension_semantics=("parallel",),
    vmem_limit_bytes=_VMEM_LIMIT_BYTES,
)


# ----------------------------------------------------------------------------
# Helpers
# ----------------------------------------------------------------------------
def _gelu_tanh(x):
    c = math.sqrt(2.0 / math.pi)
    return 0.5 * x * (1.0 + jnp.tanh(c * (x + 0.044715 * x * x * x)))


def _pick_row_tile(n, bytes_per_row, budget=_TILE_VMEM_BUDGET):
    """Largest row tile (multiple of 8, dividing n) whose working set fits budget."""
    max_rows = max(8, (budget // max(bytes_per_row, 1)) // 8 * 8)
    if n <= max_rows:
        return n
    for t in range(max_rows, 7, -8):
        if n % t == 0:
            return t
    return n  # fallback: whole array as one block (allowed: equals full dim)


def _pick_mode_tile(p, bytes_per_mode, budget=_TILE_VMEM_BUDGET):
    """Largest mode-chunk dividing p whose working set fits budget."""
    max_p = max(1, budget // max(bytes_per_mode, 1))
    if p <= max_p:
        return p
    for t in range(max_p, 0, -1):
        if p % t == 0:
            return t
    return p


# ----------------------------------------------------------------------------
# Pallas kernels
# ----------------------------------------------------------------------------
def _pw_kernel(x_ref, w_ref, b_ref, *rest, act, has_res):
    """Pointwise linear over pixels: y = x @ w + b (+ residual) (+ gelu)."""
    if has_res:
        r_ref, o_ref = rest
    else:
        (o_ref,) = rest
    y = jnp.dot(x_ref[...], w_ref[...], preferred_element_type=jnp.float32)
    y = y + b_ref[...]
    if has_res:
        y = y + r_ref[...]
    if act:
        y = _gelu_tanh(y)
    o_ref[...] = y


def _mlp_kernel(x_ref, w1_ref, b1_ref, w2_ref, b2_ref, w3_ref, b3_ref, o_ref):
    """Fused fc1 -> GELU -> fc2 -> GELU -> fc3 on a row tile."""
    h = jnp.dot(x_ref[...], w1_ref[...], preferred_element_type=jnp.float32)
    h = _gelu_tanh(h + b1_ref[...])
    h = jnp.dot(h, w2_ref[...], preferred_element_type=jnp.float32)
    h = _gelu_tanh(h + b2_ref[...])
    y = jnp.dot(h, w3_ref[...], preferred_element_type=jnp.float32)
    o_ref[...] = y + b3_ref[...]


def _spectral_kernel(xr_ref, xi_ref, wr_ref, wi_ref, or_ref, oi_ref):
    """Batched per-mode complex channel mix with the 3-multiply (Gauss) trick."""
    xr = xr_ref[...]          # (Pm, B, Cin)
    xi = xi_ref[...]
    wr = wr_ref[...]          # (Pm, Cin, Cout)
    wi = wi_ref[...]
    rr = jnp.einsum("pbi,pio->pbo", xr, wr, preferred_element_type=jnp.float32)
    ii = jnp.einsum("pbi,pio->pbo", xi, wi, preferred_element_type=jnp.float32)
    k = jnp.einsum("pbi,pio->pbo", xr + xi, wr + wi,
                   preferred_element_type=jnp.float32)
    or_ref[...] = rr - ii
    oi_ref[...] = k - rr - ii


# ----------------------------------------------------------------------------
# Pallas wrappers
# ----------------------------------------------------------------------------
def pallas_pointwise(x2d, w, b, residual=None, act=False):
    """x2d: (N, Cin); w: (Cin, Cout); b: (Cout,); residual: (N, Cout) or None."""
    N, Cin = x2d.shape
    Cout = w.shape[1]
    b2 = b.reshape(1, Cout)
    has_res = residual is not None

    # double-buffered row-tiled arrays: input (Cin) + output (Cout) [+ residual]
    bytes_per_row = 4 * 2 * (Cin + Cout + (Cout if has_res else 0))
    tn = _pick_row_tile(N, bytes_per_row)
    grid = (N // tn,)

    in_specs = [
        pl.BlockSpec((tn, Cin), lambda i: (i, 0)),
        pl.BlockSpec((Cin, Cout), lambda i: (0, 0)),
        pl.BlockSpec((1, Cout), lambda i: (0, 0)),
    ]
    args = [x2d, w, b2]
    if has_res:
        in_specs.append(pl.BlockSpec((tn, Cout), lambda i: (i, 0)))
        args.append(residual)

    kernel = functools.partial(_pw_kernel, act=act, has_res=has_res)
    return pl.pallas_call(
        kernel,
        grid=grid,
        in_specs=in_specs,
        out_specs=pl.BlockSpec((tn, Cout), lambda i: (i, 0)),
        out_shape=jax.ShapeDtypeStruct((N, Cout), jnp.float32),
        compiler_params=_COMPILER_PARAMS,
    )(*args)


def pallas_mlp(x2d, w1, b1, w2, b2, w3, b3):
    """Fused fc1 -> GELU -> fc2 -> GELU -> fc3 over flattened pixels."""
    N, C0 = x2d.shape
    Cf = w1.shape[1]
    C1 = w2.shape[1]
    Co = w3.shape[1]

    # double-buffered input/output rows + single-buffered kernel intermediates
    bytes_per_row = 4 * (2 * (C0 + Co) + Cf + C1)
    tn = _pick_row_tile(N, bytes_per_row)
    grid = (N // tn,)

    full = lambda i: (0, 0)
    row = lambda i: (i, 0)
    return pl.pallas_call(
        _mlp_kernel,
        grid=grid,
        in_specs=[
            pl.BlockSpec((tn, C0), row),
            pl.BlockSpec((C0, Cf), full),
            pl.BlockSpec((1, Cf), full),
            pl.BlockSpec((Cf, C1), full),
            pl.BlockSpec((1, C1), full),
            pl.BlockSpec((C1, Co), full),
            pl.BlockSpec((1, Co), full),
        ],
        out_specs=pl.BlockSpec((tn, Co), row),
        out_shape=jax.ShapeDtypeStruct((N, Co), jnp.float32),
        compiler_params=_COMPILER_PARAMS,
    )(x2d, w1, b1.reshape(1, Cf), w2, b2.reshape(1, C1), w3, b3.reshape(1, Co))


def pallas_spectral_modes(xr, xi, wr, wi):
    """xr, xi: (P, B, Cin); wr, wi: (P, Cin, Cout) -> (P, B, Cout) real & imag."""
    P, B, Cin = xr.shape
    Cout = wr.shape[2]

    bytes_per_mode = 4 * 2 * (2 * B * Cin + 2 * Cin * Cout + 2 * B * Cout)
    pm = _pick_mode_tile(P, bytes_per_mode)
    grid = (P // pm,)

    spec_x = pl.BlockSpec((pm, B, Cin), lambda p: (p, 0, 0))
    spec_w = pl.BlockSpec((pm, Cin, Cout), lambda p: (p, 0, 0))
    spec_o = pl.BlockSpec((pm, B, Cout), lambda p: (p, 0, 0))
    return pl.pallas_call(
        _spectral_kernel,
        grid=grid,
        in_specs=[spec_x, spec_x, spec_w, spec_w],
        out_specs=(spec_o, spec_o),
        out_shape=(
            jax.ShapeDtypeStruct((P, B, Cout), jnp.float32),
            jax.ShapeDtypeStruct((P, B, Cout), jnp.float32),
        ),
        compiler_params=_COMPILER_PARAMS,
    )(xr, xi, wr, wi)


# ----------------------------------------------------------------------------
# Model (FNO2d / FNO2dAR) forward in JAX, hot paths via Pallas
# ----------------------------------------------------------------------------
def _prep_spectral_weights(sp):
    """(Cin, Cout, m1, m2) x 4 -> real/imag stacks of shape (P=2*m1*m2, Cin, Cout)."""
    def prep(wa, wb):
        w = jnp.concatenate([wa, wb], axis=2)      # (Cin, Cout, 2*m1, m2)
        w = jnp.transpose(w, (2, 3, 0, 1))         # (2*m1, m2, Cin, Cout)
        return w.reshape(-1, w.shape[2], w.shape[3]).astype(jnp.float32)

    return prep(sp["w1r"], sp["w2r"]), prep(sp["w1i"], sp["w2i"])


def spectral_conv2d(x, wr, wi, m1, m2):
    """SpectralConv2d: rfft2 -> keep low modes -> complex channel mix -> irfft2."""
    B, H, W, Cin = x.shape
    Cout = wr.shape[2]
    assert 2 * m1 <= H and m2 <= W // 2 + 1, "retained modes exceed grid size"

    x_ft = jnp.fft.rfft2(x, axes=(1, 2))           # (B, H, W//2+1, Cin) complex64
    Wf = x_ft.shape[2]

    # Gather the positive- and negative-frequency blocks: (B, 2*m1, m2, Cin).
    xm = jnp.concatenate(
        [x_ft[:, :m1, :m2, :], x_ft[:, H - m1:, :m2, :]], axis=1)
    P = 2 * m1 * m2
    xm = jnp.transpose(xm, (1, 2, 0, 3)).reshape(P, B, Cin)
    xr = jnp.real(xm).astype(jnp.float32)
    xi = jnp.imag(xm).astype(jnp.float32)

    or_, oi_ = pallas_spectral_modes(xr, xi, wr, wi)   # (P, B, Cout) each
    om = jax.lax.complex(or_, oi_).reshape(2 * m1, m2, B, Cout)
    om = jnp.transpose(om, (2, 0, 1, 3))               # (B, 2*m1, m2, Cout)

    out_ft = jnp.zeros((B, H, Wf, Cout), dtype=jnp.complex64)
    out_ft = out_ft.at[:, :m1, :m2, :].set(om[:, :m1])
    out_ft = out_ft.at[:, H - m1:, :m2, :].set(om[:, m1:])
    return jnp.fft.irfft2(out_ft, s=(H, W), axes=(1, 2)).astype(jnp.float32)


def fno2d_forward(params, sp_weights, x, modes1, modes2):
    """x: (B, H, W, in_dim) -> (B, H, W, out_dim).  pad_ratio = [0, 0]."""
    B, H, W, _ = x.shape
    N = B * H * W

    h = pallas_pointwise(x.reshape(N, -1), params["fc0_w"], params["fc0_b"])
    h = h.reshape(B, H, W, -1)

    n_layers = len(params["w"])
    for i in range(n_layers):
        m1, m2 = modes1[i], modes2[i]
        wr, wi = sp_weights[i]
        x1 = spectral_conv2d(h, wr, wi, m1, m2)        # (B, H, W, Cout)
        Cout = x1.shape[-1]
        # x2 = 1x1 conv; fused in-kernel with the x1 add and GELU (except last layer)
        h = pallas_pointwise(
            h.reshape(N, -1),
            params["w"][i]["w"],
            params["w"][i]["b"],
            residual=x1.reshape(N, Cout),
            act=(i != n_layers - 1),
        ).reshape(B, H, W, Cout)

    # fc1 -> GELU -> fc2 -> GELU -> fc3 fused in one Pallas kernel.
    out = pallas_mlp(
        h.reshape(N, -1),
        params["fc1_w"], params["fc1_b"],
        params["fc2_w"], params["fc2_b"],
        params["fc3_w"], params["fc3_b"],
    )
    return out.reshape(B, H, W, -1)


@functools.partial(jax.jit, static_argnums=(2, 3))
def fno2dar_forward(params, x, modes1, modes2):
    """x: (B, X, Y, T, C) -> (B, X, Y, T, 1) (autoregressive rollout)."""
    B, X, Y, T, C = x.shape
    # Hoist the spectral-weight re-layout out of the per-step / per-layer loop.
    sp_weights = tuple(_prep_spectral_weights(sp) for sp in params["sp"])

    pred0 = x[:, :, :, 0:1, 0:1]
    if T == 1:
        return pred0

    input_frame = x[:, :, :, 0]            # (B, X, Y, C)
    input_concat = x[:, :, :, 0, 1:]       # (B, X, Y, C-1)

    def step(frame, _):
        out = fno2d_forward(params, sp_weights, frame, modes1, modes2)  # (B,X,Y,1)
        new_frame = jnp.concatenate([out, input_concat], axis=-1)
        return new_frame, out

    _, outs = jax.lax.scan(step, input_frame, xs=None, length=T - 1)
    outs = jnp.moveaxis(outs, 0, 3)        # (B, X, Y, T-1, out_dim)
    return jnp.concatenate([pred0, outs], axis=3)


# ----------------------------------------------------------------------------
# Deterministic parameter init (synthetic; shapes follow the nn.Module __init__)
# ----------------------------------------------------------------------------
def init_params(key, modes1, modes2, width, fc_dim, in_dim, out_dim):
    layers = [width] * (len(modes1) + 1)
    keys = iter(jax.random.split(key, 8 * (len(modes1) + 8)))

    def lin(cin, cout):
        bound = 1.0 / math.sqrt(cin)
        w = jax.random.uniform(next(keys), (cin, cout), jnp.float32, -bound, bound)
        b = jax.random.uniform(next(keys), (cout,), jnp.float32, -bound, bound)
        return w, b

    params = {}
    params["fc0_w"], params["fc0_b"] = lin(in_dim, layers[0])

    params["sp"] = []
    params["w"] = []
    for cin, cout, m1, m2 in zip(layers, layers[1:], modes1, modes2):
        scale = 1.0 / (cin * cout)
        sp = dict(
            w1r=scale * jax.random.uniform(next(keys), (cin, cout, m1, m2), jnp.float32),
            w1i=scale * jax.random.uniform(next(keys), (cin, cout, m1, m2), jnp.float32),
            w2r=scale * jax.random.uniform(next(keys), (cin, cout, m1, m2), jnp.float32),
            w2i=scale * jax.random.uniform(next(keys), (cin, cout, m1, m2), jnp.float32),
        )
        params["sp"].append(sp)
        ww, wb = lin(cin, cout)  # Conv1d(cin, cout, 1) == per-pixel linear
        params["w"].append(dict(w=ww, b=wb))

    params["fc1_w"], params["fc1_b"] = lin(layers[-1], fc_dim)
    params["fc2_w"], params["fc2_b"] = lin(fc_dim, layers[-1])
    params["fc3_w"], params["fc3_b"] = lin(layers[-1], out_dim)
    return params


# ----------------------------------------------------------------------------
if __name__ == "__main__":
    modes1 = (4, 4)
    modes2 = (4, 4)
    width = 8
    fc_dim = 16
    in_dim = 3
    out_dim = 1

    B, X, Y, T = 2, 16, 16, 3

    key = jax.random.PRNGKey(0)
    kp, kx = jax.random.split(key)
    params = init_params(kp, modes1, modes2, width, fc_dim, in_dim, out_dim)
    x = jax.random.normal(kx, (B, X, Y, T, in_dim), dtype=jnp.float32)

    out = fno2dar_forward(params, x, modes1, modes2)
    out = jax.block_until_ready(out)
    assert out.shape == (B, X, Y, T, out_dim), out.shape
    assert bool(jnp.all(jnp.isfinite(out)))
    print("KERNEL_OK")
</pallas_src>

<mosaic_0001>
module attributes {stable_mosaic.version = 11 : i64} {
  func.func @_pw_kernel(%arg0: i32, %arg1: memref<512x3xf32, #tpu.memory_space<vmem>>, %arg2: memref<3x8xf32, #tpu.memory_space<vmem>>, %arg3: memref<1x8xf32, #tpu.memory_space<vmem>>, %arg4: memref<512x8xf32, #tpu.memory_space<vmem>>) attributes {dimension_semantics = [#tpu.dimension_semantics<parallel>], iteration_bounds = array<i64: 1>, scalar_prefetch = 0 : i64, scratch_operands = 0 : i64, tpu.core_type = #tpu.core_type<tc>, window_params = [{transform_indices = @transform_0, window_bounds = array<i64: 512, 3>}, {pipeline_mode = #tpu.pipeline_mode<synchronous>, transform_indices = @transform_1, window_bounds = array<i64: 3, 8>}, {pipeline_mode = #tpu.pipeline_mode<synchronous>, transform_indices = @transform_2, window_bounds = array<i64: 1, 8>}, {transform_indices = @transform_3, window_bounds = array<i64: 512, 8>}]} {
    %c0 = arith.constant 0 : index
    %c0_0 = arith.constant 0 : index
    %0 = vector.load %arg1[%c0, %c0_0] : memref<512x3xf32, #tpu.memory_space<vmem>>, vector<512x3xf32>
    %c0_1 = arith.constant 0 : index
    %c0_2 = arith.constant 0 : index
    %1 = vector.load %arg2[%c0_1, %c0_2] : memref<3x8xf32, #tpu.memory_space<vmem>>, vector<3x8xf32>
    %cst = arith.constant dense<0.000000e+00> : vector<512x8xf32>
    %2 = tpu.matmul %0, %1, %cst {dimension_numbers = #tpu.dot_dimension_numbers<[1], [0], [0], [1], [0, 0, 1, 1], [], []>} : vector<512x3xf32>, vector<3x8xf32>, vector<512x8xf32> -> vector<512x8xf32>
    %c0_3 = arith.constant 0 : index
    %c0_4 = arith.constant 0 : index
    %3 = vector.load %arg3[%c0_3, %c0_4] : memref<1x8xf32, #tpu.memory_space<vmem>>, vector<1x8xf32>
    %4 = vector.broadcast %3 : vector<1x8xf32> to vector<512x8xf32>
    %5 = arith.addf %2, %4 : vector<512x8xf32>
    %c0_5 = arith.constant 0 : index
    %c0_6 = arith.constant 0 : index
    %6 = vector.load %arg4[%c0_5, %c0_6] : memref<512x8xf32, #tpu.memory_space<vmem>>, vector<512x8xf32>
    tpu.vector_store %arg4[%c0_5, %c0_6], %5 {strides = array<i32>} : memref<512x8xf32, #tpu.memory_space<vmem>>, vector<512x8xf32>,
    return
  }
  func.func @transform_0(%arg0: i32) -> (i32, i32) {
    %c0_i32 = arith.constant 0 : i32
    %c0_i32_0 = arith.constant 0 : i32
    return %arg0, %c0_i32 : i32, i32
  }
  func.func @transform_1(%arg0: i32) -> (i32, i32) {
    %c0_i32 = arith.constant 0 : i32
    %c0_i32_0 = arith.constant 0 : i32
    %c0_i32_1 = arith.constant 0 : i32
    return %c0_i32, %c0_i32_0 : i32, i32
  }
  func.func @transform_2(%arg0: i32) -> (i32, i32) {
    %c0_i32 = arith.constant 0 : i32
    %c0_i32_0 = arith.constant 0 : i32
    %c0_i32_1 = arith.constant 0 : i32
    return %c0_i32, %c0_i32_0 : i32, i32
  }
  func.func @transform_3(%arg0: i32) -> (i32, i32) {
    %c0_i32 = arith.constant 0 : i32
    %c0_i32_0 = arith.constant 0 : i32
    return %arg0, %c0_i32 : i32, i32
  }
}

module attributes {stable_mosaic.version = 11 : i64} {
  func.func @_spectral_kernel(%arg0: i32, %arg1: memref<32x2x8xf32, #tpu.memory_space<vmem>>, %arg2: memref<32x2x8xf32, #tpu.memory_space<vmem>>, %arg3: memref<32x8x8xf32, #tpu.memory_space<vmem>>, %arg4: memref<32x8x8xf32, #tpu.memory_space<vmem>>, %arg5: memref<32x2x8xf32, #tpu.memory_space<vmem>>, %arg6: memref<32x2x8xf32, #tpu.memory_space<vmem>>) attributes {dimension_semantics = [#tpu.dimension_semantics<parallel>], iteration_bounds = array<i64: 1>, scalar_prefetch = 0 : i64, scratch_operands = 0 : i64, tpu.core_type = #tpu.core_type<tc>, window_params = [{transform_indices = @transform_0, window_bounds = array<i64: 32, 2, 8>}, {transform_indices = @transform_1, window_bounds = array<i64: 32, 2, 8>}, {transform_indices = @transform_2, window_bounds = array<i64: 32, 8, 8>}, {transform_indices = @transform_3, window_bounds = array<i64: 32, 8, 8>}, {transform_indices = @transform_4, window_bounds = array<i64: 32, 2, 8>}, {transform_indices = @transform_5, window_bounds = array<i64: 32, 2, 8>}]} {
    %c0 = arith.constant 0 : index
    %c0_0 = arith.constant 0 : index
    %c0_1 = arith.constant 0 : index
    %0 = vector.load %arg1[%c0, %c0_0, %c0_1] : memref<32x2x8xf32, #tpu.memory_space<vmem>>, vector<32x2x8xf32>
    %c0_2 = arith.constant 0 : index
    %c0_3 = arith.constant 0 : index
    %c0_4 = arith.constant 0 : index
    %1 = vector.load %arg2[%c0_2, %c0_3, %c0_4] : memref<32x2x8xf32, #tpu.memory_space<vmem>>, vector<32x2x8xf32>
    %c0_5 = arith.constant 0 : index
    %c0_6 = arith.constant 0 : index
    %c0_7 = arith.constant 0 : index
    %2 = vector.load %arg3[%c0_5, %c0_6, %c0_7] : memref<32x8x8xf32, #tpu.memory_space<vmem>>, vector<32x8x8xf32>
    %c0_8 = arith.constant 0 : index
    %c0_9 = arith.constant 0 : index
    %c0_10 = arith.constant 0 : index
    %3 = vector.load %arg4[%c0_8, %c0_9, %c0_10] : memref<32x8x8xf32, #tpu.memory_space<vmem>>, vector<32x8x8xf32>
    "tpu.trace_start"() <{level = 10 : i32, message = "pbi,pio->pbo"}> : () -> ()
    %cst = arith.constant dense<0.000000e+00> : vector<32x2x8xf32>
    %4 = tpu.matmul %0, %2, %cst {dimension_numbers = #tpu.dot_dimension_numbers<[2], [1], [1], [2], [0, 0, 0, 1, 1, 2], [0], [0]>} : vector<32x2x8xf32>, vector<32x8x8xf32>, vector<32x2x8xf32> -> vector<32x2x8xf32>
    %cst_11 = arith.constant dense<0.000000e+00> : vector<32x2x8xf32>
    %5 = tpu.matmul %1, %3, %cst_11 {dimension_numbers = #tpu.dot_dimension_numbers<[2], [1], [1], [2], [0, 0, 0, 1, 1, 2], [0], [0]>} : vector<32x2x8xf32>, vector<32x8x8xf32>, vector<32x2x8xf32> -> vector<32x2x8xf32>
    "tpu.trace_stop"() : () -> ()
    %6 = arith.addf %0, %1 : vector<32x2x8xf32>
    %7 = arith.addf %2, %3 : vector<32x8x8xf32>
    "tpu.trace_start"() <{level = 10 : i32, message = "pbi,pio->pbo"}> : () -> ()
    %cst_12 = arith.constant dense<0.000000e+00> : vector<32x2x8xf32>
    %8 = tpu.matmul %6, %7, %cst_12 {dimension_numbers = #tpu.dot_dimension_numbers<[2], [1], [1], [2], [0, 0, 0, 1, 1, 2], [0], [0]>} : vector<32x2x8xf32>, vector<32x8x8xf32>, vector<32x2x8xf32> -> vector<32x2x8xf32>
    "tpu.trace_stop"() : () -> ()
    %9 = arith.subf %4, %5 : vector<32x2x8xf32>
    %c0_13 = arith.constant 0 : index
    %c0_14 = arith.constant 0 : index
    %c0_15 = arith.constant 0 : index
    %10 = vector.load %arg5[%c0_13, %c0_14, %c0_15] : memref<32x2x8xf32, #tpu.memory_space<vmem>>, vector<32x2x8xf32>
    tpu.vector_store %arg5[%c0_13, %c0_14, %c0_15], %9 {strides = array<i32>} : memref<32x2x8xf32, #tpu.memory_space<vmem>>, vector<32x2x8xf32>,
    %11 = arith.subf %8, %4 : vector<32x2x8xf32>
    %12 = arith.subf %11, %5 : vector<32x2x8xf32>
    %c0_16 = arith.constant 0 : index
    %c0_17 = arith.constant 0 : index
    %c0_18 = arith.constant 0 : index
    %13 = vector.load %arg6[%c0_16, %c0_17, %c0_18] : memref<32x2x8xf32, #tpu.memory_space<vmem>>, vector<32x2x8xf32>
    tpu.vector_store %arg6[%c0_16, %c0_17, %c0_18], %12 {strides = array<i32>} : memref<32x2x8xf32, #tpu.memory_space<vmem>>, vector<32x2x8xf32>,
    return
  }
  func.func @transform_0(%arg0: i32) -> (i32, i32, i32) {
    %c0_i32 = arith.constant 0 : i32
    %c0_i32_0 = arith.constant 0 : i32
    %c0_i32_1 = arith.constant 0 : i32
    return %arg0, %c0_i32, %c0_i32_0 : i32, i32, i32
  }
  func.func @transform_1(%arg0: i32) -> (i32, i32, i32) {
    %c0_i32 = arith.constant 0 : i32
    %c0_i32_0 = arith.constant 0 : i32
    %c0_i32_1 = arith.constant 0 : i32
    return %arg0, %c0_i32, %c0_i32_0 : i32, i32, i32
  }
  func.func @transform_2(%arg0: i32) -> (i32, i32, i32) {
    %c0_i32 = arith.constant 0 : i32
    %c0_i32_0 = arith.constant 0 : i32
    %c0_i32_1 = arith.constant 0 : i32
    return %arg0, %c0_i32, %c0_i32_0 : i32, i32, i32
  }
  func.func @transform_3(%arg0: i32) -> (i32, i32, i32) {
    %c0_i32 = arith.constant 0 : i32
    %c0_i32_0 = arith.constant 0 : i32
    %c0_i32_1 = arith.constant 0 : i32
    return %arg0, %c0_i32, %c0_i32_0 : i32, i32, i32
  }
  func.func @transform_4(%arg0: i32) -> (i32, i32, i32) {
    %c0_i32 = arith.constant 0 : i32
    %c0_i32_0 = arith.constant 0 : i32
    %c0_i32_1 = arith.constant 0 : i32
    return %arg0, %c0_i32, %c0_i32_0 : i32, i32, i32
  }
  func.func @transform_5(%arg0: i32) -> (i32, i32, i32) {
    %c0_i32 = arith.constant 0 : i32
    %c0_i32_0 = arith.constant 0 : i32
    %c0_i32_1 = arith.constant 0 : i32
    return %arg0, %c0_i32, %c0_i32_0 : i32, i32, i32
  }
}

module attributes {stable_mosaic.version = 11 : i64} {
  func.func @_pw_kernel(%arg0: i32, %arg1: memref<512x8xf32, #tpu.memory_space<vmem>>, %arg2: memref<8x8xf32, #tpu.memory_space<vmem>>, %arg3: memref<1x8xf32, #tpu.memory_space<vmem>>, %arg4: memref<512x8xf32, #tpu.memory_space<vmem>>, %arg5: memref<512x8xf32, #tpu.memory_space<vmem>>) attributes {dimension_semantics = [#tpu.dimension_semantics<parallel>], iteration_bounds = array<i64: 1>, scalar_prefetch = 0 : i64, scratch_operands = 0 : i64, tpu.core_type = #tpu.core_type<tc>, window_params = [{transform_indices = @transform_0, window_bounds = array<i64: 512, 8>}, {pipeline_mode = #tpu.pipeline_mode<synchronous>, transform_indices = @transform_1, window_bounds = array<i64: 8, 8>}, {pipeline_mode = #tpu.pipeline_mode<synchronous>, transform_indices = @transform_2, window_bounds = array<i64: 1, 8>}, {transform_indices = @transform_3, window_bounds = array<i64: 512, 8>}, {transform_indices = @transform_4, window_bounds = array<i64: 512, 8>}]} {
    %c0 = arith.constant 0 : index
    %c0_0 = arith.constant 0 : index
    %0 = vector.load %arg1[%c0, %c0_0] : memref<512x8xf32, #tpu.memory_space<vmem>>, vector<512x8xf32>
    %c0_1 = arith.constant 0 : index
    %c0_2 = arith.constant 0 : index
    %1 = vector.load %arg2[%c0_1, %c0_2] : memref<8x8xf32, #tpu.memory_space<vmem>>, vector<8x8xf32>
    %cst = arith.constant dense<0.000000e+00> : vector<512x8xf32>
    %2 = tpu.matmul %0, %1, %cst {dimension_numbers = #tpu.dot_dimension_numbers<[1], [0], [0], [1], [0, 0, 1, 1], [], []>} : vector<512x8xf32>, vector<8x8xf32>, vector<512x8xf32> -> vector<512x8xf32>
    %c0_3 = arith.constant 0 : index
    %c0_4 = arith.constant 0 : index
    %3 = vector.load %arg3[%c0_3, %c0_4] : memref<1x8xf32, #tpu.memory_space<vmem>>, vector<1x8xf32>
    %4 = vector.broadcast %3 : vector<1x8xf32> to vector<512x8xf32>
    %5 = arith.addf %2, %4 : vector<512x8xf32>
    %c0_5 = arith.constant 0 : index
    %c0_6 = arith.constant 0 : index
    %6 = vector.load %arg4[%c0_5, %c0_6] : memref<512x8xf32, #tpu.memory_space<vmem>>, vector<512x8xf32>
    %7 = arith.addf %5, %6 : vector<512x8xf32>
    %cst_7 = arith.constant 5.000000e-01 : f32
    %8 = vector.broadcast %cst_7 : f32 to vector<512x8xf32>
    %9 = arith.mulf %8, %7 : vector<512x8xf32>
    %cst_8 = arith.constant 4.471500e-02 : f32
    %10 = vector.broadcast %cst_8 : f32 to vector<512x8xf32>
    %11 = arith.mulf %10, %7 : vector<512x8xf32>
    %12 = arith.mulf %11, %7 : vector<512x8xf32>
    %13 = arith.mulf %12, %7 : vector<512x8xf32>
    %14 = arith.addf %7, %13 : vector<512x8xf32>
    %cst_9 = arith.constant 0.797884583 : f32
    %15 = vector.broadcast %cst_9 : f32 to vector<512x8xf32>
    %16 = arith.mulf %15, %14 : vector<512x8xf32>
    %17 = math.tanh %16 : vector<512x8xf32>
    %cst_10 = arith.constant 1.000000e+00 : f32
    %18 = vector.broadcast %cst_10 : f32 to vector<512x8xf32>
    %19 = arith.addf %18, %17 : vector<512x8xf32>
    %20 = arith.mulf %9, %19 : vector<512x8xf32>
    %c0_11 = arith.constant 0 : index
    %c0_12 = arith.constant 0 : index
    %21 = vector.load %arg5[%c0_11, %c0_12] : memref<512x8xf32, #tpu.memory_space<vmem>>, vector<512x8xf32>
    tpu.vector_store %arg5[%c0_11, %c0_12], %20 {strides = array<i32>} : memref<512x8xf32, #tpu.memory_space<vmem>>, vector<512x8xf32>,
    return
  }
  func.func @transform_0(%arg0: i32) -> (i32, i32) {
    %c0_i32 = arith.constant 0 : i32
    %c0_i32_0 = arith.constant 0 : i32
    return %arg0, %c0_i32 : i32, i32
  }
  func.func @transform_1(%arg0: i32) -> (i32, i32) {
    %c0_i32 = arith.constant 0 : i32
    %c0_i32_0 = arith.constant 0 : i32
    %c0_i32_1 = arith.constant 0 : i32
    return %c0_i32, %c0_i32_0 : i32, i32
  }
  func.func @transform_2(%arg0: i32) -> (i32, i32) {
    %c0_i32 = arith.constant 0 : i32
    %c0_i32_0 = arith.constant 0 : i32
    %c0_i32_1 = arith.constant 0 : i32
    return %c0_i32, %c0_i32_0 : i32, i32
  }
  func.func @transform_3(%arg0: i32) -> (i32, i32) {
    %c0_i32 = arith.constant 0 : i32
    %c0_i32_0 = arith.constant 0 : i32
    return %arg0, %c0_i32 : i32, i32
  }
  func.func @transform_4(%arg0: i32) -> (i32, i32) {
    %c0_i32 = arith.constant 0 : i32
    %c0_i32_0 = arith.constant 0 : i32
    return %arg0, %c0_i32 : i32, i32
  }
}

module attributes {stable_mosaic.version = 11 : i64} {
  func.func @_pw_kernel(%arg0: i32, %arg1: memref<512x8xf32, #tpu.memory_space<vmem>>, %arg2: memref<8x8xf32, #tpu.memory_space<vmem>>, %arg3: memref<1x8xf32, #tpu.memory_space<vmem>>, %arg4: memref<512x8xf32, #tpu.memory_space<vmem>>, %arg5: memref<512x8xf32, #tpu.memory_space<vmem>>) attributes {dimension_semantics = [#tpu.dimension_semantics<parallel>], iteration_bounds = array<i64: 1>, scalar_prefetch = 0 : i64, scratch_operands = 0 : i64, tpu.core_type = #tpu.core_type<tc>, window_params = [{transform_indices = @transform_0, window_bounds = array<i64: 512, 8>}, {pipeline_mode = #tpu.pipeline_mode<synchronous>, transform_indices = @transform_1, window_bounds = array<i64: 8, 8>}, {pipeline_mode = #tpu.pipeline_mode<synchronous>, transform_indices = @transform_2, window_bounds = array<i64: 1, 8>}, {transform_indices = @transform_3, window_bounds = array<i64: 512, 8>}, {transform_indices = @transform_4, window_bounds = array<i64: 512, 8>}]} {
    %c0 = arith.constant 0 : index
    %c0_0 = arith.constant 0 : index
    %0 = vector.load %arg1[%c0, %c0_0] : memref<512x8xf32, #tpu.memory_space<vmem>>, vector<512x8xf32>
    %c0_1 = arith.constant 0 : index
    %c0_2 = arith.constant 0 : index
    %1 = vector.load %arg2[%c0_1, %c0_2] : memref<8x8xf32, #tpu.memory_space<vmem>>, vector<8x8xf32>
    %cst = arith.constant dense<0.000000e+00> : vector<512x8xf32>
    %2 = tpu.matmul %0, %1, %cst {dimension_numbers = #tpu.dot_dimension_numbers<[1], [0], [0], [1], [0, 0, 1, 1], [], []>} : vector<512x8xf32>, vector<8x8xf32>, vector<512x8xf32> -> vector<512x8xf32>
    %c0_3 = arith.constant 0 : index
    %c0_4 = arith.constant 0 : index
    %3 = vector.load %arg3[%c0_3, %c0_4] : memref<1x8xf32, #tpu.memory_space<vmem>>, vector<1x8xf32>
    %4 = vector.broadcast %3 : vector<1x8xf32> to vector<512x8xf32>
    %5 = arith.addf %2, %4 : vector<512x8xf32>
    %c0_5 = arith.constant 0 : index
    %c0_6 = arith.constant 0 : index
    %6 = vector.load %arg4[%c0_5, %c0_6] : memref<512x8xf32, #tpu.memory_space<vmem>>, vector<512x8xf32>
    %7 = arith.addf %5, %6 : vector<512x8xf32>
    %c0_7 = arith.constant 0 : index
    %c0_8 = arith.constant 0 : index
    %8 = vector.load %arg5[%c0_7, %c0_8] : memref<512x8xf32, #tpu.memory_space<vmem>>, vector<512x8xf32>
    tpu.vector_store %arg5[%c0_7, %c0_8], %7 {strides = array<i32>} : memref<512x8xf32, #tpu.memory_space<vmem>>, vector<512x8xf32>,
    return
  }
  func.func @transform_0(%arg0: i32) -> (i32, i32) {
    %c0_i32 = arith.constant 0 : i32
    %c0_i32_0 = arith.constant 0 : i32
    return %arg0, %c0_i32 : i32, i32
  }
  func.func @transform_1(%arg0: i32) -> (i32, i32) {
    %c0_i32 = arith.constant 0 : i32
    %c0_i32_0 = arith.constant 0 : i32
    %c0_i32_1 = arith.constant 0 : i32
    return %c0_i32, %c0_i32_0 : i32, i32
  }
  func.func @transform_2(%arg0: i32) -> (i32, i32) {
    %c0_i32 = arith.constant 0 : i32
    %c0_i32_0 = arith.constant 0 : i32
    %c0_i32_1 = arith.constant 0 : i32
    return %c0_i32, %c0_i32_0 : i32, i32
  }
  func.func @transform_3(%arg0: i32) -> (i32, i32) {
    %c0_i32 = arith.constant 0 : i32
    %c0_i32_0 = arith.constant 0 : i32
    return %arg0, %c0_i32 : i32, i32
  }
  func.func @transform_4(%arg0: i32) -> (i32, i32) {
    %c0_i32 = arith.constant 0 : i32
    %c0_i32_0 = arith.constant 0 : i32
    return %arg0, %c0_i32 : i32, i32
  }
}

module attributes {stable_mosaic.version = 11 : i64} {
  func.func @_mlp_kernel(%arg0: i32, %arg1: memref<512x8xf32, #tpu.memory_space<vmem>>, %arg2: memref<8x16xf32, #tpu.memory_space<vmem>>, %arg3: memref<1x16xf32, #tpu.memory_space<vmem>>, %arg4: memref<16x8xf32, #tpu.memory_space<vmem>>, %arg5: memref<1x8xf32, #tpu.memory_space<vmem>>, %arg6: memref<8x1xf32, #tpu.memory_space<vmem>>, %arg7: memref<1x1xf32, #tpu.memory_space<vmem>>, %arg8: memref<512x1xf32, #tpu.memory_space<vmem>>) attributes {dimension_semantics = [#tpu.dimension_semantics<parallel>], iteration_bounds = array<i64: 1>, scalar_prefetch = 0 : i64, scratch_operands = 0 : i64, tpu.core_type = #tpu.core_type<tc>, window_params = [{transform_indices = @transform_0, window_bounds = array<i64: 512, 8>}, {pipeline_mode = #tpu.pipeline_mode<synchronous>, transform_indices = @transform_1, window_bounds = array<i64: 8, 16>}, {pipeline_mode = #tpu.pipeline_mode<synchronous>, transform_indices = @transform_2, window_bounds = array<i64: 1, 16>}, {pipeline_mode = #tpu.pipeline_mode<synchronous>, transform_indices = @transform_3, window_bounds = array<i64: 16, 8>}, {pipeline_mode = #tpu.pipeline_mode<synchronous>, transform_indices = @transform_4, window_bounds = array<i64: 1, 8>}, {pipeline_mode = #tpu.pipeline_mode<synchronous>, transform_indices = @transform_5, window_bounds = array<i64: 8, 1>}, {pipeline_mode = #tpu.pipeline_mode<synchronous>, transform_indices = @transform_6, window_bounds = array<i64: 1, 1>}, {transform_indices = @transform_7, window_bounds = array<i64: 512, 1>}]} {
    %c0 = arith.constant 0 : index
    %c0_0 = arith.constant 0 : index
    %0 = vector.load %arg1[%c0, %c0_0] : memref<512x8xf32, #tpu.memory_space<vmem>>, vector<512x8xf32>
    %c0_1 = arith.constant 0 : index
    %c0_2 = arith.constant 0 : index
    %1 = vector.load %arg2[%c0_1, %c0_2] : memref<8x16xf32, #tpu.memory_space<vmem>>, vector<8x16xf32>
    %cst = arith.constant dense<0.000000e+00> : vector<512x16xf32>
    %2 = tpu.matmul %0, %1, %cst {dimension_numbers = #tpu.dot_dimension_numbers<[1], [0], [0], [1], [0, 0, 1, 1], [], []>} : vector<512x8xf32>, vector<8x16xf32>, vector<512x16xf32> -> vector<512x16xf32>
    %c0_3 = arith.constant 0 : index
    %c0_4 = arith.constant 0 : index
    %3 = vector.load %arg3[%c0_3, %c0_4] : memref<1x16xf32, #tpu.memory_space<vmem>>, vector<1x16xf32>
    %4 = vector.broadcast %3 : vector<1x16xf32> to vector<512x16xf32>
    %5 = arith.addf %2, %4 : vector<512x16xf32>
    %cst_5 = arith.constant 5.000000e-01 : f32
    %6 = vector.broadcast %cst_5 : f32 to vector<512x16xf32>
    %7 = arith.mulf %6, %5 : vector<512x16xf32>
    %cst_6 = arith.constant 4.471500e-02 : f32
    %8 = vector.broadcast %cst_6 : f32 to vector<512x16xf32>
    %9 = arith.mulf %8, %5 : vector<512x16xf32>
    %10 = arith.mulf %9, %5 : vector<512x16xf32>
    %11 = arith.mulf %10, %5 : vector<512x16xf32>
    %12 = arith.addf %5, %11 : vector<512x16xf32>
    %cst_7 = arith.constant 0.797884583 : f32
    %13 = vector.broadcast %cst_7 : f32 to vector<512x16xf32>
    %14 = arith.mulf %13, %12 : vector<512x16xf32>
    %15 = math.tanh %14 : vector<512x16xf32>
    %cst_8 = arith.constant 1.000000e+00 : f32
    %16 = vector.broadcast %cst_8 : f32 to vector<512x16xf32>
    %17 = arith.addf %16, %15 : vector<512x16xf32>
    %18 = arith.mulf %7, %17 : vector<512x16xf32>
    %c0_9 = arith.constant 0 : index
    %c0_10 = arith.constant 0 : index
    %19 = vector.load %arg4[%c0_9, %c0_10] : memref<16x8xf32, #tpu.memory_space<vmem>>, vector<16x8xf32>
    %cst_11 = arith.constant dense<0.000000e+00> : vector<512x8xf32>
    %20 = tpu.matmul %18, %19, %cst_11 {dimension_numbers = #tpu.dot_dimension_numbers<[1], [0], [0], [1], [0, 0, 1, 1], [], []>} : vector<512x16xf32>, vector<16x8xf32>, vector<512x8xf32> -> vector<512x8xf32>
    %c0_12 = arith.constant 0 : index
    %c0_13 = arith.constant 0 : index
    %21 = vector.load %arg5[%c0_12, %c0_13] : memref<1x8xf32, #tpu.memory_space<vmem>>, vector<1x8xf32>
    %22 = vector.broadcast %21 : vector<1x8xf32> to vector<512x8xf32>
    %23 = arith.addf %20, %22 : vector<512x8xf32>
    %cst_14 = arith.constant 5.000000e-01 : f32
    %24 = vector.broadcast %cst_14 : f32 to vector<512x8xf32>
    %25 = arith.mulf %24, %23 : vector<512x8xf32>
    %cst_15 = arith.constant 4.471500e-02 : f32
    %26 = vector.broadcast %cst_15 : f32 to vector<512x8xf32>
    %27 = arith.mulf %26, %23 : vector<512x8xf32>
    %28 = arith.mulf %27, %23 : vector<512x8xf32>
    %29 = arith.mulf %28, %23 : vector<512x8xf32>
    %30 = arith.addf %23, %29 : vector<512x8xf32>
    %cst_16 = arith.constant 0.797884583 : f32
    %31 = vector.broadcast %cst_16 : f32 to vector<512x8xf32>
    %32 = arith.mulf %31, %30 : vector<512x8xf32>
    %33 = math.tanh %32 : vector<512x8xf32>
    %cst_17 = arith.constant 1.000000e+00 : f32
    %34 = vector.broadcast %cst_17 : f32 to vector<512x8xf32>
    %35 = arith.addf %34, %33 : vector<512x8xf32>
    %36 = arith.mulf %25, %35 : vector<512x8xf32>
    %c0_18 = arith.constant 0 : index
    %c0_19 = arith.constant 0 : index
    %37 = vector.load %arg6[%c0_18, %c0_19] : memref<8x1xf32, #tpu.memory_space<vmem>>, vector<8x1xf32>
    %cst_20 = arith.constant dense<0.000000e+00> : vector<512x1xf32>
    %38 = tpu.matmul %36, %37, %cst_20 {dimension_numbers = #tpu.dot_dimension_numbers<[1], [0], [0], [1], [0, 0, 1, 1], [], []>} : vector<512x8xf32>, vector<8x1xf32>, vector<512x1xf32> -> vector<512x1xf32>
    %c0_21 = arith.constant 0 : index
    %c0_22 = arith.constant 0 : index
    %39 = vector.load %arg7[%c0_21, %c0_22] : memref<1x1xf32, #tpu.memory_space<vmem>>, vector<1x1xf32>
    %40 = vector.broadcast %39 : vector<1x1xf32> to vector<512x1xf32>
    %41 = arith.addf %38, %40 : vector<512x1xf32>
    %c0_23 = arith.constant 0 : index
    %c0_24 = arith.constant 0 : index
    %42 = vector.load %arg8[%c0_23, %c0_24] : memref<512x1xf32, #tpu.memory_space<vmem>>, vector<512x1xf32>
    tpu.vector_store %arg8[%c0_23, %c0_24], %41 {strides = array<i32>} : memref<512x1xf32, #tpu.memory_space<vmem>>, vector<512x1xf32>,
    return
  }
  func.func @transform_0(%arg0: i32) -> (i32, i32) {
    %c0_i32 = arith.constant 0 : i32
    %c0_i32_0 = arith.constant 0 : i32
    return %arg0, %c0_i32 : i32, i32
  }
  func.func @transform_1(%arg0: i32) -> (i32, i32) {
    %c0_i32 = arith.constant 0 : i32
    %c0_i32_0 = arith.constant 0 : i32
    %c0_i32_1 = arith.constant 0 : i32
    return %c0_i32, %c0_i32_0 : i32, i32
  }
  func.func @transform_2(%arg0: i32) -> (i32, i32) {
    %c0_i32 = arith.constant 0 : i32
    %c0_i32_0 = arith.constant 0 : i32
    %c0_i32_1 = arith.constant 0 : i32
    return %c0_i32, %c0_i32_0 : i32, i32
  }
  func.func @transform_3(%arg0: i32) -> (i32, i32) {
    %c0_i32 = arith.constant 0 : i32
    %c0_i32_0 = arith.constant 0 : i32
    %c0_i32_1 = arith.constant 0 : i32
    return %c0_i32, %c0_i32_0 : i32, i32
  }
  func.func @transform_4(%arg0: i32) -> (i32, i32) {
    %c0_i32 = arith.constant 0 : i32
    %c0_i32_0 = arith.constant 0 : i32
    %c0_i32_1 = arith.constant 0 : i32
    return %c0_i32, %c0_i32_0 : i32, i32
  }
  func.func @transform_5(%arg0: i32) -> (i32, i32) {
    %c0_i32 = arith.constant 0 : i32
    %c0_i32_0 = arith.constant 0 : i32
    %c0_i32_1 = arith.constant 0 : i32
    return %c0_i32, %c0_i32_0 : i32, i32
  }
  func.func @transform_6(%arg0: i32) -> (i32, i32) {
    %c0_i32 = arith.constant 0 : i32
    %c0_i32_0 = arith.constant 0 : i32
    %c0_i32_1 = arith.constant 0 : i32
    return %c0_i32, %c0_i32_0 : i32, i32
  }
  func.func @transform_7(%arg0: i32) -> (i32, i32) {
    %c0_i32 = arith.constant 0 : i32
    %c0_i32_0 = arith.constant 0 : i32
    return %arg0, %c0_i32 : i32, i32
  }
}

</mosaic_0001>

<bundles_post_ra>
// kernel: custom-call
= control target key start
LH: loop header
LB: loop body
LE: loop exit
PB: predicated region body
PF: predicated region fallthrough
CT: control target
= control target key end

     0   :  { %s6_s0 = inlined_call_operand.vmem [shape: f32[2,2,16,16,1], index: 0, kind: output, shape index: {}]  }

// kernel: closed_call.44
= control target key start
LH: loop header
LB: loop body
LE: loop exit
PB: predicated region body
PF: predicated region fallthrough
CT: control target
= control target key end

     0   :  { %vm279_vm0 = vcmask 1042432   ;;  %vm86_vm1 = vcmask 23552   ;;  %vm668_vm2 = vcmask 64512   ;;  %s1572_s1 = inlined_call_operand.vmem [shape: f32[3,8], index: 1, kind: input, shape index: {}]   ;;  %s1573_s0 = inlined_call_operand.vmem [shape: f32[512,3], index: 0, kind: input, shape index: {}]   ;;  %s1574_s2 = inlined_call_operand.vmem [shape: f32[1,8], index: 2, kind: input, shape index: {}]   ;;  %s1575_s3 = inlined_call_operand.vmem [shape: f32[512,8], index: 3, kind: output, shape index: {}]  }
   0x1   :  { %v78_v0 = vld [vmem:[%s1572_s1] sm:$0x7]  ;;  %v15_v3 = vld [vmem:[%s1573_s0 + $0x8] sm:$0xff]  ;;  %v16_v5 = vld [vmem:[%s1573_s0 + $0x10] sm:$0xff] }
   0x2   :  { %v14_v1 = vld [vmem:[%s1573_s0] sm:$0xff]  ;;  %868 = vmatprep.subr.msk.mxu0 %vm279_vm0, %v78_v0  ;;  %966 = vmatprep.subr.msk.mxu1 %vm279_vm0, %v78_v0  ;;  %v47_v4 = vld [vmem:[%s1573_s0 + $0x108] sm:$0xff]  ;;  %v48_v6 = vld [vmem:[%s1573_s0 + $0x110] sm:$0xff] }
   0x3   :  { %v46_v2 = vld [vmem:[%s1573_s0 + $0x100] sm:$0xff]  ;;  %869 = vmatpush3.msk.msra.mxu0 %vm279_vm0, %v78_v0  ;;  %967 = vmatpush3.msk.msra.mxu1 %vm279_vm0, %v78_v0  ;;  %v17_v7 = vld [vmem:[%s1573_s0 + $0x18] sm:$0xff]  ;;  %v19_v11 = vld [vmem:[%s1573_s0 + $0x28] sm:$0xff] }
   0x4   :  { %870 = vmatprep.mubr.msk.f32.mxu0 %vm86_vm1, %v14_v1  ;;  %918 = vmatprep.mubr.msk.f32.mxu1 %vm86_vm1, %v46_v2  ;;  %v49_v8 = vld [vmem:[%s1573_s0 + $0x118] sm:$0xff]  ;;  %v18_v9 = vld [vmem:[%s1573_s0 + $0x20] sm:$0xff]  ;;  %v51_v12 = vld [vmem:[%s1573_s0 + $0x128] sm:$0xff] }
   0x5   :  { %871 = vmatmul.mubr.msk.f32.vlgmr.msra.gmra.mxu0 %vm86_vm1, %v15_v3  ;;  %919 = vmatmul.mubr.msk.f32.vlgmr.msra.gmra.mxu1 %vm86_vm1, %v47_v4  ;;  %v50_v10 = vld [vmem:[%s1573_s0 + $0x120] sm:$0xff]  ;;  %v20_v13 = vld [vmem:[%s1573_s0 + $0x30] sm:$0xff]  ;;  %v21_v15 = vld [vmem:[%s1573_s0 + $0x38] sm:$0xff] }
   0x6   :  { %873 = vmatprep.mubr.msk.f32.mxu0 %vm86_vm1, %v16_v5  ;;  %921 = vmatprep.mubr.msk.f32.mxu1 %vm86_vm1, %v48_v6  ;;  %v52_v14 = vld [vmem:[%s1573_s0 + $0x130] sm:$0xff]  ;;  %v53_v16 = vld [vmem:[%s1573_s0 + $0x138] sm:$0xff]  ;;  %v22_v17 = vld [vmem:[%s1573_s0 + $0x40] sm:$0xff] }
   0x7   :  { %v54_v18 = vld [vmem:[%s1573_s0 + $0x140] sm:$0xff]  ;;  %v23_v19 = vld [vmem:[%s1573_s0 + $0x48] sm:$0xff]  ;;  %v24_v21 = vld [vmem:[%s1573_s0 + $0x50] sm:$0xff] }
   0x8   :  { %v55_v20 = vld [vmem:[%s1573_s0 + $0x148] sm:$0xff]  ;;  %v56_v22 = vld [vmem:[%s1573_s0 + $0x150] sm:$0xff]  ;;  %v25_v23 = vld [vmem:[%s1573_s0 + $0x58] sm:$0xff] }
   0x9   :  { %874 = vmatmul.mubr.msk.f32.gmra.mxu0 %vm86_vm1, %v17_v7  ;;  %922 = vmatmul.mubr.msk.f32.gmra.mxu1 %vm86_vm1, %v49_v8  ;;  %v57_v24 = vld [vmem:[%s1573_s0 + $0x158] sm:$0xff]  ;;  %v26_v25 = vld [vmem:[%s1573_s0 + $0x60] sm:$0xff]  ;;  %v27_v27 = vld [vmem:[%s1573_s0 + $0x68] sm:$0xff] }
   0xa   :  { %876 = vmatprep.mubr.msk.f32.mxu0 %vm86_vm1, %v18_v9  ;;  %924 = vmatprep.mubr.msk.f32.mxu1 %vm86_vm1, %v50_v10  ;;  %v58_v26 = vld [vmem:[%s1573_s0 + $0x160] sm:$0xff]  ;;  %v59_v28 = vld [vmem:[%s1573_s0 + $0x168] sm:$0xff]  ;;  %v28_v29 = vld [vmem:[%s1573_s0 + $0x70] sm:$0xff] }
   0xb   :  { %v60_v30 = vld [vmem:[%s1573_s0 + $0x170] sm:$0xff]  ;;  %v29_v31 = vld [vmem:[%s1573_s0 + $0x78] sm:$0xff]  ;;  %v30_v33 = vld [vmem:[%s1573_s0 + $0x80] sm:$0xff] }
   0xc   :  { %v61_v32 = vld [vmem:[%s1573_s0 + $0x178] sm:$0xff]  ;;  %v62_v34 = vld [vmem:[%s1573_s0 + $0x180] sm:$0xff]  ;;  %v31_v35 = vld [vmem:[%s1573_s0 + $0x88] sm:$0xff] }
   0xd   :  { %877 = vmatmul.mubr.msk.f32.gmra.mxu0 %vm86_vm1, %v19_v11  ;;  %925 = vmatmul.mubr.msk.f32.gmra.mxu1 %vm86_vm1, %v51_v12  ;;  %v63_v36 = vld [vmem:[%s1573_s0 + $0x188] sm:$0xff]  ;;  %v32_v37 = vld [vmem:[%s1573_s0 + $0x90] sm:$0xff]  ;;  %v33_v39 = vld [vmem:[%s1573_s0 + $0x98] sm:$0xff] }
   0xe   :  { %879 = vmatprep.mubr.msk.f32.mxu0 %vm86_vm1, %v20_v13  ;;  %927 = vmatprep.mubr.msk.f32.mxu1 %vm86_vm1, %v52_v14  ;;  %v64_v38 = vld [vmem:[%s1573_s0 + $0x190] sm:$0xff]  ;;  %v65_v40 = vld [vmem:[%s1573_s0 + $0x198] sm:$0xff]  ;;  %v34_v41 = vld [vmem:[%s1573_s0 + $0xa0] sm:$0xff] }
   0xf   :  { %v66_v42 = vld [vmem:[%s1573_s0 + $0x1a0] sm:$0xff]  ;;  %v35_v43 = vld [vmem:[%s1573_s0 + $0xa8] sm:$0xff]  ;;  %v36_v45 = vld [vmem:[%s1573_s0 + $0xb0] sm:$0xff] }
  0x10   :  { %v67_v44 = vld [vmem:[%s1573_s0 + $0x1a8] sm:$0xff]  ;;  %v68_v46 = vld [vmem:[%s1573_s0 + $0x1b0] sm:$0xff]  ;;  %v37_v47 = vld [vmem:[%s1573_s0 + $0xb8] sm:$0xff] }
  0x11   :  { %880 = vmatmul.mubr.msk.f32.gmra.mxu0 %vm86_vm1, %v21_v15  ;;  %928 = vmatmul.mubr.msk.f32.gmra.mxu1 %vm86_vm1, %v53_v16  ;;  %v69_v48 = vld [vmem:[%s1573_s0 + $0x1b8] sm:$0xff]  ;;  %v38_v49 = vld [vmem:[%s1573_s0 + $0xc0] sm:$0xff]  ;;  %v39_v51 = vld [vmem:[%s1573_s0 + $0xc8] sm:$0xff] }
  0x12   :  { %882 = vmatprep.mubr.msk.f32.mxu0 %vm86_vm1, %v22_v17  ;;  %930 = vmatprep.mubr.msk.f32.mxu1 %vm86_vm1, %v54_v18  ;;  %v70_v50 = vld [vmem:[%s1573_s0 + $0x1c0] sm:$0xff]  ;;  %v71_v52 = vld [vmem:[%s1573_s0 + $0x1c8] sm:$0xff]  ;;  %v40_v53 = vld [vmem:[%s1573_s0 + $0xd0] sm:$0xff] }
  0x13   :  { %v72_v54 = vld [vmem:[%s1573_s0 + $0x1d0] sm:$0xff]  ;;  %v41_v55 = vld [vmem:[%s1573_s0 + $0xd8] sm:$0xff]  ;;  %v42_v57 = vld [vmem:[%s1573_s0 + $0xe0] sm:$0xff] }
  0x14   :  { %v73_v56 = vld [vmem:[%s1573_s0 + $0x1d8] sm:$0xff]  ;;  %v74_v58 = vld [vmem:[%s1573_s0 + $0x1e0] sm:$0xff]  ;;  %v43_v59 = vld [vmem:[%s1573_s0 + $0xe8] sm:$0xff] }
  0x15   :  { %883 = vmatmul.mubr.msk.f32.gmra.mxu0 %vm86_vm1, %v23_v19  ;;  %931 = vmatmul.mubr.msk.f32.gmra.mxu1 %vm86_vm1, %v55_v20  ;;  %v75_v60 = vld [vmem:[%s1573_s0 + $0x1e8] sm:$0xff]  ;;  %v44_v61 = vld [vmem:[%s1573_s0 + $0xf0] sm:$0xff]  ;;  %v45_v63 = vld [vmem:[%s1573_s0 + $0xf8] sm:$0xff] }
  0x16   :  { %885 = vmatprep.mubr.msk.f32.mxu0 %vm86_vm1, %v24_v21  ;;  %933 = vmatprep.mubr.msk.f32.mxu1 %vm86_vm1, %v56_v22  ;;  %v76_v62 = vld [vmem:[%s1573_s0 + $0x1f0] sm:$0xff]  ;;  %v77_v0 = vld [vmem:[%s1573_s0 + $0x1f8] sm:$0xff]  ;;  %v1250_v1 = vld [vmem:[%s1574_s2] ss:$0 sm:$0xff] }
  0x19   :  { %886 = vmatmul.mubr.msk.f32.gmra.mxu0 %vm86_vm1, %v25_v23  ;;  %934 = vmatmul.mubr.msk.f32.gmra.mxu1 %vm86_vm1, %v57_v24 }
  0x1a   :  { %888 = vmatprep.mubr.msk.f32.mxu0 %vm86_vm1, %v26_v25  ;;  %936 = vmatprep.mubr.msk.f32.mxu1 %vm86_vm1, %v58_v26 }
  0x1d   :  { %889 = vmatmul.mubr.msk.f32.gmra.mxu0 %vm86_vm1, %v27_v27  ;;  %937 = vmatmul.mubr.msk.f32.gmra.mxu1 %vm86_vm1, %v59_v28 }
  0x1e   :  { %891 = vmatprep.mubr.msk.f32.mxu0 %vm86_vm1, %v28_v29  ;;  %939 = vmatprep.mubr.msk.f32.mxu1 %vm86_vm1, %v60_v30 }
  0x21   :  { %892 = vmatmul.mubr.msk.f32.gmra.mxu0 %vm86_vm1, %v29_v31  ;;  %940 = vmatmul.mubr.msk.f32.gmra.mxu1 %vm86_vm1, %v61_v32 }
  0x22   :  { %894 = vmatprep.mubr.msk.f32.mxu0 %vm86_vm1, %v30_v33  ;;  %942 = vmatprep.mubr.msk.f32.mxu1 %vm86_vm1, %v62_v34 }
  0x25   :  { %895 = vmatmul.mubr.msk.f32.gmra.mxu0 %vm86_vm1, %v31_v35  ;;  %943 = vmatmul.mubr.msk.f32.gmra.mxu1 %vm86_vm1, %v63_v36 }
  0x26   :  { %897 = vmatprep.mubr.msk.f32.mxu0 %vm86_vm1, %v32_v37  ;;  %945 = vmatprep.mubr.msk.f32.mxu1 %vm86_vm1, %v64_v38 }
  0x29   :  { %898 = vmatmul.mubr.msk.f32.gmra.mxu0 %vm86_vm1, %v33_v39  ;;  %946 = vmatmul.mubr.msk.f32.gmra.mxu1 %vm86_vm1, %v65_v40 }
  0x2a   :  { %900 = vmatprep.mubr.msk.f32.mxu0 %vm86_vm1, %v34_v41  ;;  %948 = vmatprep.mubr.msk.f32.mxu1 %vm86_vm1, %v66_v42 }
  0x2d   :  { %901 = vmatmul.mubr.msk.f32.gmra.mxu0 %vm86_vm1, %v35_v43  ;;  %949 = vmatmul.mubr.msk.f32.gmra.mxu1 %vm86_vm1, %v67_v44 }
  0x2e   :  { %903 = vmatprep.mubr.msk.f32.mxu0 %vm86_vm1, %v36_v45  ;;  %951 = vmatprep.mubr.msk.f32.mxu1 %vm86_vm1, %v68_v46 }
  0x31   :  { %904 = vmatmul.mubr.msk.f32.gmra.mxu0 %vm86_vm1, %v37_v47  ;;  %952 = vmatmul.mubr.msk.f32.gmra.mxu1 %vm86_vm1, %v69_v48 }
  0x32   :  { %906 = vmatprep.mubr.msk.f32.mxu0 %vm86_vm1, %v38_v49  ;;  %954 = vmatprep.mubr.msk.f32.mxu1 %vm86_vm1, %v70_v50 }
  0x35   :  { %907 = vmatmul.mubr.msk.f32.gmra.mxu0 %vm86_vm1, %v39_v51  ;;  %955 = vmatmul.mubr.msk.f32.gmra.mxu1 %vm86_vm1, %v71_v52 }
  0x36   :  { %909 = vmatprep.mubr.msk.f32.mxu0 %vm86_vm1, %v40_v53  ;;  %957 = vmatprep.mubr.msk.f32.mxu1 %vm86_vm1, %v72_v54 }
  0x39   :  { %910 = vmatmul.mubr.msk.f32.gmra.mxu0 %vm86_vm1, %v41_v55  ;;  %958 = vmatmul.mubr.msk.f32.gmra.mxu1 %vm86_vm1, %v73_v56 }
  0x3a   :  { %912 = vmatprep.mubr.msk.f32.mxu0 %vm86_vm1, %v42_v57  ;;  %960 = vmatprep.mubr.msk.f32.mxu1 %vm86_vm1, %v74_v58 }
  0x3d   :  { %913 = vmatmul.mubr.msk.f32.gmra.mxu0 %vm86_vm1, %v43_v59  ;;  %961 = vmatmul.mubr.msk.f32.gmra.mxu1 %vm86_vm1, %v75_v60 }
  0x3e   :  { %915 = vmatprep.mubr.msk.f32.mxu0 %vm86_vm1, %v44_v61  ;;  %963 = vmatprep.mubr.msk.f32.mxu1 %vm86_vm1, %v76_v62 }
  0x41   :  { %916 = vmatmul.mubr.msk.f32.gmra.mxu0 %vm86_vm1, %v45_v63  ;;  %964 = vmatmul.mubr.msk.f32.gmra.mxu1 %vm86_vm1, %v77_v0 }
  0xc5   :  { %v872_v2 = vpop.f32.mrf.mxu0  ;;  %v920_v3 = vpop.f32.mrf.mxu1 }
  0xc6   :  { %v355_v4 = vadd.f32 %v872_v2, %v1250_v1  ;;  %v515_v5 = vadd.f32 %v920_v3, %v1250_v1 }
  0xc7   :  { %v349_v6 = vpop.f32.mrf.mxu0  ;;  %v509_v7 = vpop.f32.mrf.mxu1 }
  0xc8   :  { %670 = vst.msk [vmem:[%s1575_s3 + $0x8] sm:$0xff] %vm668_vm2, %v355_v4  ;;  %702 = vst.msk [vmem:[%s1575_s3 + $0x108] sm:$0xff] %vm668_vm2, %v515_v5  ;;  %v350_v8 = vadd.f32 %v1250_v1, %v349_v6  ;;  %v510_v9 = vadd.f32 %v1250_v1, %v509_v7 }
  0xc9   :  { %v875_v10 = vpop.f32.mrf.mxu0  ;;  %v923_v11 = vpop.f32.mrf.mxu1 }
  0xca   :  { %669 = vst.msk [vmem:[%s1575_s3] sm:$0xff] %vm668_vm2, %v350_v8  ;;  %701 = vst.msk [vmem:[%s1575_s3 + $0x100] sm:$0xff] %vm668_vm2, %v510_v9  ;;  %v365_v12 = vadd.f32 %v875_v10, %v1250_v1  ;;  %v525_v13 = vadd.f32 %v923_v11, %v1250_v1 }
  0xcb   :  { %v359_v14 = vpop.f32.mrf.mxu0  ;;  %v519_v15 = vpop.f32.mrf.mxu1 }
  0xcc   :  { %672 = vst.msk [vmem:[%s1575_s3 + $0x18] sm:$0xff] %vm668_vm2, %v365_v12  ;;  %704 = vst.msk [vmem:[%s1575_s3 + $0x118] sm:$0xff] %vm668_vm2, %v525_v13  ;;  %v360_v16 = vadd.f32 %v1250_v1, %v359_v14  ;;  %v520_v17 = vadd.f32 %v1250_v1, %v519_v15 }
  0xcd   :  { %v878_v18 = vpop.f32.mrf.mxu0  ;;  %v926_v19 = vpop.f32.mrf.mxu1 }
  0xce   :  { %671 = vst.msk [vmem:[%s1575_s3 + $0x10] sm:$0xff] %vm668_vm2, %v360_v16  ;;  %703 = vst.msk [vmem:[%s1575_s3 + $0x110] sm:$0xff] %vm668_vm2, %v520_v17  ;;  %v375_v20 = vadd.f32 %v878_v18, %v1250_v1  ;;  %v535_v21 = vadd.f32 %v926_v19, %v1250_v1 }
  0xcf   :  { %v369_v22 = vpop.f32.mrf.mxu0  ;;  %v529_v23 = vpop.f32.mrf.mxu1 }
  0xd0   :  { %674 = vst.msk [vmem:[%s1575_s3 + $0x28] sm:$0xff] %vm668_vm2, %v375_v20  ;;  %706 = vst.msk [vmem:[%s1575_s3 + $0x128] sm:$0xff] %vm668_vm2, %v535_v21  ;;  %v370_v24 = vadd.f32 %v1250_v1, %v369_v22  ;;  %v530_v25 = vadd.f32 %v1250_v1, %v529_v23 }
  0xd1   :  { %v881_v26 = vpop.f32.mrf.mxu0  ;;  %v929_v27 = vpop.f32.mrf.mxu1 }
  0xd2   :  { %673 = vst.msk [vmem:[%s1575_s3 + $0x20] sm:$0xff] %vm668_vm2, %v370_v24  ;;  %705 = vst.msk [vmem:[%s1575_s3 + $0x120] sm:$0xff] %vm668_vm2, %v530_v25  ;;  %v385_v28 = vadd.f32 %v881_v26, %v1250_v1  ;;  %v545_v29 = vadd.f32 %v929_v27, %v1250_v1 }
  0xd3   :  { %v379_v30 = vpop.f32.mrf.mxu0  ;;  %v539_v31 = vpop.f32.mrf.mxu1 }
  0xd4   :  { %676 = vst.msk [vmem:[%s1575_s3 + $0x38] sm:$0xff] %vm668_vm2, %v385_v28  ;;  %708 = vst.msk [vmem:[%s1575_s3 + $0x138] sm:$0xff] %vm668_vm2, %v545_v29  ;;  %v380_v32 = vadd.f32 %v1250_v1, %v379_v30  ;;  %v540_v33 = vadd.f32 %v1250_v1, %v539_v31 }
  0xd5   :  { %v884_v34 = vpop.f32.mrf.mxu0  ;;  %v932_v35 = vpop.f32.mrf.mxu1 }
  0xd6   :  { %675 = vst.msk [vmem:[%s1575_s3 + $0x30] sm:$0xff] %vm668_vm2, %v380_v32  ;;  %707 = vst.msk [vmem:[%s1575_s3 + $0x130] sm:$0xff] %vm668_vm2, %v540_v33  ;;  %v395_v36 = vadd.f32 %v884_v34, %v1250_v1  ;;  %v555_v37 = vadd.f32 %v932_v35, %v1250_v1 }
  0xd7   :  { %v389_v38 = vpop.f32.mrf.mxu0  ;;  %v549_v39 = vpop.f32.mrf.mxu1 }
  0xd8   :  { %678 = vst.msk [vmem:[%s1575_s3 + $0x48] sm:$0xff] %vm668_vm2, %v395_v36  ;;  %710 = vst.msk [vmem:[%s1575_s3 + $0x148] sm:$0xff] %vm668_vm2, %v555_v37  ;;  %v390_v40 = vadd.f32 %v1250_v1, %v389_v38  ;;  %v550_v41 = vadd.f32 %v1250_v1, %v549_v39 }
  0xd9   :  { %v887_v42 = vpop.f32.mrf.mxu0  ;;  %v935_v43 = vpop.f32.mrf.mxu1 }
  0xda   :  { %677 = vst.msk [vmem:[%s1575_s3 + $0x40] sm:$0xff] %vm668_vm2, %v390_v40  ;;  %709 = vst.msk [vmem:[%s1575_s3 + $0x140] sm:$0xff] %vm668_vm2, %v550_v41  ;;  %v405_v44 = vadd.f32 %v887_v42, %v1250_v1  ;;  %v565_v45 = vadd.f32 %v935_v43, %v1250_v1 }
  0xdb   :  { %v399_v46 = vpop.f32.mrf.mxu0  ;;  %v559_v47 = vpop.f32.mrf.mxu1 }
  0xdc   :  { %680 = vst.msk [vmem:[%s1575_s3 + $0x58] sm:$0xff] %vm668_vm2, %v405_v44  ;;  %712 = vst.msk [vmem:[%s1575_s3 + $0x158] sm:$0xff] %vm668_vm2, %v565_v45  ;;  %v400_v48 = vadd.f32 %v1250_v1, %v399_v46  ;;  %v560_v49 = vadd.f32 %v1250_v1, %v559_v47 }
  0xdd   :  { %v890_v50 = vpop.f32.mrf.mxu0  ;;  %v938_v51 = vpop.f32.mrf.mxu1 }
  0xde   :  { %679 = vst.msk [vmem:[%s1575_s3 + $0x50] sm:$0xff] %vm668_vm2, %v400_v48  ;;  %711 = vst.msk [vmem:[%s1575_s3 + $0x150] sm:$0xff] %vm668_vm2, %v560_v49  ;;  %v415_v52 = vadd.f32 %v890_v50, %v1250_v1  ;;  %v575_v53 = vadd.f32 %v938_v51, %v1250_v1 }
  0xdf   :  { %v409_v54 = vpop.f32.mrf.mxu0  ;;  %v569_v55 = vpop.f32.mrf.mxu1 }
  0xe0   :  { %682 = vst.msk [vmem:[%s1575_s3 + $0x68] sm:$0xff] %vm668_vm2, %v415_v52  ;;  %714 = vst.msk [vmem:[%s1575_s3 + $0x168] sm:$0xff] %vm668_vm2, %v575_v53  ;;  %v410_v56 = vadd.f32 %v1250_v1, %v409_v54  ;;  %v570_v57 = vadd.f32 %v1250_v1, %v569_v55 }
  0xe1   :  { %v893_v58 = vpop.f32.mrf.mxu0  ;;  %v941_v59 = vpop.f32.mrf.mxu1 }
  0xe2   :  { %681 = vst.msk [vmem:[%s1575_s3 + $0x60] sm:$0xff] %vm668_vm2, %v410_v56  ;;  %713 = vst.msk [vmem:[%s1575_s3 + $0x160] sm:$0xff] %vm668_vm2, %v570_v57  ;;  %v425_v60 = vadd.f32 %v893_v58, %v1250_v1  ;;  %v585_v61 = vadd.f32 %v941_v59, %v1250_v1 }
  0xe3   :  { %v419_v62 = vpop.f32.mrf.mxu0  ;;  %v579_v63 = vpop.f32.mrf.mxu1 }
  0xe4   :  { %684 = vst.msk [vmem:[%s1575_s3 + $0x78] sm:$0xff] %vm668_vm2, %v425_v60  ;;  %716 = vst.msk [vmem:[%s1575_s3 + $0x178] sm:$0xff] %vm668_vm2, %v585_v61  ;;  %v420_v0 = vadd.f32 %v1250_v1, %v419_v62  ;;  %v580_v2 = vadd.f32 %v1250_v1, %v579_v63 }
  0xe5   :  { %v896_v3 = vpop.f32.mrf.mxu0  ;;  %v944_v4 = vpop.f32.mrf.mxu1 }
  0xe6   :  { %683 = vst.msk [vmem:[%s1575_s3 + $0x70] sm:$0xff] %vm668_vm2, %v420_v0  ;;  %715 = vst.msk [vmem:[%s1575_s3 + $0x170] sm:$0xff] %vm668_vm2, %v580_v2  ;;  %v435_v5 = vadd.f32 %v896_v3, %v1250_v1  ;;  %v595_v6 = vadd.f32 %v944_v4, %v1250_v1 }
  0xe7   :  { %v429_v7 = vpop.f32.mrf.mxu0  ;;  %v589_v8 = vpop.f32.mrf.mxu1 }
  0xe8   :  { %686 = vst.msk [vmem:[%s1575_s3 + $0x88] sm:$0xff] %vm668_vm2, %v435_v5  ;;  %718 = vst.msk [vmem:[%s1575_s3 + $0x188] sm:$0xff] %vm668_vm2, %v595_v6  ;;  %v430_v9 = vadd.f32 %v1250_v1, %v429_v7  ;;  %v590_v10 = vadd.f32 %v1250_v1, %v589_v8 }
  0xe9   :  { %v899_v11 = vpop.f32.mrf.mxu0  ;;  %v947_v12 = vpop.f32.mrf.mxu1 }
  0xea   :  { %685 = vst.msk [vmem:[%s1575_s3 + $0x80] sm:$0xff] %vm668_vm2, %v430_v9  ;;  %717 = vst.msk [vmem:[%s1575_s3 + $0x180] sm:$0xff] %vm668_vm2, %v590_v10  ;;  %v445_v13 = vadd.f32 %v899_v11, %v1250_v1  ;;  %v605_v14 = vadd.f32 %v947_v12, %v1250_v1 }
  0xeb   :  { %v439_v15 = vpop.f32.mrf.mxu0  ;;  %v599_v16 = vpop.f32.mrf.mxu1 }
  0xec   :  { %688 = vst.msk [vmem:[%s1575_s3 + $0x98] sm:$0xff] %vm668_vm2, %v445_v13  ;;  %720 = vst.msk [vmem:[%s1575_s3 + $0x198] sm:$0xff] %vm668_vm2, %v605_v14  ;;  %v440_v17 = vadd.f32 %v1250_v1, %v439_v15  ;;  %v600_v18 = vadd.f32 %v1250_v1, %v599_v16 }
  0xed   :  { %v902_v19 = vpop.f32.mrf.mxu0  ;;  %v950_v20 = vpop.f32.mrf.mxu1 }
  0xee   :  { %687 = vst.msk [vmem:[%s1575_s3 + $0x90] sm:$0xff] %vm668_vm2, %v440_v17  ;;  %719 = vst.msk [vmem:[%s1575_s3 + $0x190] sm:$0xff] %vm668_vm2, %v600_v18  ;;  %v455_v21 = vadd.f32 %v902_v19, %v1250_v1  ;;  %v615_v22 = vadd.f32 %v950_v20, %v1250_v1 }
  0xef   :  { %v449_v23 = vpop.f32.mrf.mxu0  ;;  %v609_v24 = vpop.f32.mrf.mxu1 }
  0xf0   :  { %690 = vst.msk [vmem:[%s1575_s3 + $0xa8] sm:$0xff] %vm668_vm2, %v455_v21  ;;  %722 = vst.msk [vmem:[%s1575_s3 + $0x1a8] sm:$0xff] %vm668_vm2, %v615_v22  ;;  %v450_v25 = vadd.f32 %v1250_v1, %v449_v23  ;;  %v610_v26 = vadd.f32 %v1250_v1, %v609_v24 }
  0xf1   :  { %v905_v27 = vpop.f32.mrf.mxu0  ;;  %v953_v28 = vpop.f32.mrf.mxu1 }
  0xf2   :  { %689 = vst.msk [vmem:[%s1575_s3 + $0xa0] sm:$0xff] %vm668_vm2, %v450_v25  ;;  %721 = vst.msk [vmem:[%s1575_s3 + $0x1a0] sm:$0xff] %vm668_vm2, %v610_v26  ;;  %v465_v29 = vadd.f32 %v905_v27, %v1250_v1  ;;  %v625_v30 = vadd.f32 %v953_v28, %v1250_v1 }
  0xf3   :  { %v459_v31 = vpop.f32.mrf.mxu0  ;;  %v619_v32 = vpop.f32.mrf.mxu1 }
  0xf4   :  { %692 = vst.msk [vmem:[%s1575_s3 + $0xb8] sm:$0xff] %vm668_vm2, %v465_v29  ;;  %724 = vst.msk [vmem:[%s1575_s3 + $0x1b8] sm:$0xff] %vm668_vm2, %v625_v30  ;;  %v460_v33 = vadd.f32 %v1250_v1, %v459_v31  ;;  %v620_v34 = vadd.f32 %v1250_v1, %v619_v32 }
  0xf5   :  { %v908_v35 = vpop.f32.mrf.mxu0  ;;  %v956_v36 = vpop.f32.mrf.mxu1 }
  0xf6   :  { %691 = vst.msk [vmem:[%s1575_s3 + $0xb0] sm:$0xff] %vm668_vm2, %v460_v33  ;;  %723 = vst.msk [vmem:[%s1575_s3 + $0x1b0] sm:$0xff] %vm668_vm2, %v620_v34  ;;  %v475_v37 = vadd.f32 %v908_v35, %v1250_v1  ;;  %v635_v38 = vadd.f32 %v956_v36, %v1250_v1 }
  0xf7   :  { %v469_v39 = vpop.f32.mrf.mxu0  ;;  %v629_v40 = vpop.f32.mrf.mxu1 }
  0xf8   :  { %694 = vst.msk [vmem:[%s1575_s3 + $0xc8] sm:$0xff] %vm668_vm2, %v475_v37  ;;  %726 = vst.msk [vmem:[%s1575_s3 + $0x1c8] sm:$0xff] %vm668_vm2, %v635_v38  ;;  %v470_v41 = vadd.f32 %v1250_v1, %v469_v39  ;;  %v630_v42 = vadd.f32 %v1250_v1, %v629_v40 }
  0xf9   :  { %v911_v43 = vpop.f32.mrf.mxu0  ;;  %v959_v44 = vpop.f32.mrf.mxu1 }
  0xfa   :  { %693 = vst.msk [vmem:[%s1575_s3 + $0xc0] sm:$0xff] %vm668_vm2, %v470_v41  ;;  %725 = vst.msk [vmem:[%s1575_s3 + $0x1c0] sm:$0xff] %vm668_vm2, %v630_v42  ;;  %v485_v45 = vadd.f32 %v911_v43, %v1250_v1  ;;  %v645_v46 = vadd.f32 %v959_v44, %v1250_v1 }
  0xfb   :  { %v479_v47 = vpop.f32.mrf.mxu0  ;;  %v639_v48 = vpop.f32.mrf.mxu1 }
  0xfc   :  { %696 = vst.msk [vmem:[%s1575_s3 + $0xd8] sm:$0xff] %vm668_vm2, %v485_v45  ;;  %728 = vst.msk [vmem:[%s1575_s3 + $0x1d8] sm:$0xff] %vm668_vm2, %v645_v46  ;;  %v480_v49 = vadd.f32 %v1250_v1, %v479_v47  ;;  %v640_v50 = vadd.f32 %v1250_v1, %v639_v48 }
  0xfd   :  { %v914_v51 = vpop.f32.mrf.mxu0  ;;  %v962_v52 = vpop.f32.mrf.mxu1 }
  0xfe   :  { %695 = vst.msk [vmem:[%s1575_s3 + $0xd0] sm:$0xff] %vm668_vm2, %v480_v49  ;;  %727 = vst.msk [vmem:[%s1575_s3 + $0x1d0] sm:$0xff] %vm668_vm2, %v640_v50  ;;  %v495_v53 = vadd.f32 %v914_v51, %v1250_v1  ;;  %v655_v54 = vadd.f32 %v962_v52, %v1250_v1 }
  0xff   :  { %v489_v55 = vpop.f32.mrf.mxu0  ;;  %v649_v56 = vpop.f32.mrf.mxu1 }
 0x100   :  { %698 = vst.msk [vmem:[%s1575_s3 + $0xe8] sm:$0xff] %vm668_vm2, %v495_v53  ;;  %730 = vst.msk [vmem:[%s1575_s3 + $0x1e8] sm:$0xff] %vm668_vm2, %v655_v54  ;;  %v490_v57 = vadd.f32 %v1250_v1, %v489_v55  ;;  %v650_v58 = vadd.f32 %v1250_v1, %v649_v56 }
 0x101   :  { %v917_v59 = vpop.f32.mrf.mxu0  ;;  %v965_v60 = vpop.f32.mrf.mxu1 }
 0x102   :  { %697 = vst.msk [vmem:[%s1575_s3 + $0xe0] sm:$0xff] %vm668_vm2, %v490_v57  ;;  %729 = vst.msk [vmem:[%s1575_s3 + $0x1e0] sm:$0xff] %vm668_vm2, %v650_v58  ;;  %v505_v61 = vadd.f32 %v917_v59, %v1250_v1  ;;  %v665_v62 = vadd.f32 %v965_v60, %v1250_v1 }
 0x103   :  { %v499_v63 = vpop.f32.mrf.mxu0  ;;  %v659_v0 = vpop.f32.mrf.mxu1 }
 0x104   :  { %700 = vst.msk [vmem:[%s1575_s3 + $0xf8] sm:$0xff] %vm668_vm2, %v505_v61  ;;  %732 = vst.msk [vmem:[%s1575_s3 + $0x1f8] sm:$0xff] %vm668_vm2, %v665_v62  ;;  %v500_v2 = vadd.f32 %v1250_v1, %v499_v63  ;;  %v660_v3 = vadd.f32 %v1250_v1, %v659_v0 }
 0x106   :  { %699 = vst.msk [vmem:[%s1575_s3 + $0xf0] sm:$0xff] %vm668_vm2, %v500_v2  ;;  %731 = vst.msk [vmem:[%s1575_s3 + $0x1f0] sm:$0xff] %vm668_vm2, %v660_v3 }

// kernel: reverse.12
= control target key start
LH: loop header
LB: loop body
LE: loop exit
PB: predicated region body
PF: predicated region fallthrough
CT: control target
= control target key end

     0   :  { %v104_v3 = vlaneseq  ;;  %v97_v18 = vld [vmem:[#allocation0 + $0x7] ss:$-1 sm:$0xff]  ;;  %v111_v19 = vld [vmem:[#allocation0 + $0x17] ss:$-1 sm:$0xff]  ;;  %s606_s0 = inlined_call_operand.vmem [shape: f32[2,8,16,7], index: 0, kind: input, shape index: {}]   ;;  %s607_s1 = inlined_call_operand.vmem [shape: f32[2,8,16,7], index: 1, kind: output, shape index: {}]  }
   0x1   :  { %v61_v0 = vld [vmem:[%s606_s0] sm:$0xff]  ;;  %v63_v1 = vld [vmem:[%s606_s0 + $0x8] sm:$0xff]  ;;  %v65_v2 = vld [vmem:[%s606_s0 + $0x10] sm:$0xff]  ;;  %v98_v20 = vrot.slane %v97_v18, 1  ;;  %v112_v21 = vrot.slane %v111_v19, 1 }
   0x2   :  { %62 = vst [vmem:[#allocation0 + $0x8] sm:$0xff] %v61_v0  ;;  %64 = vst [vmem:[#allocation0 + $0x18] sm:$0xff] %v63_v1  ;;  %v67_v4 = vld [vmem:[%s606_s0 + $0x18] sm:$0xff]  ;;  %v69_v5 = vld [vmem:[%s606_s0 + $0x20] sm:$0xff]  ;;  %v502_v10 = vshrl.u32 %v104_v3, 7 }
   0x3   :  { %66 = vst [vmem:[#allocation0 + $0x28] sm:$0xff] %v65_v2  ;;  %v71_v6 = vld [vmem:[%s606_s0 + $0x28] sm:$0xff]  ;;  %68 = vst [vmem:[#allocation0 + $0x38] sm:$0xff] %v67_v4  ;;  %v73_v7 = vld [vmem:[%s606_s0 + $0x30] sm:$0xff] }
   0x4   :  { %70 = vst [vmem:[#allocation0 + $0x48] sm:$0xff] %v69_v5  ;;  %72 = vst [vmem:[#allocation0 + $0x58] sm:$0xff] %v71_v6  ;;  %v75_v8 = vld [vmem:[%s606_s0 + $0x38] sm:$0xff]  ;;  %v77_v9 = vld [vmem:[%s606_s0 + $0x40] sm:$0xff]  ;;  %vm106_vm0 = vcmp.lt.s32.totalorder %v502_v10, 7 }
   0x5   :  { %74 = vst [vmem:[#allocation0 + $0x68] sm:$0xff] %v73_v7  ;;  %76 = vst [vmem:[#allocation0 + $0x78] sm:$0xff] %v75_v8  ;;  %v79_v11 = vld [vmem:[%s606_s0 + $0x48] sm:$0xff]  ;;  %v81_v12 = vld [vmem:[%s606_s0 + $0x50] sm:$0xff] }
   0x6   :  { %78 = vst [vmem:[#allocation0 + $0x88] sm:$0xff] %v77_v9  ;;  %v83_v13 = vld [vmem:[%s606_s0 + $0x58] sm:$0xff]  ;;  %80 = vst [vmem:[#allocation0 + $0x98] sm:$0xff] %v79_v11  ;;  %v85_v14 = vld [vmem:[%s606_s0 + $0x60] sm:$0xff] }
   0x7   :  { %82 = vst [vmem:[#allocation0 + $0xa8] sm:$0xff] %v81_v12  ;;  %84 = vst [vmem:[#allocation0 + $0xb8] sm:$0xff] %v83_v13  ;;  %v87_v15 = vld [vmem:[%s606_s0 + $0x68] sm:$0xff]  ;;  %v89_v16 = vld [vmem:[%s606_s0 + $0x70] sm:$0xff] }
   0x8   :  { %86 = vst [vmem:[#allocation0 + $0xc8] sm:$0xff] %v85_v14  ;;  %88 = vst [vmem:[#allocation0 + $0xd8] sm:$0xff] %v87_v15  ;;  %v91_v17 = vld [vmem:[%s606_s0 + $0x78] sm:$0xff]  ;;  %v125_v22 = vld [vmem:[#allocation0 + $0x27] ss:$-1 sm:$0xff] }
   0x9   :  { %90 = vst [vmem:[#allocation0 + $0xe8] sm:$0xff] %v89_v16  ;;  %92 = vst [vmem:[#allocation0 + $0xf8] sm:$0xff] %v91_v17  ;;  %v139_v23 = vld [vmem:[#allocation0 + $0x37] ss:$-1 sm:$0xff]  ;;  %v126_v24 = vrot.slane %v125_v22, 1 }
   0xa   :  { %v140_v25 = vrot.slane %v139_v23, 1  ;;  %v153_v26 = vld [vmem:[#allocation0 + $0x47] ss:$-1 sm:$0xff]  ;;  %v167_v27 = vld [vmem:[#allocation0 + $0x57] ss:$-1 sm:$0xff]  ;;  %99 = vst [vmem:[#allocation1] sm:$0xff] %v98_v20 }
   0xb   :  { %v102_v28 = vld [vmem:[#allocation0 + $0xf] ss:$-1 sm:$0xff]  ;;  %113 = vst [vmem:[#allocation1 + $0x8] sm:$0xff] %v112_v21  ;;  %v116_v29 = vld [vmem:[#allocation0 + $0x1f] ss:$-1 sm:$0xff]  ;;  %127 = vst [vmem:[#allocation1 + $0x10] sm:$0xff] %v126_v24 }
   0xc   :  { %v130_v30 = vld [vmem:[#allocation0 + $0x2f] ss:$-1 sm:$0xff]  ;;  %v103_v31 = vrot.slane %v102_v28, 1  ;;  %v117_v32 = vrot.slane %v116_v29, 1  ;;  %141 = vst [vmem:[#allocation1 + $0x18] sm:$0xff] %v140_v25  ;;  %v154_v35 = vrot.slane %v153_v26, 1 }
   0xd   :  { %v131_v33 = vrot.slane %v130_v30, 1  ;;  %v144_v34 = vld [vmem:[#allocation0 + $0x3f] ss:$-1 sm:$0xff]  ;;  %v158_v37 = vld [vmem:[#allocation0 + $0x4f] ss:$-1 sm:$0xff]  ;;  %v168_v38 = vrot.slane %v167_v27, 1 }
   0xe   :  { %v145_v36 = vrot.slane %v144_v34, 1  ;;  %v172_v39 = vld [vmem:[#allocation0 + $0x5f] ss:$-1 sm:$0xff]  ;;  %107 = vst.msk [vmem:[#allocation1] sm:$0xff] %vm106_vm0, %v103_v31  ;;  %121 = vst.msk [vmem:[#allocation1 + $0x8] sm:$0xff] %vm106_vm0, %v117_v32  ;;  %v159_v40 = vrot.slane %v158_v37, 1 }
   0xf   :  { %135 = vst.msk [vmem:[#allocation1 + $0x10] sm:$0xff] %vm106_vm0, %v131_v33  ;;  %155 = vst [vmem:[#allocation1 + $0x20] sm:$0xff] %v154_v35  ;;  %v173_v41 = vrot.slane %v172_v39, 1  ;;  %v181_v42 = vld [vmem:[#allocation0 + $0x67] ss:$-1 sm:$0xff] }
  0x10   :  { %v186_v43 = vld [vmem:[#allocation0 + $0x6f] ss:$-1 sm:$0xff]  ;;  %149 = vst.msk [vmem:[#allocation1 + $0x18] sm:$0xff] %vm106_vm0, %v145_v36  ;;  %169 = vst [vmem:[#allocation1 + $0x28] sm:$0xff] %v168_v38  ;;  %v182_v44 = vrot.slane %v181_v42, 1 }
  0x11   :  { %v187_v45 = vrot.slane %v186_v43, 1  ;;  %v195_v46 = vld [vmem:[#allocation0 + $0x77] ss:$-1 sm:$0xff]  ;;  %v200_v47 = vld [vmem:[#allocation0 + $0x7f] ss:$-1 sm:$0xff]  ;;  %163 = vst.msk [vmem:[#allocation1 + $0x20] sm:$0xff] %vm106_vm0, %v159_v40 }
  0x12   :  { %177 = vst.msk [vmem:[#allocation1 + $0x28] sm:$0xff] %vm106_vm0, %v173_v41  ;;  %v196_v48 = vrot.slane %v195_v46, 1  ;;  %v201_v49 = vrot.slane %v200_v47, 1  ;;  %v209_v50 = vld [vmem:[#allocation0 + $0x87] ss:$-1 sm:$0xff]  ;;  %183 = vst [vmem:[#allocation1 + $0x30] sm:$0xff] %v182_v44 }
  0x13   :  { %v214_v51 = vld [vmem:[#allocation0 + $0x8f] ss:$-1 sm:$0xff]  ;;  %v210_v52 = vrot.slane %v209_v50, 1  ;;  %v223_v54 = vld [vmem:[#allocation0 + $0x97] ss:$-1 sm:$0xff]  ;;  %191 = vst.msk [vmem:[#allocation1 + $0x30] sm:$0xff] %vm106_vm0, %v187_v45 }
  0x14   :  { %v215_v53 = vrot.slane %v214_v51, 1  ;;  %v228_v55 = vld [vmem:[#allocation0 + $0x9f] ss:$-1 sm:$0xff]  ;;  %197 = vst [vmem:[#allocation1 + $0x38] sm:$0xff] %v196_v48  ;;  %v224_v56 = vrot.slane %v223_v54, 1 }
  0x15   :  { %v229_v57 = vrot.slane %v228_v55, 1  ;;  %v237_v58 = vld [vmem:[#allocation0 + $0xa7] ss:$-1 sm:$0xff]  ;;  %v242_v59 = vld [vmem:[#allocation0 + $0xaf] ss:$-1 sm:$0xff]  ;;  %205 = vst.msk [vmem:[#allocation1 + $0x38] sm:$0xff] %vm106_vm0, %v201_v49 }
  0x16   :  { %211 = vst [vmem:[#allocation1 + $0x40] sm:$0xff] %v210_v52  ;;  %v238_v60 = vrot.slane %v237_v58, 1  ;;  %v243_v61 = vrot.slane %v242_v59, 1  ;;  %v251_v62 = vld [vmem:[#allocation0 + $0xb7] ss:$-1 sm:$0xff]  ;;  %225 = vst [vmem:[#allocation1 + $0x48] sm:$0xff] %v224_v56 }
  0x17   :  { %v256_v63 = vld [vmem:[#allocation0 + $0xbf] ss:$-1 sm:$0xff]  ;;  %219 = vst.msk [vmem:[#allocation1 + $0x40] sm:$0xff] %vm106_vm0, %v215_v53  ;;  %v252_v0 = vrot.slane %v251_v62, 1  ;;  %v265_v2 = vld [vmem:[#allocation0 + $0xc7] ss:$-1 sm:$0xff] }
  0x18   :  { %v257_v1 = vrot.slane %v256_v63, 1  ;;  %v270_v3 = vld [vmem:[#allocation0 + $0xcf] ss:$-1 sm:$0xff]  ;;  %233 = vst.msk [vmem:[#allocation1 + $0x48] sm:$0xff] %vm106_vm0, %v229_v57  ;;  %239 = vst [vmem:[#allocation1 + $0x50] sm:$0xff] %v238_v60  ;;  %v266_v4 = vrot.slane %v265_v2, 1 }
  0x19   :  { %v271_v5 = vrot.slane %v270_v3, 1  ;;  %v279_v6 = vld [vmem:[#allocation0 + $0xd7] ss:$-1 sm:$0xff]  ;;  %v284_v7 = vld [vmem:[#allocation0 + $0xdf] ss:$-1 sm:$0xff]  ;;  %247 = vst.msk [vmem:[#allocation1 + $0x50] sm:$0xff] %vm106_vm0, %v243_v61 }
  0x1a   :  { %253 = vst [vmem:[#allocation1 + $0x58] sm:$0xff] %v252_v0  ;;  %v280_v8 = vrot.slane %v279_v6, 1  ;;  %v285_v9 = vrot.slane %v284_v7, 1  ;;  %v293_v11 = vld [vmem:[#allocation0 + $0xe7] ss:$-1 sm:$0xff]  ;;  %267 = vst [vmem:[#allocation1 + $0x60] sm:$0xff] %v266_v4 }
  0x1b   :  { %v298_v12 = vld [vmem:[#allocation0 + $0xef] ss:$-1 sm:$0xff]  ;;  %261 = vst.msk [vmem:[#allocation1 + $0x58] sm:$0xff] %vm106_vm0, %v257_v1  ;;  %v294_v13 = vrot.slane %v293_v11, 1  ;;  %v307_v15 = vld [vmem:[#allocation0 + $0xf7] ss:$-1 sm:$0xff] }
  0x1c   :  { %v299_v14 = vrot.slane %v298_v12, 1  ;;  %v312_v16 = vld [vmem:[#allocation0 + $0xff] ss:$-1 sm:$0xff]  ;;  %275 = vst.msk [vmem:[#allocation1 + $0x60] sm:$0xff] %vm106_vm0, %v271_v5  ;;  %281 = vst [vmem:[#allocation1 + $0x68] sm:$0xff] %v280_v8  ;;  %v308_v17 = vrot.slane %v307_v15, 1 }
  0x1d   :  { %v313_v18 = vrot.slane %v312_v16, 1  ;;  %v376_v19 = vld [vmem:[#allocation1] sm:$0xff]  ;;  %v378_v20 = vld [vmem:[#allocation1 + $0x8] sm:$0xff]  ;;  %v380_v21 = vld [vmem:[#allocation1 + $0x10] sm:$0xff]  ;;  %289 = vst.msk [vmem:[#allocation1 + $0x68] sm:$0xff] %vm106_vm0, %v285_v9 }
  0x1e   :  { %295 = vst [vmem:[#allocation1 + $0x70] sm:$0xff] %v294_v13  ;;  %377 = vst [vmem:[%s607_s1] sm:$0xff] %v376_v19  ;;  %v382_v22 = vld [vmem:[#allocation1 + $0x18] sm:$0xff]  ;;  %v384_v23 = vld [vmem:[#allocation1 + $0x20] sm:$0xff] }
  0x1f   :  { %379 = vst [vmem:[%s607_s1 + $0x8] sm:$0xff] %v378_v20  ;;  %381 = vst [vmem:[%s607_s1 + $0x10] sm:$0xff] %v380_v21  ;;  %v386_v24 = vld [vmem:[#allocation1 + $0x28] sm:$0xff]  ;;  %v388_v25 = vld [vmem:[#allocation1 + $0x30] sm:$0xff] }
  0x20   :  { %303 = vst.msk [vmem:[#allocation1 + $0x70] sm:$0xff] %vm106_vm0, %v299_v14  ;;  %309 = vst [vmem:[#allocation1 + $0x78] sm:$0xff] %v308_v17  ;;  %v390_v26 = vld [vmem:[#allocation1 + $0x38] sm:$0xff]  ;;  %v392_v10 = vld [vmem:[#allocation1 + $0x40] sm:$0xff] }
  0x21   :  { %383 = vst [vmem:[%s607_s1 + $0x18] sm:$0xff] %v382_v22  ;;  %385 = vst [vmem:[%s607_s1 + $0x20] sm:$0xff] %v384_v23  ;;  %v394_v27 = vld [vmem:[#allocation1 + $0x48] sm:$0xff]  ;;  %v396_v28 = vld [vmem:[#allocation1 + $0x50] sm:$0xff] }
  0x22   :  { %387 = vst [vmem:[%s607_s1 + $0x28] sm:$0xff] %v386_v24  ;;  %317 = vst.msk [vmem:[#allocation1 + $0x78] sm:$0xff] %vm106_vm0, %v313_v18  ;;  %v398_v29 = vld [vmem:[#allocation1 + $0x58] sm:$0xff] }
  0x23   :  { %389 = vst [vmem:[%s607_s1 + $0x30] sm:$0xff] %v388_v25  ;;  %391 = vst [vmem:[%s607_s1 + $0x38] sm:$0xff] %v390_v26  ;;  %v400_v30 = vld [vmem:[#allocation1 + $0x60] sm:$0xff] }
  0x24   :  { %393 = vst [vmem:[%s607_s1 + $0x40] sm:$0xff] %v392_v10  ;;  %395 = vst [vmem:[%s607_s1 + $0x48] sm:$0xff] %v394_v27  ;;  %v402_v31 = vld [vmem:[#allocation1 + $0x68] sm:$0xff] }
  0x25   :  { %397 = vst [vmem:[%s607_s1 + $0x50] sm:$0xff] %v396_v28  ;;  %399 = vst [vmem:[%s607_s1 + $0x58] sm:$0xff] %v398_v29 }
  0x26   :  { %401 = vst [vmem:[%s607_s1 + $0x60] sm:$0xff] %v400_v30  ;;  %403 = vst [vmem:[%s607_s1 + $0x68] sm:$0xff] %v402_v31 }
  0x27   :  { %v404_v32 = vld [vmem:[#allocation1 + $0x70] sm:$0xff] }
  0x28   :  { %405 = vst [vmem:[%s607_s1 + $0x70] sm:$0xff] %v404_v32 }
  0x29   :  { %v406_v33 = vld [vmem:[#allocation1 + $0x78] sm:$0xff] }
  0x2a   :  { %407 = vst [vmem:[%s607_s1 + $0x78] sm:$0xff] %v406_v33 }

// kernel: closed_call.45
= control target key start
LH: loop header
LB: loop body
LE: loop exit
PB: predicated region body
PF: predicated region fallthrough
CT: control target
= control target key end

     0   :  { %v9991_v0 = vmov 0.0   ;;  %vm147_vm0 = vcmask 64512   ;;  %vm8160_vm1 = vmmov 0   ;;  %vm7252_vm2 = vcmask 58368   ;;  %s9983_s2 = inlined_call_operand.vmem [shape: f32[32,8,8], index: 2, kind: input, shape index: {}]   ;;  %s9984_s0 = inlined_call_operand.vmem [shape: f32[32,2,8], index: 0, kind: input, shape index: {}]   ;;  %s9985_s3 = inlined_call_operand.vmem [shape: f32[32,8,8], index: 3, kind: input, shape index: {}]   ;;  %s9986_s1 = inlined_call_operand.vmem [shape: f32[32,2,8], index: 1, kind: input, shape index: {}]   ;;  %s9987_s4 = inlined_call_operand.vmem [shape: f32[32,2,8], index: 4, kind: output, shape index: {0}]   ;;  %s9988_s5 = inlined_call_operand.vmem [shape: f32[32,2,8], index: 5, kind: output, shape index: {1}]  }
   0x1   :  { %7677 = vmatprep.subr.mxu0 %v9991_v0  ;;  %7682 = vmatprep.subr.mxu1 %v9991_v0  ;;  %v8196_v1 = vld [vmem:[%s9983_s2] sm:$0xff]  ;;  %v8201_v2 = vld [vmem:[%s9983_s2 + $0x8] sm:$0xff]  ;;  %v8222_v5 = vld [vmem:[%s9983_s2 + $0x10] sm:$0xff] }
   0x2   :  { %7678 = vmatpush3.msra.mxu0 %v8196_v1  ;;  %7679 = vmatprep.mubr.msk.f32.mxu0 %vm8160_vm1, %v9991_v0  ;;  %v8209_v3 = vld [vmem:[%s9984_s0] sm:$0x3]  ;;  %v8217_v4 = vld [vmem:[%s9984_s0 + $0x2] sm:$0x3]  ;;  %v8231_v6 = vld [vmem:[%s9983_s2 + $0x18] sm:$0xff] }
   0x3   :  { %7683 = vmatpush3.msra.mxu1 %v8201_v2  ;;  %7684 = vmatprep.mubr.msk.f32.mxu1 %vm8160_vm1, %v9991_v0  ;;  %v8238_v7 = vld [vmem:[%s9984_s0 + $0x4] sm:$0x3]  ;;  %v8243_v8 = vld [vmem:[%s9984_s0 + $0x6] sm:$0x3]  ;;  %v8259_v10 = vld [vmem:[%s9983_s2 + $0x28] sm:$0xff] }
   0x4   :  { %7680 = vmatmul.mubr.msk.f32.vlgmr.msra.gmra.mxu0 %vm147_vm0, %v8209_v3  ;;  %7685 = vmatmul.mubr.msk.f32.vlgmr.msra.gmra.mxu1 %vm147_vm0, %v8217_v4  ;;  %v8254_v9 = vld [vmem:[%s9983_s2 + $0x20] sm:$0xff]  ;;  %v8270_v11 = vld [vmem:[%s9984_s0 + $0x8] sm:$0x3]  ;;  %v8275_v12 = vld [vmem:[%s9984_s0 + $0xa] sm:$0x3] }
   0x5   :  { %7687 = vmatprep.subr.mxu0 %v9991_v0  ;;  %7692 = vmatprep.subr.mxu1 %v9991_v0  ;;  %v8286_v13 = vld [vmem:[%s9983_s2 + $0x30] sm:$0xff]  ;;  %v8291_v14 = vld [vmem:[%s9983_s2 + $0x38] sm:$0xff]  ;;  %v8302_v15 = vld [vmem:[%s9984_s0 + $0xc] sm:$0x3] }
   0x6   :  { %7688 = vmatpush3.msra.mxu0 %v8222_v5  ;;  %7693 = vmatpush3.msra.mxu1 %v8231_v6  ;;  %v8307_v16 = vld [vmem:[%s9984_s0 + $0xe] sm:$0x3]  ;;  %v8318_v17 = vld [vmem:[%s9983_s2 + $0x40] sm:$0xff]  ;;  %v8334_v19 = vld [vmem:[%s9984_s0 + $0x10] sm:$0x3] }
   0x7   :  { %7689 = vmatprep.mubr.msk.f32.mxu0 %vm8160_vm1, %v9991_v0  ;;  %7694 = vmatprep.mubr.msk.f32.mxu1 %vm8160_vm1, %v9991_v0  ;;  %v8323_v18 = vld [vmem:[%s9983_s2 + $0x48] sm:$0xff]  ;;  %v8339_v20 = vld [vmem:[%s9984_s0 + $0x12] sm:$0x3]  ;;  %v8355_v22 = vld [vmem:[%s9983_s2 + $0x58] sm:$0xff] }
   0x8   :  { %7690 = vmatmul.mubr.msk.f32.vlgmr.msra.gmra.mxu0 %vm147_vm0, %v8238_v7  ;;  %7695 = vmatmul.mubr.msk.f32.vlgmr.msra.gmra.mxu1 %vm147_vm0, %v8243_v8  ;;  %v8350_v21 = vld [vmem:[%s9983_s2 + $0x50] sm:$0xff]  ;;  %v8382_v25 = vld [vmem:[%s9983_s2 + $0x60] sm:$0xff]  ;;  %v8387_v26 = vld [vmem:[%s9983_s2 + $0x68] sm:$0xff] }
   0x9   :  { %7697 = vmatprep.subr.mxu0 %v9991_v0  ;;  %7702 = vmatprep.subr.mxu1 %v9991_v0  ;;  %v8366_v23 = vld [vmem:[%s9984_s0 + $0x14] sm:$0x3]  ;;  %v8371_v24 = vld [vmem:[%s9984_s0 + $0x16] sm:$0x3]  ;;  %v8398_v27 = vld [vmem:[%s9984_s0 + $0x18] sm:$0x3] }
   0xa   :  { %7698 = vmatpush3.msra.mxu0 %v8254_v9  ;;  %7703 = vmatpush3.msra.mxu1 %v8259_v10  ;;  %v8403_v28 = vld [vmem:[%s9984_s0 + $0x1a] sm:$0x3]  ;;  %v8414_v29 = vld [vmem:[%s9983_s2 + $0x70] sm:$0xff]  ;;  %v8430_v31 = vld [vmem:[%s9984_s0 + $0x1c] sm:$0x3] }
   0xb   :  { %7699 = vmatprep.mubr.msk.f32.mxu0 %vm8160_vm1, %v9991_v0  ;;  %7704 = vmatprep.mubr.msk.f32.mxu1 %vm8160_vm1, %v9991_v0  ;;  %10072 = vst [vmem:[#allocation2_spill] sm:$0xff] %v8414_v29  ;;  %v8419_v30 = vld [vmem:[%s9983_s2 + $0x78] sm:$0xff]  ;;  %10074 = vst [vmem:[#allocation4_spill] sm:$0xff] %v8430_v31  ;;  %v8446_v33 = vld [vmem:[%s9983_s2 + $0x80] sm:$0xff] }
   0xc   :  { %7700 = vmatmul.mubr.msk.f32.vlgmr.msra.gmra.mxu0 %vm147_vm0, %v8270_v11  ;;  %7705 = vmatmul.mubr.msk.f32.vlgmr.msra.gmra.mxu1 %vm147_vm0, %v8275_v12  ;;  %10073 = vst [vmem:[#allocation3_spill] sm:$0xff] %v8419_v30  ;;  %v8435_v32 = vld [vmem:[%s9984_s0 + $0x1e] sm:$0x3]  ;;  %10076 = vst [vmem:[#allocation6_spill] sm:$0xff] %v8446_v33  ;;  %v8451_v34 = vld [vmem:[%s9983_s2 + $0x88] sm:$0xff] }
   0xd   :  { %7707 = vmatprep.subr.mxu0 %v9991_v0  ;;  %7712 = vmatprep.subr.mxu1 %v9991_v0  ;;  %10075 = vst [vmem:[#allocation5_spill] sm:$0xff] %v8435_v32  ;;  %10077 = vst [vmem:[#allocation7_spill] sm:$0xff] %v8451_v34  ;;  %v8462_v35 = vld [vmem:[%s9984_s0 + $0x20] sm:$0x3]  ;;  %v8467_v36 = vld [vmem:[%s9984_s0 + $0x22] sm:$0x3] }
   0xe   :  { %7708 = vmatpush3.msra.mxu0 %v8286_v13  ;;  %7713 = vmatpush3.msra.mxu1 %v8291_v14  ;;  %10078 = vst [vmem:[#allocation8_spill] sm:$0xff] %v8462_v35  ;;  %10079 = vst [vmem:[#allocation9_spill] sm:$0xff] %v8467_v36  ;;  %v8478_v37 = vld [vmem:[%s9983_s2 + $0x90] sm:$0xff]  ;;  %v8483_v38 = vld [vmem:[%s9983_s2 + $0x98] sm:$0xff] }
   0xf   :  { %7709 = vmatprep.mubr.msk.f32.mxu0 %vm8160_vm1, %v9991_v0  ;;  %7714 = vmatprep.mubr.msk.f32.mxu1 %vm8160_vm1, %v9991_v0  ;;  %10080 = vst [vmem:[#allocation10_spill] sm:$0xff] %v8478_v37  ;;  %10081 = vst [vmem:[#allocation11_spill] sm:$0xff] %v8483_v38  ;;  %v8494_v39 = vld [vmem:[%s9984_s0 + $0x24] sm:$0x3]  ;;  %v8499_v40 = vld [vmem:[%s9984_s0 + $0x26] sm:$0x3] }
  0x10   :  { %7710 = vmatmul.mubr.msk.f32.vlgmr.msra.gmra.mxu0 %vm147_vm0, %v8302_v15  ;;  %7715 = vmatmul.mubr.msk.f32.vlgmr.msra.gmra.mxu1 %vm147_vm0, %v8307_v16  ;;  %10082 = vst [vmem:[#allocation12_spill] sm:$0xff] %v8494_v39  ;;  %10083 = vst [vmem:[#allocation13_spill] sm:$0xff] %v8499_v40  ;;  %v8510_v41 = vld [vmem:[%s9983_s2 + $0xa0] sm:$0xff]  ;;  %v8515_v42 = vld [vmem:[%s9983_s2 + $0xa8] sm:$0xff] }
  0x11   :  { %7717 = vmatprep.subr.mxu0 %v9991_v0  ;;  %7722 = vmatprep.subr.mxu1 %v9991_v0  ;;  %10084 = vst [vmem:[#allocation14_spill] sm:$0xff] %v8510_v41  ;;  %10085 = vst [vmem:[#allocation15_spill] sm:$0xff] %v8515_v42  ;;  %v8526_v43 = vld [vmem:[%s9984_s0 + $0x28] sm:$0x3]  ;;  %v8531_v44 = vld [vmem:[%s9984_s0 + $0x2a] sm:$0x3] }
  0x12   :  { %7718 = vmatpush3.msra.mxu0 %v8318_v17  ;;  %7723 = vmatpush3.msra.mxu1 %v8323_v18  ;;  %10086 = vst [vmem:[#allocation16_spill] sm:$0xff] %v8526_v43  ;;  %10087 = vst [vmem:[#allocation17_spill] sm:$0xff] %v8531_v44  ;;  %v8542_v45 = vld [vmem:[%s9983_s2 + $0xb0] sm:$0xff]  ;;  %v8547_v46 = vld [vmem:[%s9983_s2 + $0xb8] sm:$0xff] }
  0x13   :  { %7719 = vmatprep.mubr.msk.f32.mxu0 %vm8160_vm1, %v9991_v0  ;;  %7724 = vmatprep.mubr.msk.f32.mxu1 %vm8160_vm1, %v9991_v0  ;;  %10088 = vst [vmem:[#allocation18_spill] sm:$0xff] %v8542_v45  ;;  %10089 = vst [vmem:[#allocation19_spill] sm:$0xff] %v8547_v46  ;;  %v8558_v47 = vld [vmem:[%s9984_s0 + $0x2c] sm:$0x3]  ;;  %v8563_v48 = vld [vmem:[%s9984_s0 + $0x2e] sm:$0x3] }
  0x14   :  { %7720 = vmatmul.mubr.msk.f32.vlgmr.msra.gmra.mxu0 %vm147_vm0, %v8334_v19  ;;  %7725 = vmatmul.mubr.msk.f32.vlgmr.msra.gmra.mxu1 %vm147_vm0, %v8339_v20  ;;  %10090 = vst [vmem:[#allocation20_spill] sm:$0xff] %v8558_v47  ;;  %10091 = vst [vmem:[#allocation21_spill] sm:$0xff] %v8563_v48  ;;  %v8574_v49 = vld [vmem:[%s9983_s2 + $0xc0] sm:$0xff]  ;;  %v8579_v50 = vld [vmem:[%s9983_s2 + $0xc8] sm:$0xff] }
  0x15   :  { %7727 = vmatprep.subr.mxu0 %v9991_v0  ;;  %7732 = vmatprep.subr.mxu1 %v9991_v0  ;;  %10092 = vst [vmem:[#allocation22_spill] sm:$0xff] %v8574_v49  ;;  %10093 = vst [vmem:[#allocation23_spill] sm:$0xff] %v8579_v50  ;;  %v8590_v51 = vld [vmem:[%s9984_s0 + $0x30] sm:$0x3]  ;;  %v8595_v52 = vld [vmem:[%s9984_s0 + $0x32] sm:$0x3] }
  0x16   :  { %7728 = vmatpush3.msra.mxu0 %v8350_v21  ;;  %7733 = vmatpush3.msra.mxu1 %v8355_v22  ;;  %10094 = vst [vmem:[#allocation24_spill] sm:$0xff] %v8590_v51  ;;  %10095 = vst [vmem:[#allocation25_spill] sm:$0xff] %v8595_v52  ;;  %v8606_v53 = vld [vmem:[%s9983_s2 + $0xd0] sm:$0xff]  ;;  %v8611_v54 = vld [vmem:[%s9983_s2 + $0xd8] sm:$0xff] }
  0x17   :  { %7729 = vmatprep.mubr.msk.f32.mxu0 %vm8160_vm1, %v9991_v0  ;;  %7734 = vmatprep.mubr.msk.f32.mxu1 %vm8160_vm1, %v9991_v0  ;;  %10096 = vst [vmem:[#allocation26_spill] sm:$0xff] %v8606_v53  ;;  %10097 = vst [vmem:[#allocation27_spill] sm:$0xff] %v8611_v54  ;;  %v8622_v55 = vld [vmem:[%s9984_s0 + $0x34] sm:$0x3]  ;;  %v8627_v56 = vld [vmem:[%s9984_s0 + $0x36] sm:$0x3] }
  0x18   :  { %7730 = vmatmul.mubr.msk.f32.vlgmr.msra.gmra.mxu0 %vm147_vm0, %v8366_v23  ;;  %7735 = vmatmul.mubr.msk.f32.vlgmr.msra.gmra.mxu1 %vm147_vm0, %v8371_v24  ;;  %10098 = vst [vmem:[#allocation28_spill] sm:$0xff] %v8622_v55  ;;  %10099 = vst [vmem:[#allocation29_spill] sm:$0xff] %v8627_v56  ;;  %v8638_v57 = vld [vmem:[%s9983_s2 + $0xe0] sm:$0xff]  ;;  %v8643_v58 = vld [vmem:[%s9983_s2 + $0xe8] sm:$0xff] }
  0x19   :  { %7737 = vmatprep.subr.mxu0 %v9991_v0  ;;  %7742 = vmatprep.subr.mxu1 %v9991_v0  ;;  %10100 = vst [vmem:[#allocation30_spill] sm:$0xff] %v8638_v57  ;;  %10101 = vst [vmem:[#allocation31_spill] sm:$0xff] %v8643_v58  ;;  %v8654_v59 = vld [vmem:[%s9984_s0 + $0x38] sm:$0x3]  ;;  %v8659_v60 = vld [vmem:[%s9984_s0 + $0x3a] sm:$0x3] }
  0x1a   :  { %7738 = vmatpush3.msra.mxu0 %v8382_v25  ;;  %7743 = vmatpush3.msra.mxu1 %v8387_v26  ;;  %10102 = vst [vmem:[#allocation32_spill] sm:$0xff] %v8654_v59  ;;  %10103 = vst [vmem:[#allocation33_spill] sm:$0xff] %v8659_v60  ;;  %v8670_v61 = vld [vmem:[%s9983_s2 + $0xf0] sm:$0xff]  ;;  %v8675_v62 = vld [vmem:[%s9983_s2 + $0xf8] sm:$0xff] }
  0x1b   :  { %7739 = vmatprep.mubr.msk.f32.mxu0 %vm8160_vm1, %v9991_v0  ;;  %7744 = vmatprep.mubr.msk.f32.mxu1 %vm8160_vm1, %v9991_v0  ;;  %10104 = vst [vmem:[#allocation34_spill] sm:$0xff] %v8670_v61  ;;  %10105 = vst [vmem:[#allocation35_spill] sm:$0xff] %v8675_v62  ;;  %v8686_v63 = vld [vmem:[%s9984_s0 + $0x3c] sm:$0x3] }
  0x1c   :  { %7740 = vmatmul.mubr.msk.f32.vlgmr.msra.gmra.mxu0 %vm147_vm0, %v8398_v27  ;;  %7745 = vmatmul.mubr.msk.f32.vlgmr.msra.gmra.mxu1 %vm147_vm0, %v8403_v28  ;;  %10106 = vst [vmem:[#allocation36_spill] sm:$0xff] %v8686_v63 }
  0x1d   :  { %7747 = vmatprep.subr.mxu0 %v9991_v0  ;;  %7752 = vmatprep.subr.mxu1 %v9991_v0 }
  0x1e   :  { %7748 = vmatpush3.msra.mxu0 %v8414_v29  ;;  %7753 = vmatpush3.msra.mxu1 %v8419_v30  ;;  %v8963_v30 = vld [vmem:[%s9985_s3 + $0x88] sm:$0xff] }
  0x1f   :  { %7749 = vmatprep.mubr.msk.f32.mxu0 %vm8160_vm1, %v9991_v0  ;;  %7754 = vmatprep.mubr.msk.f32.mxu1 %vm8160_vm1, %v9991_v0  ;;  %10115 = vst [vmem:[#allocation44_spill] sm:$0xff] %v8963_v30 }
  0x20   :  { %7750 = vmatmul.mubr.msk.f32.vlgmr.msra.gmra.mxu0 %vm147_vm0, %v8430_v31  ;;  %7755 = vmatmul.mubr.msk.f32.vlgmr.msra.gmra.mxu1 %vm147_vm0, %v8435_v32  ;;  %v8947_v32 = vld [vmem:[%s9986_s1 + $0x1e] sm:$0x3]  ;;  %v8958_v31 = vld [vmem:[%s9985_s3 + $0x80] sm:$0xff] }
  0x21   :  { %7757 = vmatprep.subr.mxu0 %v9991_v0  ;;  %7762 = vmatprep.subr.mxu1 %v9991_v0  ;;  %10113 = vst [vmem:[#allocation42_spill] sm:$0xff] %v8947_v32  ;;  %10114 = vst [vmem:[#allocation43_spill] sm:$0xff] %v8958_v31 }
  0x22   :  { %7758 = vmatpush3.msra.mxu0 %v8446_v33  ;;  %7763 = vmatpush3.msra.mxu1 %v8451_v34  ;;  %v8931_v34 = vld [vmem:[%s9985_s3 + $0x78] sm:$0xff] }
  0x23   :  { %7759 = vmatprep.mubr.msk.f32.mxu0 %vm8160_vm1, %v9991_v0  ;;  %7764 = vmatprep.mubr.msk.f32.mxu1 %vm8160_vm1, %v9991_v0  ;;  %10111 = vst [vmem:[#allocation40_spill] sm:$0xff] %v8931_v34  ;;  %v8942_v33 = vld [vmem:[%s9986_s1 + $0x1c] sm:$0x3] }
  0x24   :  { %7760 = vmatmul.mubr.msk.f32.vlgmr.msra.gmra.mxu0 %vm147_vm0, %v8462_v35  ;;  %7765 = vmatmul.mubr.msk.f32.vlgmr.msra.gmra.mxu1 %vm147_vm0, %v8467_v36  ;;  %v8915_v36 = vld [vmem:[%s9986_s1 + $0x1a] sm:$0x3]  ;;  %v8926_v35 = vld [vmem:[%s9985_s3 + $0x70] sm:$0xff]  ;;  %10112 = vst [vmem:[#allocation41_spill] sm:$0xff] %v8942_v33 }
  0x25   :  { %7767 = vmatprep.subr.mxu0 %v9991_v0  ;;  %7772 = vmatprep.subr.mxu1 %v9991_v0  ;;  %10109 = vst [vmem:[#allocation38_spill] sm:$0xff] %v8915_v36  ;;  %10110 = vst [vmem:[#allocation39_spill] sm:$0xff] %v8926_v35 }
  0x26   :  { %7768 = vmatpush3.msra.mxu0 %v8478_v37  ;;  %7773 = vmatpush3.msra.mxu1 %v8483_v38  ;;  %v8899_v38 = vld [vmem:[%s9985_s3 + $0x68] sm:$0xff]  ;;  %v8910_v37 = vld [vmem:[%s9986_s1 + $0x18] sm:$0x3] }
  0x27   :  { %7769 = vmatprep.mubr.msk.f32.mxu0 %vm8160_vm1, %v9991_v0  ;;  %7774 = vmatprep.mubr.msk.f32.mxu1 %vm8160_vm1, %v9991_v0 }
  0x28   :  { %7770 = vmatmul.mubr.msk.f32.vlgmr.msra.gmra.mxu0 %vm147_vm0, %v8494_v39  ;;  %7775 = vmatmul.mubr.msk.f32.vlgmr.msra.gmra.mxu1 %vm147_vm0, %v8499_v40  ;;  %v8883_v40 = vld [vmem:[%s9986_s1 + $0x16] sm:$0x3]  ;;  %v8894_v39 = vld [vmem:[%s9985_s3 + $0x60] sm:$0xff] }
  0x29   :  { %7777 = vmatprep.subr.mxu0 %v9991_v0  ;;  %7782 = vmatprep.subr.mxu1 %v9991_v0 }
  0x2a   :  { %7778 = vmatpush3.msra.mxu0 %v8510_v41  ;;  %7783 = vmatpush3.msra.mxu1 %v8515_v42  ;;  %v8867_v42 = vld [vmem:[%s9985_s3 + $0x58] sm:$0xff]  ;;  %v8878_v41 = vld [vmem:[%s9986_s1 + $0x14] sm:$0x3] }
  0x2b   :  { %7779 = vmatprep.mubr.msk.f32.mxu0 %vm8160_vm1, %v9991_v0  ;;  %7784 = vmatprep.mubr.msk.f32.mxu1 %vm8160_vm1, %v9991_v0 }
  0x2c   :  { %7780 = vmatmul.mubr.msk.f32.vlgmr.msra.gmra.mxu0 %vm147_vm0, %v8526_v43  ;;  %7785 = vmatmul.mubr.msk.f32.vlgmr.msra.gmra.mxu1 %vm147_vm0, %v8531_v44  ;;  %v8851_v44 = vld [vmem:[%s9986_s1 + $0x12] sm:$0x3] }
  0x2d   :  { %7787 = vmatprep.subr.mxu0 %v9991_v0  ;;  %7792 = vmatprep.subr.mxu1 %v9991_v0  ;;  %v8862_v43 = vld [vmem:[%s9985_s3 + $0x50] sm:$0xff] }
  0x2e   :  { %7788 = vmatpush3.msra.mxu0 %v8542_v45  ;;  %7793 = vmatpush3.msra.mxu1 %v8547_v46  ;;  %v8835_v46 = vld [vmem:[%s9985_s3 + $0x48] sm:$0xff]  ;;  %v8846_v45 = vld [vmem:[%s9986_s1 + $0x10] sm:$0x3] }
  0x2f   :  { %7789 = vmatprep.mubr.msk.f32.mxu0 %vm8160_vm1, %v9991_v0  ;;  %7794 = vmatprep.mubr.msk.f32.mxu1 %vm8160_vm1, %v9991_v0 }
  0x30   :  { %7790 = vmatmul.mubr.msk.f32.vlgmr.msra.gmra.mxu0 %vm147_vm0, %v8558_v47  ;;  %7795 = vmatmul.mubr.msk.f32.vlgmr.msra.gmra.mxu1 %vm147_vm0, %v8563_v48  ;;  %v8819_v48 = vld [vmem:[%s9986_s1 + $0xe] sm:$0x3]  ;;  %v8830_v47 = vld [vmem:[%s9985_s3 + $0x40] sm:$0xff] }
  0x31   :  { %7797 = vmatprep.subr.mxu0 %v9991_v0  ;;  %7802 = vmatprep.subr.mxu1 %v9991_v0 }
  0x32   :  { %7798 = vmatpush3.msra.mxu0 %v8574_v49  ;;  %7803 = vmatpush3.msra.mxu1 %v8579_v50  ;;  %v8803_v50 = vld [vmem:[%s9985_s3 + $0x38] sm:$0xff]  ;;  %v8814_v49 = vld [vmem:[%s9986_s1 + $0xc] sm:$0x3] }
  0x33   :  { %7799 = vmatprep.mubr.msk.f32.mxu0 %vm8160_vm1, %v9991_v0  ;;  %7804 = vmatprep.mubr.msk.f32.mxu1 %vm8160_vm1, %v9991_v0 }
  0x34   :  { %7800 = vmatmul.mubr.msk.f32.vlgmr.msra.gmra.mxu0 %vm147_vm0, %v8590_v51  ;;  %7805 = vmatmul.mubr.msk.f32.vlgmr.msra.gmra.mxu1 %vm147_vm0, %v8595_v52  ;;  %v8787_v52 = vld [vmem:[%s9986_s1 + $0xa] sm:$0x3]  ;;  %v8798_v51 = vld [vmem:[%s9985_s3 + $0x30] sm:$0xff] }
  0x35   :  { %7807 = vmatprep.subr.mxu0 %v9991_v0  ;;  %7812 = vmatprep.subr.mxu1 %v9991_v0 }
  0x36   :  { %7808 = vmatpush3.msra.mxu0 %v8606_v53  ;;  %7813 = vmatpush3.msra.mxu1 %v8611_v54  ;;  %v8771_v54 = vld [vmem:[%s9985_s3 + $0x28] sm:$0xff] }
  0x37   :  { %7809 = vmatprep.mubr.msk.f32.mxu0 %vm8160_vm1, %v9991_v0  ;;  %7814 = vmatprep.mubr.msk.f32.mxu1 %vm8160_vm1, %v9991_v0  ;;  %v8782_v53 = vld [vmem:[%s9986_s1 + $0x8] sm:$0x3] }
  0x38   :  { %7810 = vmatmul.mubr.msk.f32.vlgmr.msra.gmra.mxu0 %vm147_vm0, %v8622_v55  ;;  %7815 = vmatmul.mubr.msk.f32.vlgmr.msra.gmra.mxu1 %vm147_vm0, %v8627_v56  ;;  %v8755_v56 = vld [vmem:[%s9986_s1 + $0x6] sm:$0x3] }
  0x39   :  { %7817 = vmatprep.subr.mxu0 %v9991_v0  ;;  %7822 = vmatprep.subr.mxu1 %v9991_v0  ;;  %v8766_v55 = vld [vmem:[%s9985_s3 + $0x20] sm:$0xff] }
  0x3a   :  { %7818 = vmatpush3.msra.mxu0 %v8638_v57  ;;  %7823 = vmatpush3.msra.mxu1 %v8643_v58  ;;  %v8691_v58 = vld [vmem:[%s9984_s0 + $0x3e] sm:$0x3]  ;;  %v8750_v57 = vld [vmem:[%s9986_s1 + $0x4] sm:$0x3] }
  0x3b   :  { %7819 = vmatprep.mubr.msk.f32.mxu0 %vm8160_vm1, %v9991_v0  ;;  %7824 = vmatprep.mubr.msk.f32.mxu1 %vm8160_vm1, %v9991_v0  ;;  %10107 = vst [vmem:[#allocation37_spill] sm:$0xff] %v8691_v58 }
  0x3c   :  { %7820 = vmatmul.mubr.msk.f32.vlgmr.msra.gmra.mxu0 %vm147_vm0, %v8654_v59  ;;  %7825 = vmatmul.mubr.msk.f32.vlgmr.msra.gmra.mxu1 %vm147_vm0, %v8659_v60  ;;  %v8698_v60 = vld [vmem:[%s9985_s3] sm:$0xff]  ;;  %v10108_v59 = vmov 0.0  }
  0x3d   :  { %7827 = vmatprep.subr.mxu0 %v9991_v0  ;;  %7832 = vmatprep.subr.mxu1 %v9991_v0  ;;  %v8703_v0 = vld [vmem:[%s9985_s3 + $0x8] sm:$0xff] }
  0x3e   :  { %7828 = vmatpush3.msra.mxu0 %v8670_v61  ;;  %7833 = vmatpush3.msra.mxu1 %v8675_v62  ;;  %v8716_v62 = vld [vmem:[%s9986_s1] sm:$0x3]  ;;  %v8721_v61 = vld [vmem:[%s9986_s1 + $0x2] sm:$0x3] }
  0x3f   :  { %7829 = vmatprep.mubr.msk.f32.mxu0 %vm8160_vm1, %v10108_v59  ;;  %7834 = vmatprep.mubr.msk.f32.mxu1 %vm8160_vm1, %v10108_v59  ;;  %v4820_v29 = vadd.f32 %v8716_v62, %v8209_v3  ;;  %v4823_v3 = vadd.f32 %v8755_v56, %v8243_v8  ;;  %v4858_v8 = vadd.f32 %v8798_v51, %v8286_v13 }
  0x40   :  { %7830 = vmatmul.mubr.msk.f32.vlgmr.msra.gmra.mxu0 %vm147_vm0, %v8686_v63  ;;  %7835 = vmatmul.mubr.msk.f32.vlgmr.msra.gmra.mxu1 %vm147_vm0, %v8691_v58  ;;  %v8734_v58 = vld [vmem:[%s9985_s3 + $0x10] sm:$0xff]  ;;  %v8739_v63 = vld [vmem:[%s9985_s3 + $0x18] sm:$0xff]  ;;  %v4861_v13 = vadd.f32 %v8835_v46, %v8323_v18  ;;  %v4830_v18 = vadd.f32 %v8878_v41, %v8366_v23  ;;  %v10142_v23 = vld [vmem:[#allocation38_spill] sm:$0xff] }
  0x41   :  { %7837 = vmatprep.subr.mxu0 %v10108_v59  ;;  %7842 = vmatprep.subr.mxu1 %v10108_v59 }
  0x42   :  { %7838 = vmatpush3.msra.mxu0 %v8698_v60  ;;  %7843 = vmatpush3.msra.mxu1 %v8703_v0 }
  0x43   :  { %7839 = vmatprep.mubr.msk.f32.mxu0 %vm8160_vm1, %v10108_v59  ;;  %7844 = vmatprep.mubr.msk.f32.mxu1 %vm8160_vm1, %v10108_v59 }
  0x44   :  { %7840 = vmatmul.mubr.msk.f32.vlgmr.msra.gmra.mxu0 %vm147_vm0, %v8716_v62  ;;  %7845 = vmatmul.mubr.msk.f32.vlgmr.msra.gmra.mxu1 %vm147_vm0, %v8721_v61 }
  0x45   :  { %7847 = vmatprep.subr.mxu0 %v10108_v59  ;;  %7852 = vmatprep.subr.mxu1 %v10108_v59 }
  0x46   :  { %7848 = vmatpush3.msra.mxu0 %v8734_v58  ;;  %7853 = vmatpush3.msra.mxu1 %v8739_v63 }
  0x47   :  { %7849 = vmatprep.mubr.msk.f32.mxu0 %vm8160_vm1, %v10108_v59  ;;  %7854 = vmatprep.mubr.msk.f32.mxu1 %vm8160_vm1, %v10108_v59 }
  0x48   :  { %7850 = vmatmul.mubr.msk.f32.vlgmr.msra.gmra.mxu0 %vm147_vm0, %v8750_v57  ;;  %7855 = vmatmul.mubr.msk.f32.vlgmr.msra.gmra.mxu1 %vm147_vm0, %v8755_v56  ;;  %v10161_v56 = vld [vmem:[#allocation11_spill] sm:$0xff] }
  0x49   :  { %7857 = vmatprep.subr.mxu0 %v10108_v59  ;;  %7862 = vmatprep.subr.mxu1 %v10108_v59 }
  0x4a   :  { %7858 = vmatpush3.msra.mxu0 %v8766_v55  ;;  %7863 = vmatpush3.msra.mxu1 %v8771_v54 }
  0x4b   :  { %7859 = vmatprep.mubr.msk.f32.mxu0 %vm8160_vm1, %v10108_v59  ;;  %7864 = vmatprep.mubr.msk.f32.mxu1 %vm8160_vm1, %v10108_v59 }
  0x4c   :  { %7860 = vmatmul.mubr.msk.f32.vlgmr.msra.gmra.mxu0 %vm147_vm0, %v8782_v53  ;;  %7865 = vmatmul.mubr.msk.f32.vlgmr.msra.gmra.mxu1 %vm147_vm0, %v8787_v52 }
  0x4d   :  { %7867 = vmatprep.subr.mxu0 %v10108_v59  ;;  %7872 = vmatprep.subr.mxu1 %v10108_v59 }
  0x4e   :  { %7868 = vmatpush3.msra.mxu0 %v8798_v51  ;;  %7873 = vmatpush3.msra.mxu1 %v8803_v50 }
  0x4f   :  { %7869 = vmatprep.mubr.msk.f32.mxu0 %vm8160_vm1, %v10108_v59  ;;  %7874 = vmatprep.mubr.msk.f32.mxu1 %vm8160_vm1, %v10108_v59 }
  0x50   :  { %7870 = vmatmul.mubr.msk.f32.vlgmr.msra.gmra.mxu0 %vm147_vm0, %v8814_v49  ;;  %7875 = vmatmul.mubr.msk.f32.vlgmr.msra.gmra.mxu1 %vm147_vm0, %v8819_v48 }
  0x51   :  { %7877 = vmatprep.subr.mxu0 %v10108_v59  ;;  %7882 = vmatprep.subr.mxu1 %v10108_v59 }
  0x52   :  { %7878 = vmatpush3.msra.mxu0 %v8830_v47  ;;  %7883 = vmatpush3.msra.mxu1 %v8835_v46 }
  0x53   :  { %7879 = vmatprep.mubr.msk.f32.mxu0 %vm8160_vm1, %v10108_v59  ;;  %7884 = vmatprep.mubr.msk.f32.mxu1 %vm8160_vm1, %v10108_v59 }
  0x54   :  { %7880 = vmatmul.mubr.msk.f32.vlgmr.msra.gmra.mxu0 %vm147_vm0, %v8846_v45  ;;  %7885 = vmatmul.mubr.msk.f32.vlgmr.msra.gmra.mxu1 %vm147_vm0, %v8851_v44 }
  0x55   :  { %7887 = vmatprep.subr.mxu0 %v10108_v59  ;;  %7892 = vmatprep.subr.mxu1 %v10108_v59 }
  0x56   :  { %7888 = vmatpush3.msra.mxu0 %v8862_v43  ;;  %7893 = vmatpush3.msra.mxu1 %v8867_v42 }
  0x57   :  { %7889 = vmatprep.mubr.msk.f32.mxu0 %vm8160_vm1, %v10108_v59  ;;  %7894 = vmatprep.mubr.msk.f32.mxu1 %vm8160_vm1, %v10108_v59 }
  0x58   :  { %7890 = vmatmul.mubr.msk.f32.vlgmr.msra.gmra.mxu0 %vm147_vm0, %v8878_v41  ;;  %7895 = vmatmul.mubr.msk.f32.vlgmr.msra.gmra.mxu1 %vm147_vm0, %v8883_v40  ;;  %v10151_v41 = vld [vmem:[#allocation6_spill] sm:$0xff] }
  0x59   :  { %7897 = vmatprep.subr.mxu0 %v10108_v59  ;;  %7902 = vmatprep.subr.mxu1 %v10108_v59 }
  0x5a   :  { %7898 = vmatpush3.msra.mxu0 %v8894_v39  ;;  %7903 = vmatpush3.msra.mxu1 %v8899_v38 }
  0x5b   :  { %7899 = vmatprep.mubr.msk.f32.mxu0 %vm8160_vm1, %v10108_v59  ;;  %7904 = vmatprep.mubr.msk.f32.mxu1 %vm8160_vm1, %v10108_v59 }
  0x5c   :  { %7900 = vmatmul.mubr.msk.f32.vlgmr.msra.gmra.mxu0 %vm147_vm0, %v8910_v37  ;;  %7905 = vmatmul.mubr.msk.f32.vlgmr.msra.gmra.mxu1 %vm147_vm0, %v8915_v36  ;;  %v4821_v36 = vadd.f32 %v8721_v61, %v8217_v4  ;;  %v4856_v4 = vadd.f32 %v8766_v55, %v8254_v9  ;;  %v4859_v9 = vadd.f32 %v8803_v50, %v8291_v14  ;;  %v10157_v50 = vld [vmem:[#allocation9_spill] sm:$0xff] }
  0x5d   :  { %7907 = vmatprep.subr.mxu0 %v10108_v59  ;;  %7912 = vmatprep.subr.mxu1 %v10108_v59  ;;  %v4828_v14 = vadd.f32 %v8846_v45, %v8334_v19  ;;  %v4831_v19 = vadd.f32 %v8883_v40, %v8371_v24  ;;  %v4833_v24 = vadd.f32 %v10142_v23, %v8403_v28  ;;  %v10148_v28 = vld [vmem:[#allocation41_spill] sm:$0xff]  ;;  %v10154_v45 = vld [vmem:[#allocation44_spill] sm:$0xff] }
  0x5e   :  { %7908 = vmatpush3.msra.mxu0 %v8926_v35  ;;  %7913 = vmatpush3.msra.mxu1 %v8931_v34  ;;  %v8974_v34 = vld [vmem:[%s9986_s1 + $0x20] sm:$0x3]  ;;  %v8979_v35 = vld [vmem:[%s9986_s1 + $0x22] sm:$0x3]  ;;  %v10181_v23 = vld [vmem:[#allocation21_spill] sm:$0xff] }
  0x5f   :  { %7909 = vmatprep.mubr.msk.f32.mxu0 %vm8160_vm1, %v10108_v59  ;;  %7914 = vmatprep.mubr.msk.f32.mxu1 %vm8160_vm1, %v10108_v59  ;;  %10116 = vst [vmem:[#allocation45_spill] sm:$0xff] %v8974_v34  ;;  %10117 = vst [vmem:[#allocation46_spill] sm:$0xff] %v8979_v35 }
  0x60   :  { %7910 = vmatmul.mubr.msk.f32.vlgmr.msra.gmra.mxu0 %vm147_vm0, %v8942_v33  ;;  %7915 = vmatmul.mubr.msk.f32.vlgmr.msra.gmra.mxu1 %vm147_vm0, %v8947_v32  ;;  %v8990_v32 = vld [vmem:[%s9985_s3 + $0x90] sm:$0xff]  ;;  %v8995_v33 = vld [vmem:[%s9985_s3 + $0x98] sm:$0xff] }
  0x61   :  { %7917 = vmatprep.subr.mxu0 %v10108_v59  ;;  %7922 = vmatprep.subr.mxu1 %v10108_v59  ;;  %10118 = vst [vmem:[#allocation47_spill] sm:$0xff] %v8990_v32  ;;  %10119 = vst [vmem:[#allocation48_spill] sm:$0xff] %v8995_v33 }
  0x62   :  { %7918 = vmatpush3.msra.mxu0 %v8958_v31  ;;  %7923 = vmatpush3.msra.mxu1 %v8963_v30  ;;  %v9006_v30 = vld [vmem:[%s9986_s1 + $0x24] sm:$0x3]  ;;  %v9011_v31 = vld [vmem:[%s9986_s1 + $0x26] sm:$0x3] }
  0x63   :  { %7919 = vmatprep.mubr.msk.f32.mxu0 %vm8160_vm1, %v10108_v59  ;;  %7924 = vmatprep.mubr.msk.f32.mxu1 %vm8160_vm1, %v10108_v59  ;;  %10120 = vst [vmem:[#allocation49_spill] sm:$0xff] %v9006_v30  ;;  %10121 = vst [vmem:[#allocation50_spill] sm:$0xff] %v9011_v31 }
  0x64   :  { %7920 = vmatmul.mubr.msk.f32.vlgmr.msra.gmra.mxu0 %vm147_vm0, %v8974_v34  ;;  %7925 = vmatmul.mubr.msk.f32.vlgmr.msra.gmra.mxu1 %vm147_vm0, %v8979_v35  ;;  %v9022_v35 = vld [vmem:[%s9985_s3 + $0xa0] sm:$0xff]  ;;  %v9027_v34 = vld [vmem:[%s9985_s3 + $0xa8] sm:$0xff] }
  0x65   :  { %7927 = vmatprep.subr.mxu0 %v10108_v59  ;;  %7932 = vmatprep.subr.mxu1 %v10108_v59  ;;  %10122 = vst [vmem:[#allocation51_spill] sm:$0xff] %v9022_v35  ;;  %10123 = vst [vmem:[#allocation52_spill] sm:$0xff] %v9027_v34 }
  0x66   :  { %7928 = vmatpush3.msra.mxu0 %v8990_v32  ;;  %7933 = vmatpush3.msra.mxu1 %v8995_v33  ;;  %v9038_v33 = vld [vmem:[%s9986_s1 + $0x28] sm:$0x3]  ;;  %v9043_v32 = vld [vmem:[%s9986_s1 + $0x2a] sm:$0x3]  ;;  %v10158_v51 = vld [vmem:[#allocation46_spill] sm:$0xff] }
  0x67   :  { %7929 = vmatprep.mubr.msk.f32.mxu0 %vm8160_vm1, %v10108_v59  ;;  %7934 = vmatprep.mubr.msk.f32.mxu1 %vm8160_vm1, %v10108_v59  ;;  %10124 = vst [vmem:[#allocation53_spill] sm:$0xff] %v9038_v33  ;;  %10125 = vst [vmem:[#allocation54_spill] sm:$0xff] %v9043_v32 }
  0x68   :  { %7930 = vmatmul.mubr.msk.f32.vlgmr.msra.gmra.mxu0 %vm147_vm0, %v9006_v30  ;;  %7935 = vmatmul.mubr.msk.f32.vlgmr.msra.gmra.mxu1 %vm147_vm0, %v9011_v31  ;;  %v9054_v31 = vld [vmem:[%s9985_s3 + $0xb0] sm:$0xff]  ;;  %v9059_v30 = vld [vmem:[%s9985_s3 + $0xb8] sm:$0xff] }
  0x69   :  { %7937 = vmatprep.subr.mxu0 %v10108_v59  ;;  %7942 = vmatprep.subr.mxu1 %v10108_v59  ;;  %10126 = vst [vmem:[#allocation55_spill] sm:$0xff] %v9054_v31  ;;  %10127 = vst [vmem:[#allocation56_spill] sm:$0xff] %v9059_v30 }
  0x6a   :  { %7938 = vmatpush3.msra.mxu0 %v9022_v35  ;;  %7943 = vmatpush3.msra.mxu1 %v9027_v34  ;;  %v9070_v34 = vld [vmem:[%s9986_s1 + $0x2c] sm:$0x3]  ;;  %v9075_v35 = vld [vmem:[%s9986_s1 + $0x2e] sm:$0x3]  ;;  %v10164_v61 = vld [vmem:[#allocation49_spill] sm:$0xff] }
  0x6b   :  { %7939 = vmatprep.mubr.msk.f32.mxu0 %vm8160_vm1, %v10108_v59  ;;  %7944 = vmatprep.mubr.msk.f32.mxu1 %vm8160_vm1, %v10108_v59  ;;  %10128 = vst [vmem:[#allocation57_spill] sm:$0xff] %v9070_v34  ;;  %10129 = vst [vmem:[#allocation58_spill] sm:$0xff] %v9075_v35 }
  0x6c   :  { %7940 = vmatmul.mubr.msk.f32.vlgmr.msra.gmra.mxu0 %vm147_vm0, %v9038_v33  ;;  %7945 = vmatmul.mubr.msk.f32.vlgmr.msra.gmra.mxu1 %vm147_vm0, %v9043_v32  ;;  %v9086_v32 = vld [vmem:[%s9985_s3 + $0xc0] sm:$0xff]  ;;  %v9091_v33 = vld [vmem:[%s9985_s3 + $0xc8] sm:$0xff] }
  0x6d   :  { %7947 = vmatprep.subr.mxu0 %v10108_v59  ;;  %7952 = vmatprep.subr.mxu1 %v10108_v59  ;;  %10130 = vst [vmem:[#allocation59_spill] sm:$0xff] %v9086_v32  ;;  %10131 = vst [vmem:[#allocation60_spill] sm:$0xff] %v9091_v33 }
  0x6e   :  { %7948 = vmatpush3.msra.mxu0 %v9054_v31  ;;  %7953 = vmatpush3.msra.mxu1 %v9059_v30  ;;  %v9102_v30 = vld [vmem:[%s9986_s1 + $0x30] sm:$0x3]  ;;  %v9107_v31 = vld [vmem:[%s9986_s1 + $0x32] sm:$0x3] }
  0x6f   :  { %7949 = vmatprep.mubr.msk.f32.mxu0 %vm8160_vm1, %v10108_v59  ;;  %7954 = vmatprep.mubr.msk.f32.mxu1 %vm8160_vm1, %v10108_v59  ;;  %10132 = vst [vmem:[#allocation61_spill] sm:$0xff] %v9102_v30  ;;  %10133 = vst [vmem:[#allocation62_spill] sm:$0xff] %v9107_v31 }
  0x70   :  { %7950 = vmatmul.mubr.msk.f32.vlgmr.msra.gmra.mxu0 %vm147_vm0, %v9070_v34  ;;  %7955 = vmatmul.mubr.msk.f32.vlgmr.msra.gmra.mxu1 %vm147_vm0, %v9075_v35  ;;  %v9118_v35 = vld [vmem:[%s9985_s3 + $0xd0] sm:$0xff]  ;;  %v9123_v34 = vld [vmem:[%s9985_s3 + $0xd8] sm:$0xff] }
  0x71   :  { %7957 = vmatprep.subr.mxu0 %v10108_v59  ;;  %7962 = vmatprep.subr.mxu1 %v10108_v59  ;;  %10134 = vst [vmem:[#allocation63_spill] sm:$0xff] %v9118_v35  ;;  %10135 = vst [vmem:[#allocation64_spill] sm:$0xff] %v9123_v34 }
  0x72   :  { %7958 = vmatpush3.msra.mxu0 %v9086_v32  ;;  %7963 = vmatpush3.msra.mxu1 %v9091_v33  ;;  %v9134_v33 = vld [vmem:[%s9986_s1 + $0x34] sm:$0x3]  ;;  %v9139_v32 = vld [vmem:[%s9986_s1 + $0x36] sm:$0x3] }
  0x73   :  { %7959 = vmatprep.mubr.msk.f32.mxu0 %vm8160_vm1, %v10108_v59  ;;  %7964 = vmatprep.mubr.msk.f32.mxu1 %vm8160_vm1, %v10108_v59  ;;  %10136 = vst [vmem:[#allocation65_spill] sm:$0xff] %v9134_v33  ;;  %10137 = vst [vmem:[#allocation66_spill] sm:$0xff] %v9139_v32 }
  0x74   :  { %7960 = vmatmul.mubr.msk.f32.vlgmr.msra.gmra.mxu0 %vm147_vm0, %v9102_v30  ;;  %7965 = vmatmul.mubr.msk.f32.vlgmr.msra.gmra.mxu1 %vm147_vm0, %v9107_v31  ;;  %v9150_v31 = vld [vmem:[%s9985_s3 + $0xe0] sm:$0xff]  ;;  %v9155_v30 = vld [vmem:[%s9985_s3 + $0xe8] sm:$0xff] }
  0x75   :  { %7967 = vmatprep.subr.mxu0 %v10108_v59  ;;  %7972 = vmatprep.subr.mxu1 %v10108_v59  ;;  %10138 = vst [vmem:[#allocation67_spill] sm:$0xff] %v9150_v31  ;;  %10139 = vst [vmem:[#allocation68_spill] sm:$0xff] %v9155_v30 }
  0x76   :  { %7968 = vmatpush3.msra.mxu0 %v9118_v35  ;;  %7973 = vmatpush3.msra.mxu1 %v9123_v34  ;;  %v9166_v34 = vld [vmem:[%s9986_s1 + $0x38] sm:$0x3]  ;;  %v9171_v35 = vld [vmem:[%s9986_s1 + $0x3a] sm:$0x3] }
  0x77   :  { %7969 = vmatprep.mubr.msk.f32.mxu0 %vm8160_vm1, %v10108_v59  ;;  %7974 = vmatprep.mubr.msk.f32.mxu1 %vm8160_vm1, %v10108_v59  ;;  %10140 = vst [vmem:[#allocation69_spill] sm:$0xff] %v9166_v34  ;;  %10141 = vst [vmem:[#allocation70_spill] sm:$0xff] %v9171_v35 }
  0x78   :  { %7970 = vmatmul.mubr.msk.f32.vlgmr.msra.gmra.mxu0 %vm147_vm0, %v9134_v33  ;;  %7975 = vmatmul.mubr.msk.f32.vlgmr.msra.gmra.mxu1 %vm147_vm0, %v9139_v32  ;;  %v9182_v32 = vld [vmem:[%s9985_s3 + $0xf0] sm:$0xff]  ;;  %v9187_v33 = vld [vmem:[%s9985_s3 + $0xf8] sm:$0xff] }
  0x79   :  { %7977 = vmatprep.subr.mxu0 %v10108_v59  ;;  %7982 = vmatprep.subr.mxu1 %v10108_v59 }
  0x7a   :  { %7978 = vmatpush3.msra.mxu0 %v9150_v31  ;;  %7983 = vmatpush3.msra.mxu1 %v9155_v30  ;;  %v9198_v30 = vld [vmem:[%s9986_s1 + $0x3c] sm:$0x3]  ;;  %v9203_v31 = vld [vmem:[%s9986_s1 + $0x3e] sm:$0x3] }
  0x7b   :  { %7979 = vmatprep.mubr.msk.f32.mxu0 %vm8160_vm1, %v10108_v59  ;;  %7984 = vmatprep.mubr.msk.f32.mxu1 %vm8160_vm1, %v10108_v59 }
  0x7c   :  { %7980 = vmatmul.mubr.msk.f32.vlgmr.msra.gmra.mxu0 %vm147_vm0, %v9166_v34  ;;  %7985 = vmatmul.mubr.msk.f32.vlgmr.msra.gmra.mxu1 %vm147_vm0, %v9171_v35  ;;  %v4852_v34 = vadd.f32 %v8698_v60, %v8196_v1  ;;  %v4853_v35 = vadd.f32 %v8703_v0, %v8201_v2  ;;  %v4854_v0 = vadd.f32 %v8734_v58, %v8222_v5  ;;  %v10163_v60 = vld [vmem:[#allocation12_spill] sm:$0xff] }
  0x7d   :  { %7987 = vmatprep.subr.mxu0 %v10108_v59  ;;  %7992 = vmatprep.subr.mxu1 %v10108_v59  ;;  %v4855_v1 = vadd.f32 %v8739_v63, %v8231_v6  ;;  %v4822_v2 = vadd.f32 %v8750_v57, %v8238_v7  ;;  %v4857_v5 = vadd.f32 %v8771_v54, %v8259_v10  ;;  %v10160_v54 = vld [vmem:[#allocation47_spill] sm:$0xff]  ;;  %v10162_v57 = vld [vmem:[#allocation48_spill] sm:$0xff]  ;;  %v10165_v63 = vld [vmem:[#allocation13_spill] sm:$0xff] }
  0x7e   :  { %7988 = vmatpush3.msra.mxu0 %v9182_v32  ;;  %7993 = vmatpush3.msra.mxu1 %v9187_v33  ;;  %v4824_v6 = vadd.f32 %v8782_v53, %v8270_v11  ;;  %v4825_v7 = vadd.f32 %v8787_v52, %v8275_v12  ;;  %v4826_v10 = vadd.f32 %v8814_v49, %v8302_v15  ;;  %v10159_v53 = vld [vmem:[#allocation10_spill] sm:$0xff] }
  0x7f   :  { %7989 = vmatprep.mubr.msk.f32.mxu0 %vm8160_vm1, %v10108_v59  ;;  %7994 = vmatprep.mubr.msk.f32.mxu1 %vm8160_vm1, %v10108_v59  ;;  %v4827_v11 = vadd.f32 %v8819_v48, %v8307_v16  ;;  %v4860_v12 = vadd.f32 %v8830_v47, %v8318_v17  ;;  %v4829_v15 = vadd.f32 %v8851_v44, %v8339_v20  ;;  %v10153_v44 = vld [vmem:[#allocation7_spill] sm:$0xff]  ;;  %v10155_v47 = vld [vmem:[#allocation8_spill] sm:$0xff]  ;;  %v10156_v48 = vld [vmem:[#allocation45_spill] sm:$0xff] }
  0x80   :  { %7990 = vmatmul.mubr.msk.f32.vlgmr.msra.gmra.mxu0 %vm147_vm0, %v9198_v30  ;;  %7995 = vmatmul.mubr.msk.f32.vlgmr.msra.gmra.mxu1 %vm147_vm0, %v9203_v31  ;;  %v4862_v16 = vadd.f32 %v8862_v43, %v8350_v21  ;;  %v4863_v17 = vadd.f32 %v8867_v42, %v8355_v22  ;;  %v4864_v20 = vadd.f32 %v8894_v39, %v8382_v25  ;;  %v10143_v25 = vld [vmem:[#allocation2_spill] sm:$0xff]  ;;  %v10152_v42 = vld [vmem:[#allocation43_spill] sm:$0xff] }
  0x81   :  { %7997 = vmatprep.subr.mxu0 %v10108_v59  ;;  %8002 = vmatprep.subr.mxu1 %v10108_v59  ;;  %v4865_v21 = vadd.f32 %v8899_v38, %v8387_v26  ;;  %v4832_v22 = vadd.f32 %v8910_v37, %v8398_v27  ;;  %v10144_v26 = vld [vmem:[#allocation39_spill] sm:$0xff]  ;;  %v10147_v27 = vld [vmem:[#allocation4_spill] sm:$0xff]  ;;  %v10149_v38 = vld [vmem:[#allocation5_spill] sm:$0xff]  ;;  %v4868_v43 = vadd.f32 %v10152_v42, %v10151_v41 }
  0x82   :  { %7998 = vmatpush3.msra.mxu0 %v4852_v34  ;;  %8003 = vmatpush3.msra.mxu1 %v4853_v35  ;;  %v10145_v34 = vld [vmem:[#allocation3_spill] sm:$0xff]  ;;  %v10146_v35 = vld [vmem:[#allocation40_spill] sm:$0xff]  ;;  %v4834_v37 = vadd.f32 %v10148_v28, %v10147_v27  ;;  %v10150_v39 = vld [vmem:[#allocation42_spill] sm:$0xff]  ;;  %v4869_v46 = vadd.f32 %v10154_v45, %v10153_v44  ;;  %v4836_v49 = vadd.f32 %v10156_v48, %v10155_v47 }
  0x83   :  { %7999 = vmatprep.mubr.msk.f32.mxu0 %vm8160_vm1, %v10108_v59  ;;  %8004 = vmatprep.mubr.msk.f32.mxu1 %vm8160_vm1, %v10108_v59  ;;  %v4835_v40 = vadd.f32 %v10150_v39, %v10149_v38  ;;  %v4837_v52 = vadd.f32 %v10158_v51, %v10157_v50  ;;  %v4870_v55 = vadd.f32 %v10160_v54, %v10159_v53  ;;  %v10187_v28 = vld [vmem:[#allocation24_spill] sm:$0xff]  ;;  %v10189_v39 = vld [vmem:[#allocation25_spill] sm:$0xff]  ;;  %v10191_v42 = vld [vmem:[#allocation26_spill] sm:$0xff] }
  0x84   :  { %8000 = vmatmul.mubr.msk.f32.vlgmr.msra.gmra.mxu0 %vm147_vm0, %v4820_v29  ;;  %8005 = vmatmul.mubr.msk.f32.vlgmr.msra.gmra.mxu1 %vm147_vm0, %v4821_v36  ;;  %v4866_v29 = vadd.f32 %v10144_v26, %v10143_v25  ;;  %v4867_v36 = vadd.f32 %v10146_v35, %v10145_v34  ;;  %v4871_v58 = vadd.f32 %v10162_v57, %v10161_v56  ;;  %v10183_v26 = vld [vmem:[#allocation22_spill] sm:$0xff]  ;;  %v10185_v35 = vld [vmem:[#allocation23_spill] sm:$0xff]  ;;  %v10195_v48 = vld [vmem:[#allocation28_spill] sm:$0xff] }
  0x85   :  { %8007 = vmatprep.subr.mxu0 %v10108_v59  ;;  %8012 = vmatprep.subr.mxu1 %v10108_v59  ;;  %v4838_v62 = vadd.f32 %v10164_v61, %v10163_v60  ;;  %v10193_v45 = vld [vmem:[#allocation27_spill] sm:$0xff]  ;;  %v10197_v51 = vld [vmem:[#allocation29_spill] sm:$0xff]  ;;  %v10199_v54 = vld [vmem:[#allocation30_spill] sm:$0xff] }
  0x86   :  { %8008 = vmatpush3.msra.mxu0 %v4854_v0  ;;  %8013 = vmatpush3.msra.mxu1 %v4855_v1  ;;  %v10166_v0 = vld [vmem:[#allocation50_spill] sm:$0xff]  ;;  %v10201_v57 = vld [vmem:[#allocation31_spill] sm:$0xff]  ;;  %v10203_v61 = vld [vmem:[#allocation32_spill] sm:$0xff] }
  0x87   :  { %8009 = vmatprep.mubr.msk.f32.mxu0 %vm8160_vm1, %v10108_v59  ;;  %8014 = vmatprep.mubr.msk.f32.mxu1 %vm8160_vm1, %v10108_v59  ;;  %v4839_v1 = vadd.f32 %v10166_v0, %v10165_v63  ;;  %v10205_v0 = vld [vmem:[#allocation33_spill] sm:$0xff] }
  0x88   :  { %8010 = vmatmul.mubr.msk.f32.vlgmr.msra.gmra.mxu0 %vm147_vm0, %v4822_v2  ;;  %8015 = vmatmul.mubr.msk.f32.vlgmr.msra.gmra.mxu1 %vm147_vm0, %v4823_v3  ;;  %v10167_v2 = vld [vmem:[#allocation14_spill] sm:$0xff]  ;;  %v10168_v3 = vld [vmem:[#allocation51_spill] sm:$0xff] }
  0x89   :  { %8017 = vmatprep.subr.mxu0 %v10108_v59  ;;  %8022 = vmatprep.subr.mxu1 %v10108_v59 }
  0x8a   :  { %8018 = vmatpush3.msra.mxu0 %v4856_v4  ;;  %8023 = vmatpush3.msra.mxu1 %v4857_v5  ;;  %v4872_v4 = vadd.f32 %v10168_v3, %v10167_v2  ;;  %v10169_v5 = vld [vmem:[#allocation15_spill] sm:$0xff]  ;;  %v10207_v3 = vld [vmem:[#allocation34_spill] sm:$0xff] }
  0x8b   :  { %8019 = vmatprep.mubr.msk.f32.mxu0 %vm8160_vm1, %v10108_v59  ;;  %8024 = vmatprep.mubr.msk.f32.mxu1 %vm8160_vm1, %v10108_v59 }
  0x8c   :  { %8020 = vmatmul.mubr.msk.f32.vlgmr.msra.gmra.mxu0 %vm147_vm0, %v4824_v6  ;;  %8025 = vmatmul.mubr.msk.f32.vlgmr.msra.gmra.mxu1 %vm147_vm0, %v4825_v7  ;;  %v10170_v6 = vld [vmem:[#allocation52_spill] sm:$0xff] }
  0x8d   :  { %8027 = vmatprep.subr.mxu0 %v10108_v59  ;;  %8032 = vmatprep.subr.mxu1 %v10108_v59  ;;  %v4873_v7 = vadd.f32 %v10170_v6, %v10169_v5  ;;  %v10208_v5 = vld [vmem:[#allocation35_spill] sm:$0xff] }
  0x8e   :  { %8028 = vmatpush3.msra.mxu0 %v4858_v8  ;;  %8033 = vmatpush3.msra.mxu1 %v4859_v9  ;;  %v10171_v8 = vld [vmem:[#allocation16_spill] sm:$0xff]  ;;  %v10172_v9 = vld [vmem:[#allocation53_spill] sm:$0xff]  ;;  %v4883_v6 = vadd.f32 %v9187_v33, %v10208_v5 }
  0x8f   :  { %8029 = vmatprep.mubr.msk.f32.mxu0 %vm8160_vm1, %v10108_v59  ;;  %8034 = vmatprep.mubr.msk.f32.mxu1 %vm8160_vm1, %v10108_v59 }
  0x90   :  { %8030 = vmatmul.mubr.msk.f32.vlgmr.msra.gmra.mxu0 %vm147_vm0, %v4826_v10  ;;  %8035 = vmatmul.mubr.msk.f32.vlgmr.msra.gmra.mxu1 %vm147_vm0, %v4827_v11  ;;  %v4840_v10 = vadd.f32 %v10172_v9, %v10171_v8  ;;  %v10173_v11 = vld [vmem:[#allocation17_spill] sm:$0xff] }
  0x91   :  { %8037 = vmatprep.subr.mxu0 %v10108_v59  ;;  %8042 = vmatprep.subr.mxu1 %v10108_v59  ;;  %v10210_v9 = vld [vmem:[#allocation37_spill] sm:$0xff] }
  0x92   :  { %8038 = vmatpush3.msra.mxu0 %v4860_v12  ;;  %8043 = vmatpush3.msra.mxu1 %v4861_v13  ;;  %v10174_v12 = vld [vmem:[#allocation54_spill] sm:$0xff] }
  0x93   :  { %8039 = vmatprep.mubr.msk.f32.mxu0 %vm8160_vm1, %v10108_v59  ;;  %8044 = vmatprep.mubr.msk.f32.mxu1 %vm8160_vm1, %v10108_v59  ;;  %v4841_v13 = vadd.f32 %v10174_v12, %v10173_v11 }
  0x94   :  { %8040 = vmatmul.mubr.msk.f32.vlgmr.msra.gmra.mxu0 %vm147_vm0, %v4828_v14  ;;  %8045 = vmatmul.mubr.msk.f32.vlgmr.msra.gmra.mxu1 %vm147_vm0, %v4829_v15  ;;  %v10175_v14 = vld [vmem:[#allocation18_spill] sm:$0xff]  ;;  %v10176_v15 = vld [vmem:[#allocation55_spill] sm:$0xff] }
  0x95   :  { %8047 = vmatprep.subr.mxu0 %v10108_v59  ;;  %8052 = vmatprep.subr.mxu1 %v10108_v59 }
  0x96   :  { %8048 = vmatpush3.msra.mxu0 %v4862_v16  ;;  %8053 = vmatpush3.msra.mxu1 %v4863_v17  ;;  %v4874_v16 = vadd.f32 %v10176_v15, %v10175_v14  ;;  %v10177_v17 = vld [vmem:[#allocation19_spill] sm:$0xff] }
  0x97   :  { %8049 = vmatprep.mubr.msk.f32.mxu0 %vm8160_vm1, %v10108_v59  ;;  %8054 = vmatprep.mubr.msk.f32.mxu1 %vm8160_vm1, %v10108_v59 }
  0x98   :  { %8050 = vmatmul.mubr.msk.f32.vlgmr.msra.gmra.mxu0 %vm147_vm0, %v4830_v18  ;;  %8055 = vmatmul.mubr.msk.f32.vlgmr.msra.gmra.mxu1 %vm147_vm0, %v4831_v19  ;;  %v10178_v18 = vld [vmem:[#allocation56_spill] sm:$0xff] }
  0x99   :  { %8057 = vmatprep.subr.mxu0 %v10108_v59  ;;  %8062 = vmatprep.subr.mxu1 %v10108_v59  ;;  %v4875_v19 = vadd.f32 %v10178_v18, %v10177_v17 }
  0x9a   :  { %8058 = vmatpush3.msra.mxu0 %v4864_v20  ;;  %8063 = vmatpush3.msra.mxu1 %v4865_v21  ;;  %v10179_v20 = vld [vmem:[#allocation20_spill] sm:$0xff]  ;;  %v10180_v21 = vld [vmem:[#allocation57_spill] sm:$0xff] }
  0x9b   :  { %8059 = vmatprep.mubr.msk.f32.mxu0 %vm8160_vm1, %v10108_v59  ;;  %8064 = vmatprep.mubr.msk.f32.mxu1 %vm8160_vm1, %v10108_v59 }
  0x9c   :  { %8060 = vmatmul.mubr.msk.f32.vlgmr.msra.gmra.mxu0 %vm147_vm0, %v4832_v22  ;;  %8065 = vmatmul.mubr.msk.f32.vlgmr.msra.gmra.mxu1 %vm147_vm0, %v4833_v24  ;;  %v4842_v22 = vadd.f32 %v10180_v21, %v10179_v20  ;;  %v10182_v24 = vld [vmem:[#allocation58_spill] sm:$0xff] }
  0x9d   :  { %8067 = vmatprep.subr.mxu0 %v10108_v59  ;;  %8072 = vmatprep.subr.mxu1 %v10108_v59  ;;  %v4843_v25 = vadd.f32 %v10182_v24, %v10181_v23 }
  0x9e   :  { %8068 = vmatpush3.msra.mxu0 %v4866_v29  ;;  %8073 = vmatpush3.msra.mxu1 %v4867_v36  ;;  %v10184_v29 = vld [vmem:[#allocation59_spill] sm:$0xff]  ;;  %v10186_v36 = vld [vmem:[#allocation60_spill] sm:$0xff] }
  0x9f   :  { %8069 = vmatprep.mubr.msk.f32.mxu0 %vm8160_vm1, %v10108_v59  ;;  %8074 = vmatprep.mubr.msk.f32.mxu1 %vm8160_vm1, %v10108_v59  ;;  %v4876_v34 = vadd.f32 %v10184_v29, %v10183_v26  ;;  %v4877_v27 = vadd.f32 %v10186_v36, %v10185_v35 }
  0xa0   :  { %8070 = vmatmul.mubr.msk.f32.vlgmr.msra.gmra.mxu0 %vm147_vm0, %v4834_v37  ;;  %8075 = vmatmul.mubr.msk.f32.vlgmr.msra.gmra.mxu1 %vm147_vm0, %v4835_v40  ;;  %v10188_v37 = vld [vmem:[#allocation61_spill] sm:$0xff]  ;;  %v10190_v40 = vld [vmem:[#allocation62_spill] sm:$0xff] }
  0xa1   :  { %8077 = vmatprep.subr.mxu0 %v10108_v59  ;;  %8082 = vmatprep.subr.mxu1 %v10108_v59  ;;  %v4844_v38 = vadd.f32 %v10188_v37, %v10187_v28  ;;  %v4845_v41 = vadd.f32 %v10190_v40, %v10189_v39 }
  0xa2   :  { %8078 = vmatpush3.msra.mxu0 %v4868_v43  ;;  %8083 = vmatpush3.msra.mxu1 %v4869_v46  ;;  %v10192_v43 = vld [vmem:[#allocation63_spill] sm:$0xff]  ;;  %v10194_v46 = vld [vmem:[#allocation64_spill] sm:$0xff] }
  0xa3   :  { %8079 = vmatprep.mubr.msk.f32.mxu0 %vm8160_vm1, %v10108_v59  ;;  %8084 = vmatprep.mubr.msk.f32.mxu1 %vm8160_vm1, %v10108_v59  ;;  %v4878_v44 = vadd.f32 %v10192_v43, %v10191_v42  ;;  %v4879_v47 = vadd.f32 %v10194_v46, %v10193_v45 }
  0xa4   :  { %8080 = vmatmul.mubr.msk.f32.vlgmr.msra.gmra.mxu0 %vm147_vm0, %v4836_v49  ;;  %8085 = vmatmul.mubr.msk.f32.vlgmr.msra.gmra.mxu1 %vm147_vm0, %v4837_v52  ;;  %v10196_v49 = vld [vmem:[#allocation65_spill] sm:$0xff]  ;;  %v10198_v52 = vld [vmem:[#allocation66_spill] sm:$0xff] }
  0xa5   :  { %8087 = vmatprep.subr.mxu0 %v10108_v59  ;;  %8092 = vmatprep.subr.mxu1 %v10108_v59  ;;  %v4846_v50 = vadd.f32 %v10196_v49, %v10195_v48  ;;  %v4847_v53 = vadd.f32 %v10198_v52, %v10197_v51 }
  0xa6   :  { %8088 = vmatpush3.msra.mxu0 %v4870_v55  ;;  %8093 = vmatpush3.msra.mxu1 %v4871_v58  ;;  %v10200_v55 = vld [vmem:[#allocation67_spill] sm:$0xff]  ;;  %v10202_v58 = vld [vmem:[#allocation68_spill] sm:$0xff] }
  0xa7   :  { %8089 = vmatprep.mubr.msk.f32.mxu0 %vm8160_vm1, %v10108_v59  ;;  %8094 = vmatprep.mubr.msk.f32.mxu1 %vm8160_vm1, %v10108_v59  ;;  %v4880_v56 = vadd.f32 %v10200_v55, %v10199_v54  ;;  %v4881_v60 = vadd.f32 %v10202_v58, %v10201_v57 }
  0xa8   :  { %8090 = vmatmul.mubr.msk.f32.vlgmr.msra.gmra.mxu0 %vm147_vm0, %v4838_v62  ;;  %8095 = vmatmul.mubr.msk.f32.vlgmr.msra.gmra.mxu1 %vm147_vm0, %v4839_v1  ;;  %v10204_v62 = vld [vmem:[#allocation69_spill] sm:$0xff]  ;;  %v10206_v1 = vld [vmem:[#allocation70_spill] sm:$0xff] }
  0xa9   :  { %8097 = vmatprep.subr.mxu0 %v10108_v59  ;;  %8102 = vmatprep.subr.mxu1 %v10108_v59  ;;  %v4848_v63 = vadd.f32 %v10204_v62, %v10203_v61  ;;  %v4849_v2 = vadd.f32 %v10206_v1, %v10205_v0 }
  0xaa   :  { %8098 = vmatpush3.msra.mxu0 %v4872_v4  ;;  %8103 = vmatpush3.msra.mxu1 %v4873_v7  ;;  %v4882_v4 = vadd.f32 %v9182_v32, %v10207_v3  ;;  %v10209_v7 = vld [vmem:[#allocation36_spill] sm:$0xff] }
  0xab   :  { %8099 = vmatprep.mubr.msk.f32.mxu0 %vm8160_vm1, %v10108_v59  ;;  %8104 = vmatprep.mubr.msk.f32.mxu1 %vm8160_vm1, %v10108_v59  ;;  %v4850_v8 = vadd.f32 %v9198_v30, %v10209_v7 }
  0xac   :  { %8100 = vmatmul.mubr.msk.f32.vlgmr.msra.gmra.mxu0 %vm147_vm0, %v4840_v10  ;;  %8105 = vmatmul.mubr.msk.f32.vlgmr.msra.gmra.mxu1 %vm147_vm0, %v4841_v13  ;;  %v4851_v10 = vadd.f32 %v9203_v31, %v10210_v9 }
  0xad   :  { %8107 = vmatprep.subr.mxu0 %v10108_v59  ;;  %8112 = vmatprep.subr.mxu1 %v10108_v59 }
  0xae   :  { %8108 = vmatpush3.msra.mxu0 %v4874_v16  ;;  %8113 = vmatpush3.msra.mxu1 %v4875_v19 }
  0xaf   :  { %8109 = vmatprep.mubr.msk.f32.mxu0 %vm8160_vm1, %v10108_v59  ;;  %8114 = vmatprep.mubr.msk.f32.mxu1 %vm8160_vm1, %v10108_v59 }
  0xb0   :  { %8110 = vmatmul.mubr.msk.f32.vlgmr.msra.gmra.mxu0 %vm147_vm0, %v4842_v22  ;;  %8115 = vmatmul.mubr.msk.f32.vlgmr.msra.gmra.mxu1 %vm147_vm0, %v4843_v25 }
  0xb1   :  { %8117 = vmatprep.subr.mxu0 %v10108_v59  ;;  %8122 = vmatprep.subr.mxu1 %v10108_v59 }
  0xb2   :  { %8118 = vmatpush3.msra.mxu0 %v4876_v34  ;;  %8123 = vmatpush3.msra.mxu1 %v4877_v27 }
  0xb3   :  { %8119 = vmatprep.mubr.msk.f32.mxu0 %vm8160_vm1, %v10108_v59  ;;  %8124 = vmatprep.mubr.msk.f32.mxu1 %vm8160_vm1, %v10108_v59 }
  0xb4   :  { %8120 = vmatmul.mubr.msk.f32.vlgmr.msra.gmra.mxu0 %vm147_vm0, %v4844_v38  ;;  %8125 = vmatmul.mubr.msk.f32.vlgmr.msra.gmra.mxu1 %vm147_vm0, %v4845_v41 }
  0xb5   :  { %8127 = vmatprep.subr.mxu0 %v10108_v59  ;;  %8132 = vmatprep.subr.mxu1 %v10108_v59 }
  0xb6   :  { %8128 = vmatpush3.msra.mxu0 %v4878_v44  ;;  %8133 = vmatpush3.msra.mxu1 %v4879_v47 }
  0xb7   :  { %8129 = vmatprep.mubr.msk.f32.mxu0 %vm8160_vm1, %v10108_v59  ;;  %8134 = vmatprep.mubr.msk.f32.mxu1 %vm8160_vm1, %v10108_v59 }
  0xb8   :  { %8130 = vmatmul.mubr.msk.f32.vlgmr.msra.gmra.mxu0 %vm147_vm0, %v4846_v50  ;;  %8135 = vmatmul.mubr.msk.f32.vlgmr.msra.gmra.mxu1 %vm147_vm0, %v4847_v53 }
  0xb9   :  { %8137 = vmatprep.subr.mxu0 %v10108_v59  ;;  %8142 = vmatprep.subr.mxu1 %v10108_v59 }
  0xba   :  { %8138 = vmatpush3.msra.mxu0 %v4880_v56  ;;  %8143 = vmatpush3.msra.mxu1 %v4881_v60 }
  0xbb   :  { %8139 = vmatprep.mubr.msk.f32.mxu0 %vm8160_vm1, %v10108_v59  ;;  %8144 = vmatprep.mubr.msk.f32.mxu1 %vm8160_vm1, %v10108_v59 }
  0xbc   :  { %8140 = vmatmul.mubr.msk.f32.vlgmr.msra.gmra.mxu0 %vm147_vm0, %v4848_v63  ;;  %8145 = vmatmul.mubr.msk.f32.vlgmr.msra.gmra.mxu1 %vm147_vm0, %v4849_v2 }
  0xbd   :  { %8147 = vmatprep.subr.mxu0 %v10108_v59  ;;  %8152 = vmatprep.subr.mxu1 %v10108_v59 }
  0xbe   :  { %8148 = vmatpush3.msra.mxu0 %v4882_v4  ;;  %8153 = vmatpush3.msra.mxu1 %v4883_v6 }
  0xbf   :  { %8149 = vmatprep.mubr.msk.f32.mxu0 %vm8160_vm1, %v10108_v59  ;;  %8154 = vmatprep.mubr.msk.f32.mxu1 %vm8160_vm1, %v10108_v59 }
  0xc0   :  { %8150 = vmatmul.mubr.msk.f32.vlgmr.msra.gmra.mxu0 %vm147_vm0, %v4850_v8  ;;  %8155 = vmatmul.mubr.msk.f32.vlgmr.msra.gmra.mxu1 %vm147_vm0, %v4851_v10 }
  0xc4   :  { %v9471_v30 = vpop.f32.mrf.mxu0  ;;  %v9473_v31 = vpop.f32.mrf.mxu1 }
  0xc6   :  { %v7681_v32 = vpop.f32.mrf.mxu0  ;;  %v7686_v33 = vpop.f32.mrf.mxu1 }
  0xc8   :  { %v9475_v11 = vpop.f32.mrf.mxu0  ;;  %v9477_v12 = vpop.f32.mrf.mxu1 }
  0xca   :  { %v7691_v13 = vpop.f32.mrf.mxu0  ;;  %v7696_v14 = vpop.f32.mrf.mxu1 }
  0xcc   :  { %v9479_v15 = vpop.f32.mrf.mxu0  ;;  %v9481_v16 = vpop.f32.mrf.mxu1 }
  0xce   :  { %v7701_v59 = vpop.f32.mrf.mxu0  ;;  %v7706_v17 = vpop.f32.mrf.mxu1 }
  0xd0   :  { %v9483_v18 = vpop.f32.mrf.mxu0  ;;  %v9485_v19 = vpop.f32.mrf.mxu1 }
  0xd2   :  { %v7711_v20 = vpop.f32.mrf.mxu0  ;;  %v7716_v21 = vpop.f32.mrf.mxu1 }
  0xd4   :  { %v9487_v22 = vpop.f32.mrf.mxu0  ;;  %v9489_v23 = vpop.f32.mrf.mxu1 }
  0xd6   :  { %v7721_v24 = vpop.f32.mrf.mxu0  ;;  %v7726_v25 = vpop.f32.mrf.mxu1 }
  0xd8   :  { %v9491_v26 = vpop.f32.mrf.mxu0  ;;  %v9493_v29 = vpop.f32.mrf.mxu1 }
  0xda   :  { %v7731_v34 = vpop.f32.mrf.mxu0  ;;  %v7736_v35 = vpop.f32.mrf.mxu1 }
  0xdc   :  { %v9495_v36 = vpop.f32.mrf.mxu0  ;;  %v9497_v27 = vpop.f32.mrf.mxu1 }
  0xde   :  { %v7741_v28 = vpop.f32.mrf.mxu0  ;;  %v7746_v37 = vpop.f32.mrf.mxu1 }
  0xe0   :  { %v9499_v38 = vpop.f32.mrf.mxu0  ;;  %v9501_v39 = vpop.f32.mrf.mxu1 }
  0xe2   :  { %v7751_v40 = vpop.f32.mrf.mxu0  ;;  %v7756_v41 = vpop.f32.mrf.mxu1 }
  0xe4   :  { %v9503_v42 = vpop.f32.mrf.mxu0  ;;  %v9505_v43 = vpop.f32.mrf.mxu1 }
  0xe6   :  { %v7761_v44 = vpop.f32.mrf.mxu0  ;;  %v7766_v45 = vpop.f32.mrf.mxu1 }
  0xe8   :  { %v9507_v46 = vpop.f32.mrf.mxu0  ;;  %v9509_v47 = vpop.f32.mrf.mxu1 }
  0xea   :  { %v7771_v48 = vpop.f32.mrf.mxu0  ;;  %v7776_v49 = vpop.f32.mrf.mxu1 }
  0xec   :  { %v9511_v50 = vpop.f32.mrf.mxu0  ;;  %v9513_v51 = vpop.f32.mrf.mxu1 }
  0xee   :  { %v7781_v52 = vpop.f32.mrf.mxu0  ;;  %v7786_v53 = vpop.f32.mrf.mxu1 }
  0xf0   :  { %v9515_v54 = vpop.f32.mrf.mxu0  ;;  %v9517_v55 = vpop.f32.mrf.mxu1 }
  0xf2   :  { %v7791_v56 = vpop.f32.mrf.mxu0  ;;  %v7796_v57 = vpop.f32.mrf.mxu1 }
  0xf4   :  { %v9519_v58 = vpop.f32.mrf.mxu0  ;;  %v9521_v60 = vpop.f32.mrf.mxu1 }
  0xf6   :  { %v7801_v61 = vpop.f32.mrf.mxu0  ;;  %v7806_v62 = vpop.f32.mrf.mxu1 }
  0xf8   :  { %v9523_v63 = vpop.f32.mrf.mxu0  ;;  %v9525_v0 = vpop.f32.mrf.mxu1 }
  0xfa   :  { %v7811_v1 = vpop.f32.mrf.mxu0  ;;  %v7816_v2 = vpop.f32.mrf.mxu1 }
  0xfc   :  { %v9527_v3 = vpop.f32.mrf.mxu0  ;;  %v9529_v4 = vpop.f32.mrf.mxu1 }
  0xfd   :  { %10211 = vst [vmem:[#allocation38_spill] sm:$0xff] %v9527_v3  ;;  %10212 = vst [vmem:[#allocation2_spill] sm:$0xff] %v9529_v4 }
  0xfe   :  { %v7821_v5 = vpop.f32.mrf.mxu0  ;;  %v7826_v6 = vpop.f32.mrf.mxu1 }
 0x100   :  { %v9531_v7 = vpop.f32.mrf.mxu0  ;;  %v9533_v8 = vpop.f32.mrf.mxu1 }
 0x101   :  { %10213 = vst [vmem:[#allocation39_spill] sm:$0xff] %v9531_v7  ;;  %10214 = vst [vmem:[#allocation3_spill] sm:$0xff] %v9533_v8 }
 0x102   :  { %v7831_v9 = vpop.f32.mrf.mxu0  ;;  %v7836_v10 = vpop.f32.mrf.mxu1 }
 0x104   :  { %v9535_v32 = vpop.f32.mrf.mxu0  ;;  %v9537_v33 = vpop.f32.mrf.mxu1 }
 0x105   :  { %v7220_v13 = vsub.f32 %v9471_v30, %v9535_v32  ;;  %v7221_v14 = vsub.f32 %v9473_v31, %v9537_v33 }
 0x106   :  { %v7841_v59 = vpop.f32.mrf.mxu0  ;;  %v7846_v17 = vpop.f32.mrf.mxu1 }
 0x107   :  { %7253 = vst.msk [vmem:[%s9987_s4] sm:$0x3] %vm7252_vm2, %v7220_v13  ;;  %7254 = vst.msk [vmem:[%s9987_s4 + $0x2] sm:$0x3] %vm7252_vm2, %v7221_v14 }
 0x108   :  { %v9551_v20 = vpop.f32.mrf.mxu0  ;;  %v9553_v21 = vpop.f32.mrf.mxu1 }
 0x109   :  { %v7222_v24 = vsub.f32 %v9475_v11, %v9551_v20  ;;  %v7223_v25 = vsub.f32 %v9477_v12, %v9553_v21 }
 0x10a   :  { %v7851_v34 = vpop.f32.mrf.mxu0  ;;  %v7856_v35 = vpop.f32.mrf.mxu1 }
 0x10b   :  { %7255 = vst.msk [vmem:[%s9987_s4 + $0x4] sm:$0x3] %vm7252_vm2, %v7222_v24  ;;  %7256 = vst.msk [vmem:[%s9987_s4 + $0x6] sm:$0x3] %vm7252_vm2, %v7223_v25 }
 0x10c   :  { %v9567_v28 = vpop.f32.mrf.mxu0  ;;  %v9569_v37 = vpop.f32.mrf.mxu1 }
 0x10d   :  { %v7224_v40 = vsub.f32 %v9479_v15, %v9567_v28  ;;  %v7225_v41 = vsub.f32 %v9481_v16, %v9569_v37 }
 0x10e   :  { %v7861_v44 = vpop.f32.mrf.mxu0  ;;  %v7866_v45 = vpop.f32.mrf.mxu1 }
 0x10f   :  { %7257 = vst.msk [vmem:[%s9987_s4 + $0x8] sm:$0x3] %vm7252_vm2, %v7224_v40  ;;  %7258 = vst.msk [vmem:[%s9987_s4 + $0xa] sm:$0x3] %vm7252_vm2, %v7225_v41 }
 0x110   :  { %v9583_v48 = vpop.f32.mrf.mxu0  ;;  %v9585_v49 = vpop.f32.mrf.mxu1 }
 0x111   :  { %v7226_v52 = vsub.f32 %v9483_v18, %v9583_v48  ;;  %v7227_v53 = vsub.f32 %v9485_v19, %v9585_v49 }
 0x112   :  { %v7871_v56 = vpop.f32.mrf.mxu0  ;;  %v7876_v57 = vpop.f32.mrf.mxu1 }
 0x113   :  { %7259 = vst.msk [vmem:[%s9987_s4 + $0xc] sm:$0x3] %vm7252_vm2, %v7226_v52  ;;  %7260 = vst.msk [vmem:[%s9987_s4 + $0xe] sm:$0x3] %vm7252_vm2, %v7227_v53 }
 0x114   :  { %v9599_v61 = vpop.f32.mrf.mxu0  ;;  %v9601_v62 = vpop.f32.mrf.mxu1 }
 0x115   :  { %v7228_v1 = vsub.f32 %v9487_v22, %v9599_v61  ;;  %v7229_v2 = vsub.f32 %v9489_v23, %v9601_v62 }
 0x116   :  { %v7881_v5 = vpop.f32.mrf.mxu0  ;;  %v7886_v6 = vpop.f32.mrf.mxu1 }
 0x117   :  { %7261 = vst.msk [vmem:[%s9987_s4 + $0x10] sm:$0x3] %vm7252_vm2, %v7228_v1  ;;  %7262 = vst.msk [vmem:[%s9987_s4 + $0x12] sm:$0x3] %vm7252_vm2, %v7229_v2 }
 0x118   :  { %v9615_v9 = vpop.f32.mrf.mxu0  ;;  %v9617_v10 = vpop.f32.mrf.mxu1 }
 0x119   :  { %v7230_v13 = vsub.f32 %v9491_v26, %v9615_v9  ;;  %v7231_v14 = vsub.f32 %v9493_v29, %v9617_v10 }
 0x11a   :  { %v7891_v59 = vpop.f32.mrf.mxu0  ;;  %v7896_v17 = vpop.f32.mrf.mxu1 }
 0x11b   :  { %7263 = vst.msk [vmem:[%s9987_s4 + $0x14] sm:$0x3] %vm7252_vm2, %v7230_v13  ;;  %7264 = vst.msk [vmem:[%s9987_s4 + $0x16] sm:$0x3] %vm7252_vm2, %v7231_v14 }
 0x11c   :  { %v9631_v24 = vpop.f32.mrf.mxu0  ;;  %v9633_v25 = vpop.f32.mrf.mxu1 }
 0x11d   :  { %v7232_v34 = vsub.f32 %v9495_v36, %v9631_v24  ;;  %v7233_v35 = vsub.f32 %v9497_v27, %v9633_v25 }
 0x11e   :  { %v7901_v40 = vpop.f32.mrf.mxu0  ;;  %v7906_v41 = vpop.f32.mrf.mxu1 }
 0x11f   :  { %7265 = vst.msk [vmem:[%s9987_s4 + $0x18] sm:$0x3] %vm7252_vm2, %v7232_v34  ;;  %7266 = vst.msk [vmem:[%s9987_s4 + $0x1a] sm:$0x3] %vm7252_vm2, %v7233_v35 }
 0x120   :  { %v9647_v44 = vpop.f32.mrf.mxu0  ;;  %v9649_v45 = vpop.f32.mrf.mxu1 }
 0x121   :  { %v7234_v52 = vsub.f32 %v9499_v38, %v9647_v44  ;;  %v7235_v53 = vsub.f32 %v9501_v39, %v9649_v45 }
 0x122   :  { %v7911_v56 = vpop.f32.mrf.mxu0  ;;  %v7916_v57 = vpop.f32.mrf.mxu1 }
 0x123   :  { %7267 = vst.msk [vmem:[%s9987_s4 + $0x1c] sm:$0x3] %vm7252_vm2, %v7234_v52  ;;  %7268 = vst.msk [vmem:[%s9987_s4 + $0x1e] sm:$0x3] %vm7252_vm2, %v7235_v53 }
 0x124   :  { %v9663_v1 = vpop.f32.mrf.mxu0  ;;  %v9665_v2 = vpop.f32.mrf.mxu1 }
 0x125   :  { %v7236_v5 = vsub.f32 %v9503_v42, %v9663_v1  ;;  %v7237_v6 = vsub.f32 %v9505_v43, %v9665_v2 }
 0x126   :  { %v7921_v13 = vpop.f32.mrf.mxu0  ;;  %v7926_v14 = vpop.f32.mrf.mxu1 }
 0x127   :  { %7269 = vst.msk [vmem:[%s9987_s4 + $0x20] sm:$0x3] %vm7252_vm2, %v7236_v5  ;;  %7270 = vst.msk [vmem:[%s9987_s4 + $0x22] sm:$0x3] %vm7252_vm2, %v7237_v6 }
 0x128   :  { %v9679_v59 = vpop.f32.mrf.mxu0  ;;  %v9681_v17 = vpop.f32.mrf.mxu1 }
 0x129   :  { %v7238_v34 = vsub.f32 %v9507_v46, %v9679_v59  ;;  %v7239_v35 = vsub.f32 %v9509_v47, %v9681_v17 }
 0x12a   :  { %v7931_v40 = vpop.f32.mrf.mxu0  ;;  %v7936_v41 = vpop.f32.mrf.mxu1 }
 0x12b   :  { %7271 = vst.msk [vmem:[%s9987_s4 + $0x24] sm:$0x3] %vm7252_vm2, %v7238_v34  ;;  %7272 = vst.msk [vmem:[%s9987_s4 + $0x26] sm:$0x3] %vm7252_vm2, %v7239_v35 }
 0x12c   :  { %v9695_v52 = vpop.f32.mrf.mxu0  ;;  %v9697_v53 = vpop.f32.mrf.mxu1 }
 0x12d   :  { %v7240_v56 = vsub.f32 %v9511_v50, %v9695_v52  ;;  %v7241_v57 = vsub.f32 %v9513_v51, %v9697_v53 }
 0x12e   :  { %v7941_v5 = vpop.f32.mrf.mxu0  ;;  %v7946_v6 = vpop.f32.mrf.mxu1 }
 0x12f   :  { %7273 = vst.msk [vmem:[%s9987_s4 + $0x28] sm:$0x3] %vm7252_vm2, %v7240_v56  ;;  %7274 = vst.msk [vmem:[%s9987_s4 + $0x2a] sm:$0x3] %vm7252_vm2, %v7241_v57 }
 0x130   :  { %v9711_v13 = vpop.f32.mrf.mxu0  ;;  %v9713_v14 = vpop.f32.mrf.mxu1 }
 0x131   :  { %v7242_v34 = vsub.f32 %v9515_v54, %v9711_v13  ;;  %v7243_v35 = vsub.f32 %v9517_v55, %v9713_v14 }
 0x132   :  { %v7951_v40 = vpop.f32.mrf.mxu0  ;;  %v7956_v41 = vpop.f32.mrf.mxu1 }
 0x133   :  { %7275 = vst.msk [vmem:[%s9987_s4 + $0x2c] sm:$0x3] %vm7252_vm2, %v7242_v34  ;;  %7276 = vst.msk [vmem:[%s9987_s4 + $0x2e] sm:$0x3] %vm7252_vm2, %v7243_v35 }
 0x134   :  { %v9727_v56 = vpop.f32.mrf.mxu0  ;;  %v9729_v57 = vpop.f32.mrf.mxu1 }
 0x135   :  { %10215 = vst [vmem:[#allocation40_spill] sm:$0xff] %v9727_v56  ;;  %10216 = vst [vmem:[#allocation4_spill] sm:$0xff] %v9729_v57  ;;  %v7244_v5 = vsub.f32 %v9519_v58, %v9727_v56  ;;  %v7245_v6 = vsub.f32 %v9521_v60, %v9729_v57 }
 0x136   :  { %v7961_v40 = vpop.f32.mrf.mxu0  ;;  %v7966_v41 = vpop.f32.mrf.mxu1 }
 0x137   :  { %7277 = vst.msk [vmem:[%s9987_s4 + $0x30] sm:$0x3] %vm7252_vm2, %v7244_v5  ;;  %7278 = vst.msk [vmem:[%s9987_s4 + $0x32] sm:$0x3] %vm7252_vm2, %v7245_v6 }
 0x138   :  { %v9743_v34 = vpop.f32.mrf.mxu0  ;;  %v9745_v35 = vpop.f32.mrf.mxu1 }
 0x139   :  { %10217 = vst [vmem:[#allocation41_spill] sm:$0xff] %v9743_v34  ;;  %10218 = vst [vmem:[#allocation5_spill] sm:$0xff] %v9745_v35  ;;  %v7246_v56 = vsub.f32 %v9523_v63, %v9743_v34  ;;  %v7247_v40 = vsub.f32 %v9525_v0, %v9745_v35 }
 0x13a   :  { %v7971_v41 = vpop.f32.mrf.mxu0  ;;  %v7976_v57 = vpop.f32.mrf.mxu1 }
 0x13b   :  { %7279 = vst.msk [vmem:[%s9987_s4 + $0x34] sm:$0x3] %vm7252_vm2, %v7246_v56  ;;  %7280 = vst.msk [vmem:[%s9987_s4 + $0x36] sm:$0x3] %vm7252_vm2, %v7247_v40 }
 0x13c   :  { %v9759_v5 = vpop.f32.mrf.mxu0  ;;  %v9761_v6 = vpop.f32.mrf.mxu1 }
 0x13d   :  { %10219 = vst [vmem:[#allocation42_spill] sm:$0xff] %v9759_v5  ;;  %10220 = vst [vmem:[#allocation6_spill] sm:$0xff] %v9761_v6  ;;  %v7248_v34 = vsub.f32 %v9527_v3, %v9759_v5  ;;  %v7249_v57 = vsub.f32 %v9529_v4, %v9761_v6 }
 0x13e   :  { %v7981_v41 = vpop.f32.mrf.mxu0  ;;  %v7986_v35 = vpop.f32.mrf.mxu1 }
 0x13f   :  { %7281 = vst.msk [vmem:[%s9987_s4 + $0x38] sm:$0x3] %vm7252_vm2, %v7248_v34  ;;  %7282 = vst.msk [vmem:[%s9987_s4 + $0x3a] sm:$0x3] %vm7252_vm2, %v7249_v57 }
 0x140   :  { %v9775_v56 = vpop.f32.mrf.mxu0  ;;  %v9777_v40 = vpop.f32.mrf.mxu1 }
 0x141   :  { %10221 = vst [vmem:[#allocation43_spill] sm:$0xff] %v9775_v56  ;;  %10222 = vst [vmem:[#allocation7_spill] sm:$0xff] %v9777_v40  ;;  %v7250_v5 = vsub.f32 %v9531_v7, %v9775_v56  ;;  %v7251_v35 = vsub.f32 %v9533_v8, %v9777_v40 }
 0x142   :  { %v7991_v41 = vpop.f32.mrf.mxu0  ;;  %v7996_v6 = vpop.f32.mrf.mxu1 }
 0x143   :  { %7283 = vst.msk [vmem:[%s9987_s4 + $0x3c] sm:$0x3] %vm7252_vm2, %v7250_v5  ;;  %7284 = vst.msk [vmem:[%s9987_s4 + $0x3e] sm:$0x3] %vm7252_vm2, %v7251_v35 }
 0x144   :  { %v4953_v34 = vpop.f32.mrf.mxu0  ;;  %v5026_v57 = vpop.f32.mrf.mxu1 }
 0x145   :  { %v7285_v4 = vsub.f32 %v4953_v34, %v9471_v30  ;;  %v7286_v56 = vsub.f32 %v5026_v57, %v9473_v31 }
 0x146   :  { %v8001_v7 = vpop.f32.mrf.mxu0  ;;  %v8006_v40 = vpop.f32.mrf.mxu1 }
 0x147   :  { %v7317_v6 = vsub.f32 %v7285_v4, %v9535_v32  ;;  %v7318_v41 = vsub.f32 %v7286_v56, %v9537_v33 }
 0x148   :  { %v5099_v8 = vpop.f32.mrf.mxu0  ;;  %v5172_v3 = vpop.f32.mrf.mxu1 }
 0x149   :  { %7349 = vst.msk [vmem:[%s9988_s5] sm:$0x3] %vm7252_vm2, %v7317_v6  ;;  %7350 = vst.msk [vmem:[%s9988_s5 + $0x2] sm:$0x3] %vm7252_vm2, %v7318_v41  ;;  %v7287_v30 = vsub.f32 %v5099_v8, %v9475_v11  ;;  %v7288_v31 = vsub.f32 %v5172_v3, %v9477_v12 }
 0x14a   :  { %v8011_v7 = vpop.f32.mrf.mxu0  ;;  %v8016_v4 = vpop.f32.mrf.mxu1 }
 0x14b   :  { %v7319_v32 = vsub.f32 %v7287_v30, %v9551_v20  ;;  %v7320_v33 = vsub.f32 %v7288_v31, %v9553_v21 }
 0x14c   :  { %v5245_v5 = vpop.f32.mrf.mxu0  ;;  %v5318_v56 = vpop.f32.mrf.mxu1 }
 0x14d   :  { %7351 = vst.msk [vmem:[%s9988_s5 + $0x4] sm:$0x3] %vm7252_vm2, %v7319_v32  ;;  %7352 = vst.msk [vmem:[%s9988_s5 + $0x6] sm:$0x3] %vm7252_vm2, %v7320_v33  ;;  %v7289_v11 = vsub.f32 %v5245_v5, %v9479_v15  ;;  %v7290_v12 = vsub.f32 %v5318_v56, %v9481_v16 }
 0x14e   :  { %v8021_v3 = vpop.f32.mrf.mxu0  ;;  %v8026_v8 = vpop.f32.mrf.mxu1 }
 0x14f   :  { %v7321_v20 = vsub.f32 %v7289_v11, %v9567_v28  ;;  %v7322_v21 = vsub.f32 %v7290_v12, %v9569_v37 }
 0x150   :  { %v5391_v40 = vpop.f32.mrf.mxu0  ;;  %v5464_v35 = vpop.f32.mrf.mxu1 }
 0x151   :  { %7353 = vst.msk [vmem:[%s9988_s5 + $0x8] sm:$0x3] %vm7252_vm2, %v7321_v20  ;;  %7354 = vst.msk [vmem:[%s9988_s5 + $0xa] sm:$0x3] %vm7252_vm2, %v7322_v21  ;;  %v7291_v15 = vsub.f32 %v5391_v40, %v9483_v18  ;;  %v7292_v16 = vsub.f32 %v5464_v35, %v9485_v19 }
 0x152   :  { %v8031_v34 = vpop.f32.mrf.mxu0  ;;  %v8036_v28 = vpop.f32.mrf.mxu1 }
 0x153   :  { %v7323_v37 = vsub.f32 %v7291_v15, %v9583_v48  ;;  %v7324_v57 = vsub.f32 %v7292_v16, %v9585_v49 }
 0x154   :  { %v5537_v6 = vpop.f32.mrf.mxu0  ;;  %v5610_v41 = vpop.f32.mrf.mxu1 }
 0x155   :  { %7355 = vst.msk [vmem:[%s9988_s5 + $0xc] sm:$0x3] %vm7252_vm2, %v7323_v37  ;;  %7356 = vst.msk [vmem:[%s9988_s5 + $0xe] sm:$0x3] %vm7252_vm2, %v7324_v57  ;;  %v7293_v18 = vsub.f32 %v5537_v6, %v9487_v22  ;;  %v7294_v19 = vsub.f32 %v5610_v41, %v9489_v23 }
 0x156   :  { %v8041_v30 = vpop.f32.mrf.mxu0  ;;  %v8046_v48 = vpop.f32.mrf.mxu1 }
 0x157   :  { %v7325_v49 = vsub.f32 %v7293_v18, %v9599_v61  ;;  %v7326_v31 = vsub.f32 %v7294_v19, %v9601_v62 }
 0x158   :  { %v5683_v7 = vpop.f32.mrf.mxu0  ;;  %v5756_v4 = vpop.f32.mrf.mxu1 }
 0x159   :  { %7357 = vst.msk [vmem:[%s9988_s5 + $0x10] sm:$0x3] %vm7252_vm2, %v7325_v49  ;;  %7358 = vst.msk [vmem:[%s9988_s5 + $0x12] sm:$0x3] %vm7252_vm2, %v7326_v31  ;;  %v7295_v22 = vsub.f32 %v5683_v7, %v9491_v26  ;;  %v7296_v23 = vsub.f32 %v5756_v4, %v9493_v29 }
 0x15a   :  { %v8051_v32 = vpop.f32.mrf.mxu0  ;;  %v8056_v61 = vpop.f32.mrf.mxu1 }
 0x15b   :  { %v7327_v62 = vsub.f32 %v7295_v22, %v9615_v9  ;;  %v7328_v33 = vsub.f32 %v7296_v23, %v9617_v10  ;;  %v10223_v23 = vld [vmem:[#allocation40_spill] sm:$0xff] }
 0x15c   :  { %v5829_v5 = vpop.f32.mrf.mxu0  ;;  %v5902_v56 = vpop.f32.mrf.mxu1  ;;  %v10224_v32 = vld [vmem:[#allocation4_spill] sm:$0xff] }
 0x15d   :  { %7359 = vst.msk [vmem:[%s9988_s5 + $0x14] sm:$0x3] %vm7252_vm2, %v7327_v62  ;;  %7360 = vst.msk [vmem:[%s9988_s5 + $0x16] sm:$0x3] %vm7252_vm2, %v7328_v33  ;;  %v7297_v26 = vsub.f32 %v5829_v5, %v9495_v36  ;;  %v7298_v29 = vsub.f32 %v5902_v56, %v9497_v27 }
 0x15e   :  { %v8061_v11 = vpop.f32.mrf.mxu0  ;;  %v8066_v9 = vpop.f32.mrf.mxu1 }
 0x15f   :  { %v7329_v10 = vsub.f32 %v7297_v26, %v9631_v24  ;;  %v7330_v12 = vsub.f32 %v7298_v29, %v9633_v25  ;;  %v10225_v26 = vld [vmem:[#allocation41_spill] sm:$0xff] }
 0x160   :  { %v5975_v3 = vpop.f32.mrf.mxu0  ;;  %v6048_v8 = vpop.f32.mrf.mxu1  ;;  %v10226_v11 = vld [vmem:[#allocation5_spill] sm:$0xff] }
 0x161   :  { %7361 = vst.msk [vmem:[%s9988_s5 + $0x18] sm:$0x3] %vm7252_vm2, %v7329_v10  ;;  %7362 = vst.msk [vmem:[%s9988_s5 + $0x1a] sm:$0x3] %vm7252_vm2, %v7330_v12  ;;  %v7299_v36 = vsub.f32 %v5975_v3, %v9499_v38  ;;  %v7300_v27 = vsub.f32 %v6048_v8, %v9501_v39  ;;  %v10228_v3 = vld [vmem:[#allocation2_spill] sm:$0xff] }
 0x162   :  { %v8071_v20 = vpop.f32.mrf.mxu0  ;;  %v8076_v24 = vpop.f32.mrf.mxu1 }
 0x163   :  { %v7331_v25 = vsub.f32 %v7299_v36, %v9647_v44  ;;  %v7332_v21 = vsub.f32 %v7300_v27, %v9649_v45  ;;  %v10229_v20 = vld [vmem:[#allocation42_spill] sm:$0xff] }
 0x164   :  { %v6121_v40 = vpop.f32.mrf.mxu0  ;;  %v6194_v35 = vpop.f32.mrf.mxu1 }
 0x165   :  { %7363 = vst.msk [vmem:[%s9988_s5 + $0x1c] sm:$0x3] %vm7252_vm2, %v7331_v25  ;;  %7364 = vst.msk [vmem:[%s9988_s5 + $0x1e] sm:$0x3] %vm7252_vm2, %v7332_v21  ;;  %v7301_v38 = vsub.f32 %v6121_v40, %v9503_v42  ;;  %v7302_v39 = vsub.f32 %v6194_v35, %v9505_v43  ;;  %v10230_v25 = vld [vmem:[#allocation6_spill] sm:$0xff] }
 0x166   :  { %v8081_v15 = vpop.f32.mrf.mxu0  ;;  %v8086_v44 = vpop.f32.mrf.mxu1 }
 0x167   :  { %v7333_v45 = vsub.f32 %v7301_v38, %v9663_v1  ;;  %v7334_v16 = vsub.f32 %v7302_v39, %v9665_v2  ;;  %v10231_v38 = vld [vmem:[#allocation39_spill] sm:$0xff] }
 0x168   :  { %v6267_v34 = vpop.f32.mrf.mxu0  ;;  %v6340_v28 = vpop.f32.mrf.mxu1  ;;  %v10232_v15 = vld [vmem:[#allocation3_spill] sm:$0xff] }
 0x169   :  { %7365 = vst.msk [vmem:[%s9988_s5 + $0x20] sm:$0x3] %vm7252_vm2, %v7333_v45  ;;  %7366 = vst.msk [vmem:[%s9988_s5 + $0x22] sm:$0x3] %vm7252_vm2, %v7334_v16  ;;  %v7303_v42 = vsub.f32 %v6267_v34, %v9507_v46  ;;  %v7304_v43 = vsub.f32 %v6340_v28, %v9509_v47  ;;  %v10233_v34 = vld [vmem:[#allocation43_spill] sm:$0xff] }
 0x16a   :  { %v8091_v37 = vpop.f32.mrf.mxu0  ;;  %v8096_v1 = vpop.f32.mrf.mxu1 }
 0x16b   :  { %v7335_v2 = vsub.f32 %v7303_v42, %v9679_v59  ;;  %v7336_v57 = vsub.f32 %v7304_v43, %v9681_v17  ;;  %v10234_v42 = vld [vmem:[#allocation7_spill] sm:$0xff] }
 0x16c   :  { %v6413_v6 = vpop.f32.mrf.mxu0  ;;  %v6486_v41 = vpop.f32.mrf.mxu1 }
 0x16d   :  { %7367 = vst.msk [vmem:[%s9988_s5 + $0x24] sm:$0x3] %vm7252_vm2, %v7335_v2  ;;  %7368 = vst.msk [vmem:[%s9988_s5 + $0x26] sm:$0x3] %vm7252_vm2, %v7336_v57  ;;  %v7305_v46 = vsub.f32 %v6413_v6, %v9511_v50  ;;  %v7306_v47 = vsub.f32 %v6486_v41, %v9513_v51 }
 0x16e   :  { %v8101_v18 = vpop.f32.mrf.mxu0  ;;  %v8106_v59 = vpop.f32.mrf.mxu1 }
 0x16f   :  { %v7337_v17 = vsub.f32 %v7305_v46, %v9695_v52  ;;  %v7338_v19 = vsub.f32 %v7306_v47, %v9697_v53 }
 0x170   :  { %v6559_v30 = vpop.f32.mrf.mxu0  ;;  %v6632_v48 = vpop.f32.mrf.mxu1 }
 0x171   :  { %7369 = vst.msk [vmem:[%s9988_s5 + $0x28] sm:$0x3] %vm7252_vm2, %v7337_v17  ;;  %7370 = vst.msk [vmem:[%s9988_s5 + $0x2a] sm:$0x3] %vm7252_vm2, %v7338_v19  ;;  %v7307_v50 = vsub.f32 %v6559_v30, %v9515_v54  ;;  %v7308_v51 = vsub.f32 %v6632_v48, %v9517_v55 }
 0x172   :  { %v8111_v49 = vpop.f32.mrf.mxu0  ;;  %v8116_v52 = vpop.f32.mrf.mxu1 }
 0x173   :  { %v7339_v53 = vsub.f32 %v7307_v50, %v9711_v13  ;;  %v7340_v31 = vsub.f32 %v7308_v51, %v9713_v14 }
 0x174   :  { %v6705_v7 = vpop.f32.mrf.mxu0  ;;  %v6778_v4 = vpop.f32.mrf.mxu1 }
 0x175   :  { %7371 = vst.msk [vmem:[%s9988_s5 + $0x2c] sm:$0x3] %vm7252_vm2, %v7339_v53  ;;  %7372 = vst.msk [vmem:[%s9988_s5 + $0x2e] sm:$0x3] %vm7252_vm2, %v7340_v31  ;;  %v7309_v54 = vsub.f32 %v6705_v7, %v9519_v58  ;;  %v7310_v55 = vsub.f32 %v6778_v4, %v9521_v60 }
 0x176   :  { %v8121_v22 = vpop.f32.mrf.mxu0  ;;  %v8126_v13 = vpop.f32.mrf.mxu1 }
 0x177   :  { %v7341_v14 = vsub.f32 %v7309_v54, %v10223_v23  ;;  %v7342_v61 = vsub.f32 %v7310_v55, %v10224_v32 }
 0x178   :  { %v6851_v62 = vpop.f32.mrf.mxu0  ;;  %v6924_v33 = vpop.f32.mrf.mxu1 }
 0x179   :  { %7373 = vst.msk [vmem:[%s9988_s5 + $0x30] sm:$0x3] %vm7252_vm2, %v7341_v14  ;;  %7374 = vst.msk [vmem:[%s9988_s5 + $0x32] sm:$0x3] %vm7252_vm2, %v7342_v61  ;;  %v7311_v58 = vsub.f32 %v6851_v62, %v9523_v63  ;;  %v7312_v60 = vsub.f32 %v6924_v33, %v9525_v0  ;;  %v10227_v63 = vld [vmem:[#allocation38_spill] sm:$0xff] }
 0x17a   :  { %v8131_v5 = vpop.f32.mrf.mxu0  ;;  %v8136_v56 = vpop.f32.mrf.mxu1 }
 0x17b   :  { %v7343_v29 = vsub.f32 %v7311_v58, %v10225_v26  ;;  %v7344_v9 = vsub.f32 %v7312_v60, %v10226_v11 }
 0x17c   :  { %v6997_v10 = vpop.f32.mrf.mxu0  ;;  %v7070_v12 = vpop.f32.mrf.mxu1 }
 0x17d   :  { %7375 = vst.msk [vmem:[%s9988_s5 + $0x34] sm:$0x3] %vm7252_vm2, %v7343_v29  ;;  %7376 = vst.msk [vmem:[%s9988_s5 + $0x36] sm:$0x3] %vm7252_vm2, %v7344_v9  ;;  %v7313_v0 = vsub.f32 %v6997_v10, %v10227_v63  ;;  %v7314_v8 = vsub.f32 %v7070_v12, %v10228_v3 }
 0x17e   :  { %v8141_v36 = vpop.f32.mrf.mxu0  ;;  %v8146_v27 = vpop.f32.mrf.mxu1 }
 0x17f   :  { %v7345_v24 = vsub.f32 %v7313_v0, %v10229_v20  ;;  %v7346_v21 = vsub.f32 %v7314_v8, %v10230_v25 }
 0x180   :  { %v7143_v40 = vpop.f32.mrf.mxu0  ;;  %v7216_v35 = vpop.f32.mrf.mxu1 }
 0x181   :  { %7377 = vst.msk [vmem:[%s9988_s5 + $0x38] sm:$0x3] %vm7252_vm2, %v7345_v24  ;;  %7378 = vst.msk [vmem:[%s9988_s5 + $0x3a] sm:$0x3] %vm7252_vm2, %v7346_v21  ;;  %v7315_v39 = vsub.f32 %v7143_v40, %v10231_v38  ;;  %v7316_v44 = vsub.f32 %v7216_v35, %v10232_v15 }
 0x182   :  { %v8151_v45 = vpop.f32.mrf.mxu0  ;;  %v8156_v16 = vpop.f32.mrf.mxu1 }
 0x183   :  { %v7347_v28 = vsub.f32 %v7315_v39, %v10233_v34  ;;  %v7348_v43 = vsub.f32 %v7316_v44, %v10234_v42 }
 0x185   :  { %7379 = vst.msk [vmem:[%s9988_s5 + $0x3c] sm:$0x3] %vm7252_vm2, %v7347_v28  ;;  %7380 = vst.msk [vmem:[%s9988_s5 + $0x3e] sm:$0x3] %vm7252_vm2, %v7348_v43 }

// kernel: closed_call.48
= control target key start
LH: loop header
LB: loop body
LE: loop exit
PB: predicated region body
PF: predicated region fallthrough
CT: control target
= control target key end

     0   :  { %vm89_vm0 = vcmask 64512   ;;  %s1894_s1 = inlined_call_operand.vmem [shape: f32[8,8], index: 1, kind: input, shape index: {}]   ;;  %s1895_s0 = inlined_call_operand.vmem [shape: f32[512,8], index: 0, kind: input, shape index: {}]   ;;  %s1896_s2 = inlined_call_operand.vmem [shape: f32[1,8], index: 2, kind: input, shape index: {}]   ;;  %s1897_s3 = inlined_call_operand.vmem [shape: f32[512,8], index: 3, kind: input, shape index: {}]   ;;  %s1898_s4 = inlined_call_operand.vmem [shape: f32[512,8], index: 4, kind: output, shape index: {}]  }
   0x1   :  { %v81_v0 = vld [vmem:[%s1894_s1] sm:$0xff]  ;;  %v18_v3 = vld [vmem:[%s1895_s0 + $0x8] sm:$0xff]  ;;  %v19_v5 = vld [vmem:[%s1895_s0 + $0x10] sm:$0xff] }
   0x2   :  { %v17_v1 = vld [vmem:[%s1895_s0] sm:$0xff]  ;;  %993 = vmatprep.subr.mxu0 %v81_v0  ;;  %1091 = vmatprep.subr.mxu1 %v81_v0  ;;  %v50_v4 = vld [vmem:[%s1895_s0 + $0x108] sm:$0xff]  ;;  %v51_v6 = vld [vmem:[%s1895_s0 + $0x110] sm:$0xff] }
   0x3   :  { %v49_v2 = vld [vmem:[%s1895_s0 + $0x100] sm:$0xff]  ;;  %994 = vmatpush3.msra.mxu0 %v81_v0  ;;  %1092 = vmatpush3.msra.mxu1 %v81_v0  ;;  %v20_v7 = vld [vmem:[%s1895_s0 + $0x18] sm:$0xff]  ;;  %v22_v11 = vld [vmem:[%s1895_s0 + $0x28] sm:$0xff] }
   0x4   :  { %995 = vmatprep.mubr.msk.f32.mxu0 %vm89_vm0, %v17_v1  ;;  %1043 = vmatprep.mubr.msk.f32.mxu1 %vm89_vm0, %v49_v2  ;;  %v52_v8 = vld [vmem:[%s1895_s0 + $0x118] sm:$0xff]  ;;  %v21_v9 = vld [vmem:[%s1895_s0 + $0x20] sm:$0xff]  ;;  %v54_v12 = vld [vmem:[%s1895_s0 + $0x128] sm:$0xff] }
   0x5   :  { %996 = vmatmul.mubr.msk.f32.vlgmr.msra.gmra.mxu0 %vm89_vm0, %v18_v3  ;;  %1044 = vmatmul.mubr.msk.f32.vlgmr.msra.gmra.mxu1 %vm89_vm0, %v50_v4  ;;  %v53_v10 = vld [vmem:[%s1895_s0 + $0x120] sm:$0xff]  ;;  %v23_v13 = vld [vmem:[%s1895_s0 + $0x30] sm:$0xff]  ;;  %v24_v15 = vld [vmem:[%s1895_s0 + $0x38] sm:$0xff] }
   0x6   :  { %998 = vmatprep.mubr.msk.f32.mxu0 %vm89_vm0, %v19_v5  ;;  %1046 = vmatprep.mubr.msk.f32.mxu1 %vm89_vm0, %v51_v6  ;;  %v55_v14 = vld [vmem:[%s1895_s0 + $0x130] sm:$0xff]  ;;  %v56_v16 = vld [vmem:[%s1895_s0 + $0x138] sm:$0xff]  ;;  %v25_v17 = vld [vmem:[%s1895_s0 + $0x40] sm:$0xff] }
   0x7   :  { %v57_v18 = vld [vmem:[%s1895_s0 + $0x140] sm:$0xff]  ;;  %v26_v19 = vld [vmem:[%s1895_s0 + $0x48] sm:$0xff]  ;;  %v27_v21 = vld [vmem:[%s1895_s0 + $0x50] sm:$0xff] }
   0x8   :  { %v58_v20 = vld [vmem:[%s1895_s0 + $0x148] sm:$0xff]  ;;  %v59_v22 = vld [vmem:[%s1895_s0 + $0x150] sm:$0xff]  ;;  %v28_v23 = vld [vmem:[%s1895_s0 + $0x58] sm:$0xff] }
   0x9   :  { %999 = vmatmul.mubr.msk.f32.gmra.mxu0 %vm89_vm0, %v20_v7  ;;  %1047 = vmatmul.mubr.msk.f32.gmra.mxu1 %vm89_vm0, %v52_v8  ;;  %v60_v24 = vld [vmem:[%s1895_s0 + $0x158] sm:$0xff]  ;;  %v29_v25 = vld [vmem:[%s1895_s0 + $0x60] sm:$0xff]  ;;  %v30_v27 = vld [vmem:[%s1895_s0 + $0x68] sm:$0xff] }
   0xa   :  { %1001 = vmatprep.mubr.msk.f32.mxu0 %vm89_vm0, %v21_v9  ;;  %1049 = vmatprep.mubr.msk.f32.mxu1 %vm89_vm0, %v53_v10  ;;  %v61_v26 = vld [vmem:[%s1895_s0 + $0x160] sm:$0xff]  ;;  %v62_v28 = vld [vmem:[%s1895_s0 + $0x168] sm:$0xff]  ;;  %v31_v29 = vld [vmem:[%s1895_s0 + $0x70] sm:$0xff] }
   0xb   :  { %v63_v30 = vld [vmem:[%s1895_s0 + $0x170] sm:$0xff]  ;;  %v32_v31 = vld [vmem:[%s1895_s0 + $0x78] sm:$0xff]  ;;  %v33_v33 = vld [vmem:[%s1895_s0 + $0x80] sm:$0xff] }
   0xc   :  { %v64_v32 = vld [vmem:[%s1895_s0 + $0x178] sm:$0xff]  ;;  %v65_v34 = vld [vmem:[%s1895_s0 + $0x180] sm:$0xff]  ;;  %v34_v35 = vld [vmem:[%s1895_s0 + $0x88] sm:$0xff] }
   0xd   :  { %1002 = vmatmul.mubr.msk.f32.gmra.mxu0 %vm89_vm0, %v22_v11  ;;  %1050 = vmatmul.mubr.msk.f32.gmra.mxu1 %vm89_vm0, %v54_v12  ;;  %v66_v36 = vld [vmem:[%s1895_s0 + $0x188] sm:$0xff]  ;;  %v35_v37 = vld [vmem:[%s1895_s0 + $0x90] sm:$0xff]  ;;  %v36_v39 = vld [vmem:[%s1895_s0 + $0x98] sm:$0xff] }
   0xe   :  { %1004 = vmatprep.mubr.msk.f32.mxu0 %vm89_vm0, %v23_v13  ;;  %1052 = vmatprep.mubr.msk.f32.mxu1 %vm89_vm0, %v55_v14  ;;  %v67_v38 = vld [vmem:[%s1895_s0 + $0x190] sm:$0xff]  ;;  %v68_v40 = vld [vmem:[%s1895_s0 + $0x198] sm:$0xff]  ;;  %v37_v41 = vld [vmem:[%s1895_s0 + $0xa0] sm:$0xff] }
   0xf   :  { %v69_v42 = vld [vmem:[%s1895_s0 + $0x1a0] sm:$0xff]  ;;  %v38_v43 = vld [vmem:[%s1895_s0 + $0xa8] sm:$0xff]  ;;  %v39_v45 = vld [vmem:[%s1895_s0 + $0xb0] sm:$0xff] }
  0x10   :  { %v70_v44 = vld [vmem:[%s1895_s0 + $0x1a8] sm:$0xff]  ;;  %v71_v46 = vld [vmem:[%s1895_s0 + $0x1b0] sm:$0xff]  ;;  %v40_v47 = vld [vmem:[%s1895_s0 + $0xb8] sm:$0xff] }
  0x11   :  { %1005 = vmatmul.mubr.msk.f32.gmra.mxu0 %vm89_vm0, %v24_v15  ;;  %1053 = vmatmul.mubr.msk.f32.gmra.mxu1 %vm89_vm0, %v56_v16  ;;  %v72_v48 = vld [vmem:[%s1895_s0 + $0x1b8] sm:$0xff]  ;;  %v41_v49 = vld [vmem:[%s1895_s0 + $0xc0] sm:$0xff]  ;;  %v42_v51 = vld [vmem:[%s1895_s0 + $0xc8] sm:$0xff] }
  0x12   :  { %1007 = vmatprep.mubr.msk.f32.mxu0 %vm89_vm0, %v25_v17  ;;  %1055 = vmatprep.mubr.msk.f32.mxu1 %vm89_vm0, %v57_v18  ;;  %v73_v50 = vld [vmem:[%s1895_s0 + $0x1c0] sm:$0xff]  ;;  %v74_v52 = vld [vmem:[%s1895_s0 + $0x1c8] sm:$0xff]  ;;  %v43_v53 = vld [vmem:[%s1895_s0 + $0xd0] sm:$0xff] }
  0x13   :  { %v75_v54 = vld [vmem:[%s1895_s0 + $0x1d0] sm:$0xff]  ;;  %v44_v55 = vld [vmem:[%s1895_s0 + $0xd8] sm:$0xff]  ;;  %v45_v57 = vld [vmem:[%s1895_s0 + $0xe0] sm:$0xff] }
  0x14   :  { %v76_v56 = vld [vmem:[%s1895_s0 + $0x1d8] sm:$0xff]  ;;  %v77_v58 = vld [vmem:[%s1895_s0 + $0x1e0] sm:$0xff]  ;;  %v46_v59 = vld [vmem:[%s1895_s0 + $0xe8] sm:$0xff] }
  0x15   :  { %1008 = vmatmul.mubr.msk.f32.gmra.mxu0 %vm89_vm0, %v26_v19  ;;  %1056 = vmatmul.mubr.msk.f32.gmra.mxu1 %vm89_vm0, %v58_v20  ;;  %v78_v60 = vld [vmem:[%s1895_s0 + $0x1e8] sm:$0xff]  ;;  %v47_v61 = vld [vmem:[%s1895_s0 + $0xf0] sm:$0xff]  ;;  %v48_v63 = vld [vmem:[%s1895_s0 + $0xf8] sm:$0xff] }
  0x16   :  { %1010 = vmatprep.mubr.msk.f32.mxu0 %vm89_vm0, %v27_v21  ;;  %1058 = vmatprep.mubr.msk.f32.mxu1 %vm89_vm0, %v59_v22  ;;  %v79_v62 = vld [vmem:[%s1895_s0 + $0x1f0] sm:$0xff]  ;;  %v80_v0 = vld [vmem:[%s1895_s0 + $0x1f8] sm:$0xff]  ;;  %v1380_v1 = vld [vmem:[%s1896_s2] ss:$0 sm:$0xff] }
  0x17   :  { %v668_v3 = vld [vmem:[%s1897_s3 + $0x8] sm:$0xff]  ;;  %v667_v9 = vld [vmem:[%s1897_s3] sm:$0xff]  ;;  %v670_v17 = vld [vmem:[%s1897_s3 + $0x18] sm:$0xff] }
  0x18   :  { %v700_v5 = vld [vmem:[%s1897_s3 + $0x108] sm:$0xff]  ;;  %v699_v11 = vld [vmem:[%s1897_s3 + $0x100] sm:$0xff]  ;;  %v702_v19 = vld [vmem:[%s1897_s3 + $0x118] sm:$0xff] }
  0x19   :  { %1011 = vmatmul.mubr.msk.f32.gmra.mxu0 %vm89_vm0, %v28_v23  ;;  %1059 = vmatmul.mubr.msk.f32.gmra.mxu1 %vm89_vm0, %v60_v24 }
  0x1a   :  { %1013 = vmatprep.mubr.msk.f32.mxu0 %vm89_vm0, %v29_v25  ;;  %1061 = vmatprep.mubr.msk.f32.mxu1 %vm89_vm0, %v61_v26  ;;  %v669_v25 = vld [vmem:[%s1897_s3 + $0x10] sm:$0xff] }
  0x1d   :  { %1014 = vmatmul.mubr.msk.f32.gmra.mxu0 %vm89_vm0, %v30_v27  ;;  %1062 = vmatmul.mubr.msk.f32.gmra.mxu1 %vm89_vm0, %v62_v28  ;;  %v701_v27 = vld [vmem:[%s1897_s3 + $0x110] sm:$0xff] }
  0x1e   :  { %1016 = vmatprep.mubr.msk.f32.mxu0 %vm89_vm0, %v31_v29  ;;  %1064 = vmatprep.mubr.msk.f32.mxu1 %vm89_vm0, %v63_v30 }
  0x21   :  { %1017 = vmatmul.mubr.msk.f32.gmra.mxu0 %vm89_vm0, %v32_v31  ;;  %1065 = vmatmul.mubr.msk.f32.gmra.mxu1 %vm89_vm0, %v64_v32 }
  0x22   :  { %1019 = vmatprep.mubr.msk.f32.mxu0 %vm89_vm0, %v33_v33  ;;  %1067 = vmatprep.mubr.msk.f32.mxu1 %vm89_vm0, %v65_v34  ;;  %v672_v33 = vld [vmem:[%s1897_s3 + $0x28] sm:$0xff] }
  0x25   :  { %1020 = vmatmul.mubr.msk.f32.gmra.mxu0 %vm89_vm0, %v34_v35  ;;  %1068 = vmatmul.mubr.msk.f32.gmra.mxu1 %vm89_vm0, %v66_v36  ;;  %v704_v35 = vld [vmem:[%s1897_s3 + $0x128] sm:$0xff] }
  0x26   :  { %1022 = vmatprep.mubr.msk.f32.mxu0 %vm89_vm0, %v35_v37  ;;  %1070 = vmatprep.mubr.msk.f32.mxu1 %vm89_vm0, %v67_v38 }
  0x29   :  { %1023 = vmatmul.mubr.msk.f32.gmra.mxu0 %vm89_vm0, %v36_v39  ;;  %1071 = vmatmul.mubr.msk.f32.gmra.mxu1 %vm89_vm0, %v68_v40 }
  0x2a   :  { %1025 = vmatprep.mubr.msk.f32.mxu0 %vm89_vm0, %v37_v41  ;;  %1073 = vmatprep.mubr.msk.f32.mxu1 %vm89_vm0, %v69_v42  ;;  %v671_v41 = vld [vmem:[%s1897_s3 + $0x20] sm:$0xff] }
  0x2d   :  { %1026 = vmatmul.mubr.msk.f32.gmra.mxu0 %vm89_vm0, %v38_v43  ;;  %1074 = vmatmul.mubr.msk.f32.gmra.mxu1 %vm89_vm0, %v70_v44  ;;  %v703_v43 = vld [vmem:[%s1897_s3 + $0x120] sm:$0xff] }
  0x2e   :  { %1028 = vmatprep.mubr.msk.f32.mxu0 %vm89_vm0, %v39_v45  ;;  %1076 = vmatprep.mubr.msk.f32.mxu1 %vm89_vm0, %v71_v46 }
  0x31   :  { %1029 = vmatmul.mubr.msk.f32.gmra.mxu0 %vm89_vm0, %v40_v47  ;;  %1077 = vmatmul.mubr.msk.f32.gmra.mxu1 %vm89_vm0, %v72_v48 }
  0x32   :  { %1031 = vmatprep.mubr.msk.f32.mxu0 %vm89_vm0, %v41_v49  ;;  %1079 = vmatprep.mubr.msk.f32.mxu1 %vm89_vm0, %v73_v50  ;;  %v674_v49 = vld [vmem:[%s1897_s3 + $0x38] sm:$0xff] }
  0x35   :  { %1032 = vmatmul.mubr.msk.f32.gmra.mxu0 %vm89_vm0, %v42_v51  ;;  %1080 = vmatmul.mubr.msk.f32.gmra.mxu1 %vm89_vm0, %v74_v52  ;;  %v706_v51 = vld [vmem:[%s1897_s3 + $0x138] sm:$0xff] }
  0x36   :  { %1034 = vmatprep.mubr.msk.f32.mxu0 %vm89_vm0, %v43_v53  ;;  %1082 = vmatprep.mubr.msk.f32.mxu1 %vm89_vm0, %v75_v54 }
  0x39   :  { %1035 = vmatmul.mubr.msk.f32.gmra.mxu0 %vm89_vm0, %v44_v55  ;;  %1083 = vmatmul.mubr.msk.f32.gmra.mxu1 %vm89_vm0, %v76_v56 }
  0x3a   :  { %1037 = vmatprep.mubr.msk.f32.mxu0 %vm89_vm0, %v45_v57  ;;  %1085 = vmatprep.mubr.msk.f32.mxu1 %vm89_vm0, %v77_v58  ;;  %v673_v57 = vld [vmem:[%s1897_s3 + $0x30] sm:$0xff] }
  0x3d   :  { %1038 = vmatmul.mubr.msk.f32.gmra.mxu0 %vm89_vm0, %v46_v59  ;;  %1086 = vmatmul.mubr.msk.f32.gmra.mxu1 %vm89_vm0, %v78_v60  ;;  %v705_v59 = vld [vmem:[%s1897_s3 + $0x130] sm:$0xff] }
  0x3e   :  { %1040 = vmatprep.mubr.msk.f32.mxu0 %vm89_vm0, %v47_v61  ;;  %1088 = vmatprep.mubr.msk.f32.mxu1 %vm89_vm0, %v79_v62 }
  0x41   :  { %1041 = vmatmul.mubr.msk.f32.gmra.mxu0 %vm89_vm0, %v48_v63  ;;  %1089 = vmatmul.mubr.msk.f32.gmra.mxu1 %vm89_vm0, %v80_v0 }
  0xc5   :  { %v997_v2 = vpop.f32.mrf.mxu0  ;;  %v1045_v4 = vpop.f32.mrf.mxu1 }
  0xc6   :  { %v354_v6 = vadd.f32 %v997_v2, %v1380_v1  ;;  %v514_v7 = vadd.f32 %v1045_v4, %v1380_v1  ;;  %v676_v2 = vld [vmem:[%s1897_s3 + $0x48] sm:$0xff] }
  0xc7   :  { %v348_v8 = vpop.f32.mrf.mxu0  ;;  %v508_v10 = vpop.f32.mrf.mxu1  ;;  %v708_v4 = vld [vmem:[%s1897_s3 + $0x148] sm:$0xff] }
  0xc8   :  { %v732_v12 = vadd.f32 %v668_v3, %v354_v6  ;;  %v764_v13 = vadd.f32 %v700_v5, %v514_v7  ;;  %v349_v14 = vadd.f32 %v1380_v1, %v348_v8  ;;  %v509_v15 = vadd.f32 %v1380_v1, %v508_v10  ;;  %v675_v10 = vld [vmem:[%s1897_s3 + $0x40] sm:$0xff] }
  0xc9   :  { %v1000_v16 = vpop.f32.mrf.mxu0  ;;  %v1048_v18 = vpop.f32.mrf.mxu1 }
  0xca   :  { %796 = vst.msk [vmem:[%s1898_s4 + $0x8] sm:$0xff] %vm89_vm0, %v732_v12  ;;  %828 = vst.msk [vmem:[%s1898_s4 + $0x108] sm:$0xff] %vm89_vm0, %v764_v13  ;;  %v731_v20 = vadd.f32 %v667_v9, %v349_v14  ;;  %v763_v21 = vadd.f32 %v699_v11, %v509_v15  ;;  %v364_v22 = vadd.f32 %v1000_v16, %v1380_v1  ;;  %v707_v12 = vld [vmem:[%s1897_s3 + $0x140] sm:$0xff] }
  0xcb   :  { %v524_v23 = vadd.f32 %v1048_v18, %v1380_v1  ;;  %v358_v24 = vpop.f32.mrf.mxu0  ;;  %v518_v26 = vpop.f32.mrf.mxu1  ;;  %v678_v18 = vld [vmem:[%s1897_s3 + $0x58] sm:$0xff] }
  0xcc   :  { %795 = vst.msk [vmem:[%s1898_s4] sm:$0xff] %vm89_vm0, %v731_v20  ;;  %827 = vst.msk [vmem:[%s1898_s4 + $0x100] sm:$0xff] %vm89_vm0, %v763_v21  ;;  %v734_v28 = vadd.f32 %v670_v17, %v364_v22  ;;  %v359_v30 = vadd.f32 %v1380_v1, %v358_v24  ;;  %v519_v31 = vadd.f32 %v1380_v1, %v518_v26  ;;  %v710_v20 = vld [vmem:[%s1897_s3 + $0x158] sm:$0xff]  ;;  %v677_v26 = vld [vmem:[%s1897_s3 + $0x50] sm:$0xff] }
  0xcd   :  { %v766_v29 = vadd.f32 %v702_v19, %v524_v23  ;;  %v1003_v32 = vpop.f32.mrf.mxu0  ;;  %v1051_v34 = vpop.f32.mrf.mxu1 }
  0xce   :  { %798 = vst.msk [vmem:[%s1898_s4 + $0x18] sm:$0xff] %vm89_vm0, %v734_v28  ;;  %v733_v36 = vadd.f32 %v669_v25, %v359_v30  ;;  %v765_v37 = vadd.f32 %v701_v27, %v519_v31  ;;  %v374_v38 = vadd.f32 %v1003_v32, %v1380_v1  ;;  %v534_v39 = vadd.f32 %v1051_v34, %v1380_v1  ;;  %v709_v28 = vld [vmem:[%s1897_s3 + $0x150] sm:$0xff]  ;;  %v680_v34 = vld [vmem:[%s1897_s3 + $0x68] sm:$0xff] }
  0xcf   :  { %830 = vst.msk [vmem:[%s1898_s4 + $0x118] sm:$0xff] %vm89_vm0, %v766_v29  ;;  %v368_v40 = vpop.f32.mrf.mxu0  ;;  %v528_v42 = vpop.f32.mrf.mxu1 }
  0xd0   :  { %797 = vst.msk [vmem:[%s1898_s4 + $0x10] sm:$0xff] %vm89_vm0, %v733_v36  ;;  %829 = vst.msk [vmem:[%s1898_s4 + $0x110] sm:$0xff] %vm89_vm0, %v765_v37  ;;  %v736_v44 = vadd.f32 %v672_v33, %v374_v38  ;;  %v768_v45 = vadd.f32 %v704_v35, %v534_v39  ;;  %v369_v46 = vadd.f32 %v1380_v1, %v368_v40  ;;  %v712_v36 = vld [vmem:[%s1897_s3 + $0x168] sm:$0xff] }
  0xd1   :  { %v529_v47 = vadd.f32 %v1380_v1, %v528_v42  ;;  %v1006_v48 = vpop.f32.mrf.mxu0  ;;  %v1054_v50 = vpop.f32.mrf.mxu1  ;;  %v679_v42 = vld [vmem:[%s1897_s3 + $0x60] sm:$0xff] }
  0xd2   :  { %800 = vst.msk [vmem:[%s1898_s4 + $0x28] sm:$0xff] %vm89_vm0, %v736_v44  ;;  %832 = vst.msk [vmem:[%s1898_s4 + $0x128] sm:$0xff] %vm89_vm0, %v768_v45  ;;  %v735_v52 = vadd.f32 %v671_v41, %v369_v46  ;;  %v384_v54 = vadd.f32 %v1006_v48, %v1380_v1  ;;  %v544_v55 = vadd.f32 %v1054_v50, %v1380_v1  ;;  %v711_v44 = vld [vmem:[%s1897_s3 + $0x160] sm:$0xff]  ;;  %v682_v50 = vld [vmem:[%s1897_s3 + $0x78] sm:$0xff] }
  0xd3   :  { %v767_v53 = vadd.f32 %v703_v43, %v529_v47  ;;  %v378_v56 = vpop.f32.mrf.mxu0  ;;  %v538_v58 = vpop.f32.mrf.mxu1 }
  0xd4   :  { %799 = vst.msk [vmem:[%s1898_s4 + $0x20] sm:$0xff] %vm89_vm0, %v735_v52  ;;  %v738_v60 = vadd.f32 %v674_v49, %v384_v54  ;;  %v770_v61 = vadd.f32 %v706_v51, %v544_v55  ;;  %v379_v62 = vadd.f32 %v1380_v1, %v378_v56  ;;  %v539_v63 = vadd.f32 %v1380_v1, %v538_v58  ;;  %v714_v52 = vld [vmem:[%s1897_s3 + $0x178] sm:$0xff]  ;;  %v681_v58 = vld [vmem:[%s1897_s3 + $0x70] sm:$0xff] }
  0xd5   :  { %831 = vst.msk [vmem:[%s1898_s4 + $0x120] sm:$0xff] %vm89_vm0, %v767_v53  ;;  %v1009_v0 = vpop.f32.mrf.mxu0  ;;  %v1057_v3 = vpop.f32.mrf.mxu1 }
  0xd6   :  { %802 = vst.msk [vmem:[%s1898_s4 + $0x38] sm:$0xff] %vm89_vm0, %v738_v60  ;;  %834 = vst.msk [vmem:[%s1898_s4 + $0x138] sm:$0xff] %vm89_vm0, %v770_v61  ;;  %v737_v5 = vadd.f32 %v673_v57, %v379_v62  ;;  %v769_v6 = vadd.f32 %v705_v59, %v539_v63  ;;  %v394_v7 = vadd.f32 %v1009_v0, %v1380_v1  ;;  %v713_v60 = vld [vmem:[%s1897_s3 + $0x170] sm:$0xff] }
  0xd7   :  { %v554_v8 = vadd.f32 %v1057_v3, %v1380_v1  ;;  %v388_v9 = vpop.f32.mrf.mxu0  ;;  %v548_v11 = vpop.f32.mrf.mxu1  ;;  %v684_v3 = vld [vmem:[%s1897_s3 + $0x88] sm:$0xff] }
  0xd8   :  { %801 = vst.msk [vmem:[%s1898_s4 + $0x30] sm:$0xff] %vm89_vm0, %v737_v5  ;;  %833 = vst.msk [vmem:[%s1898_s4 + $0x130] sm:$0xff] %vm89_vm0, %v769_v6  ;;  %v740_v13 = vadd.f32 %v676_v2, %v394_v7  ;;  %v389_v15 = vadd.f32 %v1380_v1, %v388_v9  ;;  %v549_v16 = vadd.f32 %v1380_v1, %v548_v11  ;;  %v716_v5 = vld [vmem:[%s1897_s3 + $0x188] sm:$0xff]  ;;  %v683_v11 = vld [vmem:[%s1897_s3 + $0x80] sm:$0xff] }
  0xd9   :  { %v772_v14 = vadd.f32 %v708_v4, %v554_v8  ;;  %v1012_v17 = vpop.f32.mrf.mxu0  ;;  %v1060_v19 = vpop.f32.mrf.mxu1 }
  0xda   :  { %804 = vst.msk [vmem:[%s1898_s4 + $0x48] sm:$0xff] %vm89_vm0, %v740_v13  ;;  %v739_v21 = vadd.f32 %v675_v10, %v389_v15  ;;  %v771_v22 = vadd.f32 %v707_v12, %v549_v16  ;;  %v404_v23 = vadd.f32 %v1012_v17, %v1380_v1  ;;  %v564_v24 = vadd.f32 %v1060_v19, %v1380_v1  ;;  %v715_v13 = vld [vmem:[%s1897_s3 + $0x180] sm:$0xff]  ;;  %v686_v19 = vld [vmem:[%s1897_s3 + $0x98] sm:$0xff] }
  0xdb   :  { %836 = vst.msk [vmem:[%s1898_s4 + $0x148] sm:$0xff] %vm89_vm0, %v772_v14  ;;  %v398_v25 = vpop.f32.mrf.mxu0  ;;  %v558_v27 = vpop.f32.mrf.mxu1 }
  0xdc   :  { %803 = vst.msk [vmem:[%s1898_s4 + $0x40] sm:$0xff] %vm89_vm0, %v739_v21  ;;  %835 = vst.msk [vmem:[%s1898_s4 + $0x140] sm:$0xff] %vm89_vm0, %v771_v22  ;;  %v742_v29 = vadd.f32 %v678_v18, %v404_v23  ;;  %v774_v30 = vadd.f32 %v710_v20, %v564_v24  ;;  %v399_v31 = vadd.f32 %v1380_v1, %v398_v25  ;;  %v718_v21 = vld [vmem:[%s1897_s3 + $0x198] sm:$0xff] }
  0xdd   :  { %v559_v32 = vadd.f32 %v1380_v1, %v558_v27  ;;  %v1015_v33 = vpop.f32.mrf.mxu0  ;;  %v1063_v35 = vpop.f32.mrf.mxu1  ;;  %v685_v27 = vld [vmem:[%s1897_s3 + $0x90] sm:$0xff] }
  0xde   :  { %806 = vst.msk [vmem:[%s1898_s4 + $0x58] sm:$0xff] %vm89_vm0, %v742_v29  ;;  %838 = vst.msk [vmem:[%s1898_s4 + $0x158] sm:$0xff] %vm89_vm0, %v774_v30  ;;  %v741_v37 = vadd.f32 %v677_v26, %v399_v31  ;;  %v414_v39 = vadd.f32 %v1015_v33, %v1380_v1  ;;  %v574_v40 = vadd.f32 %v1063_v35, %v1380_v1  ;;  %v717_v29 = vld [vmem:[%s1897_s3 + $0x190] sm:$0xff]  ;;  %v688_v35 = vld [vmem:[%s1897_s3 + $0xa8] sm:$0xff] }
  0xdf   :  { %v773_v38 = vadd.f32 %v709_v28, %v559_v32  ;;  %v408_v41 = vpop.f32.mrf.mxu0  ;;  %v568_v43 = vpop.f32.mrf.mxu1 }
  0xe0   :  { %805 = vst.msk [vmem:[%s1898_s4 + $0x50] sm:$0xff] %vm89_vm0, %v741_v37  ;;  %v744_v45 = vadd.f32 %v680_v34, %v414_v39  ;;  %v776_v46 = vadd.f32 %v712_v36, %v574_v40  ;;  %v409_v47 = vadd.f32 %v1380_v1, %v408_v41  ;;  %v569_v48 = vadd.f32 %v1380_v1, %v568_v43  ;;  %v720_v37 = vld [vmem:[%s1897_s3 + $0x1a8] sm:$0xff]  ;;  %v687_v43 = vld [vmem:[%s1897_s3 + $0xa0] sm:$0xff] }
  0xe1   :  { %837 = vst.msk [vmem:[%s1898_s4 + $0x150] sm:$0xff] %vm89_vm0, %v773_v38  ;;  %v1018_v49 = vpop.f32.mrf.mxu0  ;;  %v1066_v51 = vpop.f32.mrf.mxu1 }
  0xe2   :  { %808 = vst.msk [vmem:[%s1898_s4 + $0x68] sm:$0xff] %vm89_vm0, %v744_v45  ;;  %840 = vst.msk [vmem:[%s1898_s4 + $0x168] sm:$0xff] %vm89_vm0, %v776_v46  ;;  %v743_v53 = vadd.f32 %v679_v42, %v409_v47  ;;  %v775_v54 = vadd.f32 %v711_v44, %v569_v48  ;;  %v424_v55 = vadd.f32 %v1018_v49, %v1380_v1  ;;  %v719_v45 = vld [vmem:[%s1897_s3 + $0x1a0] sm:$0xff] }
  0xe3   :  { %v584_v56 = vadd.f32 %v1066_v51, %v1380_v1  ;;  %v418_v57 = vpop.f32.mrf.mxu0  ;;  %v578_v59 = vpop.f32.mrf.mxu1  ;;  %v690_v51 = vld [vmem:[%s1897_s3 + $0xb8] sm:$0xff] }
  0xe4   :  { %807 = vst.msk [vmem:[%s1898_s4 + $0x60] sm:$0xff] %vm89_vm0, %v743_v53  ;;  %839 = vst.msk [vmem:[%s1898_s4 + $0x160] sm:$0xff] %vm89_vm0, %v775_v54  ;;  %v746_v61 = vadd.f32 %v682_v50, %v424_v55  ;;  %v419_v63 = vadd.f32 %v1380_v1, %v418_v57  ;;  %v579_v0 = vadd.f32 %v1380_v1, %v578_v59  ;;  %v722_v53 = vld [vmem:[%s1897_s3 + $0x1b8] sm:$0xff]  ;;  %v689_v59 = vld [vmem:[%s1897_s3 + $0xb0] sm:$0xff] }
  0xe5   :  { %v778_v62 = vadd.f32 %v714_v52, %v584_v56  ;;  %v1021_v2 = vpop.f32.mrf.mxu0  ;;  %v1069_v4 = vpop.f32.mrf.mxu1 }
  0xe6   :  { %810 = vst.msk [vmem:[%s1898_s4 + $0x78] sm:$0xff] %vm89_vm0, %v746_v61  ;;  %v745_v6 = vadd.f32 %v681_v58, %v419_v63  ;;  %v777_v7 = vadd.f32 %v713_v60, %v579_v0  ;;  %v434_v8 = vadd.f32 %v1021_v2, %v1380_v1  ;;  %v594_v9 = vadd.f32 %v1069_v4, %v1380_v1  ;;  %v721_v61 = vld [vmem:[%s1897_s3 + $0x1b0] sm:$0xff]  ;;  %v692_v4 = vld [vmem:[%s1897_s3 + $0xc8] sm:$0xff] }
  0xe7   :  { %842 = vst.msk [vmem:[%s1898_s4 + $0x178] sm:$0xff] %vm89_vm0, %v778_v62  ;;  %v428_v10 = vpop.f32.mrf.mxu0  ;;  %v588_v12 = vpop.f32.mrf.mxu1 }
  0xe8   :  { %809 = vst.msk [vmem:[%s1898_s4 + $0x70] sm:$0xff] %vm89_vm0, %v745_v6  ;;  %841 = vst.msk [vmem:[%s1898_s4 + $0x170] sm:$0xff] %vm89_vm0, %v777_v7  ;;  %v748_v14 = vadd.f32 %v684_v3, %v434_v8  ;;  %v780_v15 = vadd.f32 %v716_v5, %v594_v9  ;;  %v429_v16 = vadd.f32 %v1380_v1, %v428_v10  ;;  %v724_v6 = vld [vmem:[%s1897_s3 + $0x1c8] sm:$0xff] }
  0xe9   :  { %v589_v17 = vadd.f32 %v1380_v1, %v588_v12  ;;  %v1024_v18 = vpop.f32.mrf.mxu0  ;;  %v1072_v20 = vpop.f32.mrf.mxu1  ;;  %v691_v12 = vld [vmem:[%s1897_s3 + $0xc0] sm:$0xff] }
  0xea   :  { %812 = vst.msk [vmem:[%s1898_s4 + $0x88] sm:$0xff] %vm89_vm0, %v748_v14  ;;  %844 = vst.msk [vmem:[%s1898_s4 + $0x188] sm:$0xff] %vm89_vm0, %v780_v15  ;;  %v747_v22 = vadd.f32 %v683_v11, %v429_v16  ;;  %v444_v24 = vadd.f32 %v1024_v18, %v1380_v1  ;;  %v604_v25 = vadd.f32 %v1072_v20, %v1380_v1  ;;  %v723_v14 = vld [vmem:[%s1897_s3 + $0x1c0] sm:$0xff]  ;;  %v694_v20 = vld [vmem:[%s1897_s3 + $0xd8] sm:$0xff] }
  0xeb   :  { %v779_v23 = vadd.f32 %v715_v13, %v589_v17  ;;  %v438_v26 = vpop.f32.mrf.mxu0  ;;  %v598_v28 = vpop.f32.mrf.mxu1 }
  0xec   :  { %811 = vst.msk [vmem:[%s1898_s4 + $0x80] sm:$0xff] %vm89_vm0, %v747_v22  ;;  %v750_v30 = vadd.f32 %v686_v19, %v444_v24  ;;  %v782_v31 = vadd.f32 %v718_v21, %v604_v25  ;;  %v439_v32 = vadd.f32 %v1380_v1, %v438_v26  ;;  %v599_v33 = vadd.f32 %v1380_v1, %v598_v28  ;;  %v726_v22 = vld [vmem:[%s1897_s3 + $0x1d8] sm:$0xff]  ;;  %v693_v28 = vld [vmem:[%s1897_s3 + $0xd0] sm:$0xff] }
  0xed   :  { %843 = vst.msk [vmem:[%s1898_s4 + $0x180] sm:$0xff] %vm89_vm0, %v779_v23  ;;  %v1027_v34 = vpop.f32.mrf.mxu0  ;;  %v1075_v36 = vpop.f32.mrf.mxu1 }
  0xee   :  { %814 = vst.msk [vmem:[%s1898_s4 + $0x98] sm:$0xff] %vm89_vm0, %v750_v30  ;;  %846 = vst.msk [vmem:[%s1898_s4 + $0x198] sm:$0xff] %vm89_vm0, %v782_v31  ;;  %v749_v38 = vadd.f32 %v685_v27, %v439_v32  ;;  %v781_v39 = vadd.f32 %v717_v29, %v599_v33  ;;  %v454_v40 = vadd.f32 %v1027_v34, %v1380_v1  ;;  %v725_v30 = vld [vmem:[%s1897_s3 + $0x1d0] sm:$0xff] }
  0xef   :  { %v614_v41 = vadd.f32 %v1075_v36, %v1380_v1  ;;  %v448_v42 = vpop.f32.mrf.mxu0  ;;  %v608_v44 = vpop.f32.mrf.mxu1  ;;  %v696_v36 = vld [vmem:[%s1897_s3 + $0xe8] sm:$0xff] }
  0xf0   :  { %813 = vst.msk [vmem:[%s1898_s4 + $0x90] sm:$0xff] %vm89_vm0, %v749_v38  ;;  %845 = vst.msk [vmem:[%s1898_s4 + $0x190] sm:$0xff] %vm89_vm0, %v781_v39  ;;  %v752_v46 = vadd.f32 %v688_v35, %v454_v40  ;;  %v449_v48 = vadd.f32 %v1380_v1, %v448_v42  ;;  %v609_v49 = vadd.f32 %v1380_v1, %v608_v44  ;;  %v728_v38 = vld [vmem:[%s1897_s3 + $0x1e8] sm:$0xff]  ;;  %v695_v44 = vld [vmem:[%s1897_s3 + $0xe0] sm:$0xff] }
  0xf1   :  { %v784_v47 = vadd.f32 %v720_v37, %v614_v41  ;;  %v1030_v50 = vpop.f32.mrf.mxu0  ;;  %v1078_v52 = vpop.f32.mrf.mxu1 }
  0xf2   :  { %816 = vst.msk [vmem:[%s1898_s4 + $0xa8] sm:$0xff] %vm89_vm0, %v752_v46  ;;  %v751_v54 = vadd.f32 %v687_v43, %v449_v48  ;;  %v783_v55 = vadd.f32 %v719_v45, %v609_v49  ;;  %v464_v56 = vadd.f32 %v1030_v50, %v1380_v1  ;;  %v624_v57 = vadd.f32 %v1078_v52, %v1380_v1  ;;  %v727_v46 = vld [vmem:[%s1897_s3 + $0x1e0] sm:$0xff]  ;;  %v698_v52 = vld [vmem:[%s1897_s3 + $0xf8] sm:$0xff] }
  0xf3   :  { %848 = vst.msk [vmem:[%s1898_s4 + $0x1a8] sm:$0xff] %vm89_vm0, %v784_v47  ;;  %v458_v58 = vpop.f32.mrf.mxu0  ;;  %v618_v60 = vpop.f32.mrf.mxu1 }
  0xf4   :  { %815 = vst.msk [vmem:[%s1898_s4 + $0xa0] sm:$0xff] %vm89_vm0, %v751_v54  ;;  %847 = vst.msk [vmem:[%s1898_s4 + $0x1a0] sm:$0xff] %vm89_vm0, %v783_v55  ;;  %v754_v62 = vadd.f32 %v690_v51, %v464_v56  ;;  %v786_v63 = vadd.f32 %v722_v53, %v624_v57  ;;  %v459_v0 = vadd.f32 %v1380_v1, %v458_v58  ;;  %v730_v54 = vld [vmem:[%s1897_s3 + $0x1f8] sm:$0xff] }
  0xf5   :  { %v619_v2 = vadd.f32 %v1380_v1, %v618_v60  ;;  %v1033_v3 = vpop.f32.mrf.mxu0  ;;  %v1081_v5 = vpop.f32.mrf.mxu1  ;;  %v697_v60 = vld [vmem:[%s1897_s3 + $0xf0] sm:$0xff] }
  0xf6   :  { %818 = vst.msk [vmem:[%s1898_s4 + $0xb8] sm:$0xff] %vm89_vm0, %v754_v62  ;;  %850 = vst.msk [vmem:[%s1898_s4 + $0x1b8] sm:$0xff] %vm89_vm0, %v786_v63  ;;  %v753_v7 = vadd.f32 %v689_v59, %v459_v0  ;;  %v474_v9 = vadd.f32 %v1033_v3, %v1380_v1  ;;  %v634_v10 = vadd.f32 %v1081_v5, %v1380_v1  ;;  %v729_v62 = vld [vmem:[%s1897_s3 + $0x1f0] sm:$0xff] }
  0xf7   :  { %v785_v8 = vadd.f32 %v721_v61, %v619_v2  ;;  %v468_v11 = vpop.f32.mrf.mxu0  ;;  %v628_v13 = vpop.f32.mrf.mxu1 }
  0xf8   :  { %817 = vst.msk [vmem:[%s1898_s4 + $0xb0] sm:$0xff] %vm89_vm0, %v753_v7  ;;  %v756_v15 = vadd.f32 %v692_v4, %v474_v9  ;;  %v788_v16 = vadd.f32 %v724_v6, %v634_v10  ;;  %v469_v17 = vadd.f32 %v1380_v1, %v468_v11  ;;  %v629_v18 = vadd.f32 %v1380_v1, %v628_v13 }
  0xf9   :  { %849 = vst.msk [vmem:[%s1898_s4 + $0x1b0] sm:$0xff] %vm89_vm0, %v785_v8  ;;  %v1036_v19 = vpop.f32.mrf.mxu0  ;;  %v1084_v21 = vpop.f32.mrf.mxu1 }
  0xfa   :  { %820 = vst.msk [vmem:[%s1898_s4 + $0xc8] sm:$0xff] %vm89_vm0, %v756_v15  ;;  %852 = vst.msk [vmem:[%s1898_s4 + $0x1c8] sm:$0xff] %vm89_vm0, %v788_v16  ;;  %v755_v23 = vadd.f32 %v691_v12, %v469_v17  ;;  %v787_v24 = vadd.f32 %v723_v14, %v629_v18  ;;  %v484_v25 = vadd.f32 %v1036_v19, %v1380_v1 }
  0xfb   :  { %v644_v26 = vadd.f32 %v1084_v21, %v1380_v1  ;;  %v478_v27 = vpop.f32.mrf.mxu0  ;;  %v638_v29 = vpop.f32.mrf.mxu1 }
  0xfc   :  { %819 = vst.msk [vmem:[%s1898_s4 + $0xc0] sm:$0xff] %vm89_vm0, %v755_v23  ;;  %851 = vst.msk [vmem:[%s1898_s4 + $0x1c0] sm:$0xff] %vm89_vm0, %v787_v24  ;;  %v758_v31 = vadd.f32 %v694_v20, %v484_v25  ;;  %v479_v33 = vadd.f32 %v1380_v1, %v478_v27  ;;  %v639_v34 = vadd.f32 %v1380_v1, %v638_v29 }
  0xfd   :  { %v790_v32 = vadd.f32 %v726_v22, %v644_v26  ;;  %v1039_v35 = vpop.f32.mrf.mxu0  ;;  %v1087_v37 = vpop.f32.mrf.mxu1 }
  0xfe   :  { %822 = vst.msk [vmem:[%s1898_s4 + $0xd8] sm:$0xff] %vm89_vm0, %v758_v31  ;;  %v757_v39 = vadd.f32 %v693_v28, %v479_v33  ;;  %v789_v40 = vadd.f32 %v725_v30, %v639_v34  ;;  %v494_v41 = vadd.f32 %v1039_v35, %v1380_v1  ;;  %v654_v42 = vadd.f32 %v1087_v37, %v1380_v1 }
  0xff   :  { %854 = vst.msk [vmem:[%s1898_s4 + $0x1d8] sm:$0xff] %vm89_vm0, %v790_v32  ;;  %v488_v43 = vpop.f32.mrf.mxu0  ;;  %v648_v45 = vpop.f32.mrf.mxu1 }
 0x100   :  { %821 = vst.msk [vmem:[%s1898_s4 + $0xd0] sm:$0xff] %vm89_vm0, %v757_v39  ;;  %853 = vst.msk [vmem:[%s1898_s4 + $0x1d0] sm:$0xff] %vm89_vm0, %v789_v40  ;;  %v760_v47 = vadd.f32 %v696_v36, %v494_v41  ;;  %v792_v48 = vadd.f32 %v728_v38, %v654_v42  ;;  %v489_v49 = vadd.f32 %v1380_v1, %v488_v43 }
 0x101   :  { %v649_v50 = vadd.f32 %v1380_v1, %v648_v45  ;;  %v1042_v51 = vpop.f32.mrf.mxu0  ;;  %v1090_v53 = vpop.f32.mrf.mxu1 }
 0x102   :  { %824 = vst.msk [vmem:[%s1898_s4 + $0xe8] sm:$0xff] %vm89_vm0, %v760_v47  ;;  %856 = vst.msk [vmem:[%s1898_s4 + $0x1e8] sm:$0xff] %vm89_vm0, %v792_v48  ;;  %v759_v55 = vadd.f32 %v695_v44, %v489_v49  ;;  %v504_v57 = vadd.f32 %v1042_v51, %v1380_v1  ;;  %v664_v58 = vadd.f32 %v1090_v53, %v1380_v1 }
 0x103   :  { %v791_v56 = vadd.f32 %v727_v46, %v649_v50  ;;  %v498_v59 = vpop.f32.mrf.mxu0  ;;  %v658_v61 = vpop.f32.mrf.mxu1 }
 0x104   :  { %823 = vst.msk [vmem:[%s1898_s4 + $0xe0] sm:$0xff] %vm89_vm0, %v759_v55  ;;  %v762_v63 = vadd.f32 %v698_v52, %v504_v57  ;;  %v794_v0 = vadd.f32 %v730_v54, %v664_v58  ;;  %v499_v2 = vadd.f32 %v1380_v1, %v498_v59  ;;  %v659_v3 = vadd.f32 %v1380_v1, %v658_v61 }
 0x105   :  { %855 = vst.msk [vmem:[%s1898_s4 + $0x1e0] sm:$0xff] %vm89_vm0, %v791_v56 }
 0x106   :  { %826 = vst.msk [vmem:[%s1898_s4 + $0xf8] sm:$0xff] %vm89_vm0, %v762_v63  ;;  %858 = vst.msk [vmem:[%s1898_s4 + $0x1f8] sm:$0xff] %vm89_vm0, %v794_v0  ;;  %v761_v4 = vadd.f32 %v697_v60, %v499_v2  ;;  %v793_v5 = vadd.f32 %v729_v62, %v659_v3 }
 0x108   :  { %825 = vst.msk [vmem:[%s1898_s4 + $0xf0] sm:$0xff] %vm89_vm0, %v761_v4  ;;  %857 = vst.msk [vmem:[%s1898_s4 + $0x1f0] sm:$0xff] %vm89_vm0, %v793_v5 }

// kernel: closed_call.46
= control target key start
LH: loop header
LB: loop body
LE: loop exit
PB: predicated region body
PF: predicated region fallthrough
CT: control target
= control target key end

     0   :  { %vm89_vm0 = vcmask 64512   ;;  %s3047_s1 = inlined_call_operand.vmem [shape: f32[8,8], index: 1, kind: input, shape index: {}]   ;;  %s3048_s0 = inlined_call_operand.vmem [shape: f32[512,8], index: 0, kind: input, shape index: {}]   ;;  %s3049_s2 = inlined_call_operand.vmem [shape: f32[1,8], index: 2, kind: input, shape index: {}]   ;;  %s3050_s3 = inlined_call_operand.vmem [shape: f32[512,8], index: 3, kind: input, shape index: {}]   ;;  %s3051_s4 = inlined_call_operand.vmem [shape: f32[512,8], index: 4, kind: output, shape index: {}]  }
   0x1   :  { %v81_v0 = vld [vmem:[%s3047_s1] sm:$0xff]  ;;  %v18_v3 = vld [vmem:[%s3048_s0 + $0x8] sm:$0xff]  ;;  %v19_v5 = vld [vmem:[%s3048_s0 + $0x10] sm:$0xff] }
   0x2   :  { %v17_v1 = vld [vmem:[%s3048_s0] sm:$0xff]  ;;  %1569 = vmatprep.subr.mxu0 %v81_v0  ;;  %1667 = vmatprep.subr.mxu1 %v81_v0  ;;  %v50_v4 = vld [vmem:[%s3048_s0 + $0x108] sm:$0xff]  ;;  %v51_v6 = vld [vmem:[%s3048_s0 + $0x110] sm:$0xff] }
   0x3   :  { %v49_v2 = vld [vmem:[%s3048_s0 + $0x100] sm:$0xff]  ;;  %1570 = vmatpush3.msra.mxu0 %v81_v0  ;;  %1668 = vmatpush3.msra.mxu1 %v81_v0  ;;  %v20_v7 = vld [vmem:[%s3048_s0 + $0x18] sm:$0xff]  ;;  %v22_v11 = vld [vmem:[%s3048_s0 + $0x28] sm:$0xff] }
   0x4   :  { %1571 = vmatprep.mubr.msk.f32.mxu0 %vm89_vm0, %v17_v1  ;;  %1619 = vmatprep.mubr.msk.f32.mxu1 %vm89_vm0, %v49_v2  ;;  %v52_v8 = vld [vmem:[%s3048_s0 + $0x118] sm:$0xff]  ;;  %v21_v9 = vld [vmem:[%s3048_s0 + $0x20] sm:$0xff]  ;;  %v54_v12 = vld [vmem:[%s3048_s0 + $0x128] sm:$0xff] }
   0x5   :  { %1572 = vmatmul.mubr.msk.f32.vlgmr.msra.gmra.mxu0 %vm89_vm0, %v18_v3  ;;  %1620 = vmatmul.mubr.msk.f32.vlgmr.msra.gmra.mxu1 %vm89_vm0, %v50_v4  ;;  %v53_v10 = vld [vmem:[%s3048_s0 + $0x120] sm:$0xff]  ;;  %v23_v13 = vld [vmem:[%s3048_s0 + $0x30] sm:$0xff]  ;;  %v24_v15 = vld [vmem:[%s3048_s0 + $0x38] sm:$0xff] }
   0x6   :  { %1574 = vmatprep.mubr.msk.f32.mxu0 %vm89_vm0, %v19_v5  ;;  %1622 = vmatprep.mubr.msk.f32.mxu1 %vm89_vm0, %v51_v6  ;;  %v55_v14 = vld [vmem:[%s3048_s0 + $0x130] sm:$0xff]  ;;  %v56_v16 = vld [vmem:[%s3048_s0 + $0x138] sm:$0xff]  ;;  %v25_v17 = vld [vmem:[%s3048_s0 + $0x40] sm:$0xff] }
   0x7   :  { %v57_v18 = vld [vmem:[%s3048_s0 + $0x140] sm:$0xff]  ;;  %v26_v19 = vld [vmem:[%s3048_s0 + $0x48] sm:$0xff]  ;;  %v27_v21 = vld [vmem:[%s3048_s0 + $0x50] sm:$0xff] }
   0x8   :  { %v58_v20 = vld [vmem:[%s3048_s0 + $0x148] sm:$0xff]  ;;  %v59_v22 = vld [vmem:[%s3048_s0 + $0x150] sm:$0xff]  ;;  %v28_v23 = vld [vmem:[%s3048_s0 + $0x58] sm:$0xff] }
   0x9   :  { %1575 = vmatmul.mubr.msk.f32.gmra.mxu0 %vm89_vm0, %v20_v7  ;;  %1623 = vmatmul.mubr.msk.f32.gmra.mxu1 %vm89_vm0, %v52_v8  ;;  %v60_v24 = vld [vmem:[%s3048_s0 + $0x158] sm:$0xff]  ;;  %v29_v25 = vld [vmem:[%s3048_s0 + $0x60] sm:$0xff]  ;;  %v30_v27 = vld [vmem:[%s3048_s0 + $0x68] sm:$0xff] }
   0xa   :  { %1577 = vmatprep.mubr.msk.f32.mxu0 %vm89_vm0, %v21_v9  ;;  %1625 = vmatprep.mubr.msk.f32.mxu1 %vm89_vm0, %v53_v10  ;;  %v61_v26 = vld [vmem:[%s3048_s0 + $0x160] sm:$0xff]  ;;  %v62_v28 = vld [vmem:[%s3048_s0 + $0x168] sm:$0xff]  ;;  %v31_v29 = vld [vmem:[%s3048_s0 + $0x70] sm:$0xff] }
   0xb   :  { %v63_v30 = vld [vmem:[%s3048_s0 + $0x170] sm:$0xff]  ;;  %v32_v31 = vld [vmem:[%s3048_s0 + $0x78] sm:$0xff]  ;;  %v33_v33 = vld [vmem:[%s3048_s0 + $0x80] sm:$0xff] }
   0xc   :  { %v64_v32 = vld [vmem:[%s3048_s0 + $0x178] sm:$0xff]  ;;  %v65_v34 = vld [vmem:[%s3048_s0 + $0x180] sm:$0xff]  ;;  %v34_v35 = vld [vmem:[%s3048_s0 + $0x88] sm:$0xff] }
   0xd   :  { %1578 = vmatmul.mubr.msk.f32.gmra.mxu0 %vm89_vm0, %v22_v11  ;;  %1626 = vmatmul.mubr.msk.f32.gmra.mxu1 %vm89_vm0, %v54_v12  ;;  %v66_v36 = vld [vmem:[%s3048_s0 + $0x188] sm:$0xff]  ;;  %v35_v37 = vld [vmem:[%s3048_s0 + $0x90] sm:$0xff]  ;;  %v36_v39 = vld [vmem:[%s3048_s0 + $0x98] sm:$0xff] }
   0xe   :  { %1580 = vmatprep.mubr.msk.f32.mxu0 %vm89_vm0, %v23_v13  ;;  %1628 = vmatprep.mubr.msk.f32.mxu1 %vm89_vm0, %v55_v14  ;;  %v67_v38 = vld [vmem:[%s3048_s0 + $0x190] sm:$0xff]  ;;  %v68_v40 = vld [vmem:[%s3048_s0 + $0x198] sm:$0xff]  ;;  %v37_v41 = vld [vmem:[%s3048_s0 + $0xa0] sm:$0xff] }
   0xf   :  { %v69_v42 = vld [vmem:[%s3048_s0 + $0x1a0] sm:$0xff]  ;;  %v38_v43 = vld [vmem:[%s3048_s0 + $0xa8] sm:$0xff]  ;;  %v39_v45 = vld [vmem:[%s3048_s0 + $0xb0] sm:$0xff] }
  0x10   :  { %v70_v44 = vld [vmem:[%s3048_s0 + $0x1a8] sm:$0xff]  ;;  %v71_v46 = vld [vmem:[%s3048_s0 + $0x1b0] sm:$0xff]  ;;  %v40_v47 = vld [vmem:[%s3048_s0 + $0xb8] sm:$0xff] }
  0x11   :  { %1581 = vmatmul.mubr.msk.f32.gmra.mxu0 %vm89_vm0, %v24_v15  ;;  %1629 = vmatmul.mubr.msk.f32.gmra.mxu1 %vm89_vm0, %v56_v16  ;;  %v72_v48 = vld [vmem:[%s3048_s0 + $0x1b8] sm:$0xff]  ;;  %v41_v49 = vld [vmem:[%s3048_s0 + $0xc0] sm:$0xff]  ;;  %v42_v51 = vld [vmem:[%s3048_s0 + $0xc8] sm:$0xff] }
  0x12   :  { %1583 = vmatprep.mubr.msk.f32.mxu0 %vm89_vm0, %v25_v17  ;;  %1631 = vmatprep.mubr.msk.f32.mxu1 %vm89_vm0, %v57_v18  ;;  %v73_v50 = vld [vmem:[%s3048_s0 + $0x1c0] sm:$0xff]  ;;  %v74_v52 = vld [vmem:[%s3048_s0 + $0x1c8] sm:$0xff]  ;;  %v43_v53 = vld [vmem:[%s3048_s0 + $0xd0] sm:$0xff] }
  0x13   :  { %v75_v54 = vld [vmem:[%s3048_s0 + $0x1d0] sm:$0xff]  ;;  %v44_v55 = vld [vmem:[%s3048_s0 + $0xd8] sm:$0xff]  ;;  %v45_v57 = vld [vmem:[%s3048_s0 + $0xe0] sm:$0xff] }
  0x14   :  { %v76_v56 = vld [vmem:[%s3048_s0 + $0x1d8] sm:$0xff]  ;;  %v77_v58 = vld [vmem:[%s3048_s0 + $0x1e0] sm:$0xff]  ;;  %v46_v59 = vld [vmem:[%s3048_s0 + $0xe8] sm:$0xff] }
  0x15   :  { %1584 = vmatmul.mubr.msk.f32.gmra.mxu0 %vm89_vm0, %v26_v19  ;;  %1632 = vmatmul.mubr.msk.f32.gmra.mxu1 %vm89_vm0, %v58_v20  ;;  %v78_v60 = vld [vmem:[%s3048_s0 + $0x1e8] sm:$0xff]  ;;  %v47_v61 = vld [vmem:[%s3048_s0 + $0xf0] sm:$0xff]  ;;  %v48_v63 = vld [vmem:[%s3048_s0 + $0xf8] sm:$0xff] }
  0x16   :  { %1586 = vmatprep.mubr.msk.f32.mxu0 %vm89_vm0, %v27_v21  ;;  %1634 = vmatprep.mubr.msk.f32.mxu1 %vm89_vm0, %v59_v22  ;;  %v79_v62 = vld [vmem:[%s3048_s0 + $0x1f0] sm:$0xff]  ;;  %v80_v0 = vld [vmem:[%s3048_s0 + $0x1f8] sm:$0xff]  ;;  %v2085_v1 = vld [vmem:[%s3049_s2] ss:$0 sm:$0xff] }
  0x17   :  { %v668_v3 = vld [vmem:[%s3050_s3 + $0x8] sm:$0xff]  ;;  %v667_v13 = vld [vmem:[%s3050_s3] sm:$0xff] }
  0x18   :  { %v700_v5 = vld [vmem:[%s3050_s3 + $0x108] sm:$0xff]  ;;  %v699_v15 = vld [vmem:[%s3050_s3 + $0x100] sm:$0xff] }
  0x19   :  { %1587 = vmatmul.mubr.msk.f32.gmra.mxu0 %vm89_vm0, %v28_v23  ;;  %1635 = vmatmul.mubr.msk.f32.gmra.mxu1 %vm89_vm0, %v60_v24  ;;  %v670_v23 = vld [vmem:[%s3050_s3 + $0x18] sm:$0xff] }
  0x1a   :  { %1589 = vmatprep.mubr.msk.f32.mxu0 %vm89_vm0, %v29_v25  ;;  %1637 = vmatprep.mubr.msk.f32.mxu1 %vm89_vm0, %v61_v26  ;;  %v702_v25 = vld [vmem:[%s3050_s3 + $0x118] sm:$0xff] }
  0x1d   :  { %1590 = vmatmul.mubr.msk.f32.gmra.mxu0 %vm89_vm0, %v30_v27  ;;  %1638 = vmatmul.mubr.msk.f32.gmra.mxu1 %vm89_vm0, %v62_v28 }
  0x1e   :  { %1592 = vmatprep.mubr.msk.f32.mxu0 %vm89_vm0, %v31_v29  ;;  %1640 = vmatprep.mubr.msk.f32.mxu1 %vm89_vm0, %v63_v30 }
  0x21   :  { %1593 = vmatmul.mubr.msk.f32.gmra.mxu0 %vm89_vm0, %v32_v31  ;;  %1641 = vmatmul.mubr.msk.f32.gmra.mxu1 %vm89_vm0, %v64_v32  ;;  %v669_v31 = vld [vmem:[%s3050_s3 + $0x10] sm:$0xff] }
  0x22   :  { %1595 = vmatprep.mubr.msk.f32.mxu0 %vm89_vm0, %v33_v33  ;;  %1643 = vmatprep.mubr.msk.f32.mxu1 %vm89_vm0, %v65_v34 }
  0x25   :  { %1596 = vmatmul.mubr.msk.f32.gmra.mxu0 %vm89_vm0, %v34_v35  ;;  %1644 = vmatmul.mubr.msk.f32.gmra.mxu1 %vm89_vm0, %v66_v36  ;;  %v701_v35 = vld [vmem:[%s3050_s3 + $0x110] sm:$0xff] }
  0x26   :  { %1598 = vmatprep.mubr.msk.f32.mxu0 %vm89_vm0, %v35_v37  ;;  %1646 = vmatprep.mubr.msk.f32.mxu1 %vm89_vm0, %v67_v38 }
  0x29   :  { %1599 = vmatmul.mubr.msk.f32.gmra.mxu0 %vm89_vm0, %v36_v39  ;;  %1647 = vmatmul.mubr.msk.f32.gmra.mxu1 %vm89_vm0, %v68_v40 }
  0x2a   :  { %1601 = vmatprep.mubr.msk.f32.mxu0 %vm89_vm0, %v37_v41  ;;  %1649 = vmatprep.mubr.msk.f32.mxu1 %vm89_vm0, %v69_v42 }
  0x2d   :  { %1602 = vmatmul.mubr.msk.f32.gmra.mxu0 %vm89_vm0, %v38_v43  ;;  %1650 = vmatmul.mubr.msk.f32.gmra.mxu1 %vm89_vm0, %v70_v44 }
  0x2e   :  { %1604 = vmatprep.mubr.msk.f32.mxu0 %vm89_vm0, %v39_v45  ;;  %1652 = vmatprep.mubr.msk.f32.mxu1 %vm89_vm0, %v71_v46 }
  0x31   :  { %1605 = vmatmul.mubr.msk.f32.gmra.mxu0 %vm89_vm0, %v40_v47  ;;  %1653 = vmatmul.mubr.msk.f32.gmra.mxu1 %vm89_vm0, %v72_v48 }
  0x32   :  { %1607 = vmatprep.mubr.msk.f32.mxu0 %vm89_vm0, %v41_v49  ;;  %1655 = vmatprep.mubr.msk.f32.mxu1 %vm89_vm0, %v73_v50 }
  0x35   :  { %1608 = vmatmul.mubr.msk.f32.gmra.mxu0 %vm89_vm0, %v42_v51  ;;  %1656 = vmatmul.mubr.msk.f32.gmra.mxu1 %vm89_vm0, %v74_v52 }
  0x36   :  { %1610 = vmatprep.mubr.msk.f32.mxu0 %vm89_vm0, %v43_v53  ;;  %1658 = vmatprep.mubr.msk.f32.mxu1 %vm89_vm0, %v75_v54 }
  0x39   :  { %1611 = vmatmul.mubr.msk.f32.gmra.mxu0 %vm89_vm0, %v44_v55  ;;  %1659 = vmatmul.mubr.msk.f32.gmra.mxu1 %vm89_vm0, %v76_v56 }
  0x3a   :  { %1613 = vmatprep.mubr.msk.f32.mxu0 %vm89_vm0, %v45_v57  ;;  %1661 = vmatprep.mubr.msk.f32.mxu1 %vm89_vm0, %v77_v58 }
  0x3d   :  { %1614 = vmatmul.mubr.msk.f32.gmra.mxu0 %vm89_vm0, %v46_v59  ;;  %1662 = vmatmul.mubr.msk.f32.gmra.mxu1 %vm89_vm0, %v78_v60 }
  0x3e   :  { %1616 = vmatprep.mubr.msk.f32.mxu0 %vm89_vm0, %v47_v61  ;;  %1664 = vmatprep.mubr.msk.f32.mxu1 %vm89_vm0, %v79_v62 }
  0x41   :  { %1617 = vmatmul.mubr.msk.f32.gmra.mxu0 %vm89_vm0, %v48_v63  ;;  %1665 = vmatmul.mubr.msk.f32.gmra.mxu1 %vm89_vm0, %v80_v0 }
  0xc5   :  { %v1573_v2 = vpop.f32.mrf.mxu0  ;;  %v1621_v4 = vpop.f32.mrf.mxu1 }
  0xc6   :  { %v354_v6 = vadd.f32 %v1573_v2, %v2085_v1  ;;  %v514_v7 = vadd.f32 %v1621_v4, %v2085_v1 }
  0xc7   :  { %v348_v8 = vpop.f32.mrf.mxu0  ;;  %v508_v9 = vpop.f32.mrf.mxu1 }
  0xc8   :  { %v732_v10 = vadd.f32 %v668_v3, %v354_v6  ;;  %v2095_v11 = vadd.f32 %v700_v5, %v514_v7  ;;  %v349_v12 = vadd.f32 %v2085_v1, %v348_v8  ;;  %v509_v14 = vadd.f32 %v2085_v1, %v508_v9  ;;  %v672_v7 = vld [vmem:[%s3050_s3 + $0x28] sm:$0xff]  ;;  %v671_v9 = vld [vmem:[%s3050_s3 + $0x20] sm:$0xff] }
  0xc9   :  { %v1576_v16 = vpop.f32.mrf.mxu0  ;;  %v1624_v17 = vpop.f32.mrf.mxu1  ;;  %v704_v8 = vld [vmem:[%s3050_s3 + $0x128] sm:$0xff] }
  0xca   :  { %v860_v18 = vmul.f32 0.044715, %v732_v10  ;;  %v892_v19 = vmul.f32 0.044715, %v2095_v11  ;;  %v2106_v20 = vadd.f32 %v667_v13, %v349_v12  ;;  %v2108_v21 = vadd.f32 %v699_v15, %v509_v14 }
  0xcb   :  { %v364_v22 = vadd.f32 %v1576_v16, %v2085_v1  ;;  %v524_v24 = vadd.f32 %v1624_v17, %v2085_v1  ;;  %v358_v26 = vpop.f32.mrf.mxu0  ;;  %v518_v27 = vpop.f32.mrf.mxu1  ;;  %v2150_v59 = vmul.f32 0.5, %v732_v10 }
  0xcc   :  { %v924_v28 = vmul.f32 %v860_v18, %v732_v10  ;;  %v956_v29 = vmul.f32 %v892_v19, %v2095_v11  ;;  %v359_v30 = vadd.f32 %v2085_v1, %v358_v26  ;;  %v519_v32 = vadd.f32 %v2085_v1, %v518_v27 }
  0xcd   :  { %v859_v33 = vmul.f32 0.044715, %v2106_v20  ;;  %v891_v34 = vmul.f32 0.044715, %v2108_v21  ;;  %v2130_v38 = vadd.f32 %v670_v23, %v364_v22  ;;  %v2132_v39 = vadd.f32 %v702_v25, %v524_v24  ;;  %v1579_v47 = vpop.f32.mrf.mxu0  ;;  %v1627_v58 = vpop.f32.mrf.mxu1  ;;  %v703_v24 = vld [vmem:[%s3050_s3 + $0x120] sm:$0xff] }
  0xce   :  { %v988_v36 = vmul.f32 %v924_v28, %v732_v10  ;;  %v1020_v37 = vmul.f32 %v956_v29, %v2095_v11  ;;  %v2136_v42 = vadd.f32 %v669_v31, %v359_v30  ;;  %v2140_v46 = vadd.f32 %v701_v35, %v519_v32  ;;  %v674_v32 = vld [vmem:[%s3050_s3 + $0x38] sm:$0xff] }
  0xcf   :  { %v923_v40 = vmul.f32 %v859_v33, %v2106_v20  ;;  %v955_v41 = vmul.f32 %v891_v34, %v2108_v21  ;;  %v862_v45 = vmul.f32 0.044715, %v2130_v38  ;;  %v894_v50 = vmul.f32 0.044715, %v2132_v39  ;;  %v368_v62 = vpop.f32.mrf.mxu0  ;;  %v528_v14 = vpop.f32.mrf.mxu1 }
  0xd0   :  { %v1052_v43 = vadd.f32 %v988_v36, %v732_v10  ;;  %v1084_v44 = vadd.f32 %v1020_v37, %v2095_v11  ;;  %v861_v57 = vmul.f32 0.044715, %v2136_v42  ;;  %v893_v61 = vmul.f32 0.044715, %v2140_v46 }
  0xd1   :  { %v987_v48 = vmul.f32 %v923_v40, %v2106_v20  ;;  %v1019_v49 = vmul.f32 %v955_v41, %v2108_v21  ;;  %v926_v53 = vmul.f32 %v862_v45, %v2130_v38  ;;  %v958_v56 = vmul.f32 %v894_v50, %v2132_v39  ;;  %v1582_v28 = vpop.f32.mrf.mxu0  ;;  %v1630_v41 = vpop.f32.mrf.mxu1  ;;  %v706_v50 = vld [vmem:[%s3050_s3 + $0x138] sm:$0xff] }
  0xd2   :  { %v1116_v51 = vmul.f32 0.7978846, %v1052_v43  ;;  %v1148_v52 = vmul.f32 0.7978846, %v1084_v44  ;;  %v925_v4 = vmul.f32 %v861_v57, %v2136_v42  ;;  %v957_v5 = vmul.f32 %v893_v61, %v2140_v46 }
  0xd3   :  { %v1051_v54 = vadd.f32 %v987_v48, %v2106_v20  ;;  %v1083_v55 = vadd.f32 %v1019_v49, %v2108_v21  ;;  %v990_v60 = vmul.f32 %v926_v53, %v2130_v38  ;;  %v1022_v2 = vmul.f32 %v958_v56, %v2132_v39 }
  0xd4   :  { %1669 = vtanh.f32 %v1116_v51  ;;  %v374_v6 = vadd.f32 %v1579_v47, %v2085_v1  ;;  %v534_v12 = vadd.f32 %v1627_v58, %v2085_v1  ;;  %v369_v13 = vadd.f32 %v2085_v1, %v368_v62  ;;  %v378_v47 = vpop.f32.mrf.mxu0 }
  0xd5   :  { %1671 = vtanh.f32 %v1148_v52  ;;  %v1115_v63 = vmul.f32 0.7978846, %v1051_v54  ;;  %v1147_v0 = vmul.f32 0.7978846, %v1083_v55  ;;  %v1054_v3 = vadd.f32 %v990_v60, %v2130_v38 }
  0xd6   :  { %v1086_v10 = vadd.f32 %v1022_v2, %v2132_v39  ;;  %v989_v16 = vmul.f32 %v925_v4, %v2136_v42  ;;  %v1021_v17 = vmul.f32 %v957_v5, %v2140_v46  ;;  %v2173_v19 = vadd.f32 %v672_v7, %v374_v6 }
  0xd7   :  { %1673 = vtanh.f32 %v1115_v63  ;;  %v1118_v15 = vmul.f32 0.7978846, %v1054_v3  ;;  %v2175_v22 = vadd.f32 %v704_v8, %v534_v12  ;;  %v2177_v23 = vadd.f32 %v671_v9, %v369_v13  ;;  %v538_v12 = vpop.f32.mrf.mxu1 }
  0xd8   :  { %1675 = vtanh.f32 %v1147_v0  ;;  %v1150_v18 = vmul.f32 0.7978846, %v1086_v10  ;;  %v1053_v25 = vadd.f32 %v989_v16, %v2136_v42  ;;  %v1085_v26 = vadd.f32 %v1021_v17, %v2140_v46  ;;  %v673_v10 = vld [vmem:[%s3050_s3 + $0x30] sm:$0xff] }
  0xd9   :  { %1677 = vtanh.f32 %v1118_v15  ;;  %v529_v27 = vadd.f32 %v2085_v1, %v528_v14  ;;  %v828_v29 = vmul.f32 0.5, %v2095_v11  ;;  %v795_v30 = vmul.f32 0.5, %v2106_v20 }
  0xda   :  { %1679 = vtanh.f32 %v1150_v18  ;;  %v864_v31 = vmul.f32 0.044715, %v2173_v19  ;;  %v1117_v33 = vmul.f32 0.7978846, %v1053_v25  ;;  %v1149_v34 = vmul.f32 0.7978846, %v1085_v26 }
  0xdb   :  { %v896_v35 = vmul.f32 0.044715, %v2175_v22  ;;  %v2192_v36 = vadd.f32 %v703_v24, %v529_v27  ;;  %v827_v37 = vmul.f32 0.5, %v2108_v21  ;;  %v863_v11 = vmul.f32 0.044715, %v2177_v23  ;;  %v1585_v27 = vpop.f32.mrf.mxu0 }
  0xdc   :  { %v928_v40 = vmul.f32 %v864_v31, %v2173_v19  ;;  %v384_v20 = vadd.f32 %v1582_v28, %v2085_v1  ;;  %v2199_v43 = vmul.f32 0.5, %v2130_v38  ;;  %1681 = vtanh.f32 %v1117_v33  ;;  %v1633_v33 = vpop.f32.mrf.mxu1 }
  0xdd   :  { %v960_v44 = vmul.f32 %v896_v35, %v2175_v22  ;;  %v895_v45 = vmul.f32 0.044715, %v2192_v36  ;;  %1683 = vtanh.f32 %v1149_v34  ;;  %v927_v21 = vmul.f32 %v863_v11, %v2177_v23  ;;  %v676_v11 = vld [vmem:[%s3050_s3 + $0x48] sm:$0xff] }
  0xde   :  { %v992_v48 = vmul.f32 %v928_v40, %v2173_v19  ;;  %v2205_v49 = vadd.f32 %v674_v32, %v384_v20  ;;  %v2211_v38 = vmul.f32 0.5, %v2132_v39  ;;  %v544_v53 = vadd.f32 %v1630_v41, %v2085_v1 }
  0xdf   :  { %v1024_v51 = vmul.f32 %v960_v44, %v2175_v22  ;;  %v959_v52 = vmul.f32 %v895_v45, %v2192_v36  ;;  %v991_v56 = vmul.f32 %v927_v21, %v2177_v23  ;;  %v379_v58 = vadd.f32 %v2085_v1, %v378_v47  ;;  %v708_v45 = vld [vmem:[%s3050_s3 + $0x148] sm:$0xff] }
  0xe0   :  { %v1056_v55 = vadd.f32 %v992_v48, %v2173_v19  ;;  %v866_v57 = vmul.f32 0.044715, %v2205_v49  ;;  %v2222_v63 = vadd.f32 %v706_v50, %v544_v53  ;;  %v797_v7 = vmul.f32 0.5, %v2136_v42 }
  0xe1   :  { %v1670_v54 = vpop.eup %1669  ;;  %v1088_v39 = vadd.f32 %v1024_v51, %v2175_v22  ;;  %v1023_v62 = vmul.f32 %v959_v52, %v2192_v36  ;;  %v1055_v3 = vadd.f32 %v991_v56, %v2177_v23  ;;  %v2242_v26 = vadd.f32 %v673_v10, %v379_v58 }
  0xe2   :  { %v1672_v60 = vpop.eup %1671  ;;  %v1244_v61 = vadd.f32 1.0, %v1670_v54  ;;  %v1120_v2 = vmul.f32 0.7978846, %v1056_v55  ;;  %v930_v4 = vmul.f32 %v866_v57, %v2205_v49  ;;  %v898_v25 = vmul.f32 0.044715, %v2222_v63  ;;  %v388_v55 = vpop.f32.mrf.mxu0 }
  0xe3   :  { %v1276_v0 = vadd.f32 1.0, %v1672_v60  ;;  %v1152_v8 = vmul.f32 0.7978846, %v1088_v39  ;;  %v1087_v9 = vadd.f32 %v1023_v62, %v2192_v36  ;;  %v1119_v16 = vmul.f32 0.7978846, %v1055_v3 }
  0xe4   :  { %v1674_v5 = vpop.eup %1673  ;;  %v1308_v6 = vmul.f32 %v1244_v61, %v2150_v59  ;;  %1685 = vtanh.f32 %v1120_v2  ;;  %v994_v17 = vmul.f32 %v930_v4, %v2205_v49  ;;  %v962_v35 = vmul.f32 %v898_v25, %v2222_v63 }
  0xe5   :  { %v1676_v13 = vpop.eup %1675  ;;  %v1340_v14 = vmul.f32 %v1276_v0, %v828_v29  ;;  %v1243_v15 = vadd.f32 1.0, %v1674_v5  ;;  %1687 = vtanh.f32 %v1152_v8  ;;  %v1151_v42 = vmul.f32 0.7978846, %v1087_v9  ;;  %v548_v0 = vpop.f32.mrf.mxu1 }
  0xe6   :  { %1372 = vst.msk [vmem:[%s3051_s4 + $0x8] sm:$0xff] %vm89_vm0, %v1308_v6  ;;  %v1275_v59 = vadd.f32 1.0, %v1676_v13  ;;  %v1678_v18 = vpop.eup %1677  ;;  %1689 = vtanh.f32 %v1119_v16  ;;  %v1058_v32 = vadd.f32 %v994_v17, %v2205_v49  ;;  %v865_v40 = vmul.f32 0.044715, %v2242_v26  ;;  %v675_v6 = vld [vmem:[%s3050_s3 + $0x40] sm:$0xff]  ;;  %v1588_v9 = vpop.f32.mrf.mxu0 }
  0xe7   :  { %1404 = vst.msk [vmem:[%s3051_s4 + $0x108] sm:$0xff] %vm89_vm0, %v1340_v14  ;;  %v1307_v24 = vmul.f32 %v1243_v15, %v795_v30  ;;  %v1680_v28 = vpop.eup %1679  ;;  %v1246_v31 = vadd.f32 1.0, %v1678_v18  ;;  %1691 = vtanh.f32 %v1151_v42  ;;  %v829_v30 = vmul.f32 0.5, %v2140_v46 }
  0xe8   :  { %v1339_v29 = vmul.f32 %v1275_v59, %v827_v37  ;;  %v1278_v34 = vadd.f32 1.0, %v1680_v28  ;;  %v705_v37 = vld [vmem:[%s3050_s3 + $0x130] sm:$0xff]  ;;  %v1122_v46 = vmul.f32 0.7978846, %v1058_v32  ;;  %v539_v41 = vadd.f32 %v2085_v1, %v538_v12 }
  0xe9   :  { %1371 = vst.msk [vmem:[%s3051_s4] sm:$0xff] %vm89_vm0, %v1307_v24  ;;  %v1310_v20 = vmul.f32 %v1246_v31, %v2199_v43  ;;  %v394_v44 = vadd.f32 %v1585_v27, %v2085_v1  ;;  %v1682_v47 = vpop.eup %1681  ;;  %v1026_v21 = vmul.f32 %v962_v35, %v2222_v63  ;;  %v929_v50 = vmul.f32 %v865_v40, %v2242_v26  ;;  %v1636_v40 = vpop.f32.mrf.mxu1 }
  0xea   :  { %1403 = vst.msk [vmem:[%s3051_s4 + $0x100] sm:$0xff] %vm89_vm0, %v1339_v29  ;;  %v1342_v48 = vmul.f32 %v1278_v34, %v2211_v38  ;;  %v554_v51 = vadd.f32 %v1633_v33, %v2085_v1  ;;  %v1684_v52 = vpop.eup %1683  ;;  %v1245_v43 = vadd.f32 1.0, %v1682_v47  ;;  %1693 = vtanh.f32 %v1122_v46 }
  0xeb   :  { %1374 = vst.msk [vmem:[%s3051_s4 + $0x18] sm:$0xff] %vm89_vm0, %v1310_v20  ;;  %v2276_v53 = vadd.f32 %v705_v37, %v539_v41  ;;  %v2278_v54 = vadd.f32 %v676_v11, %v394_v44  ;;  %v1277_v38 = vadd.f32 1.0, %v1684_v52  ;;  %v1090_v56 = vadd.f32 %v1026_v21, %v2222_v63  ;;  %v678_v41 = vld [vmem:[%s3050_s3 + $0x58] sm:$0xff]  ;;  %v398_v21 = vpop.f32.mrf.mxu0 }
  0xec   :  { %1406 = vst.msk [vmem:[%s3051_s4 + $0x118] sm:$0xff] %vm89_vm0, %v1342_v48  ;;  %v993_v57 = vmul.f32 %v929_v50, %v2242_v26  ;;  %v2286_v58 = vadd.f32 %v708_v45, %v554_v51  ;;  %v1309_v60 = vmul.f32 %v1245_v43, %v797_v7  ;;  %v800_v61 = vmul.f32 0.5, %v2173_v19  ;;  %v710_v43 = vld [vmem:[%s3050_s3 + $0x158] sm:$0xff] }
  0xed   :  { %v832_v39 = vmul.f32 0.5, %v2175_v22  ;;  %v897_v62 = vmul.f32 0.044715, %v2276_v53  ;;  %v1341_v2 = vmul.f32 %v1277_v38, %v829_v30  ;;  %v1154_v3 = vmul.f32 0.7978846, %v1090_v56 }
  0xee   :  { %v1057_v4 = vadd.f32 %v993_v57, %v2242_v26  ;;  %v868_v5 = vmul.f32 0.044715, %v2278_v54  ;;  %1373 = vst.msk [vmem:[%s3051_s4 + $0x10] sm:$0xff] %vm89_vm0, %v1309_v60  ;;  %v799_v19 = vmul.f32 0.5, %v2177_v23  ;;  %v900_v7 = vmul.f32 0.044715, %v2286_v58  ;;  %v558_v60 = vpop.f32.mrf.mxu1 }
  0xef   :  { %v961_v22 = vmul.f32 %v897_v62, %v2276_v53  ;;  %v389_v8 = vadd.f32 %v2085_v1, %v388_v55  ;;  %1405 = vst.msk [vmem:[%s3051_s4 + $0x110] sm:$0xff] %vm89_vm0, %v1341_v2  ;;  %1695 = vtanh.f32 %v1154_v3  ;;  %v549_v13 = vadd.f32 %v2085_v1, %v548_v0  ;;  %v707_v23 = vld [vmem:[%s3050_s3 + $0x140] sm:$0xff]  ;;  %v677_v57 = vld [vmem:[%s3050_s3 + $0x50] sm:$0xff] }
  0xf0   :  { %v1121_v10 = vmul.f32 0.7978846, %v1057_v4  ;;  %v932_v12 = vmul.f32 %v868_v5, %v2278_v54  ;;  %v831_v15 = vmul.f32 0.5, %v2192_v36  ;;  %v964_v59 = vmul.f32 %v900_v7, %v2286_v58  ;;  %v709_v5 = vld [vmem:[%s3050_s3 + $0x150] sm:$0xff] }
  0xf1   :  { %v1686_v14 = vpop.eup %1685  ;;  %v1025_v16 = vmul.f32 %v961_v22, %v2276_v53  ;;  %v2316_v42 = vadd.f32 %v675_v6, %v389_v8  ;;  %v404_v25 = vadd.f32 %v1588_v9, %v2085_v1  ;;  %v2322_v36 = vadd.f32 %v707_v23, %v549_v13 }
  0xf2   :  { %v1688_v17 = vpop.eup %1687  ;;  %v1248_v18 = vadd.f32 1.0, %v1686_v14  ;;  %1697 = vtanh.f32 %v1121_v10  ;;  %v996_v24 = vmul.f32 %v932_v12, %v2278_v54  ;;  %v1028_v31 = vmul.f32 %v964_v59, %v2286_v58 }
  0xf3   :  { %v1690_v27 = vpop.eup %1689  ;;  %v1280_v28 = vadd.f32 1.0, %v1688_v17  ;;  %v1089_v29 = vadd.f32 %v1025_v16, %v2276_v53  ;;  %v867_v35 = vmul.f32 0.044715, %v2316_v42  ;;  %v802_v45 = vmul.f32 0.5, %v2205_v49 }
  0xf4   :  { %v1692_v32 = vpop.eup %1691  ;;  %v1312_v33 = vmul.f32 %v1248_v18, %v800_v61  ;;  %v1247_v34 = vadd.f32 1.0, %v1690_v27  ;;  %v1060_v30 = vadd.f32 %v996_v24, %v2278_v54  ;;  %v1092_v46 = vadd.f32 %v1028_v31, %v2286_v58  ;;  %v1639_v18 = vpop.f32.mrf.mxu1 }
  0xf5   :  { %v1344_v37 = vmul.f32 %v1280_v28, %v832_v39  ;;  %v1279_v11 = vadd.f32 1.0, %v1692_v32  ;;  %v1153_v20 = vmul.f32 0.7978846, %v1089_v29  ;;  %v931_v48 = vmul.f32 %v867_v35, %v2316_v42 }
  0xf6   :  { %1376 = vst.msk [vmem:[%s3051_s4 + $0x28] sm:$0xff] %vm89_vm0, %v1312_v33  ;;  %v1311_v44 = vmul.f32 %v1247_v34, %v799_v19  ;;  %v1124_v47 = vmul.f32 0.7978846, %v1060_v30  ;;  %v1156_v51 = vmul.f32 0.7978846, %v1092_v46  ;;  %v2349_v38 = vadd.f32 %v678_v41, %v404_v25  ;;  %v680_v34 = vld [vmem:[%s3050_s3 + $0x68] sm:$0xff] }
  0xf7   :  { %1408 = vst.msk [vmem:[%s3051_s4 + $0x128] sm:$0xff] %vm89_vm0, %v1344_v37  ;;  %v1343_v50 = vmul.f32 %v1279_v11, %v831_v15  ;;  %1699 = vtanh.f32 %v1153_v20  ;;  %v899_v52 = vmul.f32 0.044715, %v2322_v36  ;;  %v1694_v55 = vpop.eup %1693  ;;  %v995_v49 = vmul.f32 %v931_v48, %v2316_v42 }
  0xf8   :  { %1375 = vst.msk [vmem:[%s3051_s4 + $0x20] sm:$0xff] %vm89_vm0, %v1311_v44  ;;  %1701 = vtanh.f32 %v1124_v47  ;;  %v564_v56 = vadd.f32 %v1636_v40, %v2085_v1  ;;  %v1250_v61 = vadd.f32 1.0, %v1694_v55  ;;  %v399_v62 = vadd.f32 %v2085_v1, %v398_v21  ;;  %v712_v40 = vld [vmem:[%s3050_s3 + $0x168] sm:$0xff]  ;;  %v568_v44 = vpop.f32.mrf.mxu1 }
  0xf9   :  { %1407 = vst.msk [vmem:[%s3051_s4 + $0x120] sm:$0xff] %vm89_vm0, %v1343_v50  ;;  %1703 = vtanh.f32 %v1156_v51  ;;  %v963_v39 = vmul.f32 %v899_v52, %v2322_v36  ;;  %v834_v0 = vmul.f32 0.5, %v2222_v63  ;;  %v1059_v2 = vadd.f32 %v995_v49, %v2316_v42 }
  0xfa   :  { %v870_v3 = vmul.f32 0.044715, %v2349_v38  ;;  %v2364_v4 = vadd.f32 %v710_v43, %v564_v56  ;;  %v1314_v6 = vmul.f32 %v1250_v61, %v802_v45  ;;  %v2370_v22 = vadd.f32 %v677_v57, %v399_v62  ;;  %v679_v57 = vld [vmem:[%s3050_s3 + $0x60] sm:$0xff] }
  0xfb   :  { %v1027_v19 = vmul.f32 %v963_v39, %v2322_v36  ;;  %v559_v7 = vadd.f32 %v2085_v1, %v558_v60  ;;  %v801_v8 = vmul.f32 0.5, %v2242_v26  ;;  %v1123_v63 = vmul.f32 0.7978846, %v1059_v2  ;;  %v1591_v26 = vpop.f32.mrf.mxu0  ;;  %v711_v2 = vld [vmem:[%s3050_s3 + $0x160] sm:$0xff] }
  0xfc   :  { %v934_v9 = vmul.f32 %v870_v3, %v2349_v38  ;;  %v902_v10 = vmul.f32 0.044715, %v2364_v4  ;;  %v1696_v12 = vpop.eup %1695  ;;  %1378 = vst.msk [vmem:[%s3051_s4 + $0x38] sm:$0xff] %vm89_vm0, %v1314_v6  ;;  %v833_v13 = vmul.f32 0.5, %v2276_v53  ;;  %v869_v14 = vmul.f32 0.044715, %v2370_v22 }
  0xfd   :  { %v1091_v23 = vadd.f32 %v1027_v19, %v2322_v36  ;;  %v2383_v15 = vadd.f32 %v709_v5, %v559_v7  ;;  %v1282_v16 = vadd.f32 1.0, %v1696_v12  ;;  %1705 = vtanh.f32 %v1123_v63  ;;  %v408_v37 = vpop.f32.mrf.mxu0 }
  0xfe   :  { %v998_v59 = vmul.f32 %v934_v9, %v2349_v38  ;;  %v966_v17 = vmul.f32 %v902_v10, %v2364_v4  ;;  %v804_v25 = vmul.f32 0.5, %v2278_v54  ;;  %v933_v53 = vmul.f32 %v869_v14, %v2370_v22  ;;  %v1642_v10 = vpop.f32.mrf.mxu1 }
  0xff   :  { %v1698_v24 = vpop.eup %1697  ;;  %v1155_v27 = vmul.f32 0.7978846, %v1091_v23  ;;  %v901_v28 = vmul.f32 0.044715, %v2383_v15  ;;  %v1346_v29 = vmul.f32 %v1282_v16, %v834_v0  ;;  %v414_v35 = vadd.f32 %v1591_v26, %v2085_v1  ;;  %v1594_v3 = vpop.f32.mrf.mxu0 }
 0x100   :  { %v1249_v31 = vadd.f32 1.0, %v1698_v24  ;;  %v1062_v32 = vadd.f32 %v998_v59, %v2349_v38  ;;  %v1030_v33 = vmul.f32 %v966_v17, %v2364_v4  ;;  %v997_v30 = vmul.f32 %v933_v53, %v2370_v22  ;;  %v714_v17 = vld [vmem:[%s3050_s3 + $0x178] sm:$0xff] }
 0x101   :  { %1707 = vtanh.f32 %v1155_v27  ;;  %v965_v54 = vmul.f32 %v901_v28, %v2383_v15  ;;  %1410 = vst.msk [vmem:[%s3051_s4 + $0x138] sm:$0xff] %vm89_vm0, %v1346_v29  ;;  %v574_v41 = vadd.f32 %v1639_v18, %v2085_v1  ;;  %v836_v45 = vmul.f32 0.5, %v2286_v58 }
 0x102   :  { %v1313_v11 = vmul.f32 %v1249_v31, %v801_v8  ;;  %v1126_v20 = vmul.f32 0.7978846, %v1062_v32  ;;  %v1094_v46 = vadd.f32 %v1030_v33, %v2364_v4  ;;  %v1061_v47 = vadd.f32 %v997_v30, %v2370_v22 }
 0x103   :  { %v1029_v48 = vmul.f32 %v965_v54, %v2383_v15  ;;  %v2410_v21 = vadd.f32 %v680_v34, %v414_v35  ;;  %v2416_v52 = vadd.f32 %v712_v40, %v574_v41  ;;  %v409_v43 = vadd.f32 %v2085_v1, %v408_v37 }
 0x104   :  { %v1700_v50 = vpop.eup %1699  ;;  %1377 = vst.msk [vmem:[%s3051_s4 + $0x30] sm:$0xff] %vm89_vm0, %v1313_v11  ;;  %1709 = vtanh.f32 %v1126_v20  ;;  %v1158_v51 = vmul.f32 0.7978846, %v1094_v46  ;;  %v1125_v49 = vmul.f32 0.7978846, %v1061_v47  ;;  %v569_v60 = vadd.f32 %v2085_v1, %v568_v44  ;;  %v418_v11 = vpop.f32.mrf.mxu0 }
 0x105   :  { %v1702_v55 = vpop.eup %1701  ;;  %v1281_v58 = vadd.f32 1.0, %v1700_v50  ;;  %v1093_v56 = vadd.f32 %v1029_v48, %v2383_v15  ;;  %v803_v62 = vmul.f32 0.5, %v2316_v42  ;;  %v872_v0 = vmul.f32 0.044715, %v2410_v21  ;;  %v682_v42 = vld [vmem:[%s3050_s3 + $0x78] sm:$0xff]  ;;  %v578_v44 = vpop.f32.mrf.mxu1 }
 0x106   :  { %v1704_v61 = vpop.eup %1703  ;;  %v1252_v39 = vadd.f32 1.0, %v1702_v55  ;;  %1711 = vtanh.f32 %v1158_v51  ;;  %v904_v63 = vmul.f32 0.044715, %v2416_v52  ;;  %v2431_v9 = vadd.f32 %v679_v57, %v409_v43 }
 0x107   :  { %v1345_v5 = vmul.f32 %v1281_v58, %v833_v13  ;;  %v1284_v6 = vadd.f32 1.0, %v1704_v61  ;;  %1713 = vtanh.f32 %v1125_v49  ;;  %v1157_v19 = vmul.f32 0.7978846, %v1093_v56 }
 0x108   :  { %v1316_v7 = vmul.f32 %v1252_v39, %v804_v25  ;;  %v936_v8 = vmul.f32 %v872_v0, %v2410_v21  ;;  %v2440_v13 = vadd.f32 %v711_v2, %v569_v60  ;;  %v424_v23 = vadd.f32 %v1594_v3, %v2085_v1  ;;  %v1597_v60 = vpop.f32.mrf.mxu0  ;;  %v713_v3 = vld [vmem:[%s3050_s3 + $0x170] sm:$0xff] }
 0x109   :  { %1409 = vst.msk [vmem:[%s3051_s4 + $0x130] sm:$0xff] %vm89_vm0, %v1345_v5  ;;  %v1348_v12 = vmul.f32 %v1284_v6, %v836_v45  ;;  %1715 = vtanh.f32 %v1157_v19  ;;  %v835_v14 = vmul.f32 0.5, %v2322_v36  ;;  %v968_v16 = vmul.f32 %v904_v63, %v2416_v52  ;;  %v1645_v5 = vpop.f32.mrf.mxu1 }
 0x10a   :  { %1380 = vst.msk [vmem:[%s3051_s4 + $0x48] sm:$0xff] %vm89_vm0, %v1316_v7  ;;  %v1000_v26 = vmul.f32 %v936_v8, %v2410_v21  ;;  %v871_v59 = vmul.f32 0.044715, %v2431_v9  ;;  %v1706_v18 = vpop.eup %1705  ;;  %v806_v24 = vmul.f32 0.5, %v2349_v38  ;;  %v903_v36 = vmul.f32 0.044715, %v2440_v13 }
 0x10b   :  { %1412 = vst.msk [vmem:[%s3051_s4 + $0x148] sm:$0xff] %vm89_vm0, %v1348_v12  ;;  %v2460_v25 = vadd.f32 %v682_v42, %v424_v23  ;;  %v584_v27 = vadd.f32 %v1642_v10, %v2085_v1  ;;  %v1251_v53 = vadd.f32 1.0, %v1706_v18  ;;  %v1032_v29 = vmul.f32 %v968_v16, %v2416_v52 }
 0x10c   :  { %v1064_v28 = vadd.f32 %v1000_v26, %v2410_v21  ;;  %v935_v31 = vmul.f32 %v871_v59, %v2431_v9  ;;  %v838_v32 = vmul.f32 0.5, %v2364_v4  ;;  %v967_v33 = vmul.f32 %v903_v36, %v2440_v13  ;;  %v684_v59 = vld [vmem:[%s3050_s3 + $0x88] sm:$0xff] }
 0x10d   :  { %v874_v34 = vmul.f32 0.044715, %v2460_v25  ;;  %v2469_v38 = vadd.f32 %v714_v17, %v584_v27  ;;  %v1315_v54 = vmul.f32 %v1251_v53, %v803_v62  ;;  %v1096_v40 = vadd.f32 %v1032_v29, %v2416_v52  ;;  %v716_v36 = vld [vmem:[%s3050_s3 + $0x188] sm:$0xff]  ;;  %v588_v27 = vpop.f32.mrf.mxu1 }
 0x10e   :  { %v1708_v30 = vpop.eup %1707  ;;  %v1128_v35 = vmul.f32 0.7978846, %v1064_v28  ;;  %v999_v37 = vmul.f32 %v935_v31, %v2431_v9  ;;  %v805_v46 = vmul.f32 0.5, %v2370_v22  ;;  %v1031_v41 = vmul.f32 %v967_v33, %v2440_v13  ;;  %v681_v22 = vld [vmem:[%s3050_s3 + $0x70] sm:$0xff] }
 0x10f   :  { %v1283_v20 = vadd.f32 1.0, %v1708_v30  ;;  %v938_v4 = vmul.f32 %v874_v34, %v2460_v25  ;;  %1379 = vst.msk [vmem:[%s3051_s4 + $0x40] sm:$0xff] %vm89_vm0, %v1315_v54  ;;  %v1160_v45 = vmul.f32 0.7978846, %v1096_v40  ;;  %v906_v48 = vmul.f32 0.044715, %v2469_v38 }
 0x110   :  { %1717 = vtanh.f32 %v1128_v35  ;;  %v1063_v47 = vadd.f32 %v999_v37, %v2431_v9  ;;  %v1095_v43 = vadd.f32 %v1031_v41, %v2440_v13  ;;  %v419_v58 = vadd.f32 %v2085_v1, %v418_v11  ;;  %v715_v54 = vld [vmem:[%s3050_s3 + $0x180] sm:$0xff] }
 0x111   :  { %v1710_v50 = vpop.eup %1709  ;;  %v1347_v51 = vmul.f32 %v1283_v20, %v835_v14  ;;  %v1002_v55 = vmul.f32 %v938_v4, %v2460_v25  ;;  %1719 = vtanh.f32 %v1160_v45  ;;  %v970_v57 = vmul.f32 %v906_v48, %v2469_v38 }
 0x112   :  { %v1254_v49 = vadd.f32 1.0, %v1710_v50  ;;  %v1127_v56 = vmul.f32 0.7978846, %v1063_v47  ;;  %v1159_v39 = vmul.f32 0.7978846, %v1095_v43  ;;  %v2494_v0 = vadd.f32 %v681_v22, %v419_v58 }
 0x113   :  { %v1712_v61 = vpop.eup %1711  ;;  %1411 = vst.msk [vmem:[%s3051_s4 + $0x140] sm:$0xff] %vm89_vm0, %v1347_v51  ;;  %v1066_v62 = vadd.f32 %v1002_v55, %v2460_v25  ;;  %v579_v2 = vadd.f32 %v2085_v1, %v578_v44  ;;  %v1034_v8 = vmul.f32 %v970_v57, %v2469_v38  ;;  %v837_v42 = vmul.f32 0.5, %v2383_v15  ;;  %v428_v15 = vpop.f32.mrf.mxu0 }
 0x114   :  { %v1714_v6 = vpop.eup %1713  ;;  %v1318_v19 = vmul.f32 %v1254_v49, %v806_v24  ;;  %v1286_v7 = vadd.f32 1.0, %v1712_v61  ;;  %1721 = vtanh.f32 %v1127_v56  ;;  %v873_v26 = vmul.f32 0.044715, %v2494_v0 }
 0x115   :  { %v1253_v63 = vadd.f32 1.0, %v1714_v6  ;;  %1723 = vtanh.f32 %v1159_v39  ;;  %v1130_v10 = vmul.f32 0.7978846, %v1066_v62  ;;  %v1098_v14 = vadd.f32 %v1034_v8, %v2469_v38  ;;  %v1600_v11 = vpop.f32.mrf.mxu0  ;;  %v686_v39 = vld [vmem:[%s3050_s3 + $0x98] sm:$0xff]  ;;  %v1648_v62 = vpop.f32.mrf.mxu1 }
 0x116   :  { %v1716_v12 = vpop.eup %1715  ;;  %1382 = vst.msk [vmem:[%s3051_s4 + $0x58] sm:$0xff] %vm89_vm0, %v1318_v19  ;;  %v1350_v23 = vmul.f32 %v1286_v7, %v838_v32  ;;  %v2508_v16 = vadd.f32 %v713_v3, %v579_v2  ;;  %v434_v24 = vadd.f32 %v1597_v60, %v2085_v1  ;;  %v808_v53 = vmul.f32 0.5, %v2410_v21  ;;  %v683_v32 = vld [vmem:[%s3050_s3 + $0x80] sm:$0xff] }
 0x117   :  { %v1317_v17 = vmul.f32 %v1253_v63, %v805_v46  ;;  %v1285_v18 = vadd.f32 1.0, %v1716_v12  ;;  %1725 = vtanh.f32 %v1130_v10  ;;  %v1162_v28 = vmul.f32 0.7978846, %v1098_v14 }
 0x118   :  { %1414 = vst.msk [vmem:[%s3051_s4 + $0x158] sm:$0xff] %vm89_vm0, %v1350_v23  ;;  %v937_v29 = vmul.f32 %v873_v26, %v2494_v0  ;;  %v905_v31 = vmul.f32 0.044715, %v2508_v16  ;;  %v2531_v34 = vadd.f32 %v684_v59, %v434_v24  ;;  %v594_v30 = vadd.f32 %v1645_v5, %v2085_v1  ;;  %v438_v23 = vpop.f32.mrf.mxu0 }
 0x119   :  { %1381 = vst.msk [vmem:[%s3051_s4 + $0x50] sm:$0xff] %vm89_vm0, %v1317_v17  ;;  %v1349_v33 = vmul.f32 %v1285_v18, %v837_v42  ;;  %v429_v21 = vadd.f32 %v2085_v1, %v428_v15  ;;  %1727 = vtanh.f32 %v1162_v28  ;;  %v589_v37 = vadd.f32 %v2085_v1, %v588_v27  ;;  %v598_v17 = vpop.f32.mrf.mxu1 }
 0x11a   :  { %v1001_v35 = vmul.f32 %v937_v29, %v2494_v0  ;;  %v969_v40 = vmul.f32 %v905_v31, %v2508_v16  ;;  %v840_v20 = vmul.f32 0.5, %v2416_v52  ;;  %v876_v46 = vmul.f32 0.044715, %v2531_v34 }
 0x11b   :  { %1413 = vst.msk [vmem:[%s3051_s4 + $0x150] sm:$0xff] %vm89_vm0, %v1349_v33  ;;  %v2547_v41 = vadd.f32 %v716_v36, %v594_v30  ;;  %v2549_v4 = vadd.f32 %v683_v32, %v429_v21  ;;  %v807_v44 = vmul.f32 0.5, %v2431_v9  ;;  %v2554_v48 = vadd.f32 %v715_v54, %v589_v37  ;;  %v718_v21 = vld [vmem:[%s3050_s3 + $0x198] sm:$0xff]  ;;  %v685_v54 = vld [vmem:[%s3050_s3 + $0x90] sm:$0xff] }
 0x11c   :  { %v1065_v45 = vadd.f32 %v1001_v35, %v2494_v0  ;;  %v1033_v47 = vmul.f32 %v969_v40, %v2508_v16  ;;  %v839_v50 = vmul.f32 0.5, %v2440_v13  ;;  %v940_v51 = vmul.f32 %v876_v46, %v2531_v34  ;;  %v717_v35 = vld [vmem:[%s3050_s3 + $0x190] sm:$0xff]  ;;  %v1603_v40 = vpop.f32.mrf.mxu0 }
 0x11d   :  { %v1718_v22 = vpop.eup %1717  ;;  %v908_v52 = vmul.f32 0.044715, %v2547_v41  ;;  %v444_v43 = vadd.f32 %v1600_v11, %v2085_v1  ;;  %v875_v9 = vmul.f32 0.044715, %v2549_v4  ;;  %v810_v57 = vmul.f32 0.5, %v2460_v25 }
 0x11e   :  { %v1256_v55 = vadd.f32 1.0, %v1718_v22  ;;  %v1129_v58 = vmul.f32 0.7978846, %v1065_v45  ;;  %v1097_v49 = vadd.f32 %v1033_v47, %v2508_v16  ;;  %v1720_v56 = vpop.eup %1719  ;;  %v1004_v60 = vmul.f32 %v940_v51, %v2531_v34  ;;  %v2612_v11 = vld [vmem:[%s3049_s2] ss:$0 sm:$0xff] }
 0x11f   :  { %v972_v61 = vmul.f32 %v908_v52, %v2547_v41  ;;  %v907_v13 = vmul.f32 0.044715, %v2554_v48  ;;  %v1288_v3 = vadd.f32 1.0, %v1720_v56  ;;  %v939_v7 = vmul.f32 %v875_v9, %v2549_v4 }
 0x120   :  { %v1320_v2 = vmul.f32 %v1256_v55, %v808_v53  ;;  %1729 = vtanh.f32 %v1129_v58  ;;  %v1161_v5 = vmul.f32 0.7978846, %v1097_v49  ;;  %v1068_v19 = vadd.f32 %v1004_v60, %v2531_v34  ;;  %v688_v58 = vld [vmem:[%s3050_s3 + $0xa8] sm:$0xff]  ;;  %v448_v60 = vpop.f32.mrf.mxu0 }
 0x121   :  { %v1722_v6 = vpop.eup %1721  ;;  %v1036_v25 = vmul.f32 %v972_v61, %v2547_v41  ;;  %v971_v8 = vmul.f32 %v907_v13, %v2554_v48  ;;  %v1352_v42 = vmul.f32 %v1288_v3, %v840_v20  ;;  %v2577_v12 = vadd.f32 %v686_v39, %v444_v43 }
 0x122   :  { %v1724_v63 = vpop.eup %1723  ;;  %1384 = vst.msk [vmem:[%s3051_s4 + $0x68] sm:$0xff] %vm89_vm0, %v1320_v2  ;;  %v1255_v10 = vadd.f32 1.0, %v1722_v6  ;;  %1731 = vtanh.f32 %v1161_v5  ;;  %v1132_v26 = vmul.f32 0.7978846, %v1068_v19  ;;  %v1003_v15 = vmul.f32 %v939_v7, %v2549_v4 }
 0x123   :  { %v1287_v14 = vadd.f32 1.0, %v1724_v63  ;;  %v1100_v59 = vadd.f32 %v1036_v25, %v2547_v41  ;;  %1416 = vst.msk [vmem:[%s3051_s4 + $0x168] sm:$0xff] %vm89_vm0, %v1352_v42  ;;  %v842_v36 = vmul.f32 0.5, %v2469_v38  ;;  %v1035_v27 = vmul.f32 %v971_v8, %v2554_v48  ;;  %v687_v63 = vld [vmem:[%s3050_s3 + $0xa0] sm:$0xff] }
 0x124   :  { %v1726_v18 = vpop.eup %1725  ;;  %v1319_v24 = vmul.f32 %v1255_v10, %v807_v44  ;;  %v878_v53 = vmul.f32 0.044715, %v2577_v12  ;;  %1733 = vtanh.f32 %v1132_v26  ;;  %v1067_v32 = vadd.f32 %v1003_v15, %v2549_v4  ;;  %v1651_v44 = vpop.f32.mrf.mxu1 }
 0x125   :  { %v1351_v28 = vmul.f32 %v1287_v14, %v839_v50  ;;  %v1258_v29 = vadd.f32 1.0, %v1726_v18  ;;  %v1164_v31 = vmul.f32 0.7978846, %v1100_v59  ;;  %v1099_v33 = vadd.f32 %v1035_v27, %v2554_v48 }
 0x126   :  { %1383 = vst.msk [vmem:[%s3051_s4 + $0x60] sm:$0xff] %vm89_vm0, %v1319_v24  ;;  %v942_v30 = vmul.f32 %v878_v53, %v2577_v12  ;;  %v604_v38 = vadd.f32 %v1648_v62, %v2085_v1  ;;  %v1728_v37 = vpop.eup %1727  ;;  %v439_v20 = vadd.f32 %v2612_v11, %v438_v23  ;;  %v599_v46 = vadd.f32 %v2612_v11, %v598_v17  ;;  %v608_v59 = vpop.f32.mrf.mxu1 }
 0x127   :  { %1415 = vst.msk [vmem:[%s3051_s4 + $0x160] sm:$0xff] %vm89_vm0, %v1351_v28  ;;  %v1322_v1 = vmul.f32 %v1258_v29, %v810_v57  ;;  %1735 = vtanh.f32 %v1164_v31  ;;  %v1290_v45 = vadd.f32 1.0, %v1728_v37  ;;  %v1131_v47 = vmul.f32 0.7978846, %v1067_v32  ;;  %v720_v57 = vld [vmem:[%s3050_s3 + $0x1a8] sm:$0xff] }
 0x128   :  { %v1163_v22 = vmul.f32 0.7978846, %v1099_v33  ;;  %v1006_v50 = vmul.f32 %v942_v30, %v2577_v12  ;;  %v2621_v51 = vadd.f32 %v718_v21, %v604_v38  ;;  %v2623_v52 = vadd.f32 %v685_v54, %v439_v20  ;;  %v1606_v33 = vpop.f32.mrf.mxu0 }
 0x129   :  { %1386 = vst.msk [vmem:[%s3051_s4 + $0x78] sm:$0xff] %vm89_vm0, %v1322_v1  ;;  %v2625_v43 = vadd.f32 %v717_v35, %v599_v46  ;;  %v454_v55 = vadd.f32 %v2612_v11, %v1603_v40  ;;  %v1354_v49 = vmul.f32 %v1290_v45, %v842_v36  ;;  %1737 = vtanh.f32 %v1131_v47  ;;  %v719_v46 = vld [vmem:[%s3050_s3 + $0x1a0] sm:$0xff] }
 0x12a   :  { %v1070_v9 = vadd.f32 %v1006_v50, %v2577_v12  ;;  %v614_v56 = vadd.f32 %v2612_v11, %v1651_v44  ;;  %v809_v61 = vmul.f32 0.5, %v2494_v0  ;;  %1739 = vtanh.f32 %v1163_v22 }
 0x12b   :  { %v910_v13 = vmul.f32 0.044715, %v2621_v51  ;;  %1418 = vst.msk [vmem:[%s3051_s4 + $0x178] sm:$0xff] %vm89_vm0, %v1354_v49  ;;  %v841_v39 = vmul.f32 0.5, %v2508_v16  ;;  %v877_v2 = vmul.f32 0.044715, %v2623_v52  ;;  %v2644_v3 = vadd.f32 %v688_v58, %v454_v55  ;;  %v1654_v58 = vpop.f32.mrf.mxu1  ;;  %v458_v49 = vpop.f32.mrf.mxu0 }
 0x12c   :  { %v1134_v62 = vmul.f32 0.7978846, %v1070_v9  ;;  %v909_v0 = vmul.f32 0.044715, %v2625_v43  ;;  %v2648_v19 = vadd.f32 %v720_v57, %v614_v56  ;;  %v449_v25 = vadd.f32 %v2612_v11, %v448_v60  ;;  %v690_v55 = vld [vmem:[%s3050_s3 + $0xb8] sm:$0xff] }
 0x12d   :  { %v1730_v5 = vpop.eup %1729  ;;  %v974_v6 = vmul.f32 %v910_v13, %v2621_v51  ;;  %v812_v8 = vmul.f32 0.5, %v2531_v34  ;;  %v941_v16 = vmul.f32 %v877_v2, %v2623_v52  ;;  %v844_v10 = vmul.f32 0.5, %v2547_v41 }
 0x12e   :  { %v1257_v7 = vadd.f32 1.0, %v1730_v5  ;;  %1741 = vtanh.f32 %v1134_v62  ;;  %v973_v14 = vmul.f32 %v909_v0, %v2625_v43  ;;  %v880_v26 = vmul.f32 0.044715, %v2644_v3 }
 0x12f   :  { %v1732_v42 = vpop.eup %1731  ;;  %v1038_v23 = vmul.f32 %v974_v6, %v2621_v51  ;;  %v1005_v34 = vmul.f32 %v941_v16, %v2623_v52  ;;  %v912_v18 = vmul.f32 0.044715, %v2648_v19  ;;  %v2665_v41 = vadd.f32 %v687_v63, %v449_v25 }
 0x130   :  { %v1321_v15 = vmul.f32 %v1257_v7, %v809_v61  ;;  %v1289_v17 = vadd.f32 1.0, %v1732_v42  ;;  %v1037_v36 = vmul.f32 %v973_v14, %v2625_v43  ;;  %v944_v27 = vmul.f32 %v880_v26, %v2644_v3  ;;  %v722_v7 = vld [vmem:[%s3050_s3 + $0x1b8] sm:$0xff]  ;;  %v618_v42 = vpop.f32.mrf.mxu1 }
 0x131   :  { %v1102_v24 = vadd.f32 %v1038_v23, %v2621_v51  ;;  %v1734_v53 = vpop.eup %1733  ;;  %v1069_v29 = vadd.f32 %v1005_v34, %v2623_v52  ;;  %v976_v31 = vmul.f32 %v912_v18, %v2648_v19  ;;  %v609_v32 = vadd.f32 %v2612_v11, %v608_v59  ;;  %v689_v59 = vld [vmem:[%s3050_s3 + $0xb0] sm:$0xff] }
 0x132   :  { %1385 = vst.msk [vmem:[%s3051_s4 + $0x70] sm:$0xff] %vm89_vm0, %v1321_v15  ;;  %v1353_v28 = vmul.f32 %v1289_v17, %v841_v39  ;;  %v1260_v30 = vadd.f32 1.0, %v1734_v53  ;;  %v1101_v21 = vadd.f32 %v1037_v36, %v2625_v43  ;;  %v1008_v54 = vmul.f32 %v944_v27, %v2644_v3 }
 0x133   :  { %v1166_v38 = vmul.f32 0.7978846, %v1102_v24  ;;  %v811_v40 = vmul.f32 0.5, %v2549_v4  ;;  %v1133_v37 = vmul.f32 0.7978846, %v1069_v29  ;;  %v1040_v1 = vmul.f32 %v976_v31, %v2648_v19 }
 0x134   :  { %v1736_v35 = vpop.eup %1735  ;;  %1417 = vst.msk [vmem:[%s3051_s4 + $0x170] sm:$0xff] %vm89_vm0, %v1353_v28  ;;  %v879_v20 = vmul.f32 0.044715, %v2665_v41  ;;  %v1324_v44 = vmul.f32 %v1260_v30, %v812_v8  ;;  %v1165_v47 = vmul.f32 0.7978846, %v1101_v21  ;;  %v1072_v22 = vadd.f32 %v1008_v54, %v2644_v3  ;;  %v692_v28 = vld [vmem:[%s3050_s3 + $0xc8] sm:$0xff]  ;;  %v1657_v54 = vpop.f32.mrf.mxu1 }
 0x135   :  { %v1292_v45 = vadd.f32 1.0, %v1736_v35  ;;  %1743 = vtanh.f32 %v1166_v38  ;;  %v1104_v50 = vadd.f32 %v1040_v1, %v2648_v19  ;;  %v2696_v57 = vadd.f32 %v719_v46, %v609_v32 }
 0x136   :  { %1745 = vtanh.f32 %v1133_v37  ;;  %v943_v4 = vmul.f32 %v879_v20, %v2665_v41  ;;  %v1738_v9 = vpop.eup %1737  ;;  %1388 = vst.msk [vmem:[%s3051_s4 + $0x88] sm:$0xff] %vm89_vm0, %v1324_v44  ;;  %v464_v60 = vadd.f32 %v2612_v11, %v1606_v33  ;;  %v1136_v39 = vmul.f32 0.7978846, %v1072_v22 }
 0x137   :  { %v1356_v56 = vmul.f32 %v1292_v45, %v844_v10  ;;  %1747 = vtanh.f32 %v1165_v47  ;;  %v1740_v61 = vpop.eup %1739  ;;  %v1259_v13 = vadd.f32 1.0, %v1738_v9  ;;  %v1168_v62 = vmul.f32 0.7978846, %v1104_v50  ;;  %v1609_v10 = vpop.f32.mrf.mxu0 }
 0x138   :  { %v1007_v2 = vmul.f32 %v943_v4, %v2665_v41  ;;  %v843_v5 = vmul.f32 0.5, %v2554_v48  ;;  %v1291_v6 = vadd.f32 1.0, %v1740_v61  ;;  %v911_v0 = vmul.f32 0.044715, %v2696_v57 }
 0x139   :  { %1420 = vst.msk [vmem:[%s3051_s4 + $0x188] sm:$0xff] %vm89_vm0, %v1356_v56  ;;  %v2706_v25 = vadd.f32 %v690_v55, %v464_v60  ;;  %v1323_v8 = vmul.f32 %v1259_v13, %v811_v40  ;;  %1749 = vtanh.f32 %v1136_v39  ;;  %v624_v63 = vadd.f32 %v2612_v11, %v1654_v58  ;;  %v468_v35 = vpop.f32.mrf.mxu0  ;;  %v724_v13 = vld [vmem:[%s3050_s3 + $0x1c8] sm:$0xff] }
 0x13a   :  { %v1071_v16 = vadd.f32 %v1007_v2, %v2665_v41  ;;  %v1355_v14 = vmul.f32 %v1291_v6, %v843_v5  ;;  %v814_v48 = vmul.f32 0.5, %v2577_v12  ;;  %1751 = vtanh.f32 %v1168_v62  ;;  %v721_v12 = vld [vmem:[%s3050_s3 + $0x1b0] sm:$0xff]  ;;  %v691_v6 = vld [vmem:[%s3050_s3 + $0xc0] sm:$0xff] }
 0x13b   :  { %v1742_v23 = vpop.eup %1741  ;;  %v975_v26 = vmul.f32 %v911_v0, %v2696_v57  ;;  %1387 = vst.msk [vmem:[%s3051_s4 + $0x80] sm:$0xff] %vm89_vm0, %v1323_v8  ;;  %v882_v34 = vmul.f32 0.044715, %v2706_v25  ;;  %v2723_v18 = vadd.f32 %v722_v7, %v624_v63  ;;  %v459_v36 = vadd.f32 %v2612_v11, %v458_v49 }
 0x13c   :  { %v1262_v15 = vadd.f32 1.0, %v1742_v23  ;;  %v1135_v17 = vmul.f32 0.7978846, %v1071_v16  ;;  %1419 = vst.msk [vmem:[%s3051_s4 + $0x180] sm:$0xff] %vm89_vm0, %v1355_v14  ;;  %v619_v27 = vadd.f32 %v2612_v11, %v618_v42  ;;  %v474_v53 = vadd.f32 %v2612_v11, %v1609_v10  ;;  %v628_v16 = vpop.f32.mrf.mxu1 }
 0x13d   :  { %v1039_v24 = vmul.f32 %v975_v26, %v2696_v57  ;;  %v846_v31 = vmul.f32 0.5, %v2621_v51  ;;  %v946_v32 = vmul.f32 %v882_v34, %v2706_v25  ;;  %v914_v30 = vmul.f32 0.044715, %v2723_v18 }
 0x13e   :  { %v1326_v29 = vmul.f32 %v1262_v15, %v814_v48  ;;  %1753 = vtanh.f32 %v1135_v17  ;;  %v2743_v38 = vadd.f32 %v689_v59, %v459_v36  ;;  %v2745_v21 = vadd.f32 %v721_v12, %v619_v27  ;;  %v1612_v48 = vpop.f32.mrf.mxu0 }
 0x13f   :  { %v1103_v33 = vadd.f32 %v1039_v24, %v2696_v57  ;;  %v813_v51 = vmul.f32 0.5, %v2623_v52  ;;  %v845_v40 = vmul.f32 0.5, %v2625_v43  ;;  %v1010_v37 = vmul.f32 %v946_v32, %v2706_v25 }
 0x140   :  { %1390 = vst.msk [vmem:[%s3051_s4 + $0x98] sm:$0xff] %vm89_vm0, %v1326_v29  ;;  %v2754_v1 = vadd.f32 %v692_v28, %v474_v53  ;;  %v816_v20 = vmul.f32 0.5, %v2644_v3  ;;  %v978_v44 = vmul.f32 %v914_v30, %v2723_v18  ;;  %v881_v45 = vmul.f32 0.044715, %v2743_v38 }
 0x141   :  { %v1167_v46 = vmul.f32 0.7978846, %v1103_v33  ;;  %v1074_v22 = vadd.f32 %v1010_v37, %v2706_v25  ;;  %v913_v50 = vmul.f32 0.044715, %v2745_v21  ;;  %v634_v52 = vadd.f32 %v2612_v11, %v1657_v54  ;;  %v723_v37 = vld [vmem:[%s3050_s3 + $0x1c0] sm:$0xff] }
 0x142   :  { %v1744_v47 = vpop.eup %1743  ;;  %v469_v43 = vadd.f32 %v2612_v11, %v468_v35  ;;  %v1042_v58 = vmul.f32 %v978_v44, %v2723_v18  ;;  %v945_v3 = vmul.f32 %v881_v45, %v2743_v38  ;;  %v884_v61 = vmul.f32 0.044715, %v2754_v1  ;;  %v478_v35 = vpop.f32.mrf.mxu0 }
 0x143   :  { %v1746_v4 = vpop.eup %1745  ;;  %v1294_v55 = vadd.f32 1.0, %v1744_v47  ;;  %1755 = vtanh.f32 %v1167_v46  ;;  %v1138_v56 = vmul.f32 0.7978846, %v1074_v22  ;;  %v977_v60 = vmul.f32 %v913_v50, %v2745_v21 }
 0x144   :  { %v1748_v49 = vpop.eup %1747  ;;  %v1261_v9 = vadd.f32 1.0, %v1746_v4  ;;  %v1106_v2 = vadd.f32 %v1042_v58, %v2723_v18  ;;  %v1009_v5 = vmul.f32 %v945_v3, %v2743_v38  ;;  %v948_v8 = vmul.f32 %v884_v61, %v2754_v1 }
 0x145   :  { %v1358_v39 = vmul.f32 %v1294_v55, %v846_v31  ;;  %v1293_v62 = vadd.f32 1.0, %v1748_v49  ;;  %1757 = vtanh.f32 %v1138_v56  ;;  %v1041_v7 = vmul.f32 %v977_v60, %v2745_v21  ;;  %v1660_v31 = vpop.f32.mrf.mxu1 }
 0x146   :  { %v1325_v0 = vmul.f32 %v1261_v9, %v813_v51  ;;  %v1750_v63 = vpop.eup %1749  ;;  %v1170_v10 = vmul.f32 0.7978846, %v1106_v2  ;;  %v1073_v23 = vadd.f32 %v1009_v5, %v2743_v38  ;;  %v2782_v14 = vadd.f32 %v724_v13, %v634_v52  ;;  %v1615_v9 = vpop.f32.mrf.mxu0 }
 0x147   :  { %1422 = vst.msk [vmem:[%s3051_s4 + $0x198] sm:$0xff] %vm89_vm0, %v1358_v39  ;;  %v1357_v42 = vmul.f32 %v1293_v62, %v845_v40  ;;  %v1752_v26 = vpop.eup %1751  ;;  %v1264_v59 = vadd.f32 1.0, %v1750_v63  ;;  %v1105_v15 = vadd.f32 %v1041_v7, %v2745_v21  ;;  %v1012_v17 = vmul.f32 %v948_v8, %v2754_v1  ;;  %v638_v49 = vpop.f32.mrf.mxu1 }
 0x148   :  { %1389 = vst.msk [vmem:[%s3051_s4 + $0x90] sm:$0xff] %vm89_vm0, %v1325_v0  ;;  %v2790_v34 = vadd.f32 %v691_v6, %v469_v43  ;;  %v848_v12 = vmul.f32 0.5, %v2648_v19  ;;  %v1296_v24 = vadd.f32 1.0, %v1752_v26  ;;  %1759 = vtanh.f32 %v1170_v10  ;;  %v693_v43 = vld [vmem:[%s3050_s3 + $0xd0] sm:$0xff] }
 0x149   :  { %1421 = vst.msk [vmem:[%s3051_s4 + $0x190] sm:$0xff] %vm89_vm0, %v1357_v42  ;;  %v1137_v36 = vmul.f32 0.7978846, %v1073_v23  ;;  %v1328_v27 = vmul.f32 %v1264_v59, %v816_v20  ;;  %v1169_v53 = vmul.f32 0.7978846, %v1105_v15  ;;  %v1076_v28 = vadd.f32 %v1012_v17, %v2754_v1  ;;  %v726_v20 = vld [vmem:[%s3050_s3 + $0x1d8] sm:$0xff] }
 0x14a   :  { %v916_v29 = vmul.f32 0.044715, %v2782_v14  ;;  %v1360_v33 = vmul.f32 %v1296_v24, %v848_v12  ;;  %v815_v30 = vmul.f32 0.5, %v2665_v41  ;;  %v883_v54 = vmul.f32 0.044715, %v2790_v34  ;;  %v694_v41 = vld [vmem:[%s3050_s3 + $0xd8] sm:$0xff] }
 0x14b   :  { %v1754_v32 = vpop.eup %1753  ;;  %1761 = vtanh.f32 %v1137_v36  ;;  %1392 = vst.msk [vmem:[%s3051_s4 + $0xa8] sm:$0xff] %vm89_vm0, %v1328_v27  ;;  %v1140_v51 = vmul.f32 0.7978846, %v1076_v28  ;;  %v629_v44 = vadd.f32 %v2612_v11, %v628_v16  ;;  %v484_v45 = vadd.f32 %v2612_v11, %v1612_v48  ;;  %v725_v10 = vld [vmem:[%s3050_s3 + $0x1d0] sm:$0xff]  ;;  %v696_v23 = vld [vmem:[%s3050_s3 + $0xe8] sm:$0xff]  ;;  %v1663_v28 = vpop.f32.mrf.mxu1 }
 0x14c   :  { %v1263_v19 = vadd.f32 1.0, %v1754_v32  ;;  %1763 = vtanh.f32 %v1169_v53  ;;  %v980_v40 = vmul.f32 %v916_v29, %v2782_v14  ;;  %1424 = vst.msk [vmem:[%s3051_s4 + $0x1a8] sm:$0xff] %vm89_vm0, %v1360_v33  ;;  %v947_v46 = vmul.f32 %v883_v54, %v2790_v34 }
 0x14d   :  { %v644_v47 = vadd.f32 %v2612_v11, %v1660_v31  ;;  %1765 = vtanh.f32 %v1140_v51  ;;  %v479_v52 = vadd.f32 %v2612_v11, %v478_v35  ;;  %v2829_v55 = vadd.f32 %v723_v37, %v629_v44  ;;  %v488_v44 = vpop.f32.mrf.mxu0 }
 0x14e   :  { %v1327_v22 = vmul.f32 %v1263_v19, %v815_v30  ;;  %v1044_v50 = vmul.f32 %v980_v40, %v2782_v14  ;;  %v1011_v4 = vmul.f32 %v947_v46, %v2790_v34  ;;  %v2831_v58 = vadd.f32 %v694_v41, %v484_v45 }
 0x14f   :  { %v2833_v3 = vadd.f32 %v726_v20, %v644_v47  ;;  %v847_v60 = vmul.f32 0.5, %v2696_v57  ;;  %v818_v61 = vmul.f32 0.5, %v2706_v25  ;;  %v850_v13 = vmul.f32 0.5, %v2723_v18 }
 0x150   :  { %v1756_v56 = vpop.eup %1755  ;;  %1391 = vst.msk [vmem:[%s3051_s4 + $0xa0] sm:$0xff] %vm89_vm0, %v1327_v22  ;;  %v1108_v39 = vadd.f32 %v1044_v50, %v2782_v14  ;;  %v1075_v2 = vadd.f32 %v1011_v4, %v2790_v34  ;;  %v915_v5 = vmul.f32 0.044715, %v2829_v55  ;;  %v2845_v6 = vadd.f32 %v693_v43, %v479_v52 }
 0x151   :  { %v1295_v62 = vadd.f32 1.0, %v1756_v56  ;;  %v886_v7 = vmul.f32 0.044715, %v2831_v58  ;;  %v639_v8 = vadd.f32 %v2612_v11, %v638_v49  ;;  %v494_v57 = vadd.f32 %v2612_v11, %v1615_v9 }
 0x152   :  { %v1172_v0 = vmul.f32 0.7978846, %v1108_v39  ;;  %v1758_v16 = vpop.eup %1757  ;;  %v1139_v63 = vmul.f32 0.7978846, %v1075_v2  ;;  %v979_v18 = vmul.f32 %v915_v5, %v2829_v55  ;;  %v918_v42 = vmul.f32 0.044715, %v2833_v3  ;;  %v1618_v5 = vpop.f32.mrf.mxu0 }
 0x153   :  { %v1359_v25 = vmul.f32 %v1295_v62, %v847_v60  ;;  %v1266_v48 = vadd.f32 1.0, %v1758_v16  ;;  %v817_v26 = vmul.f32 0.5, %v2743_v38  ;;  %v950_v59 = vmul.f32 %v886_v7, %v2831_v58  ;;  %v728_v60 = vld [vmem:[%s3050_s3 + $0x1e8] sm:$0xff]  ;;  %v695_v62 = vld [vmem:[%s3050_s3 + $0xe0] sm:$0xff] }
 0x154   :  { %1767 = vtanh.f32 %v1172_v0  ;;  %v1043_v15 = vmul.f32 %v979_v18, %v2829_v55  ;;  %v982_v17 = vmul.f32 %v918_v42, %v2833_v3  ;;  %v885_v12 = vmul.f32 0.044715, %v2845_v6  ;;  %v727_v2 = vld [vmem:[%s3050_s3 + $0x1e0] sm:$0xff] }
 0x155   :  { %1423 = vst.msk [vmem:[%s3051_s4 + $0x1a0] sm:$0xff] %vm89_vm0, %v1359_v25  ;;  %1769 = vtanh.f32 %v1139_v63  ;;  %v1760_v24 = vpop.eup %1759  ;;  %v1330_v36 = vmul.f32 %v1266_v48, %v818_v61  ;;  %v1014_v27 = vmul.f32 %v950_v59, %v2831_v58  ;;  %v2868_v38 = vadd.f32 %v725_v10, %v639_v8 }
 0x156   :  { %v2870_v53 = vadd.f32 %v696_v23, %v494_v57  ;;  %v1298_v29 = vadd.f32 1.0, %v1760_v24  ;;  %v1107_v31 = vadd.f32 %v1043_v15, %v2829_v55  ;;  %v1046_v32 = vmul.f32 %v982_v17, %v2833_v3  ;;  %v698_v17 = vld [vmem:[%s3050_s3 + $0xf8] sm:$0xff] }
 0x157   :  { %v949_v33 = vmul.f32 %v885_v12, %v2845_v6  ;;  %1394 = vst.msk [vmem:[%s3051_s4 + $0xb8] sm:$0xff] %vm89_vm0, %v1330_v36  ;;  %v849_v54 = vmul.f32 0.5, %v2745_v21  ;;  %v820_v35 = vmul.f32 0.5, %v2754_v1  ;;  %v1078_v19 = vadd.f32 %v1014_v27, %v2831_v58  ;;  %v648_v21 = vpop.f32.mrf.mxu1 }
 0x158   :  { %v1762_v30 = vpop.eup %1761  ;;  %v917_v51 = vmul.f32 0.044715, %v2868_v38  ;;  %v1362_v37 = vmul.f32 %v1298_v29, %v850_v13  ;;  %v1171_v20 = vmul.f32 0.7978846, %v1107_v31  ;;  %v1110_v46 = vadd.f32 %v1046_v32, %v2833_v3  ;;  %v730_v31 = vld [vmem:[%s3050_s3 + $0x1f8] sm:$0xff] }
 0x159   :  { %v1764_v40 = vpop.eup %1763  ;;  %v1265_v41 = vadd.f32 1.0, %v1762_v30  ;;  %v1142_v47 = vmul.f32 0.7978846, %v1078_v19  ;;  %v1013_v22 = vmul.f32 %v949_v33, %v2845_v6  ;;  %v888_v4 = vmul.f32 0.044715, %v2870_v53  ;;  %v1666_v16 = vpop.f32.mrf.mxu1 }
 0x15a   :  { %v1297_v45 = vadd.f32 1.0, %v1764_v40  ;;  %v981_v50 = vmul.f32 %v917_v51, %v2868_v38  ;;  %v1766_v52 = vpop.eup %1765  ;;  %1426 = vst.msk [vmem:[%s3051_s4 + $0x1b8] sm:$0xff] %vm89_vm0, %v1362_v37  ;;  %1771 = vtanh.f32 %v1171_v20  ;;  %v1174_v43 = vmul.f32 0.7978846, %v1110_v46 }
 0x15b   :  { %v1329_v1 = vmul.f32 %v1265_v41, %v817_v26  ;;  %v1268_v9 = vadd.f32 1.0, %v1766_v52  ;;  %1773 = vtanh.f32 %v1142_v47  ;;  %v1077_v56 = vadd.f32 %v1013_v22, %v2845_v6  ;;  %v658_v41 = vpop.f32.mrf.mxu1  ;;  %v697_v47 = vld [vmem:[%s3050_s3 + $0xf0] sm:$0xff] }
 0x15c   :  { %v1361_v49 = vmul.f32 %v1297_v45, %v849_v54  ;;  %1775 = vtanh.f32 %v1174_v43  ;;  %v1045_v61 = vmul.f32 %v981_v50, %v2868_v38  ;;  %v952_v13 = vmul.f32 %v888_v4, %v2870_v53 }
 0x15d   :  { %1393 = vst.msk [vmem:[%s3051_s4 + $0xb0] sm:$0xff] %vm89_vm0, %v1329_v1  ;;  %v654_v39 = vadd.f32 %v2612_v11, %v1663_v28  ;;  %v1332_v0 = vmul.f32 %v1268_v9, %v820_v35  ;;  %v1141_v7 = vmul.f32 0.7978846, %v1077_v56  ;;  %v489_v8 = vadd.f32 %v2612_v11, %v488_v44 }
 0x15e   :  { %1425 = vst.msk [vmem:[%s3051_s4 + $0x1b0] sm:$0xff] %vm89_vm0, %v1361_v49  ;;  %v649_v57 = vadd.f32 %v2612_v11, %v648_v21  ;;  %v852_v25 = vmul.f32 0.5, %v2782_v14  ;;  %v1109_v63 = vadd.f32 %v1045_v61, %v2868_v38  ;;  %v1016_v18 = vmul.f32 %v952_v13, %v2870_v53 }
 0x15f   :  { %v2917_v42 = vadd.f32 %v728_v60, %v654_v39  ;;  %1396 = vst.msk [vmem:[%s3051_s4 + $0xc8] sm:$0xff] %vm89_vm0, %v1332_v0  ;;  %1777 = vtanh.f32 %v1141_v7  ;;  %v2923_v10 = vadd.f32 %v695_v62, %v489_v8  ;;  %v504_v48 = vadd.f32 %v2612_v11, %v1618_v5 }
 0x160   :  { %v2925_v23 = vadd.f32 %v727_v2, %v649_v57  ;;  %v1173_v14 = vmul.f32 0.7978846, %v1109_v63  ;;  %v1080_v59 = vadd.f32 %v1016_v18, %v2870_v53  ;;  %v664_v12 = vadd.f32 %v2612_v11, %v1666_v16 }
 0x161   :  { %v1768_v26 = vpop.eup %1767  ;;  %v920_v15 = vmul.f32 0.044715, %v2917_v42  ;;  %v819_v27 = vmul.f32 0.5, %v2790_v34  ;;  %v851_v28 = vmul.f32 0.5, %v2829_v55  ;;  %v887_v29 = vmul.f32 0.044715, %v2923_v10  ;;  %v498_v34 = vpop.f32.mrf.mxu0 }
 0x162   :  { %v1770_v24 = vpop.eup %1769  ;;  %v1300_v36 = vadd.f32 1.0, %v1768_v26  ;;  %1779 = vtanh.f32 %v1173_v14  ;;  %v1144_v33 = vmul.f32 0.7978846, %v1080_v59  ;;  %v919_v19 = vmul.f32 0.044715, %v2925_v23 }
 0x163   :  { %v1267_v32 = vadd.f32 1.0, %v1770_v24  ;;  %v984_v30 = vmul.f32 %v920_v15, %v2917_v42  ;;  %v951_v35 = vmul.f32 %v887_v29, %v2923_v10  ;;  %v2943_v51 = vadd.f32 %v698_v17, %v504_v48 }
 0x164   :  { %v1364_v54 = vmul.f32 %v1300_v36, %v852_v25  ;;  %1781 = vtanh.f32 %v1144_v33  ;;  %v2946_v37 = vadd.f32 %v730_v31, %v664_v12  ;;  %v822_v20 = vmul.f32 0.5, %v2831_v58 }
 0x165   :  { %v1331_v55 = vmul.f32 %v1267_v32, %v819_v27  ;;  %v1048_v40 = vmul.f32 %v984_v30, %v2917_v42  ;;  %v1015_v46 = vmul.f32 %v951_v35, %v2923_v10  ;;  %v983_v44 = vmul.f32 %v919_v19, %v2925_v23 }
 0x166   :  { %1428 = vst.msk [vmem:[%s3051_s4 + $0x1c8] sm:$0xff] %vm89_vm0, %v1364_v54  ;;  %v890_v45 = vmul.f32 0.044715, %v2943_v51  ;;  %v854_v22 = vmul.f32 0.5, %v2833_v3  ;;  %v922_v58 = vmul.f32 0.044715, %v2946_v37  ;;  %v499_v21 = vadd.f32 %v2612_v11, %v498_v34 }
 0x167   :  { %1395 = vst.msk [vmem:[%s3051_s4 + $0xc0] sm:$0xff] %vm89_vm0, %v1331_v55  ;;  %v1112_v50 = vadd.f32 %v1048_v40, %v2917_v42  ;;  %v1772_v52 = vpop.eup %1771  ;;  %v1079_v1 = vadd.f32 %v1015_v46, %v2923_v10  ;;  %v1047_v43 = vmul.f32 %v983_v44, %v2925_v23  ;;  %v659_v49 = vadd.f32 %v2612_v11, %v658_v41  ;;  %v729_v11 = vld [vmem:[%s3050_s3 + $0x1f0] sm:$0xff] }
 0x168   :  { %v954_v4 = vmul.f32 %v890_v45, %v2943_v51  ;;  %v1774_v9 = vpop.eup %1773  ;;  %v1299_v56 = vadd.f32 1.0, %v1772_v52  ;;  %v986_v3 = vmul.f32 %v922_v58, %v2946_v37  ;;  %v2972_v61 = vadd.f32 %v697_v47, %v499_v21 }
 0x169   :  { %v1176_v60 = vmul.f32 0.7978846, %v1112_v50  ;;  %v1776_v13 = vpop.eup %1775  ;;  %v1270_v39 = vadd.f32 1.0, %v1774_v9  ;;  %v1143_v62 = vmul.f32 0.7978846, %v1079_v1  ;;  %v1111_v2 = vadd.f32 %v1047_v43, %v2925_v23 }
 0x16a   :  { %v1018_v5 = vmul.f32 %v954_v4, %v2943_v51  ;;  %v1363_v0 = vmul.f32 %v1299_v56, %v851_v28  ;;  %v1302_v7 = vadd.f32 1.0, %v1776_v13  ;;  %v1050_v8 = vmul.f32 %v986_v3, %v2946_v37 }
 0x16b   :  { %1783 = vtanh.f32 %v1176_v60  ;;  %v1334_v57 = vmul.f32 %v1270_v39, %v822_v20  ;;  %v1175_v16 = vmul.f32 0.7978846, %v1111_v2  ;;  %v821_v48 = vmul.f32 0.5, %v2845_v6 }
 0x16c   :  { %1785 = vtanh.f32 %v1143_v62  ;;  %v1082_v25 = vadd.f32 %v1018_v5, %v2943_v51  ;;  %v1778_v63 = vpop.eup %1777  ;;  %1427 = vst.msk [vmem:[%s3051_s4 + $0x1c0] sm:$0xff] %vm89_vm0, %v1363_v0  ;;  %v1366_v18 = vmul.f32 %v1302_v7, %v854_v22  ;;  %v1114_v26 = vadd.f32 %v1050_v8, %v2946_v37 }
 0x16d   :  { %v889_v14 = vmul.f32 0.044715, %v2972_v61  ;;  %1398 = vst.msk [vmem:[%s3051_s4 + $0xd8] sm:$0xff] %vm89_vm0, %v1334_v57  ;;  %v1269_v59 = vadd.f32 1.0, %v1778_v63  ;;  %1787 = vtanh.f32 %v1175_v16  ;;  %v793_v17 = vadd.f32 %v729_v11, %v659_v49 }
 0x16e   :  { %v1146_v15 = vmul.f32 0.7978846, %v1082_v25  ;;  %1430 = vst.msk [vmem:[%s3051_s4 + $0x1d8] sm:$0xff] %vm89_vm0, %v1366_v18  ;;  %v1178_v12 = vmul.f32 0.7978846, %v1114_v26  ;;  %v853_v28 = vmul.f32 0.5, %v2868_v38 }
 0x16f   :  { %v953_v6 = vmul.f32 %v889_v14, %v2972_v61  ;;  %v1780_v24 = vpop.eup %1779  ;;  %v1333_v36 = vmul.f32 %v1269_v59, %v821_v48  ;;  %v921_v27 = vmul.f32 0.044715, %v793_v17  ;;  %v824_v54 = vmul.f32 0.5, %v2870_v53 }
 0x170   :  { %1789 = vtanh.f32 %v1146_v15  ;;  %v1301_v29 = vadd.f32 1.0, %v1780_v24  ;;  %v856_v46 = vmul.f32 0.5, %v2917_v42  ;;  %v823_v45 = vmul.f32 0.5, %v2923_v10 }
 0x171   :  { %1791 = vtanh.f32 %v1178_v12  ;;  %v1017_v31 = vmul.f32 %v953_v6, %v2972_v61  ;;  %v1782_v32 = vpop.eup %1781  ;;  %1397 = vst.msk [vmem:[%s3051_s4 + $0xd0] sm:$0xff] %vm89_vm0, %v1333_v36  ;;  %v985_v33 = vmul.f32 %v921_v27, %v793_v17  ;;  %v855_v21 = vmul.f32 0.5, %v2925_v23 }
 0x172   :  { %v1365_v30 = vmul.f32 %v1301_v29, %v853_v28  ;;  %v1272_v35 = vadd.f32 1.0, %v1782_v32  ;;  %v826_v10 = vmul.f32 0.5, %v2943_v51  ;;  %v858_v49 = vmul.f32 0.5, %v2946_v37 }
 0x173   :  { %v1081_v19 = vadd.f32 %v1017_v31, %v2972_v61  ;;  %v1049_v34 = vmul.f32 %v985_v33, %v793_v17  ;;  %v825_v37 = vmul.f32 0.5, %v2972_v61  ;;  %v857_v39 = vmul.f32 0.5, %v793_v17 }
 0x174   :  { %1429 = vst.msk [vmem:[%s3051_s4 + $0x1d0] sm:$0xff] %vm89_vm0, %v1365_v30  ;;  %v1336_v38 = vmul.f32 %v1272_v35, %v824_v54 }
 0x175   :  { %v1145_v55 = vmul.f32 0.7978846, %v1081_v19  ;;  %v1113_v40 = vadd.f32 %v1049_v34, %v793_v17 }
 0x176   :  { %1400 = vst.msk [vmem:[%s3051_s4 + $0xe8] sm:$0xff] %vm89_vm0, %v1336_v38 }
 0x177   :  { %1793 = vtanh.f32 %v1145_v55  ;;  %v1177_v53 = vmul.f32 0.7978846, %v1113_v40 }
 0x178   :  { %v1784_v41 = vpop.eup %1783 }
 0x179   :  { %v1786_v20 = vpop.eup %1785  ;;  %v1304_v44 = vadd.f32 1.0, %v1784_v41  ;;  %1795 = vtanh.f32 %v1177_v53 }
 0x17a   :  { %v1271_v47 = vadd.f32 1.0, %v1786_v20  ;;  %v1788_v22 = vpop.eup %1787 }
 0x17b   :  { %v1368_v50 = vmul.f32 %v1304_v44, %v856_v46  ;;  %v1303_v52 = vadd.f32 1.0, %v1788_v22 }
 0x17c   :  { %v1335_v58 = vmul.f32 %v1271_v47, %v823_v45 }
 0x17d   :  { %v1790_v1 = vpop.eup %1789  ;;  %1432 = vst.msk [vmem:[%s3051_s4 + $0x1e8] sm:$0xff] %vm89_vm0, %v1368_v50  ;;  %v1367_v42 = vmul.f32 %v1303_v52, %v855_v21 }
 0x17e   :  { %v1792_v43 = vpop.eup %1791  ;;  %1399 = vst.msk [vmem:[%s3051_s4 + $0xe0] sm:$0xff] %vm89_vm0, %v1335_v58  ;;  %v1274_v4 = vadd.f32 1.0, %v1790_v1 }
 0x17f   :  { %v1306_v23 = vadd.f32 1.0, %v1792_v43  ;;  %1431 = vst.msk [vmem:[%s3051_s4 + $0x1e0] sm:$0xff] %vm89_vm0, %v1367_v42 }
 0x180   :  { %v1338_v9 = vmul.f32 %v1274_v4, %v826_v10 }
 0x181   :  { %v1370_v56 = vmul.f32 %v1306_v23, %v858_v49 }
 0x182   :  { %1402 = vst.msk [vmem:[%s3051_s4 + $0xf8] sm:$0xff] %vm89_vm0, %v1338_v9 }
 0x183   :  { %1434 = vst.msk [vmem:[%s3051_s4 + $0x1f8] sm:$0xff] %vm89_vm0, %v1370_v56 }
 0x184   :  { %v1794_v51 = vpop.eup %1793 }
 0x185   :  { %v1273_v60 = vadd.f32 1.0, %v1794_v51 }
 0x186   :  { %v1796_v3 = vpop.eup %1795 }
 0x187   :  { %v1337_v13 = vmul.f32 %v1273_v60, %v825_v37  ;;  %v1305_v62 = vadd.f32 1.0, %v1796_v3 }
 0x189   :  { %1401 = vst.msk [vmem:[%s3051_s4 + $0xf0] sm:$0xff] %vm89_vm0, %v1337_v13  ;;  %v1369_v2 = vmul.f32 %v1305_v62, %v857_v39 }
 0x18b   :  { %1433 = vst.msk [vmem:[%s3051_s4 + $0x1f0] sm:$0xff] %vm89_vm0, %v1369_v2 }

// kernel: closed_call.49
= control target key start
LH: loop header
LB: loop body
LE: loop exit
PB: predicated region body
PF: predicated region fallthrough
CT: control target
= control target key end

     0   :  { %vm100_vm0 = vcmask 64512   ;;  %vm1263_vm1 = vcmask 130048   ;;  %vm3002_vm2 = vcmask 7168   ;;  %s5989_s1 = inlined_call_operand.vmem [shape: f32[8,16], index: 1, kind: input, shape index: {}]   ;;  %s5990_s0 = inlined_call_operand.vmem [shape: f32[512,8], index: 0, kind: input, shape index: {}]   ;;  %s5991_s3 = inlined_call_operand.vmem [shape: f32[16,8], index: 3, kind: input, shape index: {}]   ;;  %s5992_s2 = inlined_call_operand.vmem [shape: f32[1,16], index: 2, kind: input, shape index: {}]   ;;  %s5993_s5 = inlined_call_operand.vmem [shape: f32[8,1], index: 5, kind: input, shape index: {}]   ;;  %s5994_s4 = inlined_call_operand.vmem [shape: f32[1,8], index: 4, kind: input, shape index: {}]   ;;  %s5995_s6 = inlined_call_operand.<no memory space> [shape: f32[1,1], index: 6, kind: input, shape index: {}]   ;;  %s5996_s7 = inlined_call_operand.vmem [shape: f32[512,1], index: 7, kind: output, shape index: {}]  }
   0x1   :  { %v92_v0 = vld [vmem:[%s5989_s1] sm:$0xff]  ;;  %v29_v2 = vld [vmem:[%s5990_s0 + $0x8] sm:$0xff]  ;;  %v30_v3 = vld [vmem:[%s5990_s0 + $0x10] sm:$0xff] }
   0x2   :  { %v28_v1 = vld [vmem:[%s5990_s0] sm:$0xff]  ;;  %3462 = vmatprep.subr.mxu0 %v92_v0  ;;  %3758 = vmatprep.subr.mxu1 %v92_v0  ;;  %v31_v4 = vld [vmem:[%s5990_s0 + $0x18] sm:$0xff]  ;;  %v61_v7 = vld [vmem:[%s5990_s0 + $0x108] sm:$0xff] }
   0x3   :  { %3464 = vmatprep.mubr.msk.f32.mxu0 %vm100_vm0, %v28_v1  ;;  %3463 = vmatpush3.msra.mxu0 %v92_v0  ;;  %v32_v5 = vld [vmem:[%s5990_s0 + $0x20] sm:$0xff]  ;;  %v33_v8 = vld [vmem:[%s5990_s0 + $0x28] sm:$0xff]  ;;  %v62_v9 = vld [vmem:[%s5990_s0 + $0x110] sm:$0xff] }
   0x4   :  { %3465 = vmatmul.mubr.msk.f32.vlgmr.msra.gmra.mxu0 %vm100_vm0, %v29_v2  ;;  %3759 = vmatpush3.msra.mxu1 %v92_v0  ;;  %v60_v6 = vld [vmem:[%s5990_s0 + $0x100] sm:$0xff]  ;;  %v34_v10 = vld [vmem:[%s5990_s0 + $0x30] sm:$0xff]  ;;  %v63_v11 = vld [vmem:[%s5990_s0 + $0x118] sm:$0xff] }
   0x5   :  { %3467 = vmatprep.mubr.msk.f32.mxu0 %vm100_vm0, %v30_v3  ;;  %3512 = vmatprep.mubr.msk.f32.mxu1 %vm100_vm0, %v60_v6  ;;  %v64_v12 = vld [vmem:[%s5990_s0 + $0x120] sm:$0xff]  ;;  %v35_v13 = vld [vmem:[%s5990_s0 + $0x38] sm:$0xff]  ;;  %v65_v15 = vld [vmem:[%s5990_s0 + $0x128] sm:$0xff] }
   0x6   :  { %3513 = vmatmul.mubr.msk.f32.vlgmr.msra.gmra.mxu1 %vm100_vm0, %v61_v7  ;;  %v36_v14 = vld [vmem:[%s5990_s0 + $0x40] sm:$0xff]  ;;  %v66_v16 = vld [vmem:[%s5990_s0 + $0x130] sm:$0xff]  ;;  %v37_v17 = vld [vmem:[%s5990_s0 + $0x48] sm:$0xff] }
   0x7   :  { %3515 = vmatprep.mubr.msk.f32.mxu1 %vm100_vm0, %v62_v9  ;;  %v38_v18 = vld [vmem:[%s5990_s0 + $0x50] sm:$0xff]  ;;  %v67_v19 = vld [vmem:[%s5990_s0 + $0x138] sm:$0xff]  ;;  %v68_v20 = vld [vmem:[%s5990_s0 + $0x140] sm:$0xff] }
   0x8   :  { %3468 = vmatmul.mubr.msk.f32.gmra.mxu0 %vm100_vm0, %v31_v4  ;;  %v39_v21 = vld [vmem:[%s5990_s0 + $0x58] sm:$0xff]  ;;  %v40_v22 = vld [vmem:[%s5990_s0 + $0x60] sm:$0xff]  ;;  %v1255_v23 = vld [vmem:[%s5991_s3 + $0x8] sm:$0xff] }
   0x9   :  { %3470 = vmatprep.mubr.msk.f32.mxu0 %vm100_vm0, %v32_v5  ;;  %v69_v24 = vld [vmem:[%s5990_s0 + $0x148] sm:$0xff]  ;;  %3560 = vmatprep.subr.mxu1 %v1255_v23  ;;  %v70_v25 = vld [vmem:[%s5990_s0 + $0x150] sm:$0xff]  ;;  %v71_v28 = vld [vmem:[%s5990_s0 + $0x158] sm:$0xff] }
   0xa   :  { %3516 = vmatmul.mubr.msk.f32.gmra.mxu1 %vm100_vm0, %v63_v11  ;;  %v41_v26 = vld [vmem:[%s5990_s0 + $0x68] sm:$0xff]  ;;  %v42_v27 = vld [vmem:[%s5990_s0 + $0x70] sm:$0xff]  ;;  %v72_v29 = vld [vmem:[%s5990_s0 + $0x160] sm:$0xff] }
   0xb   :  { %3518 = vmatprep.mubr.msk.f32.mxu1 %vm100_vm0, %v64_v12  ;;  %3561 = vmatpush3.msra.mxu1 %v1255_v23  ;;  %v43_v30 = vld [vmem:[%s5990_s0 + $0x78] sm:$0xff]  ;;  %v44_v31 = vld [vmem:[%s5990_s0 + $0x80] sm:$0xff]  ;;  %v73_v32 = vld [vmem:[%s5990_s0 + $0x168] sm:$0xff] }
   0xc   :  { %3471 = vmatmul.mubr.msk.f32.gmra.mxu0 %vm100_vm0, %v33_v8  ;;  %v74_v33 = vld [vmem:[%s5990_s0 + $0x170] sm:$0xff]  ;;  %v45_v34 = vld [vmem:[%s5990_s0 + $0x88] sm:$0xff]  ;;  %v75_v36 = vld [vmem:[%s5990_s0 + $0x178] sm:$0xff] }
   0xd   :  { %3473 = vmatprep.mubr.msk.f32.mxu0 %vm100_vm0, %v34_v10  ;;  %v46_v35 = vld [vmem:[%s5990_s0 + $0x90] sm:$0xff]  ;;  %v76_v37 = vld [vmem:[%s5990_s0 + $0x180] sm:$0xff]  ;;  %v47_v38 = vld [vmem:[%s5990_s0 + $0x98] sm:$0xff] }
   0xe   :  { %3519 = vmatmul.mubr.msk.f32.gmra.mxu1 %vm100_vm0, %v65_v15  ;;  %v48_v39 = vld [vmem:[%s5990_s0 + $0xa0] sm:$0xff]  ;;  %v77_v40 = vld [vmem:[%s5990_s0 + $0x188] sm:$0xff]  ;;  %v78_v41 = vld [vmem:[%s5990_s0 + $0x190] sm:$0xff] }
   0xf   :  { %3521 = vmatprep.mubr.msk.f32.mxu1 %vm100_vm0, %v66_v16  ;;  %v49_v42 = vld [vmem:[%s5990_s0 + $0xa8] sm:$0xff]  ;;  %v50_v43 = vld [vmem:[%s5990_s0 + $0xb0] sm:$0xff]  ;;  %v79_v44 = vld [vmem:[%s5990_s0 + $0x198] sm:$0xff] }
  0x10   :  { %3474 = vmatmul.mubr.msk.f32.gmra.mxu0 %vm100_vm0, %v35_v13  ;;  %v80_v45 = vld [vmem:[%s5990_s0 + $0x1a0] sm:$0xff]  ;;  %v51_v46 = vld [vmem:[%s5990_s0 + $0xb8] sm:$0xff]  ;;  %v81_v48 = vld [vmem:[%s5990_s0 + $0x1a8] sm:$0xff] }
  0x11   :  { %3476 = vmatprep.mubr.msk.f32.mxu0 %vm100_vm0, %v36_v14  ;;  %v52_v47 = vld [vmem:[%s5990_s0 + $0xc0] sm:$0xff]  ;;  %v82_v49 = vld [vmem:[%s5990_s0 + $0x1b0] sm:$0xff]  ;;  %v53_v50 = vld [vmem:[%s5990_s0 + $0xc8] sm:$0xff] }
  0x12   :  { %3522 = vmatmul.mubr.msk.f32.gmra.mxu1 %vm100_vm0, %v67_v19  ;;  %v54_v51 = vld [vmem:[%s5990_s0 + $0xd0] sm:$0xff]  ;;  %v83_v52 = vld [vmem:[%s5990_s0 + $0x1b8] sm:$0xff]  ;;  %v84_v53 = vld [vmem:[%s5990_s0 + $0x1c0] sm:$0xff] }
  0x13   :  { %3524 = vmatprep.mubr.msk.f32.mxu1 %vm100_vm0, %v68_v20  ;;  %v55_v54 = vld [vmem:[%s5990_s0 + $0xd8] sm:$0xff]  ;;  %v56_v55 = vld [vmem:[%s5990_s0 + $0xe0] sm:$0xff]  ;;  %v85_v56 = vld [vmem:[%s5990_s0 + $0x1c8] sm:$0xff] }
  0x14   :  { %3477 = vmatmul.mubr.msk.f32.gmra.mxu0 %vm100_vm0, %v37_v17  ;;  %v86_v57 = vld [vmem:[%s5990_s0 + $0x1d0] sm:$0xff]  ;;  %v57_v58 = vld [vmem:[%s5990_s0 + $0xe8] sm:$0xff]  ;;  %v87_v60 = vld [vmem:[%s5990_s0 + $0x1d8] sm:$0xff] }
  0x15   :  { %3479 = vmatprep.mubr.msk.f32.mxu0 %vm100_vm0, %v38_v18  ;;  %v58_v59 = vld [vmem:[%s5990_s0 + $0xf0] sm:$0xff]  ;;  %v88_v61 = vld [vmem:[%s5990_s0 + $0x1e0] sm:$0xff]  ;;  %v59_v62 = vld [vmem:[%s5990_s0 + $0xf8] sm:$0xff] }
  0x16   :  { %3525 = vmatmul.mubr.msk.f32.gmra.mxu1 %vm100_vm0, %v69_v24  ;;  %v89_v63 = vld [vmem:[%s5990_s0 + $0x1e8] sm:$0xff]  ;;  %v90_v0 = vld [vmem:[%s5990_s0 + $0x1f0] sm:$0xff]  ;;  %v91_v1 = vld [vmem:[%s5990_s0 + $0x1f8] sm:$0xff] }
  0x17   :  { %3527 = vmatprep.mubr.msk.f32.mxu1 %vm100_vm0, %v70_v25  ;;  %v1254_v2 = vld [vmem:[%s5991_s3] sm:$0xff] }
  0x18   :  { %3480 = vmatmul.mubr.msk.f32.gmra.mxu0 %vm100_vm0, %v39_v21  ;;  %3562 = vmatprep.subr.mxu1 %v1254_v2  ;;  %v4326_v3 = vld [vmem:[%s5992_s2] ss:$0 sm:$0xff] }
  0x19   :  { %3482 = vmatprep.mubr.msk.f32.mxu0 %vm100_vm0, %v40_v22  ;;  %3563 = vmatpush3.msra.mxu1 %v1254_v2 }
  0x1a   :  { %3528 = vmatmul.mubr.msk.f32.gmra.mxu1 %vm100_vm0, %v71_v28 }
  0x1b   :  { %3530 = vmatprep.mubr.msk.f32.mxu1 %vm100_vm0, %v72_v29 }
  0x1c   :  { %3483 = vmatmul.mubr.msk.f32.gmra.mxu0 %vm100_vm0, %v41_v26 }
  0x1d   :  { %3485 = vmatprep.mubr.msk.f32.mxu0 %vm100_vm0, %v42_v27 }
  0x1e   :  { %3531 = vmatmul.mubr.msk.f32.gmra.mxu1 %vm100_vm0, %v73_v32 }
  0x1f   :  { %3533 = vmatprep.mubr.msk.f32.mxu1 %vm100_vm0, %v74_v33 }
  0x20   :  { %3486 = vmatmul.mubr.msk.f32.gmra.mxu0 %vm100_vm0, %v43_v30 }
  0x21   :  { %3488 = vmatprep.mubr.msk.f32.mxu0 %vm100_vm0, %v44_v31 }
  0x22   :  { %3534 = vmatmul.mubr.msk.f32.gmra.mxu1 %vm100_vm0, %v75_v36 }
  0x23   :  { %3536 = vmatprep.mubr.msk.f32.mxu1 %vm100_vm0, %v76_v37 }
  0x24   :  { %3489 = vmatmul.mubr.msk.f32.gmra.mxu0 %vm100_vm0, %v45_v34 }
  0x25   :  { %3491 = vmatprep.mubr.msk.f32.mxu0 %vm100_vm0, %v46_v35 }
  0x26   :  { %3537 = vmatmul.mubr.msk.f32.gmra.mxu1 %vm100_vm0, %v77_v40 }
  0x27   :  { %3539 = vmatprep.mubr.msk.f32.mxu1 %vm100_vm0, %v78_v41 }
  0x28   :  { %3492 = vmatmul.mubr.msk.f32.gmra.mxu0 %vm100_vm0, %v47_v38 }
  0x29   :  { %3494 = vmatprep.mubr.msk.f32.mxu0 %vm100_vm0, %v48_v39 }
  0x2a   :  { %3540 = vmatmul.mubr.msk.f32.gmra.mxu1 %vm100_vm0, %v79_v44 }
  0x2b   :  { %3542 = vmatprep.mubr.msk.f32.mxu1 %vm100_vm0, %v80_v45 }
  0x2c   :  { %3495 = vmatmul.mubr.msk.f32.gmra.mxu0 %vm100_vm0, %v49_v42 }
  0x2d   :  { %3497 = vmatprep.mubr.msk.f32.mxu0 %vm100_vm0, %v50_v43 }
  0x2e   :  { %3543 = vmatmul.mubr.msk.f32.gmra.mxu1 %vm100_vm0, %v81_v48 }
  0x2f   :  { %3545 = vmatprep.mubr.msk.f32.mxu1 %vm100_vm0, %v82_v49 }
  0x30   :  { %3498 = vmatmul.mubr.msk.f32.gmra.mxu0 %vm100_vm0, %v51_v46 }
  0x31   :  { %3500 = vmatprep.mubr.msk.f32.mxu0 %vm100_vm0, %v52_v47 }
  0x32   :  { %3546 = vmatmul.mubr.msk.f32.gmra.mxu1 %vm100_vm0, %v83_v52 }
  0x33   :  { %3548 = vmatprep.mubr.msk.f32.mxu1 %vm100_vm0, %v84_v53 }
  0x34   :  { %3501 = vmatmul.mubr.msk.f32.gmra.mxu0 %vm100_vm0, %v53_v50 }
  0x35   :  { %3503 = vmatprep.mubr.msk.f32.mxu0 %vm100_vm0, %v54_v51 }
  0x36   :  { %3549 = vmatmul.mubr.msk.f32.gmra.mxu1 %vm100_vm0, %v85_v56 }
  0x37   :  { %3551 = vmatprep.mubr.msk.f32.mxu1 %vm100_vm0, %v86_v57 }
  0x38   :  { %3504 = vmatmul.mubr.msk.f32.gmra.mxu0 %vm100_vm0, %v55_v54 }
  0x39   :  { %3506 = vmatprep.mubr.msk.f32.mxu0 %vm100_vm0, %v56_v55 }
  0x3a   :  { %3552 = vmatmul.mubr.msk.f32.gmra.mxu1 %vm100_vm0, %v87_v60 }
  0x3b   :  { %3554 = vmatprep.mubr.msk.f32.mxu1 %vm100_vm0, %v88_v61 }
  0x3c   :  { %3507 = vmatmul.mubr.msk.f32.gmra.mxu0 %vm100_vm0, %v57_v58 }
  0x3d   :  { %3509 = vmatprep.mubr.msk.f32.mxu0 %vm100_vm0, %v58_v59 }
  0x3e   :  { %3555 = vmatmul.mubr.msk.f32.gmra.mxu1 %vm100_vm0, %v89_v63 }
  0x3f   :  { %3557 = vmatprep.mubr.msk.f32.mxu1 %vm100_vm0, %v90_v0 }
  0x40   :  { %3510 = vmatmul.mubr.msk.f32.gmra.mxu0 %vm100_vm0, %v59_v62 }
  0x42   :  { %3558 = vmatmul.mubr.msk.f32.gmra.mxu1 %vm100_vm0, %v91_v1 }
  0xc4   :  { %v3466_v4 = vpop.f32.mrf.mxu0 }
  0xc5   :  { %v4329_v5 = vadd.f32 %v3466_v4, %v4326_v3 }
  0xc6   :  { %v359_v6 = vpop.f32.mrf.mxu0  ;;  %v3514_v52 = vpop.f32.mrf.mxu1 }
  0xc7   :  { %v743_v7 = vmul.f32 0.044715, %v4329_v5  ;;  %v4333_v8 = vadd.f32 %v4326_v3, %v359_v6  ;;  %v4380_v63 = vadd.f32 %v3514_v52, %v4326_v3 }
  0xc8   :  { %v3469_v9 = vpop.f32.mrf.mxu0  ;;  %v519_v59 = vpop.f32.mrf.mxu1 }
  0xc9   :  { %v807_v10 = vmul.f32 %v743_v7, %v4329_v5  ;;  %v742_v11 = vmul.f32 0.044715, %v4333_v8  ;;  %v4338_v12 = vadd.f32 %v3469_v9, %v4326_v3  ;;  %v4383_v2 = vadd.f32 %v4326_v3, %v519_v59 }
  0xca   :  { %v369_v13 = vpop.f32.mrf.mxu0  ;;  %v678_v9 = vmul.f32 0.5, %v4333_v8 }
  0xcb   :  { %v871_v14 = vmul.f32 %v807_v10, %v4329_v5  ;;  %v806_v15 = vmul.f32 %v742_v11, %v4333_v8  ;;  %v745_v16 = vmul.f32 0.044715, %v4338_v12  ;;  %v4344_v17 = vadd.f32 %v4326_v3, %v369_v13  ;;  %v3517_v11 = vpop.f32.mrf.mxu1 }
  0xcc   :  { %v3472_v18 = vpop.f32.mrf.mxu0 }
  0xcd   :  { %v935_v19 = vadd.f32 %v871_v14, %v4329_v5  ;;  %v870_v20 = vmul.f32 %v806_v15, %v4333_v8  ;;  %v809_v21 = vmul.f32 %v745_v16, %v4338_v12  ;;  %v744_v22 = vmul.f32 0.044715, %v4344_v17 }
  0xce   :  { %v4351_v23 = vadd.f32 %v3472_v18, %v4326_v3  ;;  %v379_v24 = vpop.f32.mrf.mxu0  ;;  %v679_v14 = vmul.f32 0.5, %v4329_v5 }
  0xcf   :  { %v999_v25 = vmul.f32 0.7978846, %v935_v19  ;;  %v934_v26 = vadd.f32 %v870_v20, %v4333_v8  ;;  %v873_v27 = vmul.f32 %v809_v21, %v4338_v12  ;;  %v808_v28 = vmul.f32 %v744_v22, %v4344_v17 }
  0xd0   :  { %v747_v29 = vmul.f32 0.044715, %v4351_v23  ;;  %v4358_v30 = vadd.f32 %v4326_v3, %v379_v24  ;;  %v3475_v31 = vpop.f32.mrf.mxu0  ;;  %v680_v19 = vmul.f32 0.5, %v4344_v17  ;;  %v775_v20 = vmul.f32 0.044715, %v4380_v63 }
  0xd1   :  { %3760 = vtanh.f32 %v999_v25  ;;  %v937_v32 = vadd.f32 %v873_v27, %v4338_v12  ;;  %v872_v33 = vmul.f32 %v808_v28, %v4344_v17  ;;  %v998_v37 = vmul.f32 0.7978846, %v934_v26 }
  0xd2   :  { %v811_v34 = vmul.f32 %v747_v29, %v4351_v23  ;;  %v746_v35 = vmul.f32 0.044715, %v4358_v30  ;;  %v389_v36 = vpop.f32.mrf.mxu0  ;;  %v4375_v54 = vadd.f32 %v3475_v31, %v4326_v3  ;;  %v774_v25 = vmul.f32 0.044715, %v4383_v2  ;;  %v529_v29 = vpop.f32.mrf.mxu1 }
  0xd3   :  { %v936_v38 = vadd.f32 %v872_v33, %v4344_v17  ;;  %v1001_v39 = vmul.f32 0.7978846, %v937_v32  ;;  %3762 = vtanh.f32 %v998_v37  ;;  %v4369_v45 = vadd.f32 %v4326_v3, %v389_v36 }
  0xd4   :  { %v810_v40 = vmul.f32 %v746_v35, %v4358_v30  ;;  %v3478_v41 = vpop.f32.mrf.mxu0  ;;  %v875_v43 = vmul.f32 %v811_v34, %v4351_v23  ;;  %v749_v61 = vmul.f32 0.044715, %v4375_v54  ;;  %v681_v33 = vmul.f32 0.5, %v4338_v12 }
  0xd5   :  { %v1000_v42 = vmul.f32 0.7978846, %v936_v38  ;;  %3764 = vtanh.f32 %v1001_v39  ;;  %v748_v50 = vmul.f32 0.044715, %v4369_v45  ;;  %v4399_v24 = vadd.f32 %v3478_v41, %v4326_v3 }
  0xd6   :  { %v874_v44 = vmul.f32 %v810_v40, %v4358_v30  ;;  %v399_v46 = vpop.f32.mrf.mxu0  ;;  %v939_v49 = vadd.f32 %v875_v43, %v4351_v23  ;;  %v813_v15 = vmul.f32 %v749_v61, %v4375_v54  ;;  %v4417_v34 = vadd.f32 %v3517_v11, %v4326_v3 }
  0xd7   :  { %3766 = vtanh.f32 %v1000_v42  ;;  %v812_v57 = vmul.f32 %v748_v50, %v4369_v45  ;;  %v4387_v6 = vadd.f32 %v4326_v3, %v399_v46  ;;  %v839_v38 = vmul.f32 %v775_v20, %v4380_v63 }
  0xd8   :  { %v938_v47 = vadd.f32 %v874_v44, %v4358_v30  ;;  %v3481_v48 = vpop.f32.mrf.mxu0  ;;  %v1003_v60 = vmul.f32 0.7978846, %v939_v49  ;;  %v877_v31 = vmul.f32 %v813_v15, %v4375_v54  ;;  %6003 = vst [vmem:[#allocation3_spill] sm:$0xff] %v4417_v34  ;;  %v751_v40 = vmul.f32 0.044715, %v4399_v24  ;;  %v3520_v49 = vpop.f32.mrf.mxu1 }
  0xd9   :  { %v876_v4 = vmul.f32 %v812_v57, %v4369_v45  ;;  %v750_v26 = vmul.f32 0.044715, %v4387_v6  ;;  %v4405_v27 = vadd.f32 %v3481_v48, %v4326_v3  ;;  %v838_v42 = vmul.f32 %v774_v25, %v4383_v2 }
  0xda   :  { %v409_v51 = vpop.f32.mrf.mxu0  ;;  %v1002_v53 = vmul.f32 0.7978846, %v938_v47  ;;  %v682_v43 = vmul.f32 0.5, %v4358_v30  ;;  %v941_v50 = vadd.f32 %v877_v31, %v4375_v54  ;;  %v777_v30 = vmul.f32 0.044715, %v4417_v34 }
  0xdb   :  { %v940_v5 = vadd.f32 %v876_v4, %v4369_v45  ;;  %v4412_v32 = vadd.f32 %v4326_v3, %v409_v51  ;;  %v814_v12 = vmul.f32 %v750_v26, %v4387_v6  ;;  %v753_v44 = vmul.f32 0.044715, %v4405_v27 }
  0xdc   :  { %v3484_v55 = vpop.f32.mrf.mxu0  ;;  %3768 = vtanh.f32 %v1002_v53  ;;  %v815_v59 = vmul.f32 %v751_v40, %v4399_v24  ;;  %v1005_v20 = vmul.f32 0.7978846, %v941_v50 }
  0xdd   :  { %3770 = vtanh.f32 %v1003_v60  ;;  %v4420_v35 = vadd.f32 %v3484_v55, %v4326_v3  ;;  %v1004_v48 = vmul.f32 0.7978846, %v940_v5  ;;  %v752_v51 = vmul.f32 0.044715, %v4412_v32 }
  0xde   :  { %v3761_v56 = vpop.eup %3760  ;;  %v419_v58 = vpop.f32.mrf.mxu0  ;;  %v903_v60 = vmul.f32 %v839_v38, %v4380_v63 }
  0xdf   :  { %v1127_v1 = vadd.f32 1.0, %v3761_v56  ;;  %v4434_v52 = vadd.f32 %v4326_v3, %v419_v58  ;;  %v755_v53 = vmul.f32 0.044715, %v4420_v35  ;;  %3772 = vtanh.f32 %v1004_v48 }
  0xe0   :  { %v3487_v62 = vpop.f32.mrf.mxu0  ;;  %v3763_v0 = vpop.eup %3762  ;;  %v4445_v58 = vadd.f32 %v4326_v3, %v529_v29  ;;  %3774 = vtanh.f32 %v1005_v20  ;;  %v4472_v29 = vadd.f32 %v903_v60, %v4380_v63 }
  0xe1   :  { %v1126_v10 = vadd.f32 1.0, %v3763_v0  ;;  %v1191_v22 = vmul.f32 %v1127_v1, %v679_v14  ;;  %v4440_v55 = vadd.f32 %v3487_v62, %v4326_v3  ;;  %v878_v0 = vmul.f32 %v814_v12, %v4387_v6 }
  0xe2   :  { %v4389_v7 = vpop.f32.mrf.mxu0  ;;  %v3765_v13 = vpop.eup %3764  ;;  %v817_v1 = vmul.f32 %v753_v44, %v4405_v27  ;;  %v683_v62 = vmul.f32 0.5, %v4351_v23  ;;  %v754_v11 = vmul.f32 0.044715, %v4434_v52  ;;  %v841_v14 = vmul.f32 %v777_v30, %v4417_v34 }
  0xe3   :  { %v1190_v18 = vmul.f32 %v1126_v10, %v678_v9  ;;  %v1129_v8 = vadd.f32 1.0, %v3765_v13  ;;  %v4451_v9 = vpop.f32.mrf.mxu1  ;;  %v816_v10 = vmul.f32 %v752_v51, %v4412_v32  ;;  %v902_v13 = vmul.f32 %v838_v42, %v4383_v2 }
  0xe4   :  { %v4394_v16 = vpop.f32.mrf.mxu0  ;;  %v3767_v21 = vpop.eup %3766  ;;  %v819_v15 = vmul.f32 %v755_v53, %v4420_v35  ;;  %v4462_v23 = vadd.f32 %v4326_v3, %v4389_v7  ;;  %v942_v25 = vadd.f32 %v878_v0, %v4387_v6  ;;  %v881_v5 = vmul.f32 %v817_v1, %v4405_v27 }
  0xe5   :  { %3564 = vmatprep.mubr.msk.f32.mxu1 %vm1263_vm1, %v1190_v18  ;;  %v1128_v28 = vadd.f32 1.0, %v3767_v21  ;;  %v1193_v41 = vmul.f32 %v1129_v8, %v681_v33  ;;  %v757_v18 = vmul.f32 0.044715, %v4440_v55  ;;  %v879_v21 = vmul.f32 %v815_v59, %v4399_v24  ;;  %v4468_v26 = vpop.f32.mrf.mxu1 }
  0xe6   :  { %v4408_v17 = vpop.f32.mrf.mxu0  ;;  %3565 = vmatmul.mubr.msk.f32.vlgmr.msra.gmra.mxu1 %vm1263_vm1, %v1191_v22  ;;  %v776_v8 = vmul.f32 0.044715, %v4445_v58  ;;  %v905_v7 = vmul.f32 %v841_v14, %v4417_v34  ;;  %v880_v31 = vmul.f32 %v816_v10, %v4412_v32  ;;  %v883_v33 = vmul.f32 %v819_v15, %v4420_v35 }
  0xe7   :  { %v1192_v37 = vmul.f32 %v1128_v28, %v680_v19  ;;  %v818_v28 = vmul.f32 %v754_v11, %v4434_v52  ;;  %v4479_v38 = vadd.f32 %v902_v13, %v4383_v2  ;;  %v756_v40 = vmul.f32 0.044715, %v4462_v23  ;;  %v4497_v50 = vpop.f32.mrf.mxu1 }
  0xe8   :  { %v4422_v36 = vpop.f32.mrf.mxu0  ;;  %v945_v12 = vadd.f32 %v881_v5, %v4405_v27  ;;  %v4491_v44 = vadd.f32 %v4326_v3, %v4408_v17  ;;  %v1006_v48 = vmul.f32 0.7978846, %v942_v25  ;;  %v4504_v30 = vadd.f32 %v905_v7, %v4417_v34 }
  0xe9   :  { %v3769_v39 = vpop.eup %3768  ;;  %3567 = vmatprep.mubr.msk.f32.mxu1 %vm1263_vm1, %v1192_v37  ;;  %v821_v37 = vmul.f32 %v757_v18, %v4440_v55  ;;  %v882_v51 = vmul.f32 %v818_v28, %v4434_v52  ;;  %v4507_v53 = vadd.f32 %v3520_v49, %v4326_v3  ;;  %v944_v17 = vadd.f32 %v880_v31, %v4412_v32  ;;  %v4523_v11 = vpop.f32.mrf.mxu1 }
  0xea   :  { %v449_v46 = vpop.f32.mrf.mxu0  ;;  %v1130_v47 = vadd.f32 1.0, %v3769_v39  ;;  %3568 = vmatmul.mubr.msk.f32.gmra.mxu1 %vm1263_vm1, %v1193_v41  ;;  %v3771_v57 = vpop.eup %3770  ;;  %v943_v39 = vadd.f32 %v879_v21, %v4399_v24  ;;  %v4485_v41 = vadd.f32 %v4394_v16, %v4326_v3  ;;  %3776 = vtanh.f32 %v1006_v48 }
  0xeb   :  { %v1131_v4 = vadd.f32 1.0, %v3771_v57  ;;  %v4501_v16 = vadd.f32 %v4326_v3, %v449_v46  ;;  %6004 = vst [vmem:[#allocation4_spill] sm:$0xff] %v4507_v53  ;;  %v820_v59 = vmul.f32 %v756_v40, %v4462_v23  ;;  %v758_v1 = vmul.f32 0.044715, %v4491_v44 }
  0xec   :  { %v1194_v56 = vmul.f32 %v1130_v47, %v682_v43  ;;  %v3496_v61 = vpop.f32.mrf.mxu0  ;;  %v840_v43 = vmul.f32 %v776_v8, %v4445_v58  ;;  %v4495_v47 = vadd.f32 %v4422_v36, %v4326_v3  ;;  %v885_v36 = vmul.f32 %v821_v37, %v4440_v55  ;;  %v3773_v57 = vpop.eup %3772 }
  0xed   :  { %v1195_v19 = vmul.f32 %v1131_v4, %v683_v62  ;;  %v759_v46 = vmul.f32 0.044715, %v4485_v41  ;;  %v4517_v60 = vadd.f32 %v3496_v61, %v4326_v3  ;;  %v684_v4 = vmul.f32 0.5, %v4369_v45  ;;  %v3775_v37 = vpop.eup %3774 }
  0xee   :  { %3570 = vmatprep.mubr.msk.f32.mxu1 %vm1263_vm1, %v1194_v56  ;;  %v459_v22 = vpop.f32.mrf.mxu0  ;;  %v4511_v56 = vadd.f32 %v883_v33, %v4420_v35  ;;  %v904_v0 = vmul.f32 %v840_v43, %v4445_v58  ;;  %v761_v62 = vmul.f32 0.044715, %v4495_v47  ;;  %v1132_v10 = vadd.f32 1.0, %v3773_v57  ;;  %v4549_v33 = vpop.f32.mrf.mxu1 }
  0xef   :  { %3571 = vmatmul.mubr.msk.f32.gmra.mxu1 %vm1263_vm1, %v1195_v19  ;;  %v946_v13 = vadd.f32 %v882_v51, %v4434_v52  ;;  %v760_v14 = vmul.f32 0.044715, %v4501_v16  ;;  %v779_v15 = vmul.f32 0.044715, %v4507_v53  ;;  %v1007_v61 = vmul.f32 0.7978846, %v943_v39 }
  0xf0   :  { %v3499_v42 = vpop.f32.mrf.mxu0  ;;  %v4529_v18 = vadd.f32 %v885_v36, %v4440_v55  ;;  %v4532_v19 = vadd.f32 %v4326_v3, %v459_v22  ;;  %v1196_v45 = vmul.f32 %v1132_v10, %v684_v4  ;;  %v884_v21 = vmul.f32 %v820_v59, %v4462_v23  ;;  %v4567_v4 = vpop.f32.mrf.mxu1 }
  0xf1   :  { %v4535_v20 = vadd.f32 %v3499_v42, %v4326_v3  ;;  %v823_v8 = vmul.f32 %v759_v46, %v4485_v41  ;;  %v763_v25 = vmul.f32 0.044715, %v4517_v60  ;;  %3778 = vtanh.f32 %v1007_v61 }
  0xf2   :  { %v469_v49 = vpop.f32.mrf.mxu0  ;;  %v822_v28 = vmul.f32 %v758_v1, %v4491_v44  ;;  %v4542_v7 = vadd.f32 %v904_v0, %v4445_v58  ;;  %3573 = vmatprep.mubr.msk.f32.mxu1 %vm1263_vm1, %v1196_v45  ;;  %v4547_v22 = vadd.f32 %v4326_v3, %v4451_v9  ;;  %v1008_v31 = vmul.f32 0.7978846, %v944_v17 }
  0xf3   :  { %v825_v39 = vmul.f32 %v761_v62, %v4495_v47  ;;  %v824_v40 = vmul.f32 %v760_v14, %v4501_v16  ;;  %v843_v42 = vmul.f32 %v779_v15, %v4507_v53  ;;  %v685_v43 = vmul.f32 0.5, %v4375_v54 }
  0xf4   :  { %v3502_v5 = vpop.f32.mrf.mxu0  ;;  %6005 = vst [vmem:[#allocation5_spill] sm:$0xff] %v4547_v22  ;;  %v762_v48 = vmul.f32 0.044715, %v4532_v19  ;;  %v765_v51 = vmul.f32 0.044715, %v4535_v20  ;;  %v1133_v36 = vadd.f32 1.0, %v3775_v37  ;;  %3780 = vtanh.f32 %v1008_v31 }
  0xf5   :  { %v948_v9 = vadd.f32 %v884_v21, %v4462_v23  ;;  %v827_v17 = vmul.f32 %v763_v25, %v4517_v60  ;;  %v4560_v57 = vadd.f32 %v4326_v3, %v469_v49  ;;  %v1009_v46 = vmul.f32 0.7978846, %v945_v12 }
  0xf6   :  { %v479_v59 = vpop.f32.mrf.mxu0  ;;  %v887_v0 = vmul.f32 %v823_v8, %v4485_v41  ;;  %v1197_v1 = vmul.f32 %v1133_v36, %v685_v43  ;;  %v4564_v54 = vadd.f32 %v3502_v5, %v4326_v3  ;;  %v778_v62 = vmul.f32 0.044715, %v4547_v22  ;;  %v4588_v43 = vpop.f32.mrf.mxu1 }
  0xf7   :  { %v886_v10 = vmul.f32 %v822_v28, %v4491_v44  ;;  %v889_v14 = vmul.f32 %v825_v39, %v4495_v47  ;;  %v888_v15 = vmul.f32 %v824_v40, %v4501_v16  ;;  %3782 = vtanh.f32 %v1009_v46  ;;  %v3777_v21 = vpop.eup %3776 }
  0xf8   :  { %v826_v49 = vmul.f32 %v762_v48, %v4532_v19  ;;  %v829_v12 = vmul.f32 %v765_v51, %v4535_v20  ;;  %v907_v61 = vmul.f32 %v843_v42, %v4507_v53  ;;  %3574 = vmatmul.mubr.msk.f32.gmra.mxu1 %vm1263_vm1, %v1197_v1  ;;  %v4578_v45 = vadd.f32 %v4468_v26, %v4326_v3  ;;  %v3505_v28 = vpop.f32.mrf.mxu0 }
  0xf9   :  { %v891_v8 = vmul.f32 %v827_v17, %v4517_v60  ;;  %v764_v25 = vmul.f32 0.044715, %v4560_v57  ;;  %v686_v5 = vmul.f32 0.5, %v4387_v6  ;;  %v1010_v31 = vmul.f32 0.7978846, %v946_v13 }
  0xfa   :  { %6006 = vst [vmem:[#allocation6_spill] sm:$0xff] %v4578_v45  ;;  %v767_v37 = vmul.f32 0.044715, %v4564_v54  ;;  %v842_v39 = vmul.f32 %v778_v62, %v4547_v22  ;;  %v1134_v40 = vadd.f32 1.0, %v3777_v21  ;;  %v4586_v42 = vadd.f32 %v4326_v3, %v479_v59  ;;  %v489_v1 = vpop.f32.mrf.mxu0  ;;  %v4617_v21 = vpop.f32.mrf.mxu1 }
  0xfb   :  { %v4591_v26 = vadd.f32 %v887_v0, %v4485_v41  ;;  %v4594_v48 = vadd.f32 %v886_v10, %v4491_v44  ;;  %v4597_v6 = vadd.f32 %v889_v14, %v4495_v47  ;;  %3784 = vtanh.f32 %v1010_v31 }
  0xfc   :  { %v890_v13 = vmul.f32 %v826_v49, %v4532_v19  ;;  %v893_v51 = vmul.f32 %v829_v12, %v4535_v20  ;;  %v1198_v36 = vmul.f32 %v1134_v40, %v686_v5  ;;  %v781_v17 = vmul.f32 0.044715, %v4578_v45 }
  0xfd   :  { %v4603_v59 = vadd.f32 %v888_v15, %v4501_v16  ;;  %v828_v46 = vmul.f32 %v764_v25, %v4560_v57  ;;  %v4607_v0 = vadd.f32 %v907_v61, %v4507_v53  ;;  %v1011_v62 = vmul.f32 0.7978846, %v4511_v56 }
  0xfe   :  { %v3779_v10 = vpop.eup %3778  ;;  %v4611_v14 = vadd.f32 %v891_v8, %v4517_v60  ;;  %v831_v49 = vmul.f32 %v767_v37, %v4564_v54  ;;  %v906_v12 = vmul.f32 %v842_v39, %v4547_v22  ;;  %3576 = vmatprep.mubr.msk.f32.mxu1 %vm1263_vm1, %v1198_v36  ;;  %v766_v15 = vmul.f32 0.044715, %v4586_v42 }
  0xff   :  { %v687_v61 = vmul.f32 0.5, %v4399_v24  ;;  %v1135_v25 = vadd.f32 1.0, %v3779_v10  ;;  %v4621_v5 = vadd.f32 %v3505_v28, %v4326_v3  ;;  %3786 = vtanh.f32 %v1011_v62  ;;  %v3508_v62 = vpop.f32.mrf.mxu0 }
 0x100   :  { %v4624_v56 = vadd.f32 %v890_v13, %v4532_v19  ;;  %v4627_v8 = vadd.f32 %v893_v51, %v4535_v20  ;;  %v845_v31 = vmul.f32 %v781_v17, %v4578_v45  ;;  %v1012_v37 = vmul.f32 0.7978846, %v948_v9  ;;  %v2417_v13 = vld [vmem:[%s5993_s5] sm:$0xff]  ;;  %v4646_v17 = vpop.f32.mrf.mxu1 }
 0x101   :  { %v3781_v39 = vpop.eup %3780  ;;  %v892_v40 = vmul.f32 %v828_v46, %v4560_v57  ;;  %v1199_v36 = vmul.f32 %v1135_v25, %v687_v61  ;;  %v4633_v24 = vadd.f32 %v4326_v3, %v4497_v50  ;;  %v688_v28 = vmul.f32 0.5, %v4412_v32  ;;  %3660 = vmatprep.subr.mxu0 %v2417_v13 }
 0x102   :  { %v1136_v51 = vadd.f32 1.0, %v3781_v39  ;;  %v4640_v10 = vadd.f32 %v4326_v3, %v489_v1  ;;  %v4644_v9 = vadd.f32 %v4523_v11, %v4326_v3  ;;  %3788 = vtanh.f32 %v1012_v37  ;;  %3661 = vmatpush3.msra.mxu0 %v2417_v13 }
 0x103   :  { %6007 = vst [vmem:[#allocation7_spill] sm:$0xff] %v4633_v24  ;;  %v895_v50 = vmul.f32 %v831_v49, %v4564_v54  ;;  %v4650_v32 = vadd.f32 %v906_v12, %v4547_v22  ;;  %v830_v46 = vmul.f32 %v766_v15, %v4586_v42  ;;  %3577 = vmatmul.mubr.msk.f32.gmra.mxu1 %vm1263_vm1, %v1199_v36  ;;  %v769_v1 = vmul.f32 0.044715, %v4621_v5 }
 0x104   :  { %6008 = vst [vmem:[#allocation8_spill] sm:$0xff] %v4644_v9  ;;  %v3783_v61 = vpop.eup %3782  ;;  %v909_v11 = vmul.f32 %v845_v31, %v4578_v45  ;;  %v1200_v25 = vmul.f32 %v1136_v51, %v688_v28  ;;  %v4657_v37 = vadd.f32 %v3508_v62, %v4326_v3  ;;  %v1013_v39 = vmul.f32 0.7978846, %v4529_v18  ;;  %v499_v62 = vpop.f32.mrf.mxu0 }
 0x105   :  { %v4661_v49 = vadd.f32 %v892_v40, %v4560_v57  ;;  %v780_v12 = vmul.f32 0.044715, %v4633_v24  ;;  %v689_v15 = vmul.f32 0.5, %v4405_v27  ;;  %v1137_v36 = vadd.f32 1.0, %v3783_v61  ;;  %v4672_v18 = vpop.f32.mrf.mxu1 }
 0x106   :  { %3579 = vmatprep.mubr.msk.f32.mxu1 %vm1263_vm1, %v1200_v25  ;;  %v768_v13 = vmul.f32 0.044715, %v4640_v10  ;;  %v783_v31 = vmul.f32 0.044715, %v4644_v9  ;;  %v4670_v28 = vadd.f32 %v4326_v3, %v4549_v33  ;;  %3790 = vtanh.f32 %v1013_v39 }
 0x107   :  { %v894_v40 = vmul.f32 %v830_v46, %v4586_v42  ;;  %v833_v51 = vmul.f32 %v769_v1, %v4621_v5  ;;  %v1201_v27 = vmul.f32 %v1137_v36, %v689_v15  ;;  %v1014_v61 = vmul.f32 0.7978846, %v4594_v48  ;;  %v4691_v36 = vpop.f32.mrf.mxu1 }
 0x108   :  { %v3785_v25 = vpop.eup %3784  ;;  %v4678_v53 = vadd.f32 %v895_v50, %v4564_v54  ;;  %v4681_v22 = vadd.f32 %v909_v11, %v4578_v45  ;;  %v771_v33 = vmul.f32 0.044715, %v4657_v37  ;;  %v1015_v39 = vmul.f32 0.7978846, %v4591_v26  ;;  %v3511_v11 = vpop.f32.mrf.mxu0 }
 0x109   :  { %v844_v34 = vmul.f32 %v780_v12, %v4633_v24  ;;  %3580 = vmatmul.mubr.msk.f32.gmra.mxu1 %vm1263_vm1, %v1201_v27  ;;  %v690_v46 = vmul.f32 0.5, %v4434_v52  ;;  %v1138_v1 = vadd.f32 1.0, %v3785_v25  ;;  %3792 = vtanh.f32 %v1014_v61 }
 0x10a   :  { %v832_v48 = vmul.f32 %v768_v13, %v4640_v10  ;;  %v847_v50 = vmul.f32 %v783_v31, %v4644_v9  ;;  %v782_v15 = vmul.f32 0.044715, %v4670_v28  ;;  %3794 = vtanh.f32 %v1015_v39 }
 0x10b   :  { %v4694_v26 = vadd.f32 %v894_v40, %v4586_v42  ;;  %v897_v12 = vmul.f32 %v833_v51, %v4621_v5  ;;  %v1202_v27 = vmul.f32 %v1138_v1, %v690_v46  ;;  %v1016_v52 = vmul.f32 0.7978846, %v4603_v59  ;;  %v4716_v1 = vpop.f32.mrf.mxu1 }
 0x10c   :  { %v3787_v25 = vpop.eup %3786  ;;  %v835_v61 = vmul.f32 %v771_v33, %v4657_v37  ;;  %v4700_v13 = vadd.f32 %v4326_v3, %v499_v62  ;;  %v4704_v31 = vadd.f32 %v4567_v4, %v4326_v3  ;;  %v691_v39 = vmul.f32 0.5, %v4420_v35 }
 0x10d   :  { %3582 = vmatprep.mubr.msk.f32.mxu1 %vm1263_vm1, %v1202_v27  ;;  %v1139_v40 = vadd.f32 1.0, %v3787_v25  ;;  %v4709_v51 = vadd.f32 %v3511_v11, %v4326_v3  ;;  %3796 = vtanh.f32 %v1016_v52  ;;  %v1017_v59 = vmul.f32 0.7978846, %v4597_v6  ;;  %v509_v11 = vpop.f32.mrf.mxu0 }
 0x10e   :  { %v908_v33 = vmul.f32 %v844_v34, %v4633_v24  ;;  %v896_v62 = vmul.f32 %v832_v48, %v4640_v10  ;;  %v911_v46 = vmul.f32 %v847_v50, %v4644_v9  ;;  %v846_v4 = vmul.f32 %v782_v15, %v4670_v28 }
 0x10f   :  { %v3789_v35 = vpop.eup %3788  ;;  %v1203_v45 = vmul.f32 %v1139_v40, %v691_v39  ;;  %v4720_v27 = vadd.f32 %v4326_v3, %v4588_v43  ;;  %3798 = vtanh.f32 %v1017_v59  ;;  %v1018_v6 = vmul.f32 0.7978846, %v4624_v56  ;;  %v4738_v40 = vpop.f32.mrf.mxu1 }
 0x110   :  { %v4724_v34 = vadd.f32 %v897_v12, %v4621_v5  ;;  %v770_v48 = vmul.f32 0.044715, %v4700_v13  ;;  %v692_v50 = vmul.f32 0.5, %v4462_v23  ;;  %v1140_v15 = vadd.f32 1.0, %v3789_v35 }
 0x111   :  { %v899_v52 = vmul.f32 %v835_v61, %v4657_v37  ;;  %v785_v25 = vmul.f32 0.044715, %v4704_v31  ;;  %3583 = vmatmul.mubr.msk.f32.gmra.mxu1 %vm1263_vm1, %v1203_v45  ;;  %v773_v43 = vmul.f32 0.044715, %v4709_v51  ;;  %3800 = vtanh.f32 %v1018_v6 }
 0x112   :  { %v4733_v39 = vadd.f32 %v908_v33, %v4633_v24  ;;  %v1204_v56 = vmul.f32 %v1140_v15, %v692_v50  ;;  %v4736_v12 = vadd.f32 %v4326_v3, %v509_v11  ;;  %v1019_v23 = vmul.f32 0.7978846, %v4611_v14 }
 0x113   :  { %v3791_v59 = vpop.eup %3790  ;;  %v4742_v61 = vadd.f32 %v896_v62, %v4640_v10  ;;  %v4745_v45 = vadd.f32 %v911_v46, %v4644_v9  ;;  %v910_v35 = vmul.f32 %v846_v4, %v4670_v28  ;;  %v784_v33 = vmul.f32 0.044715, %v4720_v27 }
 0x114   :  { %3585 = vmatprep.mubr.msk.f32.mxu1 %vm1263_vm1, %v1204_v56  ;;  %v693_v11 = vmul.f32 0.5, %v4440_v55  ;;  %v1141_v6 = vadd.f32 1.0, %v3791_v59  ;;  %3802 = vtanh.f32 %v1019_v23  ;;  %v1020_v50 = vmul.f32 0.7978846, %v4661_v49  ;;  %v4759_v56 = vpop.f32.mrf.mxu1 }
 0x115   :  { %v4753_v14 = vadd.f32 %v899_v52, %v4657_v37  ;;  %v834_v62 = vmul.f32 %v770_v48, %v4700_v13  ;;  %v849_v46 = vmul.f32 %v785_v25, %v4704_v31  ;;  %v837_v15 = vmul.f32 %v773_v43, %v4709_v51 }
 0x116   :  { %v3793_v4 = vpop.eup %3792  ;;  %v772_v9 = vmul.f32 0.044715, %v4736_v12  ;;  %v1205_v24 = vmul.f32 %v1141_v6, %v693_v11  ;;  %3804 = vtanh.f32 %v1020_v50  ;;  %v1021_v55 = vmul.f32 0.7978846, %v4627_v8 }
 0x117   :  { %v3795_v23 = vpop.eup %3794  ;;  %v848_v49 = vmul.f32 %v784_v33, %v4720_v27  ;;  %v4765_v52 = vadd.f32 %v4617_v21, %v4326_v3  ;;  %v694_v48 = vmul.f32 0.5, %v4491_v44  ;;  %v1142_v25 = vadd.f32 1.0, %v3793_v4 }
 0x118   :  { %3586 = vmatmul.mubr.msk.f32.gmra.mxu1 %vm1263_vm1, %v1205_v24  ;;  %v4771_v43 = vadd.f32 %v4326_v3, %v4646_v17  ;;  %v695_v59 = vmul.f32 0.5, %v4485_v41  ;;  %v1143_v11 = vadd.f32 1.0, %v3795_v23  ;;  %3806 = vtanh.f32 %v1021_v55  ;;  %v4781_v17 = vpop.f32.mrf.mxu1 }
 0x119   :  { %v4775_v8 = vadd.f32 %v910_v35, %v4670_v28  ;;  %v898_v33 = vmul.f32 %v834_v62, %v4700_v13  ;;  %v913_v21 = vmul.f32 %v849_v46, %v4704_v31  ;;  %v1206_v6 = vmul.f32 %v1142_v25, %v694_v48 }
 0x11a   :  { %v3797_v44 = vpop.eup %3796  ;;  %v901_v50 = vmul.f32 %v837_v15, %v4709_v51  ;;  %v836_v24 = vmul.f32 %v772_v9, %v4736_v12  ;;  %v1207_v4 = vmul.f32 %v1143_v11, %v695_v59  ;;  %v1022_v41 = vmul.f32 0.7978846, %v4694_v26 }
 0x11b   :  { %v912_v55 = vmul.f32 %v848_v49, %v4720_v27  ;;  %v787_v35 = vmul.f32 0.044715, %v4765_v52  ;;  %3588 = vmatprep.mubr.msk.f32.mxu1 %vm1263_vm1, %v1206_v6  ;;  %v696_v62 = vmul.f32 0.5, %v4501_v16  ;;  %v1144_v46 = vadd.f32 1.0, %v3797_v44  ;;  %v3544_v44 = vpop.f32.mrf.mxu1 }
 0x11c   :  { %v3799_v23 = vpop.eup %3798  ;;  %v786_v48 = vmul.f32 0.044715, %v4771_v43  ;;  %v4791_v9 = vadd.f32 %v4672_v18, %v4326_v3  ;;  %3589 = vmatmul.mubr.msk.f32.gmra.mxu1 %vm1263_vm1, %v1207_v4  ;;  %3808 = vtanh.f32 %v1022_v41  ;;  %v1023_v26 = vmul.f32 0.7978846, %v4678_v53 }
 0x11d   :  { %v962_v15 = vadd.f32 %v898_v33, %v4700_v13  ;;  %v1208_v49 = vmul.f32 %v1144_v46, %v696_v62  ;;  %v697_v25 = vmul.f32 0.5, %v4495_v47  ;;  %v1145_v59 = vadd.f32 1.0, %v3799_v23 }
 0x11e   :  { %v3801_v16 = vpop.eup %3800  ;;  %v4798_v11 = vadd.f32 %v913_v21, %v4704_v31  ;;  %v4801_v6 = vadd.f32 %v901_v50, %v4709_v51  ;;  %v900_v18 = vmul.f32 %v836_v24, %v4736_v12  ;;  %3810 = vtanh.f32 %v1023_v26  ;;  %v619_v26 = vpop.f32.mrf.mxu1 }
 0x11f   :  { %v851_v4 = vmul.f32 %v787_v35, %v4765_v52  ;;  %3591 = vmatprep.mubr.msk.f32.mxu1 %vm1263_vm1, %v1208_v49  ;;  %v1209_v53 = vmul.f32 %v1145_v59, %v697_v25  ;;  %v698_v33 = vmul.f32 0.5, %v4532_v19  ;;  %v1146_v47 = vadd.f32 1.0, %v3801_v16 }
 0x120   :  { %v4808_v41 = vadd.f32 %v912_v55, %v4720_v27  ;;  %v850_v21 = vmul.f32 %v786_v48, %v4771_v43  ;;  %v789_v50 = vmul.f32 0.044715, %v4791_v9  ;;  %v1024_v62 = vmul.f32 0.7978846, %v4742_v61 }
 0x121   :  { %v3803_v24 = vpop.eup %3802  ;;  %v4815_v46 = vadd.f32 %v4326_v3, %v4691_v36  ;;  %v4819_v35 = vadd.f32 %v4716_v1, %v4326_v3  ;;  %3592 = vmatmul.mubr.msk.f32.gmra.mxu1 %vm1263_vm1, %v1209_v53  ;;  %v1210_v19 = vmul.f32 %v1146_v47, %v698_v33  ;;  %v1025_v55 = vmul.f32 0.7978846, %v4724_v34 }
 0x122   :  { %v4825_v23 = vadd.f32 %v4326_v3, %v4738_v40  ;;  %v699_v61 = vmul.f32 0.5, %v4517_v60  ;;  %v1147_v48 = vadd.f32 1.0, %v3803_v24  ;;  %3812 = vtanh.f32 %v1024_v62  ;;  %v3547_v24 = vpop.f32.mrf.mxu1 }
 0x123   :  { %v3805_v36 = vpop.eup %3804  ;;  %v964_v49 = vadd.f32 %v900_v18, %v4736_v12  ;;  %v915_v1 = vmul.f32 %v851_v4, %v4765_v52  ;;  %3594 = vmatprep.mubr.msk.f32.mxu1 %vm1263_vm1, %v1210_v19  ;;  %v4833_v25 = vadd.f32 %v4759_v56, %v4326_v3  ;;  %3814 = vtanh.f32 %v1025_v55 }
 0x124   :  { %v853_v34 = vmul.f32 %v789_v50, %v4791_v9  ;;  %v1211_v40 = vmul.f32 %v1147_v48, %v699_v61  ;;  %v700_v60 = vmul.f32 0.5, %v4560_v57  ;;  %v1148_v59 = vadd.f32 1.0, %v3805_v36 }
 0x125   :  { %v3807_v16 = vpop.eup %3806  ;;  %v914_v53 = vmul.f32 %v850_v21, %v4771_v43  ;;  %v788_v18 = vmul.f32 0.044715, %v4815_v46  ;;  %v791_v4 = vmul.f32 0.044715, %v4819_v35  ;;  %v1026_v33 = vmul.f32 0.7978846, %v962_v15 }
 0x126   :  { %v790_v47 = vmul.f32 0.044715, %v4825_v23  ;;  %3595 = vmatmul.mubr.msk.f32.gmra.mxu1 %vm1263_vm1, %v1211_v40  ;;  %v1212_v56 = vmul.f32 %v1148_v59, %v700_v60  ;;  %v701_v62 = vmul.f32 0.5, %v4535_v20  ;;  %v1149_v50 = vadd.f32 1.0, %v3807_v16 }
 0x127   :  { %v793_v57 = vmul.f32 0.044715, %v4833_v25  ;;  %v4846_v19 = vadd.f32 %v4326_v3, %v4781_v17  ;;  %3816 = vtanh.f32 %v1026_v33  ;;  %v1027_v21 = vmul.f32 0.7978846, %v4753_v14 }
 0x128   :  { %v4850_v15 = vadd.f32 %v915_v1, %v4765_v52  ;;  %v917_v55 = vmul.f32 %v853_v34, %v4791_v9  ;;  %3597 = vmatprep.mubr.msk.f32.mxu1 %vm1263_vm1, %v1212_v56  ;;  %v4855_v20 = vadd.f32 %v3544_v44, %v4326_v3  ;;  %v1213_v61 = vmul.f32 %v1149_v50, %v701_v62  ;;  %v629_v44 = vpop.f32.mrf.mxu1 }
 0x129   :  { %v3809_v48 = vpop.eup %3808  ;;  %v852_v36 = vmul.f32 %v788_v18, %v4815_v46  ;;  %v855_v17 = vmul.f32 %v791_v4, %v4819_v35  ;;  %3818 = vtanh.f32 %v1027_v21  ;;  %v1028_v40 = vmul.f32 0.7978846, %v964_v49 }
 0x12a   :  { %v854_v14 = vmul.f32 %v790_v47, %v4825_v23  ;;  %3598 = vmatmul.mubr.msk.f32.gmra.mxu1 %vm1263_vm1, %v1213_v61  ;;  %v4862_v1 = vadd.f32 %v4326_v3, %v619_v26  ;;  %v702_v34 = vmul.f32 0.5, %v4586_v42  ;;  %v1150_v60 = vadd.f32 1.0, %v3809_v48 }
 0x12b   :  { %v3811_v59 = vpop.eup %3810  ;;  %v857_v16 = vmul.f32 %v793_v57, %v4833_v25  ;;  %v792_v18 = vmul.f32 0.044715, %v4846_v19  ;;  %3820 = vtanh.f32 %v1028_v40  ;;  %v1029_v4 = vmul.f32 0.7978846, %v4801_v6 }
 0x12c   :  { %v795_v49 = vmul.f32 0.044715, %v4855_v20  ;;  %v1214_v33 = vmul.f32 %v1150_v60, %v702_v34  ;;  %v703_v47 = vmul.f32 0.5, %v4564_v54  ;;  %v1151_v56 = vadd.f32 1.0, %v3811_v59  ;;  %v3550_v54 = vpop.f32.mrf.mxu1 }
 0x12d   :  { %v4871_v3 = vadd.f32 %v914_v53, %v4771_v43  ;;  %v4874_v42 = vadd.f32 %v917_v55, %v4791_v9  ;;  %3822 = vtanh.f32 %v1029_v4  ;;  %v1030_v26 = vmul.f32 0.7978846, %v4479_v38 }
 0x12e   :  { %v916_v62 = vmul.f32 %v852_v36, %v4815_v46  ;;  %v919_v50 = vmul.f32 %v855_v17, %v4819_v35  ;;  %v794_v6 = vmul.f32 0.044715, %v4862_v1  ;;  %3600 = vmatprep.mubr.msk.f32.mxu1 %vm1263_vm1, %v1214_v33  ;;  %v1215_v57 = vmul.f32 %v1151_v56, %v703_v47  ;;  %v4902_v4 = vpop.f32.mrf.mxu1 }
 0x12f   :  { %v3813_v21 = vpop.eup %3812  ;;  %v918_v53 = vmul.f32 %v854_v14, %v4825_v23  ;;  %v921_v61 = vmul.f32 %v857_v16, %v4833_v25  ;;  %3824 = vtanh.f32 %v1030_v26  ;;  %v1031_v55 = vmul.f32 0.7978846, %v4472_v29  ;;  %v4897_v16 = vld [vmem:[%s5992_s2] ss:$0 sm:$0xff] }
 0x130   :  { %v3815_v48 = vpop.eup %3814  ;;  %v856_v38 = vmul.f32 %v792_v18, %v4846_v19  ;;  %v859_v36 = vmul.f32 %v795_v49, %v4855_v20  ;;  %3601 = vmatmul.mubr.msk.f32.gmra.mxu1 %vm1263_vm1, %v1215_v57  ;;  %v704_v17 = vmul.f32 0.5, %v4640_v10  ;;  %v1152_v40 = vadd.f32 1.0, %v3813_v21 }
 0x131   :  { %v705_v34 = vmul.f32 0.5, %v4621_v5  ;;  %v1153_v60 = vadd.f32 1.0, %v3815_v48  ;;  %3826 = vtanh.f32 %v1031_v55  ;;  %v1032_v14 = vmul.f32 0.7978846, %v4542_v7 }
 0x132   :  { %v4891_v59 = vadd.f32 %v916_v62, %v4815_v46  ;;  %v858_v29 = vmul.f32 %v794_v6, %v4862_v1  ;;  %v4900_v18 = vadd.f32 %v4897_v16, %v3547_v24  ;;  %v1216_v10 = vmul.f32 %v1152_v40, %v704_v17 }
 0x133   :  { %v4905_v5 = vadd.f32 %v919_v50, %v4819_v35  ;;  %v4908_v7 = vadd.f32 %v918_v53, %v4825_v23  ;;  %v1217_v49 = vmul.f32 %v1153_v60, %v705_v34  ;;  %3828 = vtanh.f32 %v1032_v14 }
 0x134   :  { %v3817_v33 = vpop.eup %3816  ;;  %v4911_v47 = vadd.f32 %v921_v61, %v4833_v25  ;;  %v920_v56 = vmul.f32 %v856_v38, %v4846_v19  ;;  %v4915_v24 = vadd.f32 %v4897_v16, %v629_v44  ;;  %3603 = vmatprep.mubr.msk.f32.mxu1 %vm1263_vm1, %v1216_v10  ;;  %v1033_v26 = vmul.f32 0.7978846, %v4504_v30  ;;  %v4925_v44 = vpop.f32.mrf.mxu1 }
 0x135   :  { %v923_v62 = vmul.f32 %v859_v36, %v4855_v20  ;;  %3604 = vmatmul.mubr.msk.f32.gmra.mxu1 %vm1263_vm1, %v1217_v49  ;;  %v706_v50 = vmul.f32 0.5, %v4700_v13  ;;  %v1154_v6 = vadd.f32 1.0, %v3817_v33  ;;  %v1034_v57 = vmul.f32 0.7978846, %v4650_v32 }
 0x136   :  { %v3819_v21 = vpop.eup %3818  ;;  %v922_v53 = vmul.f32 %v858_v29, %v4862_v1  ;;  %v797_v61 = vmul.f32 0.044715, %v4900_v18  ;;  %3830 = vtanh.f32 %v1033_v26  ;;  %v1035_v55 = vmul.f32 0.7978846, %v4607_v0  ;;  %v649_v29 = vpop.f32.mrf.mxu1 }
 0x137   :  { %v1218_v30 = vmul.f32 %v1154_v6, %v706_v50  ;;  %v707_v48 = vmul.f32 0.5, %v4657_v37  ;;  %v1155_v38 = vadd.f32 1.0, %v3819_v21  ;;  %3832 = vtanh.f32 %v1034_v57 }
 0x138   :  { %v3821_v36 = vpop.eup %3820  ;;  %v796_v13 = vmul.f32 0.044715, %v4915_v24  ;;  %v4931_v32 = vadd.f32 %v4897_v16, %v3550_v54  ;;  %3834 = vtanh.f32 %v1035_v55  ;;  %v1036_v17 = vmul.f32 0.7978846, %v4733_v39 }
 0x139   :  { %3606 = vmatprep.mubr.msk.f32.mxu1 %vm1263_vm1, %v1218_v30  ;;  %v1219_v40 = vmul.f32 %v1155_v38, %v707_v48  ;;  %v708_v34 = vmul.f32 0.5, %v4736_v12  ;;  %v1156_v0 = vadd.f32 1.0, %v3821_v36  ;;  %v1037_v60 = vmul.f32 0.7978846, %v4681_v22 }
 0x13a   :  { %v3823_v37 = vpop.eup %3822  ;;  %v861_v14 = vmul.f32 %v797_v61, %v4900_v18  ;;  %v709_v10 = vmul.f32 0.5, %v4709_v51  ;;  %3836 = vtanh.f32 %v1036_v17  ;;  %v1038_v54 = vmul.f32 0.7978846, %v4775_v8  ;;  %v4949_v61 = vpop.f32.mrf.mxu1 }
 0x13b   :  { %3607 = vmatmul.mubr.msk.f32.gmra.mxu1 %vm1263_vm1, %v1219_v40  ;;  %v1220_v39 = vmul.f32 %v1156_v0, %v708_v34  ;;  %v1157_v49 = vadd.f32 1.0, %v3823_v37  ;;  %v710_v33 = vmul.f32 0.5, %v4383_v2  ;;  %3838 = vtanh.f32 %v1037_v60  ;;  %v6009_v34 = vld [vmem:[#allocation3_spill] sm:$0xff]  ;;  %v6010_v37 = vld [vmem:[#allocation5_spill] sm:$0xff] }
 0x13c   :  { %v3825_v12 = vpop.eup %3824  ;;  %v860_v26 = vmul.f32 %v796_v13, %v4915_v24  ;;  %3840 = vtanh.f32 %v1038_v54  ;;  %v1039_v22 = vmul.f32 0.7978846, %v4745_v45  ;;  %v1040_v50 = vmul.f32 0.7978846, %v4808_v41 }
 0x13d   :  { %v799_v51 = vmul.f32 0.044715, %v4931_v32  ;;  %3609 = vmatprep.mubr.msk.f32.mxu1 %vm1263_vm1, %v1220_v39  ;;  %v1221_v8 = vmul.f32 %v1157_v49, %v709_v10  ;;  %v1158_v6 = vadd.f32 1.0, %v3825_v12  ;;  %v711_v57 = vmul.f32 0.5, %v4380_v63 }
 0x13e   :  { %v3827_v21 = vpop.eup %3826  ;;  %v925_v2 = vmul.f32 %v861_v14, %v4900_v18  ;;  %v712_v55 = vmul.f32 0.5, %v4445_v58  ;;  %3842 = vtanh.f32 %v1039_v22  ;;  %v1041_v45 = vmul.f32 0.7978846, %v4798_v11 }
 0x13f   :  { %3610 = vmatmul.mubr.msk.f32.gmra.mxu1 %vm1263_vm1, %v1221_v8  ;;  %v1222_v41 = vmul.f32 %v1158_v6, %v710_v33  ;;  %v1159_v30 = vadd.f32 1.0, %v3827_v21  ;;  %3844 = vtanh.f32 %v1040_v50  ;;  %v1042_v48 = vmul.f32 0.7978846, %v4871_v3  ;;  %v6011_v50 = vld [vmem:[#allocation4_spill] sm:$0xff] }
 0x140   :  { %v3829_v38 = vpop.eup %3828  ;;  %v984_v63 = vadd.f32 %v920_v56, %v4846_v19  ;;  %v4957_v36 = vadd.f32 %v923_v62, %v4855_v20  ;;  %v4960_v13 = vadd.f32 %v922_v53, %v4862_v1  ;;  %v4964_v58 = vadd.f32 %v4897_v16, %v4902_v4  ;;  %v659_v62 = vpop.f32.mrf.mxu1 }
 0x141   :  { %v924_v11 = vmul.f32 %v860_v26, %v4915_v24  ;;  %v863_v17 = vmul.f32 %v799_v51, %v4931_v32  ;;  %3612 = vmatprep.mubr.msk.f32.mxu1 %vm1263_vm1, %v1222_v41  ;;  %v1223_v3 = vmul.f32 %v1159_v30, %v711_v57  ;;  %v1160_v40 = vadd.f32 1.0, %v3829_v38 }
 0x142   :  { %v4970_v56 = vadd.f32 %v925_v2, %v4900_v18  ;;  %v713_v0 = vmul.f32 0.5, %v6009_v34  ;;  %3846 = vtanh.f32 %v1041_v45  ;;  %v1043_v53 = vmul.f32 0.7978846, %v4850_v15  ;;  %v3559_v8 = vpop.f32.mrf.mxu1  ;;  %v6012_v2 = vld [vmem:[#allocation7_spill] sm:$0xff] }
 0x143   :  { %v3831_v60 = vpop.eup %3830  ;;  %3613 = vmatmul.mubr.msk.f32.gmra.mxu1 %vm1263_vm1, %v1223_v3  ;;  %v1224_v4 = vmul.f32 %v1160_v40, %v712_v55  ;;  %v714_v14 = vmul.f32 0.5, %v6010_v37  ;;  %3848 = vtanh.f32 %v1042_v48  ;;  %v1044_v10 = vmul.f32 0.7978846, %v4891_v59 }
 0x144   :  { %v3833_v54 = vpop.eup %3832  ;;  %v798_v39 = vmul.f32 0.044715, %v4964_v58  ;;  %v4980_v49 = vadd.f32 %v4897_v16, %v4925_v44  ;;  %v4983_v33 = vadd.f32 %v4897_v16, %v649_v29  ;;  %v1161_v15 = vadd.f32 1.0, %v3831_v60 }
 0x145   :  { %v3835_v12 = vpop.eup %3834  ;;  %v4986_v26 = vadd.f32 %v924_v11, %v4915_v24  ;;  %v927_v22 = vmul.f32 %v863_v17, %v4931_v32  ;;  %3615 = vmatprep.mubr.msk.f32.mxu1 %vm1263_vm1, %v1224_v4  ;;  %v1162_v59 = vadd.f32 1.0, %v3833_v54  ;;  %v715_v51 = vmul.f32 0.5, %v6011_v50 }
 0x146   :  { %v1225_v6 = vmul.f32 %v1161_v15, %v713_v0  ;;  %v1163_v57 = vadd.f32 1.0, %v3835_v12  ;;  %3850 = vtanh.f32 %v1043_v53  ;;  %v1045_v44 = vmul.f32 0.7978846, %v4874_v42  ;;  %v669_v0 = vpop.f32.mrf.mxu1 }
 0x147   :  { %v3837_v29 = vpop.eup %3836  ;;  %v1226_v21 = vmul.f32 %v1162_v59, %v714_v14  ;;  %v716_v55 = vmul.f32 0.5, %v6012_v2  ;;  %3852 = vtanh.f32 %v1044_v10  ;;  %v1046_v45 = vmul.f32 0.7978846, %v4908_v7  ;;  %v6013_v7 = vld [vmem:[#allocation6_spill] sm:$0xff] }
 0x148   :  { %v3839_v41 = vpop.eup %3838  ;;  %v862_v30 = vmul.f32 %v798_v39, %v4964_v58  ;;  %v801_v48 = vmul.f32 0.044715, %v4980_v49  ;;  %v800_v38 = vmul.f32 0.044715, %v4983_v33  ;;  %3616 = vmatmul.mubr.msk.f32.gmra.mxu1 %vm1263_vm1, %v1225_v6  ;;  %v1164_v11 = vadd.f32 1.0, %v3837_v29 }
 0x149   :  { %v3841_v17 = vpop.eup %3840  ;;  %v4999_v42 = vadd.f32 %v927_v22, %v4931_v32  ;;  %v5002_v3 = vadd.f32 %v4897_v16, %v659_v62  ;;  %3618 = vmatprep.mubr.msk.f32.mxu1 %vm1263_vm1, %v1226_v21  ;;  %v717_v40 = vmul.f32 0.5, %v6013_v7  ;;  %v718_v34 = vmul.f32 0.5, %v4670_v28 }
 0x14a   :  { %v1227_v53 = vmul.f32 %v1163_v57, %v715_v51  ;;  %v1165_v60 = vadd.f32 1.0, %v3839_v41  ;;  %3854 = vtanh.f32 %v1045_v44  ;;  %v1047_v4 = vmul.f32 0.7978846, %v4905_v5 }
 0x14b   :  { %v3843_v37 = vpop.eup %3842  ;;  %v1228_v14 = vmul.f32 %v1164_v11, %v716_v55  ;;  %v1166_v10 = vadd.f32 1.0, %v3841_v17  ;;  %3856 = vtanh.f32 %v1046_v45  ;;  %v1048_v54 = vmul.f32 0.7978846, %v984_v63  ;;  %v6014_v63 = vld [vmem:[#allocation8_spill] sm:$0xff] }
 0x14c   :  { %v3845_v39 = vpop.eup %3844  ;;  %v926_v62 = vmul.f32 %v862_v30, %v4964_v58  ;;  %v865_v15 = vmul.f32 %v801_v48, %v4980_v49  ;;  %v864_v12 = vmul.f32 %v800_v38, %v4983_v33  ;;  %v5013_v28 = vadd.f32 %v4897_v16, %v4949_v61  ;;  %3619 = vmatmul.mubr.msk.f32.gmra.mxu1 %vm1263_vm1, %v1227_v53 }
 0x14d   :  { %v802_v5 = vmul.f32 0.044715, %v5002_v3  ;;  %v5018_v22 = vadd.f32 %v4897_v16, %v669_v0  ;;  %3621 = vmatprep.mubr.msk.f32.mxu1 %vm1263_vm1, %v1228_v14  ;;  %v719_v59 = vmul.f32 0.5, %v6014_v63  ;;  %v720_v50 = vmul.f32 0.5, %v4720_v27 }
 0x14e   :  { %v1229_v51 = vmul.f32 %v1165_v60, %v717_v40  ;;  %v1167_v6 = vadd.f32 1.0, %v3843_v37  ;;  %3858 = vtanh.f32 %v1047_v4  ;;  %v1049_v57 = vmul.f32 0.7978846, %v4911_v47 }
 0x14f   :  { %v3847_v61 = vpop.eup %3846  ;;  %v1230_v44 = vmul.f32 %v1166_v10, %v718_v34  ;;  %v1168_v29 = vadd.f32 1.0, %v3845_v39  ;;  %3860 = vtanh.f32 %v1048_v54  ;;  %v1050_v21 = vmul.f32 0.7978846, %v4960_v13 }
 0x150   :  { %v3849_v2 = vpop.eup %3848  ;;  %v990_v55 = vadd.f32 %v926_v62, %v4964_v58  ;;  %v928_v45 = vmul.f32 %v864_v12, %v4983_v33  ;;  %v803_v41 = vmul.f32 0.044715, %v5013_v28  ;;  %v5029_v27 = vadd.f32 %v4897_v16, %v3559_v8  ;;  %3622 = vmatmul.mubr.msk.f32.gmra.mxu1 %vm1263_vm1, %v1229_v51 }
 0x151   :  { %v866_v47 = vmul.f32 %v802_v5, %v5002_v3  ;;  %v804_v30 = vmul.f32 0.044715, %v5018_v22  ;;  %3624 = vmatprep.mubr.msk.f32.mxu1 %vm1263_vm1, %v1230_v44  ;;  %v721_v13 = vmul.f32 0.5, %v4704_v31  ;;  %v722_v48 = vmul.f32 0.5, %v4771_v43 }
 0x152   :  { %v1231_v38 = vmul.f32 %v1167_v6, %v719_v59  ;;  %v1169_v11 = vadd.f32 1.0, %v3847_v61  ;;  %3862 = vtanh.f32 %v1049_v57  ;;  %v1051_v17 = vmul.f32 0.7978846, %v4957_v36 }
 0x153   :  { %v3851_v7 = vpop.eup %3850  ;;  %v1232_v16 = vmul.f32 %v1168_v29, %v720_v50  ;;  %v1170_v8 = vadd.f32 1.0, %v3849_v2  ;;  %3864 = vtanh.f32 %v1050_v21  ;;  %v1052_v40 = vmul.f32 0.7978846, %v4986_v26 }
 0x154   :  { %v3853_v34 = vpop.eup %3852  ;;  %v929_v0 = vmul.f32 %v865_v15, %v4980_v49  ;;  %v992_v53 = vadd.f32 %v928_v45, %v4983_v33  ;;  %v867_v31 = vmul.f32 %v803_v41, %v5013_v28  ;;  %v805_v43 = vmul.f32 0.044715, %v5029_v27  ;;  %3625 = vmatmul.mubr.msk.f32.gmra.mxu1 %vm1263_vm1, %v1231_v38 }
 0x155   :  { %v930_v60 = vmul.f32 %v866_v47, %v5002_v3  ;;  %v868_v36 = vmul.f32 %v804_v30, %v5018_v22  ;;  %3627 = vmatprep.mubr.msk.f32.mxu1 %vm1263_vm1, %v1232_v16  ;;  %v723_v4 = vmul.f32 0.5, %v4765_v52  ;;  %v724_v26 = vmul.f32 0.5, %v4815_v46 }
 0x156   :  { %v1233_v37 = vmul.f32 %v1169_v11, %v721_v13  ;;  %v1171_v14 = vadd.f32 1.0, %v3851_v7  ;;  %3866 = vtanh.f32 %v1051_v17  ;;  %v1053_v10 = vmul.f32 0.7978846, %v4970_v56 }
 0x157   :  { %v3855_v54 = vpop.eup %3854  ;;  %v1234_v39 = vmul.f32 %v1170_v8, %v722_v48  ;;  %v1172_v62 = vadd.f32 1.0, %v3853_v34  ;;  %3868 = vtanh.f32 %v1052_v40  ;;  %v1054_v15 = vmul.f32 0.7978846, %v990_v55 }
 0x158   :  { %v3857_v12 = vpop.eup %3856  ;;  %v993_v5 = vadd.f32 %v929_v0, %v4980_v49  ;;  %v931_v63 = vmul.f32 %v867_v31, %v5013_v28  ;;  %v869_v59 = vmul.f32 %v805_v43, %v5029_v27  ;;  %3628 = vmatmul.mubr.msk.f32.gmra.mxu1 %vm1263_vm1, %v1233_v37  ;;  %v994_v52 = vadd.f32 %v930_v60, %v5002_v3 }
 0x159   :  { %v932_v46 = vmul.f32 %v868_v36, %v5018_v22  ;;  %3630 = vmatprep.mubr.msk.f32.mxu1 %vm1263_vm1, %v1234_v39  ;;  %v725_v56 = vmul.f32 0.5, %v4791_v9  ;;  %v726_v50 = vmul.f32 0.5, %v4825_v23  ;;  %v1235_v51 = vmul.f32 %v1171_v14, %v723_v4 }
 0x15a   :  { %v1173_v6 = vadd.f32 1.0, %v3855_v54  ;;  %3870 = vtanh.f32 %v1053_v10  ;;  %v1055_v57 = vmul.f32 0.7978846, %v4999_v42  ;;  %v1236_v44 = vmul.f32 %v1172_v62, %v724_v26 }
 0x15b   :  { %v3859_v61 = vpop.eup %3858  ;;  %v1174_v29 = vadd.f32 1.0, %v3857_v12  ;;  %3872 = vtanh.f32 %v1054_v15  ;;  %v1056_v21 = vmul.f32 0.7978846, %v992_v53  ;;  %v995_v55 = vadd.f32 %v931_v63, %v5013_v28 }
 0x15c   :  { %v3861_v2 = vpop.eup %3860  ;;  %3631 = vmatmul.mubr.msk.f32.gmra.mxu1 %vm1263_vm1, %v1235_v51  ;;  %v933_v45 = vmul.f32 %v869_v59, %v5029_v27  ;;  %v996_v9 = vadd.f32 %v932_v46, %v5018_v22  ;;  %v727_v23 = vmul.f32 0.5, %v4819_v35  ;;  %v728_v42 = vmul.f32 0.5, %v4846_v19 }
 0x15d   :  { %3633 = vmatprep.mubr.msk.f32.mxu1 %vm1263_vm1, %v1236_v44  ;;  %v1237_v41 = vmul.f32 %v1173_v6, %v725_v56  ;;  %v1175_v47 = vadd.f32 1.0, %v3859_v61  ;;  %3874 = vtanh.f32 %v1055_v57  ;;  %v1057_v30 = vmul.f32 0.7978846, %v993_v5 }
 0x15e   :  { %v1238_v48 = vmul.f32 %v1174_v29, %v726_v50  ;;  %v1176_v38 = vadd.f32 1.0, %v3861_v2  ;;  %3876 = vtanh.f32 %v1056_v21  ;;  %v1058_v11 = vmul.f32 0.7978846, %v994_v52 }
 0x15f   :  { %v3863_v13 = vpop.eup %3862  ;;  %v997_v7 = vadd.f32 %v933_v45, %v5029_v27  ;;  %v729_v35 = vmul.f32 0.5, %v4833_v25  ;;  %v730_v19 = vmul.f32 0.5, %v4862_v1  ;;  %v1239_v16 = vmul.f32 %v1175_v47, %v727_v23 }
 0x160   :  { %v3865_v17 = vpop.eup %3864  ;;  %3634 = vmatmul.mubr.msk.f32.gmra.mxu1 %vm1263_vm1, %v1237_v41  ;;  %v1177_v8 = vadd.f32 1.0, %v3863_v13  ;;  %3878 = vtanh.f32 %v1057_v30  ;;  %v1059_v40 = vmul.f32 0.7978846, %v995_v55  ;;  %v1240_v0 = vmul.f32 %v1176_v38, %v728_v42 }
 0x161   :  { %3636 = vmatprep.mubr.msk.f32.mxu1 %vm1263_vm1, %v1238_v48  ;;  %v1178_v53 = vadd.f32 1.0, %v3865_v17  ;;  %3880 = vtanh.f32 %v1058_v11  ;;  %v1060_v31 = vmul.f32 0.7978846, %v996_v9  ;;  %v731_v60 = vmul.f32 0.5, %v4855_v20 }
 0x162   :  { %v1241_v36 = vmul.f32 %v1177_v8, %v729_v35  ;;  %3882 = vtanh.f32 %v1059_v40  ;;  %v1061_v1 = vmul.f32 0.7978846, %v997_v7  ;;  %v732_v37 = vmul.f32 0.5, %v4915_v24 }
 0x163   :  { %v3867_v34 = vpop.eup %3866  ;;  %v1242_v26 = vmul.f32 %v1178_v53, %v730_v19  ;;  %3884 = vtanh.f32 %v1060_v31  ;;  %v733_v39 = vmul.f32 0.5, %v4900_v18  ;;  %v734_v12 = vmul.f32 0.5, %v4964_v58 }
 0x164   :  { %v3869_v43 = vpop.eup %3868  ;;  %3637 = vmatmul.mubr.msk.f32.gmra.mxu1 %vm1263_vm1, %v1239_v16  ;;  %v1179_v25 = vadd.f32 1.0, %v3867_v34  ;;  %3886 = vtanh.f32 %v1061_v1  ;;  %v735_v59 = vmul.f32 0.5, %v4931_v32  ;;  %v736_v18 = vmul.f32 0.5, %v4983_v33 }
 0x165   :  { %3639 = vmatprep.mubr.msk.f32.mxu1 %vm1263_vm1, %v1240_v0  ;;  %v1180_v14 = vadd.f32 1.0, %v3869_v43  ;;  %v737_v6 = vmul.f32 0.5, %v4980_v49  ;;  %v738_v29 = vmul.f32 0.5, %v5002_v3  ;;  %v739_v2 = vmul.f32 0.5, %v5013_v28 }
 0x166   :  { %v1243_v54 = vmul.f32 %v1179_v25, %v731_v60  ;;  %v740_v23 = vmul.f32 0.5, %v5018_v22  ;;  %v741_v42 = vmul.f32 0.5, %v5029_v27  ;;  %v5101_v22 = vld [vmem:[%s5994_s4] ss:$0 sm:$0xff] }
 0x167   :  { %v3871_v4 = vpop.eup %3870  ;;  %v1244_v15 = vmul.f32 %v1180_v14, %v732_v37 }
 0x168   :  { %v3873_v10 = vpop.eup %3872  ;;  %3640 = vmatmul.mubr.msk.f32.gmra.mxu1 %vm1263_vm1, %v1241_v36  ;;  %v1181_v62 = vadd.f32 1.0, %v3871_v4 }
 0x169   :  { %3642 = vmatprep.mubr.msk.f32.mxu1 %vm1263_vm1, %v1242_v26  ;;  %v1182_v5 = vadd.f32 1.0, %v3873_v10 }
 0x16a   :  { %v3875_v20 = vpop.eup %3874  ;;  %v1245_v24 = vmul.f32 %v1181_v62, %v733_v39 }
 0x16b   :  { %v3877_v63 = vpop.eup %3876  ;;  %v1183_v52 = vadd.f32 1.0, %v3875_v20  ;;  %v1246_v56 = vmul.f32 %v1182_v5, %v734_v12 }
 0x16c   :  { %3643 = vmatmul.mubr.msk.f32.gmra.mxu1 %vm1263_vm1, %v1243_v54  ;;  %v1184_v50 = vadd.f32 1.0, %v3877_v63 }
 0x16d   :  { %3645 = vmatprep.mubr.msk.f32.mxu1 %vm1263_vm1, %v1244_v15  ;;  %v3879_v46 = vpop.eup %3878  ;;  %v1247_v58 = vmul.f32 %v1183_v52, %v735_v59 }
 0x16e   :  { %v3881_v51 = vpop.eup %3880  ;;  %v1185_v57 = vadd.f32 1.0, %v3879_v46  ;;  %v1248_v44 = vmul.f32 %v1184_v50, %v736_v18 }
 0x16f   :  { %v3883_v61 = vpop.eup %3882  ;;  %v1186_v32 = vadd.f32 1.0, %v3881_v51 }
 0x170   :  { %3646 = vmatmul.mubr.msk.f32.gmra.mxu1 %vm1263_vm1, %v1245_v24  ;;  %v3885_v21 = vpop.eup %3884  ;;  %v1249_v33 = vmul.f32 %v1185_v57, %v737_v6  ;;  %v1187_v55 = vadd.f32 1.0, %v3883_v61 }
 0x171   :  { %3648 = vmatprep.mubr.msk.f32.mxu1 %vm1263_vm1, %v1246_v56  ;;  %v3887_v45 = vpop.eup %3886  ;;  %v1250_v9 = vmul.f32 %v1186_v32, %v738_v29  ;;  %v1188_v49 = vadd.f32 1.0, %v3885_v21 }
 0x172   :  { %v1251_v3 = vmul.f32 %v1187_v55, %v739_v2  ;;  %v1189_v41 = vadd.f32 1.0, %v3887_v45 }
 0x173   :  { %v1252_v47 = vmul.f32 %v1188_v49, %v740_v23 }
 0x174   :  { %3649 = vmatmul.mubr.msk.f32.gmra.mxu1 %vm1263_vm1, %v1247_v58  ;;  %v1253_v28 = vmul.f32 %v1189_v41, %v741_v42 }
 0x175   :  { %3651 = vmatprep.mubr.msk.f32.mxu1 %vm1263_vm1, %v1248_v44 }
 0x178   :  { %3652 = vmatmul.mubr.msk.f32.gmra.mxu1 %vm1263_vm1, %v1249_v33 }
 0x179   :  { %3654 = vmatprep.mubr.msk.f32.mxu1 %vm1263_vm1, %v1250_v9 }
 0x17c   :  { %3655 = vmatmul.mubr.msk.f32.gmra.mxu1 %vm1263_vm1, %v1251_v3 }
 0x17d   :  { %3657 = vmatprep.mubr.msk.f32.mxu1 %vm1263_vm1, %v1252_v47 }
 0x180   :  { %3658 = vmatmul.mubr.msk.f32.gmra.mxu1 %vm1263_vm1, %v1253_v28 }
 0x1a6   :  { %v3566_v30 = vpop.f32.mrf.mxu1 }
 0x1a7   :  { %v1528_v13 = vadd.f32 %v3566_v30, %v5101_v22 }
 0x1a8   :  { %v1522_v48 = vpop.f32.mrf.mxu1 }
 0x1a9   :  { %v1906_v38 = vmul.f32 0.044715, %v1528_v13  ;;  %v1523_v27 = vadd.f32 %v5101_v22, %v1522_v48  ;;  %v1842_v32 = vmul.f32 0.5, %v1528_v13 }
 0x1aa   :  { %v3569_v11 = vpop.f32.mrf.mxu1 }
 0x1ab   :  { %v1970_v17 = vmul.f32 %v1906_v38, %v1528_v13  ;;  %v1905_v7 = vmul.f32 0.044715, %v1523_v27  ;;  %v1538_v35 = vadd.f32 %v3569_v11, %v5101_v22  ;;  %v1841_v61 = vmul.f32 0.5, %v1523_v27 }
 0x1ac   :  { %v1532_v19 = vpop.f32.mrf.mxu1 }
 0x1ad   :  { %v2034_v16 = vmul.f32 %v1970_v17, %v1528_v13  ;;  %v1969_v8 = vmul.f32 %v1905_v7, %v1523_v27  ;;  %v1908_v40 = vmul.f32 0.044715, %v1538_v35  ;;  %v1533_v34 = vadd.f32 %v5101_v22, %v1532_v19 }
 0x1ae   :  { %v1844_v28 = vmul.f32 0.5, %v1538_v35 }
 0x1af   :  { %v2098_v0 = vadd.f32 %v2034_v16, %v1528_v13  ;;  %v2033_v53 = vmul.f32 %v1969_v8, %v1523_v27  ;;  %v1972_v31 = vmul.f32 %v1908_v40, %v1538_v35  ;;  %v1907_v43 = vmul.f32 0.044715, %v1533_v34  ;;  %v3572_v4 = vpop.f32.mrf.mxu1 }
 0x1b0   :  { %v5108_v26 = vadd.f32 %v3572_v4, %v5101_v22  ;;  %v1843_v3 = vmul.f32 0.5, %v1533_v34 }
 0x1b1   :  { %v2162_v60 = vmul.f32 0.7978846, %v2098_v0  ;;  %v2097_v36 = vadd.f32 %v2033_v53, %v1523_v27  ;;  %v2036_v25 = vmul.f32 %v1972_v31, %v1538_v35  ;;  %v1971_v1 = vmul.f32 %v1907_v43, %v1533_v34  ;;  %v1542_v10 = vpop.f32.mrf.mxu1 }
 0x1b2   :  { %v1910_v39 = vmul.f32 0.044715, %v5108_v26  ;;  %v1543_v62 = vadd.f32 %v5101_v22, %v1542_v10  ;;  %v1846_v53 = vmul.f32 0.5, %v5108_v26 }
 0x1b3   :  { %3888 = vtanh.f32 %v2162_v60  ;;  %v2100_v37 = vadd.f32 %v2036_v25, %v1538_v35  ;;  %v2035_v14 = vmul.f32 %v1971_v1, %v1533_v34  ;;  %v2161_v54 = vmul.f32 0.7978846, %v2097_v36 }
 0x1b4   :  { %v1974_v12 = vmul.f32 %v1910_v39, %v5108_v26  ;;  %v1909_v5 = vmul.f32 0.044715, %v1543_v62  ;;  %v1845_v8 = vmul.f32 0.5, %v1543_v62 }
 0x1b5   :  { %v2099_v20 = vadd.f32 %v2035_v14, %v1533_v34  ;;  %3890 = vtanh.f32 %v2161_v54  ;;  %v2164_v15 = vmul.f32 0.7978846, %v2100_v37 }
 0x1b6   :  { %v2038_v24 = vmul.f32 %v1974_v12, %v5108_v26  ;;  %v1973_v59 = vmul.f32 %v1909_v5, %v1543_v62 }
 0x1b7   :  { %v2163_v63 = vmul.f32 0.7978846, %v2099_v20  ;;  %3892 = vtanh.f32 %v2164_v15 }
 0x1b8   :  { %v2102_v52 = vadd.f32 %v2038_v24, %v5108_v26  ;;  %v2037_v46 = vmul.f32 %v1973_v59, %v1543_v62  ;;  %v3575_v57 = vpop.f32.mrf.mxu1 }
 0x1b9   :  { %3894 = vtanh.f32 %v2163_v63  ;;  %v5116_v21 = vadd.f32 %v3575_v57, %v5101_v22 }
 0x1ba   :  { %v2101_v56 = vadd.f32 %v2037_v46, %v1543_v62  ;;  %v2166_v18 = vmul.f32 0.7978846, %v2102_v52  ;;  %v1552_v33 = vpop.f32.mrf.mxu1 }
 0x1bb   :  { %v1912_v9 = vmul.f32 0.044715, %v5116_v21  ;;  %v5120_v23 = vadd.f32 %v5101_v22, %v1552_v33 }
 0x1bc   :  { %v2165_v50 = vmul.f32 0.7978846, %v2101_v56  ;;  %3896 = vtanh.f32 %v2166_v18 }
 0x1bd   :  { %v1976_v41 = vmul.f32 %v1912_v9, %v5116_v21  ;;  %v1911_v47 = vmul.f32 0.044715, %v5120_v23  ;;  %v1848_v9 = vmul.f32 0.5, %v5116_v21 }
 0x1be   :  { %3898 = vtanh.f32 %v2165_v50 }
 0x1bf   :  { %v2040_v13 = vmul.f32 %v1976_v41, %v5116_v21  ;;  %v1975_v48 = vmul.f32 %v1911_v47, %v5120_v23 }
 0x1c0   :  { %v3889_v51 = vpop.eup %3888 }
 0x1c1   :  { %v2290_v6 = vadd.f32 1.0, %v3889_v51  ;;  %v2104_v11 = vadd.f32 %v2040_v13, %v5116_v21  ;;  %v2039_v17 = vmul.f32 %v1975_v48, %v5120_v23 }
 0x1c2   :  { %v3891_v58 = vpop.eup %3890 }
 0x1c3   :  { %v2289_v44 = vadd.f32 1.0, %v3891_v58  ;;  %v2354_v45 = vmul.f32 %v2290_v6, %v1842_v32  ;;  %v2103_v16 = vadd.f32 %v2039_v17, %v5120_v23  ;;  %v3578_v35 = vpop.f32.mrf.mxu1  ;;  %v2168_v34 = vmul.f32 0.7978846, %v2104_v11 }
 0x1c4   :  { %v3893_v29 = vpop.eup %3892  ;;  %v5134_v0 = vadd.f32 %v3578_v35, %v5101_v22 }
 0x1c5   :  { %v2353_v2 = vmul.f32 %v2289_v44, %v1841_v61  ;;  %v2292_v49 = vadd.f32 1.0, %v3893_v29  ;;  %v1562_v31 = vpop.f32.mrf.mxu1  ;;  %v2167_v60 = vmul.f32 0.7978846, %v2103_v16  ;;  %3900 = vtanh.f32 %v2168_v34 }
 0x1c6   :  { %v3895_v55 = vpop.eup %3894  ;;  %v1914_v36 = vmul.f32 0.044715, %v5134_v0  ;;  %v5139_v25 = vadd.f32 %v5101_v22, %v1562_v31 }
 0x1c7   :  { %3662 = vmatprep.mubr.msk.f32.mxu0 %vm100_vm0, %v2353_v2  ;;  %v2291_v42 = vadd.f32 1.0, %v3895_v55  ;;  %v2356_v38 = vmul.f32 %v2292_v49, %v1844_v28  ;;  %3902 = vtanh.f32 %v2167_v60  ;;  %v1847_v55 = vmul.f32 0.5, %v5120_v23 }
 0x1c8   :  { %3663 = vmatmul.mubr.msk.f32.vlgmr.msra.gmra.mxu0 %vm100_vm0, %v2354_v45  ;;  %v1978_v4 = vmul.f32 %v1914_v36, %v5134_v0  ;;  %v1913_v37 = vmul.f32 0.044715, %v5139_v25 }
 0x1c9   :  { %v2355_v30 = vmul.f32 %v2291_v42, %v1843_v3  ;;  %v3897_v27 = vpop.eup %3896  ;;  %v3581_v26 = vpop.f32.mrf.mxu1 }
 0x1ca   :  { %v2294_v19 = vadd.f32 1.0, %v3897_v27  ;;  %v2042_v14 = vmul.f32 %v1978_v4, %v5134_v0  ;;  %v1977_v10 = vmul.f32 %v1913_v37, %v5139_v25  ;;  %v5148_v54 = vadd.f32 %v3581_v26, %v5101_v22 }
 0x1cb   :  { %3665 = vmatprep.mubr.msk.f32.mxu0 %vm100_vm0, %v2355_v30  ;;  %v3899_v7 = vpop.eup %3898  ;;  %v1572_v39 = vpop.f32.mrf.mxu1  ;;  %v1849_v37 = vmul.f32 0.5, %v5139_v25 }
 0x1cc   :  { %3666 = vmatmul.mubr.msk.f32.gmra.mxu0 %vm100_vm0, %v2356_v38  ;;  %v2293_v40 = vadd.f32 1.0, %v3899_v7  ;;  %v2358_v1 = vmul.f32 %v2294_v19, %v1846_v53  ;;  %v2106_v62 = vadd.f32 %v2042_v14, %v5134_v0  ;;  %v2041_v20 = vmul.f32 %v1977_v10, %v5139_v25 }
 0x1cd   :  { %v1916_v15 = vmul.f32 0.044715, %v5148_v54  ;;  %v5154_v12 = vadd.f32 %v5101_v22, %v1572_v39  ;;  %v1850_v14 = vmul.f32 0.5, %v5134_v0 }
 0x1ce   :  { %v2357_v43 = vmul.f32 %v2293_v40, %v1845_v8  ;;  %v2105_v5 = vadd.f32 %v2041_v20, %v5139_v25  ;;  %v2170_v59 = vmul.f32 0.7978846, %v2106_v62 }
 0x1cf   :  { %v1980_v63 = vmul.f32 %v1916_v15, %v5148_v54  ;;  %v1915_v24 = vmul.f32 0.044715, %v5154_v12 }
 0x1d0   :  { %3668 = vmatprep.mubr.msk.f32.mxu0 %vm100_vm0, %v2357_v43  ;;  %v2169_v56 = vmul.f32 0.7978846, %v2105_v5  ;;  %3904 = vtanh.f32 %v2170_v59 }
 0x1d1   :  { %3669 = vmatmul.mubr.msk.f32.gmra.mxu0 %vm100_vm0, %v2358_v1  ;;  %v2044_v52 = vmul.f32 %v1980_v63, %v5148_v54  ;;  %v1979_v46 = vmul.f32 %v1915_v24, %v5154_v12  ;;  %v3584_v18 = vpop.f32.mrf.mxu1 }
 0x1d2   :  { %v3901_v50 = vpop.eup %3900  ;;  %v5164_v6 = vadd.f32 %v3584_v18, %v5101_v22  ;;  %3906 = vtanh.f32 %v2169_v56 }
 0x1d3   :  { %v2108_v51 = vadd.f32 %v2044_v52, %v5148_v54  ;;  %v2043_v58 = vmul.f32 %v1979_v46, %v5154_v12  ;;  %v1582_v57 = vpop.f32.mrf.mxu1  ;;  %v2296_v61 = vadd.f32 1.0, %v3901_v50 }
 0x1d4   :  { %v3903_v44 = vpop.eup %3902  ;;  %v1918_v32 = vmul.f32 0.044715, %v5164_v6  ;;  %v5169_v33 = vadd.f32 %v5101_v22, %v1582_v57 }
 0x1d5   :  { %v2107_v29 = vadd.f32 %v2043_v58, %v5154_v12  ;;  %v2172_v2 = vmul.f32 0.7978846, %v2108_v51  ;;  %v2295_v45 = vadd.f32 1.0, %v3903_v44  ;;  %v2360_v13 = vmul.f32 %v2296_v61, %v1848_v9 }
 0x1d6   :  { %v1982_v49 = vmul.f32 %v1918_v32, %v5164_v6  ;;  %v1917_v3 = vmul.f32 0.044715, %v5169_v33  ;;  %v1852_v51 = vmul.f32 0.5, %v5148_v54 }
 0x1d7   :  { %v2171_v42 = vmul.f32 0.7978846, %v2107_v29  ;;  %3908 = vtanh.f32 %v2172_v2  ;;  %v2359_v41 = vmul.f32 %v2295_v45, %v1847_v55  ;;  %v1851_v45 = vmul.f32 0.5, %v5154_v12 }
 0x1d8   :  { %v2046_v47 = vmul.f32 %v1982_v49, %v5164_v6  ;;  %v1981_v28 = vmul.f32 %v1917_v3, %v5169_v33  ;;  %v3587_v30 = vpop.f32.mrf.mxu1 }
 0x1d9   :  { %3910 = vtanh.f32 %v2171_v42  ;;  %v5178_v48 = vadd.f32 %v3587_v30, %v5101_v22  ;;  %3671 = vmatprep.mubr.msk.f32.mxu0 %vm100_vm0, %v2359_v41 }
 0x1da   :  { %v2110_v21 = vadd.f32 %v2046_v47, %v5164_v6  ;;  %v2045_v23 = vmul.f32 %v1981_v28, %v5169_v33  ;;  %v1592_v38 = vpop.f32.mrf.mxu1  ;;  %3672 = vmatmul.mubr.msk.f32.gmra.mxu0 %vm100_vm0, %v2360_v13 }
 0x1db   :  { %v1920_v27 = vmul.f32 0.044715, %v5178_v48  ;;  %v5186_v11 = vadd.f32 %v5101_v22, %v1592_v38 }
 0x1dc   :  { %v2109_v17 = vadd.f32 %v2045_v23, %v5169_v33  ;;  %v3590_v7 = vpop.f32.mrf.mxu1  ;;  %v2174_v19 = vmul.f32 0.7978846, %v2110_v21 }
 0x1dd   :  { %v3905_v16 = vpop.eup %3904  ;;  %v1984_v35 = vmul.f32 %v1920_v27, %v5178_v48  ;;  %v1919_v8 = vmul.f32 0.044715, %v5186_v11  ;;  %v5192_v40 = vadd.f32 %v3590_v7, %v5101_v22 }
 0x1de   :  { %v1602_v34 = vpop.f32.mrf.mxu1  ;;  %v2298_v53 = vadd.f32 1.0, %v3905_v16  ;;  %v2173_v31 = vmul.f32 0.7978846, %v2109_v17  ;;  %3912 = vtanh.f32 %v2174_v19 }
 0x1df   :  { %v3907_v43 = vpop.eup %3906  ;;  %v2048_v60 = vmul.f32 %v1984_v35, %v5178_v48  ;;  %v1983_v36 = vmul.f32 %v1919_v8, %v5186_v11  ;;  %v1922_v1 = vmul.f32 0.044715, %v5192_v40  ;;  %v5198_v4 = vadd.f32 %v5101_v22, %v1602_v34 }
 0x1e0   :  { %v2297_v26 = vadd.f32 1.0, %v3907_v43  ;;  %3914 = vtanh.f32 %v2173_v31  ;;  %v2362_v24 = vmul.f32 %v2298_v53, %v1850_v14  ;;  %v1854_v34 = vmul.f32 0.5, %v5164_v6 }
 0x1e1   :  { %v2112_v10 = vadd.f32 %v2048_v60, %v5178_v48  ;;  %v2047_v39 = vmul.f32 %v1983_v36, %v5186_v11  ;;  %v1986_v62 = vmul.f32 %v1922_v1, %v5192_v40  ;;  %v1921_v20 = vmul.f32 0.044715, %v5198_v4  ;;  %v3593_v15 = vpop.f32.mrf.mxu1 }
 0x1e2   :  { %v5207_v5 = vadd.f32 %v3593_v15, %v5101_v22  ;;  %v2361_v63 = vmul.f32 %v2297_v26, %v1849_v37  ;;  %v1853_v26 = vmul.f32 0.5, %v5169_v33 }
 0x1e3   :  { %v2111_v25 = vadd.f32 %v2047_v39, %v5186_v11  ;;  %v2050_v0 = vmul.f32 %v1986_v62, %v5192_v40  ;;  %v1985_v52 = vmul.f32 %v1921_v20, %v5198_v4  ;;  %v1612_v46 = vpop.f32.mrf.mxu1  ;;  %v2176_v56 = vmul.f32 0.7978846, %v2112_v10 }
 0x1e4   :  { %v3909_v59 = vpop.eup %3908  ;;  %v1924_v18 = vmul.f32 0.044715, %v5207_v5  ;;  %v5214_v50 = vadd.f32 %v5101_v22, %v1612_v46  ;;  %3674 = vmatprep.mubr.msk.f32.mxu0 %vm100_vm0, %v2361_v63 }
 0x1e5   :  { %v2300_v58 = vadd.f32 1.0, %v3909_v59  ;;  %v2114_v61 = vadd.f32 %v2050_v0, %v5192_v40  ;;  %v2049_v44 = vmul.f32 %v1985_v52, %v5198_v4  ;;  %3675 = vmatmul.mubr.msk.f32.gmra.mxu0 %vm100_vm0, %v2362_v24  ;;  %v2175_v29 = vmul.f32 0.7978846, %v2111_v25 }
 0x1e6   :  { %v3911_v57 = vpop.eup %3910  ;;  %3916 = vtanh.f32 %v2176_v56  ;;  %v1988_v32 = vmul.f32 %v1924_v18, %v5207_v5  ;;  %v1923_v2 = vmul.f32 0.044715, %v5214_v50  ;;  %v3596_v55 = vpop.f32.mrf.mxu1  ;;  %v1856_v56 = vmul.f32 0.5, %v5178_v48 }
 0x1e7   :  { %v2299_v9 = vadd.f32 1.0, %v3911_v57  ;;  %v2113_v54 = vadd.f32 %v2049_v44, %v5198_v4  ;;  %v5226_v49 = vadd.f32 %v3596_v55, %v5101_v22  ;;  %3918 = vtanh.f32 %v2175_v29 }
 0x1e8   :  { %v2178_v3 = vmul.f32 0.7978846, %v2114_v61  ;;  %v2052_v42 = vmul.f32 %v1988_v32, %v5207_v5  ;;  %v1987_v41 = vmul.f32 %v1923_v2, %v5214_v50  ;;  %v1622_v47 = vpop.f32.mrf.mxu1  ;;  %v2364_v30 = vmul.f32 %v2300_v58, %v1852_v51 }
 0x1e9   :  { %v2363_v28 = vmul.f32 %v2299_v9, %v1851_v45  ;;  %v1926_v13 = vmul.f32 0.044715, %v5226_v49  ;;  %v5232_v21 = vadd.f32 %v5101_v22, %v1622_v47  ;;  %v2177_v12 = vmul.f32 0.7978846, %v2113_v54 }
 0x1ea   :  { %3920 = vtanh.f32 %v2178_v3  ;;  %v2116_v23 = vadd.f32 %v2052_v42, %v5207_v5  ;;  %v2051_v38 = vmul.f32 %v1987_v41, %v5214_v50  ;;  %v3599_v27 = vpop.f32.mrf.mxu1  ;;  %v1855_v29 = vmul.f32 0.5, %v5186_v11 }
 0x1eb   :  { %3677 = vmatprep.mubr.msk.f32.mxu0 %vm100_vm0, %v2363_v28  ;;  %v3913_v17 = vpop.eup %3912  ;;  %v1990_v7 = vmul.f32 %v1926_v13, %v5226_v49  ;;  %v1925_v19 = vmul.f32 0.044715, %v5232_v21  ;;  %v5240_v16 = vadd.f32 %v3599_v27, %v5101_v22  ;;  %3922 = vtanh.f32 %v2177_v12 }
 0x1ec   :  { %3678 = vmatmul.mubr.msk.f32.gmra.mxu0 %vm100_vm0, %v2364_v30  ;;  %v2115_v35 = vadd.f32 %v2051_v38, %v5214_v50  ;;  %v1632_v8 = vpop.f32.mrf.mxu1  ;;  %v2302_v53 = vadd.f32 1.0, %v3913_v17  ;;  %v2180_v31 = vmul.f32 0.7978846, %v2116_v23 }
 0x1ed   :  { %v3915_v43 = vpop.eup %3914  ;;  %v2054_v60 = vmul.f32 %v1990_v7, %v5226_v49  ;;  %v1989_v36 = vmul.f32 %v1925_v19, %v5232_v21  ;;  %v1928_v1 = vmul.f32 0.044715, %v5240_v16  ;;  %v5249_v37 = vadd.f32 %v5101_v22, %v1632_v8 }
 0x1ee   :  { %v2301_v14 = vadd.f32 1.0, %v3915_v43  ;;  %v2179_v10 = vmul.f32 0.7978846, %v2115_v35  ;;  %3924 = vtanh.f32 %v2180_v31  ;;  %v2366_v24 = vmul.f32 %v2302_v53, %v1854_v34 }
 0x1ef   :  { %v2118_v39 = vadd.f32 %v2054_v60, %v5226_v49  ;;  %v2053_v6 = vmul.f32 %v1989_v36, %v5232_v21  ;;  %v1992_v62 = vmul.f32 %v1928_v1, %v5240_v16  ;;  %v1927_v20 = vmul.f32 0.044715, %v5249_v37 }
 0x1f0   :  { %v3602_v15 = vpop.f32.mrf.mxu1  ;;  %v2365_v63 = vmul.f32 %v2301_v14, %v1853_v26  ;;  %3926 = vtanh.f32 %v2179_v10  ;;  %v1857_v35 = vmul.f32 0.5, %v5198_v4  ;;  %v1858_v31 = vmul.f32 0.5, %v5192_v40 }
 0x1f1   :  { %v2117_v59 = vadd.f32 %v2053_v6, %v5232_v21  ;;  %v2056_v25 = vmul.f32 %v1992_v62, %v5240_v16  ;;  %v1991_v33 = vmul.f32 %v1927_v20, %v5249_v37  ;;  %v5260_v0 = vadd.f32 %v3602_v15, %v5101_v22 }
 0x1f2   :  { %v1642_v46 = vpop.f32.mrf.mxu1  ;;  %3680 = vmatprep.mubr.msk.f32.mxu0 %vm100_vm0, %v2365_v63  ;;  %v2182_v18 = vmul.f32 0.7978846, %v2118_v39  ;;  %v12_v15 = vstv %s5995_s6 }
 0x1f3   :  { %v3917_v52 = vpop.eup %3916  ;;  %v2120_v51 = vadd.f32 %v2056_v25, %v5240_v16  ;;  %v2055_v58 = vmul.f32 %v1991_v33, %v5249_v37  ;;  %v1930_v57 = vmul.f32 0.044715, %v5260_v0  ;;  %v5268_v61 = vadd.f32 %v5101_v22, %v1642_v46  ;;  %3681 = vmatmul.mubr.msk.f32.gmra.mxu0 %vm100_vm0, %v2366_v24  ;;  %13 = vst [vmem:[#allocation2] sm:$0x1] %v12_v15 }
 0x1f4   :  { %v3919_v44 = vpop.eup %3918  ;;  %v2304_v32 = vadd.f32 1.0, %v3917_v52  ;;  %v2181_v2 = vmul.f32 0.7978846, %v2117_v59  ;;  %3928 = vtanh.f32 %v2182_v18  ;;  %v1859_v52 = vmul.f32 0.5, %v5214_v50 }
 0x1f5   :  { %v2119_v48 = vadd.f32 %v2055_v58, %v5249_v37  ;;  %v1994_v55 = vmul.f32 %v1930_v57, %v5260_v0  ;;  %v1929_v45 = vmul.f32 0.044715, %v5268_v61  ;;  %v3605_v9 = vpop.f32.mrf.mxu1  ;;  %v2303_v54 = vadd.f32 1.0, %v3919_v44 }
 0x1f6   :  { %v5276_v42 = vadd.f32 %v3605_v9, %v5101_v22  ;;  %v2368_v41 = vmul.f32 %v2304_v32, %v1856_v56  ;;  %3930 = vtanh.f32 %v2181_v2  ;;  %v2184_v47 = vmul.f32 0.7978846, %v2120_v51 }
 0x1f7   :  { %v3921_v3 = vpop.eup %3920  ;;  %v2058_v11 = vmul.f32 %v1994_v55, %v5260_v0  ;;  %v1993_v28 = vmul.f32 %v1929_v45, %v5268_v61  ;;  %v1652_v30 = vpop.f32.mrf.mxu1  ;;  %v2367_v13 = vmul.f32 %v2303_v54, %v1855_v29  ;;  %v2183_v17 = vmul.f32 0.7978846, %v2119_v48 }
 0x1f8   :  { %v2306_v12 = vadd.f32 1.0, %v3921_v3  ;;  %v3923_v23 = vpop.eup %3922  ;;  %v1932_v38 = vmul.f32 0.044715, %v5276_v42  ;;  %v5282_v27 = vadd.f32 %v5101_v22, %v1652_v30  ;;  %3932 = vtanh.f32 %v2184_v47 }
 0x1f9   :  { %v2122_v7 = vadd.f32 %v2058_v11, %v5260_v0  ;;  %v2057_v19 = vmul.f32 %v1993_v28, %v5268_v61  ;;  %3683 = vmatprep.mubr.msk.f32.mxu0 %vm100_vm0, %v2367_v13  ;;  %v2305_v8 = vadd.f32 1.0, %v3923_v23  ;;  %3934 = vtanh.f32 %v2183_v17 }
 0x1fa   :  { %v1996_v34 = vmul.f32 %v1932_v38, %v5276_v42  ;;  %v1931_v53 = vmul.f32 0.044715, %v5282_v27  ;;  %3684 = vmatmul.mubr.msk.f32.gmra.mxu0 %vm100_vm0, %v2368_v41  ;;  %v2370_v39 = vmul.f32 %v2306_v12, %v1858_v31  ;;  %v1860_v56 = vmul.f32 0.5, %v5207_v5 }
 0x1fb   :  { %v3925_v43 = vpop.eup %3924  ;;  %v2121_v60 = vadd.f32 %v2057_v19, %v5268_v61  ;;  %v3608_v36 = vpop.f32.mrf.mxu1  ;;  %v2369_v1 = vmul.f32 %v2305_v8, %v1857_v35  ;;  %v2186_v26 = vmul.f32 0.7978846, %v2122_v7  ;;  %v1862_v48 = vmul.f32 0.5, %v5226_v49 }
 0x1fc   :  { %v2060_v14 = vmul.f32 %v1996_v34, %v5276_v42  ;;  %v1995_v4 = vmul.f32 %v1931_v53, %v5282_v27  ;;  %v5296_v10 = vadd.f32 %v3608_v36, %v5101_v22  ;;  %v2308_v40 = vadd.f32 1.0, %v3925_v43 }
 0x1fd   :  { %v3927_v6 = vpop.eup %3926  ;;  %v1662_v62 = vpop.f32.mrf.mxu1  ;;  %3686 = vmatprep.mubr.msk.f32.mxu0 %vm100_vm0, %v2369_v1  ;;  %v2185_v20 = vmul.f32 0.7978846, %v2121_v60  ;;  %3936 = vtanh.f32 %v2186_v26  ;;  %v1861_v41 = vmul.f32 0.5, %v5232_v21  ;;  %v1863_v21 = vmul.f32 0.5, %v5249_v37 }
 0x1fe   :  { %v2124_v63 = vadd.f32 %v2060_v14, %v5276_v42  ;;  %v2059_v24 = vmul.f32 %v1995_v4, %v5282_v27  ;;  %v1934_v59 = vmul.f32 0.044715, %v5296_v10  ;;  %v5306_v25 = vadd.f32 %v5101_v22, %v1662_v62  ;;  %3687 = vmatmul.mubr.msk.f32.gmra.mxu0 %vm100_vm0, %v2370_v39 }
 0x1ff   :  { %v3611_v33 = vpop.f32.mrf.mxu1  ;;  %v2307_v46 = vadd.f32 1.0, %v3927_v6  ;;  %3938 = vtanh.f32 %v2185_v20  ;;  %v2372_v2 = vmul.f32 %v2308_v40, %v1860_v56  ;;  %v1864_v6 = vmul.f32 0.5, %v5240_v16 }
 0x200   :  { %v2123_v18 = vadd.f32 %v2059_v24, %v5282_v27  ;;  %v1998_v51 = vmul.f32 %v1934_v59, %v5296_v10  ;;  %v1933_v58 = vmul.f32 0.044715, %v5306_v25  ;;  %v5315_v57 = vadd.f32 %v3611_v33, %v5101_v22 }
 0x201   :  { %v3929_v44 = vpop.eup %3928  ;;  %v1672_v29 = vpop.f32.mrf.mxu1  ;;  %v2371_v32 = vmul.f32 %v2307_v46, %v1859_v52  ;;  %v2188_v50 = vmul.f32 0.7978846, %v2124_v63  ;;  %v1865_v52 = vmul.f32 0.5, %v5268_v61 }
 0x202   :  { %v2062_v55 = vmul.f32 %v1998_v51, %v5296_v10  ;;  %v1997_v5 = vmul.f32 %v1933_v58, %v5306_v25  ;;  %v1936_v45 = vmul.f32 0.044715, %v5315_v57  ;;  %v5322_v9 = vadd.f32 %v5101_v22, %v1672_v29 }
 0x203   :  { %v3931_v54 = vpop.eup %3930  ;;  %v3614_v3 = vpop.f32.mrf.mxu1  ;;  %3689 = vmatprep.mubr.msk.f32.mxu0 %vm100_vm0, %v2371_v32  ;;  %v2310_v47 = vadd.f32 1.0, %v3929_v44  ;;  %v2187_v11 = vmul.f32 0.7978846, %v2123_v18  ;;  %3940 = vtanh.f32 %v2188_v50 }
 0x204   :  { %v2126_v49 = vadd.f32 %v2062_v55, %v5296_v10  ;;  %v2061_v28 = vmul.f32 %v1997_v5, %v5306_v25  ;;  %v2000_v30 = vmul.f32 %v1936_v45, %v5315_v57  ;;  %v1935_v13 = vmul.f32 0.044715, %v5322_v9  ;;  %3690 = vmatmul.mubr.msk.f32.gmra.mxu0 %vm100_vm0, %v2372_v2 }
 0x205   :  { %v3933_v12 = vpop.eup %3932  ;;  %v5332_v23 = vadd.f32 %v3614_v3, %v5101_v22  ;;  %v1682_v38 = vpop.f32.mrf.mxu1  ;;  %v2309_v17 = vadd.f32 1.0, %v3931_v54  ;;  %3942 = vtanh.f32 %v2187_v11  ;;  %v2374_v8 = vmul.f32 %v2310_v47, %v1862_v48 }
 0x206   :  { %v2125_v7 = vadd.f32 %v2061_v28, %v5306_v25  ;;  %v1999_v19 = vmul.f32 %v1935_v13, %v5322_v9  ;;  %v5338_v35 = vadd.f32 %v5101_v22, %v1682_v38  ;;  %v3935_v34 = vpop.eup %3934  ;;  %v2064_v53 = vmul.f32 %v2000_v30, %v5315_v57 }
 0x207   :  { %v1938_v31 = vmul.f32 0.044715, %v5332_v23  ;;  %v2373_v43 = vmul.f32 %v2309_v17, %v1861_v41  ;;  %v2190_v60 = vmul.f32 0.7978846, %v2126_v49  ;;  %v2311_v26 = vadd.f32 1.0, %v3935_v34 }
 0x208   :  { %v2063_v36 = vmul.f32 %v1999_v19, %v5322_v9  ;;  %v1937_v37 = vmul.f32 0.044715, %v5338_v35  ;;  %v3617_v1 = vpop.f32.mrf.mxu1  ;;  %v2312_v14 = vadd.f32 1.0, %v3933_v12  ;;  %v2189_v62 = vmul.f32 0.7978846, %v2125_v7 }
 0x209   :  { %v2002_v4 = vmul.f32 %v1938_v31, %v5332_v23  ;;  %v5346_v39 = vadd.f32 %v3617_v1, %v5101_v22  ;;  %3692 = vmatprep.mubr.msk.f32.mxu0 %vm100_vm0, %v2373_v43  ;;  %v2375_v24 = vmul.f32 %v2311_v26, %v1863_v21  ;;  %3944 = vtanh.f32 %v2190_v60 }
 0x20a   :  { %v3937_v40 = vpop.eup %3936  ;;  %v2127_v20 = vadd.f32 %v2063_v36, %v5322_v9  ;;  %v2001_v15 = vmul.f32 %v1937_v37, %v5338_v35  ;;  %v1692_v63 = vpop.f32.mrf.mxu1  ;;  %3693 = vmatmul.mubr.msk.f32.gmra.mxu0 %vm100_vm0, %v2374_v8  ;;  %v2128_v59 = vadd.f32 %v2064_v53, %v5315_v57  ;;  %v2376_v18 = vmul.f32 %v2312_v14, %v1864_v6 }
 0x20b   :  { %v5355_v33 = vadd.f32 %v5101_v22, %v1692_v63  ;;  %3695 = vmatprep.mubr.msk.f32.mxu0 %vm100_vm0, %v2375_v24  ;;  %3946 = vtanh.f32 %v2189_v62  ;;  %v2066_v58 = vmul.f32 %v2002_v4, %v5332_v23  ;;  %v1940_v44 = vmul.f32 0.044715, %v5346_v39 }
 0x20c   :  { %v3939_v46 = vpop.eup %3938  ;;  %v2065_v16 = vmul.f32 %v2001_v15, %v5338_v35  ;;  %v3620_v56 = vpop.f32.mrf.mxu1  ;;  %v2191_v51 = vmul.f32 0.7978846, %v2127_v20  ;;  %v2314_v32 = vadd.f32 1.0, %v3937_v40  ;;  %v1866_v45 = vmul.f32 0.5, %v5260_v0 }
 0x20d   :  { %v1939_v29 = vmul.f32 0.044715, %v5355_v33  ;;  %v5365_v61 = vadd.f32 %v3620_v56, %v5101_v22  ;;  %v2313_v50 = vadd.f32 1.0, %v3939_v46  ;;  %v2192_v47 = vmul.f32 0.7978846, %v2128_v59 }
 0x20e   :  { %v2129_v2 = vadd.f32 %v2065_v16, %v5338_v35  ;;  %v1702_v48 = vpop.f32.mrf.mxu1  ;;  %3696 = vmatmul.mubr.msk.f32.gmra.mxu0 %vm100_vm0, %v2376_v18  ;;  %3948 = vtanh.f32 %v2191_v51  ;;  %v2378_v30 = vmul.f32 %v2314_v32, %v1866_v45  ;;  %v2130_v12 = vadd.f32 %v2066_v58, %v5332_v23 }
 0x20f   :  { %v2003_v55 = vmul.f32 %v1939_v29, %v5355_v33  ;;  %v5370_v5 = vadd.f32 %v5101_v22, %v1702_v48  ;;  %v2377_v41 = vmul.f32 %v2313_v50, %v1865_v52  ;;  %v2004_v38 = vmul.f32 %v1940_v44, %v5346_v39 }
 0x210   :  { %v3941_v54 = vpop.eup %3940  ;;  %v3623_v3 = vpop.f32.mrf.mxu1  ;;  %v2193_v11 = vmul.f32 0.7978846, %v2129_v2  ;;  %v1942_v17 = vmul.f32 0.044715, %v5365_v61  ;;  %3950 = vtanh.f32 %v2192_v47  ;;  %v1867_v7 = vmul.f32 0.5, %v5282_v27 }
 0x211   :  { %v2067_v49 = vmul.f32 %v2003_v55, %v5355_v33  ;;  %v1941_v28 = vmul.f32 0.044715, %v5370_v5  ;;  %3698 = vmatprep.mubr.msk.f32.mxu0 %vm100_vm0, %v2377_v41  ;;  %v2316_v19 = vadd.f32 1.0, %v3941_v54  ;;  %v5387_v43 = vadd.f32 %v3623_v3, %v5101_v22 }
 0x212   :  { %v3943_v13 = vpop.eup %3942  ;;  %v1712_v21 = vpop.f32.mrf.mxu1  ;;  %3699 = vmatmul.mubr.msk.f32.gmra.mxu0 %vm100_vm0, %v2378_v30  ;;  %3952 = vtanh.f32 %v2193_v11  ;;  %v1868_v60 = vmul.f32 0.5, %v5276_v42  ;;  %v2068_v36 = vmul.f32 %v2004_v38, %v5346_v39  ;;  %v2006_v37 = vmul.f32 %v1942_v17, %v5365_v61 }
 0x213   :  { %v5380_v0 = vadd.f32 %v5101_v22, %v1712_v21  ;;  %v2131_v8 = vadd.f32 %v2067_v49, %v5355_v33  ;;  %v2005_v34 = vmul.f32 %v1941_v28, %v5370_v5  ;;  %v2315_v31 = vadd.f32 1.0, %v3943_v13 }
 0x214   :  { %v3626_v53 = vpop.f32.mrf.mxu1  ;;  %v2194_v27 = vmul.f32 0.7978846, %v2130_v12  ;;  %v2380_v62 = vmul.f32 %v2316_v19, %v1868_v60  ;;  %v1944_v63 = vmul.f32 0.044715, %v5387_v43  ;;  %v1869_v24 = vmul.f32 0.5, %v5306_v25 }
 0x215   :  { %v2379_v26 = vmul.f32 %v2315_v31, %v1867_v7  ;;  %v1943_v4 = vmul.f32 0.044715, %v5380_v0  ;;  %v2069_v40 = vmul.f32 %v2005_v34, %v5370_v5  ;;  %v2195_v42 = vmul.f32 0.7978846, %v2131_v8 }
 0x216   :  { %v1722_v1 = vpop.f32.mrf.mxu1  ;;  %v3945_v14 = vpop.eup %3944  ;;  %3954 = vtanh.f32 %v2194_v27  ;;  %v1870_v59 = vmul.f32 0.5, %v5296_v10  ;;  %v2132_v46 = vadd.f32 %v2068_v36, %v5346_v39  ;;  %v2070_v16 = vmul.f32 %v2006_v37, %v5365_v61 }
 0x217   :  { %v5394_v6 = vadd.f32 %v5101_v22, %v1722_v1  ;;  %3701 = vmatprep.mubr.msk.f32.mxu0 %vm100_vm0, %v2379_v26  ;;  %v2318_v52 = vadd.f32 1.0, %v3945_v14  ;;  %3956 = vtanh.f32 %v2195_v42  ;;  %v2007_v58 = vmul.f32 %v1943_v4, %v5380_v0 }
 0x218   :  { %v3629_v20 = vpop.f32.mrf.mxu1  ;;  %v3947_v15 = vpop.eup %3946  ;;  %3702 = vmatmul.mubr.msk.f32.gmra.mxu0 %vm100_vm0, %v2380_v62  ;;  %v5406_v44 = vadd.f32 %v3626_v53, %v5101_v22  ;;  %v1871_v25 = vmul.f32 0.5, %v5322_v9  ;;  %v2133_v10 = vadd.f32 %v2069_v40, %v5370_v5  ;;  %v2008_v55 = vmul.f32 %v1944_v63, %v5387_v43 }
 0x219   :  { %v2317_v18 = vadd.f32 1.0, %v3947_v15  ;;  %v1945_v29 = vmul.f32 0.044715, %v5394_v6  ;;  %v5412_v32 = vadd.f32 %v3629_v20, %v5101_v22  ;;  %v2382_v54 = vmul.f32 %v2318_v52, %v1870_v59 }
 0x21a   :  { %v1732_v56 = vpop.f32.mrf.mxu1  ;;  %v2134_v3 = vadd.f32 %v2070_v16, %v5365_v61  ;;  %v1872_v47 = vmul.f32 0.5, %v5315_v57  ;;  %v2196_v11 = vmul.f32 0.7978846, %v2132_v46  ;;  %v2071_v28 = vmul.f32 %v2007_v58, %v5380_v0 }
 0x21b   :  { %v3949_v51 = vpop.eup %3948  ;;  %v2381_v48 = vmul.f32 %v2317_v18, %v1869_v24  ;;  %v5416_v45 = vadd.f32 %v5101_v22, %v1732_v56  ;;  %v1946_v30 = vmul.f32 0.044715, %v5406_v44  ;;  %v2009_v13 = vmul.f32 %v1945_v29, %v5394_v6  ;;  %v5450_v24 = vld [vmem:[%s5994_s4] ss:$0 sm:$0xff] }
 0x21c   :  { %v3632_v2 = vpop.f32.mrf.mxu1  ;;  %v2319_v50 = vadd.f32 1.0, %v3949_v51  ;;  %v1948_v38 = vmul.f32 0.044715, %v5412_v32  ;;  %3958 = vtanh.f32 %v2196_v11  ;;  %v2197_v57 = vmul.f32 0.7978846, %v2133_v10 }
 0x21d   :  { %3704 = vmatprep.mubr.msk.f32.mxu0 %vm100_vm0, %v2381_v48  ;;  %v3951_v49 = vpop.eup %3950  ;;  %v5425_v12 = vadd.f32 %v3632_v2, %v5101_v22  ;;  %v2072_v19 = vmul.f32 %v2008_v55, %v5387_v43  ;;  %v1947_v8 = vmul.f32 0.044715, %v5416_v45  ;;  %v1873_v34 = vmul.f32 0.5, %v5338_v35 }
 0x21e   :  { %v1742_v41 = vpop.f32.mrf.mxu1  ;;  %v2383_v9 = vmul.f32 %v2319_v50, %v1871_v25  ;;  %3705 = vmatmul.mubr.msk.f32.gmra.mxu0 %vm100_vm0, %v2382_v54  ;;  %v2320_v21 = vadd.f32 1.0, %v3951_v49  ;;  %3960 = vtanh.f32 %v2197_v57  ;;  %v2010_v37 = vmul.f32 %v1946_v30, %v5406_v44 }
 0x21f   :  { %v3953_v7 = vpop.eup %3952  ;;  %v5434_v53 = vadd.f32 %v5101_v22, %v1742_v41  ;;  %v2073_v1 = vmul.f32 %v2009_v13, %v5394_v6  ;;  %v1950_v26 = vmul.f32 0.044715, %v5425_v12  ;;  %v2135_v27 = vadd.f32 %v2071_v28, %v5380_v0 }
 0x220   :  { %v3635_v17 = vpop.f32.mrf.mxu1  ;;  %3707 = vmatprep.mubr.msk.f32.mxu0 %vm100_vm0, %v2383_v9  ;;  %v2384_v60 = vmul.f32 %v2320_v21, %v1872_v47  ;;  %v2321_v36 = vadd.f32 1.0, %v3953_v7  ;;  %v2012_v14 = vmul.f32 %v1948_v38, %v5412_v32  ;;  %v2198_v22 = vmul.f32 0.7978846, %v2134_v3 }
 0x221   :  { %v2136_v40 = vadd.f32 %v2072_v19, %v5387_v43  ;;  %v2011_v20 = vmul.f32 %v1947_v8, %v5416_v45  ;;  %v1874_v42 = vmul.f32 0.5, %v5332_v23  ;;  %v1875_v15 = vmul.f32 0.5, %v5355_v33 }
 0x222   :  { %v1752_v31 = vpop.f32.mrf.mxu1  ;;  %3708 = vmatmul.mubr.msk.f32.gmra.mxu0 %vm100_vm0, %v2384_v60  ;;  %v2385_v4 = vmul.f32 %v2321_v36, %v1873_v34  ;;  %v1949_v63 = vmul.f32 0.044715, %v5434_v53  ;;  %v5453_v59 = vadd.f32 %v5450_v24, %v3635_v17  ;;  %3962 = vtanh.f32 %v2198_v22 }
 0x223   :  { %v3955_v62 = vpop.eup %3954  ;;  %v2074_v23 = vmul.f32 %v2010_v37, %v5406_v44  ;;  %v2137_v33 = vadd.f32 %v2073_v1, %v5394_v6  ;;  %v2014_v56 = vmul.f32 %v1950_v26, %v5425_v12  ;;  %v5460_v18 = vadd.f32 %v5450_v24, %v1752_v31 }
 0x224   :  { %v3638_v35 = vpop.f32.mrf.mxu1  ;;  %3710 = vmatprep.mubr.msk.f32.mxu0 %vm100_vm0, %v2385_v4  ;;  %v2322_v46 = vadd.f32 1.0, %v3955_v62  ;;  %v3957_v16 = vpop.eup %3956  ;;  %v2076_v51 = vmul.f32 %v2012_v14, %v5412_v32  ;;  %v2199_v10 = vmul.f32 0.7978846, %v2135_v27  ;;  %v2075_v2 = vmul.f32 %v2011_v20, %v5416_v45 }
 0x225   :  { %v2323_v25 = vadd.f32 1.0, %v3957_v16  ;;  %v5465_v48 = vadd.f32 %v5450_v24, %v3638_v35  ;;  %v1876_v50 = vmul.f32 0.5, %v5346_v39  ;;  %v2013_v55 = vmul.f32 %v1949_v63, %v5434_v53 }
 0x226   :  { %v1762_v52 = vpop.f32.mrf.mxu1  ;;  %v2386_v58 = vmul.f32 %v2322_v46, %v1874_v42  ;;  %v1952_v54 = vmul.f32 0.044715, %v5453_v59  ;;  %3964 = vtanh.f32 %v2199_v10  ;;  %v2138_v9 = vadd.f32 %v2074_v23, %v5406_v44 }
 0x227   :  { %v2387_v3 = vmul.f32 %v2323_v25, %v1875_v15  ;;  %v2078_v47 = vmul.f32 %v2014_v56, %v5425_v12  ;;  %v1951_v11 = vmul.f32 0.044715, %v5460_v18  ;;  %v5475_v49 = vadd.f32 %v5450_v24, %v1762_v52 }
 0x228   :  { %v3641_v29 = vpop.f32.mrf.mxu1  ;;  %3711 = vmatmul.mubr.msk.f32.gmra.mxu0 %vm100_vm0, %v2386_v58  ;;  %v5478_v39 = vadd.f32 %v2076_v51, %v5412_v32  ;;  %v1877_v30 = vmul.f32 0.5, %v5370_v5  ;;  %v2200_v13 = vmul.f32 0.7978846, %v2136_v40  ;;  %v2201_v38 = vmul.f32 0.7978846, %v2137_v33 }
 0x229   :  { %3713 = vmatprep.mubr.msk.f32.mxu0 %vm100_vm0, %v2387_v3  ;;  %v3959_v17 = vpop.eup %3958  ;;  %v2139_v21 = vadd.f32 %v2075_v2, %v5416_v45  ;;  %v1954_v57 = vmul.f32 0.044715, %v5465_v48  ;;  %v5485_v7 = vadd.f32 %v5450_v24, %v3641_v29  ;;  %v1878_v19 = vmul.f32 0.5, %v5365_v61 }
 0x22a   :  { %v1772_v41 = vpop.f32.mrf.mxu1  ;;  %v2077_v8 = vmul.f32 %v2013_v55, %v5434_v53  ;;  %v2016_v34 = vmul.f32 %v1952_v54, %v5453_v59  ;;  %v2324_v31 = vadd.f32 1.0, %v3959_v17  ;;  %3966 = vtanh.f32 %v2200_v13 }
 0x22b   :  { %v3961_v5 = vpop.eup %3960  ;;  %v5491_v36 = vadd.f32 %v2078_v47, %v5425_v12  ;;  %v2015_v37 = vmul.f32 %v1951_v11, %v5460_v18  ;;  %v1953_v1 = vmul.f32 0.044715, %v5475_v49  ;;  %v5496_v26 = vadd.f32 %v5450_v24, %v1772_v41 }
 0x22c   :  { %v3644_v28 = vpop.f32.mrf.mxu1  ;;  %v2388_v27 = vmul.f32 %v2324_v31, %v1876_v50  ;;  %v2325_v14 = vadd.f32 1.0, %v3961_v5  ;;  %3968 = vtanh.f32 %v2201_v38  ;;  %v2018_v4 = vmul.f32 %v1954_v57, %v5465_v48 }
 0x22d   :  { %v5499_v61 = vadd.f32 %v5450_v24, %v3644_v28  ;;  %v1956_v22 = vmul.f32 0.044715, %v5485_v7  ;;  %v1879_v40 = vmul.f32 0.5, %v5380_v0  ;;  %v2141_v20 = vadd.f32 %v2077_v8, %v5434_v53 }
 0x22e   :  { %v1782_v60 = vpop.f32.mrf.mxu1  ;;  %v2080_v42 = vmul.f32 %v2016_v34, %v5453_v59  ;;  %3714 = vmatmul.mubr.msk.f32.gmra.mxu0 %vm100_vm0, %v2388_v27  ;;  %v2389_v15 = vmul.f32 %v2325_v14, %v1877_v30  ;;  %v2202_v52 = vmul.f32 0.7978846, %v2138_v9  ;;  %v2079_v16 = vmul.f32 %v2015_v37, %v5460_v18 }
 0x22f   :  { %v5504_v62 = vadd.f32 %v5450_v24, %v1782_v60  ;;  %v3963_v46 = vpop.eup %3962  ;;  %v2017_v23 = vmul.f32 %v1953_v1, %v5475_v49  ;;  %v1955_v33 = vmul.f32 0.044715, %v5496_v26  ;;  %v1958_v0 = vmul.f32 0.044715, %v5499_v61 }
 0x230   :  { %v3647_v35 = vpop.f32.mrf.mxu1  ;;  %3716 = vmatprep.mubr.msk.f32.mxu0 %vm100_vm0, %v2389_v15  ;;  %v2326_v51 = vadd.f32 1.0, %v3963_v46  ;;  %3970 = vtanh.f32 %v2202_v52  ;;  %v2203_v29 = vmul.f32 0.7978846, %v2139_v21  ;;  %v2082_v25 = vmul.f32 %v2018_v4, %v5465_v48 }
 0x231   :  { %v5514_v56 = vadd.f32 %v5450_v24, %v3647_v35  ;;  %v2020_v10 = vmul.f32 %v1956_v22, %v5485_v7  ;;  %v1957_v2 = vmul.f32 0.044715, %v5504_v62  ;;  %v5525_v55 = vadd.f32 %v2080_v42, %v5453_v59 }
 0x232   :  { %v1792_v63 = vpop.f32.mrf.mxu1  ;;  %v2390_v54 = vmul.f32 %v2326_v51, %v1878_v19  ;;  %v1880_v3 = vmul.f32 0.5, %v5387_v43  ;;  %3972 = vtanh.f32 %v2203_v29  ;;  %v2143_v47 = vadd.f32 %v2079_v16, %v5460_v18 }
 0x233   :  { %v5522_v50 = vadd.f32 %v5450_v24, %v1792_v63  ;;  %v3965_v9 = vpop.eup %3964  ;;  %v2081_v11 = vmul.f32 %v2017_v23, %v5475_v49  ;;  %v1960_v28 = vmul.f32 0.044715, %v5514_v56  ;;  %v1881_v30 = vmul.f32 0.5, %v5394_v6 }
 0x234   :  { %v3650_v58 = vpop.f32.mrf.mxu1  ;;  %v2019_v13 = vmul.f32 %v1955_v33, %v5496_v26  ;;  %v2022_v38 = vmul.f32 %v1958_v0, %v5499_v61  ;;  %3717 = vmatmul.mubr.msk.f32.gmra.mxu0 %vm100_vm0, %v2390_v54  ;;  %v2327_v17 = vadd.f32 1.0, %v3965_v9  ;;  %v2204_v43 = vmul.f32 0.7978846, %v5478_v39 }
 0x235   :  { %v5537_v57 = vadd.f32 %v2082_v25, %v5465_v48  ;;  %v2084_v19 = vmul.f32 %v2020_v10, %v5485_v7  ;;  %v2021_v8 = vmul.f32 %v1957_v2, %v5504_v62  ;;  %v1959_v34 = vmul.f32 0.044715, %v5522_v50 }
 0x236   :  { %v1802_v41 = vpop.f32.mrf.mxu1  ;;  %v2391_v6 = vmul.f32 %v2327_v17, %v1879_v40  ;;  %v5543_v31 = vadd.f32 %v5450_v24, %v3650_v58  ;;  %3974 = vtanh.f32 %v2204_v43  ;;  %v2205_v5 = vmul.f32 0.7978846, %v2141_v20 }
 0x237   :  { %v3967_v37 = vpop.eup %3966  ;;  %v2145_v1 = vadd.f32 %v2081_v11, %v5475_v49  ;;  %v2024_v39 = vmul.f32 %v1960_v28, %v5514_v56  ;;  %v5548_v27 = vadd.f32 %v5450_v24, %v1802_v41  ;;  %v1882_v14 = vmul.f32 0.5, %v5406_v44 }
 0x238   :  { %v3653_v21 = vpop.f32.mrf.mxu1  ;;  %v2083_v35 = vmul.f32 %v2019_v13, %v5496_v26  ;;  %v2086_v4 = vmul.f32 %v2022_v38, %v5499_v61  ;;  %3719 = vmatprep.mubr.msk.f32.mxu0 %vm100_vm0, %v2391_v6  ;;  %v2328_v22 = vadd.f32 1.0, %v3967_v37  ;;  %3976 = vtanh.f32 %v2205_v5 }
 0x239   :  { %v3969_v20 = vpop.eup %3968  ;;  %v5555_v42 = vadd.f32 %v2084_v19, %v5485_v7  ;;  %v2085_v15 = vmul.f32 %v2021_v8, %v5504_v62  ;;  %v2023_v63 = vmul.f32 %v1959_v34, %v5522_v50  ;;  %v1962_v46 = vmul.f32 0.044715, %v5543_v31 }
 0x23a   :  { %v1812_v60 = vpop.f32.mrf.mxu1  ;;  %v2392_v44 = vmul.f32 %v2328_v22, %v1880_v3  ;;  %v2329_v16 = vadd.f32 1.0, %v3969_v20  ;;  %v2206_v33 = vmul.f32 0.7978846, %v5491_v36  ;;  %v2088_v0 = vmul.f32 %v2024_v39, %v5514_v56 }
 0x23b   :  { %v5560_v52 = vadd.f32 %v5450_v24, %v1812_v60  ;;  %v1961_v51 = vmul.f32 0.044715, %v5548_v27  ;;  %v5567_v58 = vadd.f32 %v5450_v24, %v3653_v21  ;;  %v1883_v29 = vmul.f32 0.5, %v5416_v45 }
 0x23c   :  { %v3656_v40 = vpop.f32.mrf.mxu1  ;;  %v2147_v25 = vadd.f32 %v2083_v35, %v5496_v26  ;;  %v2150_v10 = vadd.f32 %v2086_v4, %v5499_v61  ;;  %3720 = vmatmul.mubr.msk.f32.gmra.mxu0 %vm100_vm0, %v2392_v44  ;;  %v2393_v2 = vmul.f32 %v2329_v16, %v1881_v30  ;;  %3978 = vtanh.f32 %v2206_v33 }
 0x23d   :  { %v3971_v3 = vpop.eup %3970  ;;  %v2087_v36 = vmul.f32 %v2023_v63, %v5522_v50  ;;  %v1963_v41 = vmul.f32 0.044715, %v5560_v52  ;;  %v1884_v9 = vmul.f32 0.5, %v5412_v32  ;;  %v2149_v45 = vadd.f32 %v2085_v15, %v5504_v62 }
 0x23e   :  { %v1822_v23 = vpop.f32.mrf.mxu1  ;;  %v2026_v28 = vmul.f32 %v1962_v46, %v5543_v31  ;;  %3722 = vmatprep.mubr.msk.f32.mxu0 %vm100_vm0, %v2393_v2  ;;  %v2330_v13 = vadd.f32 1.0, %v3971_v3  ;;  %v2207_v30 = vmul.f32 0.7978846, %v2143_v47  ;;  %v2152_v17 = vadd.f32 %v2088_v0, %v5514_v56 }
 0x23f   :  { %v5577_v11 = vadd.f32 %v5450_v24, %v1822_v23  ;;  %v3973_v38 = vpop.eup %3972  ;;  %v2025_v21 = vmul.f32 %v1961_v51, %v5548_v27  ;;  %v1964_v43 = vmul.f32 0.044715, %v5567_v58  ;;  %v1885_v32 = vmul.f32 0.5, %v5434_v53 }
 0x240   :  { %v3659_v54 = vpop.f32.mrf.mxu1  ;;  %v2394_v8 = vmul.f32 %v2330_v13, %v1882_v14  ;;  %v2331_v34 = vadd.f32 1.0, %v3973_v38  ;;  %v5587_v6 = vadd.f32 %v5450_v24, %v3656_v40  ;;  %3980 = vtanh.f32 %v2207_v30 }
 0x241   :  { %v2151_v60 = vadd.f32 %v2087_v36, %v5522_v50  ;;  %v2027_v47 = vmul.f32 %v1963_v41, %v5560_v52  ;;  %v1965_v5 = vmul.f32 0.044715, %v5577_v11  ;;  %v2208_v37 = vmul.f32 0.7978846, %v5525_v55 }
 0x242   :  { %v1832_v19 = vpop.f32.mrf.mxu1  ;;  %v2090_v39 = vmul.f32 %v2026_v28, %v5543_v31  ;;  %3723 = vmatmul.mubr.msk.f32.gmra.mxu0 %vm100_vm0, %v2394_v8  ;;  %v2395_v53 = vmul.f32 %v2331_v34, %v1883_v29  ;;  %v2209_v35 = vmul.f32 0.7978846, %v2145_v1  ;;  %v2089_v22 = vmul.f32 %v2025_v21, %v5548_v27 }
 0x243   :  { %v5596_v14 = vadd.f32 %v5450_v24, %v1832_v19  ;;  %v3975_v4 = vpop.eup %3974  ;;  %v2028_v40 = vmul.f32 %v1964_v43, %v5567_v58  ;;  %v1886_v20 = vmul.f32 0.5, %v5425_v12  ;;  %3982 = vtanh.f32 %v2208_v37 }
 0x244   :  { %3725 = vmatprep.mubr.msk.f32.mxu0 %vm100_vm0, %v2395_v53  ;;  %v2332_v55 = vadd.f32 1.0, %v3975_v4  ;;  %v1966_v15 = vmul.f32 0.044715, %v5587_v6  ;;  %3984 = vtanh.f32 %v2209_v35  ;;  %v2210_v63 = vmul.f32 0.7978846, %v5537_v57 }
 0x245   :  { %v3977_v44 = vpop.eup %3976  ;;  %v2091_v46 = vmul.f32 %v2027_v47, %v5560_v52  ;;  %v2029_v1 = vmul.f32 %v1965_v5, %v5577_v11  ;;  %v5607_v16 = vadd.f32 %v5450_v24, %v3659_v54  ;;  %v2211_v23 = vmul.f32 0.7978846, %v2147_v25 }
 0x246   :  { %v2396_v33 = vmul.f32 %v2332_v55, %v1884_v9  ;;  %v2333_v12 = vadd.f32 1.0, %v3977_v44  ;;  %v1967_v0 = vmul.f32 0.044715, %v5596_v14  ;;  %3986 = vtanh.f32 %v2210_v63 }
 0x247   :  { %v2153_v51 = vadd.f32 %v2089_v22, %v5548_v27  ;;  %3988 = vtanh.f32 %v2211_v23  ;;  %v2212_v29 = vmul.f32 0.7978846, %v5555_v42  ;;  %v2213_v57 = vmul.f32 0.7978846, %v2149_v45 }
 0x248   :  { %v2154_v2 = vadd.f32 %v2090_v39, %v5543_v31  ;;  %3726 = vmatmul.mubr.msk.f32.gmra.mxu0 %vm100_vm0, %v2396_v33  ;;  %v2030_v3 = vmul.f32 %v1966_v15, %v5587_v6  ;;  %v2397_v24 = vmul.f32 %v2333_v12, %v1885_v32  ;;  %v2214_v54 = vmul.f32 0.7978846, %v2150_v10 }
 0x249   :  { %v3979_v25 = vpop.eup %3978  ;;  %v2093_v36 = vmul.f32 %v2029_v1, %v5577_v11  ;;  %v1968_v41 = vmul.f32 0.044715, %v5607_v16  ;;  %3990 = vtanh.f32 %v2212_v29  ;;  %v2215_v9 = vmul.f32 0.7978846, %v2151_v60 }
 0x24a   :  { %v2155_v28 = vadd.f32 %v2091_v46, %v5560_v52  ;;  %3728 = vmatprep.mubr.msk.f32.mxu0 %vm100_vm0, %v2397_v24  ;;  %v2334_v42 = vadd.f32 1.0, %v3979_v25  ;;  %v2031_v45 = vmul.f32 %v1967_v0, %v5596_v14  ;;  %3992 = vtanh.f32 %v2213_v57 }
 0x24b   :  { %v2092_v13 = vmul.f32 %v2028_v40, %v5567_v58  ;;  %3994 = vtanh.f32 %v2214_v54  ;;  %v2216_v30 = vmul.f32 0.7978846, %v2152_v17  ;;  %v2217_v10 = vmul.f32 0.7978846, %v2153_v51 }
 0x24c   :  { %v2398_v38 = vmul.f32 %v2334_v42, %v1886_v20  ;;  %3996 = vtanh.f32 %v2215_v9  ;;  %v2094_v43 = vmul.f32 %v2030_v3, %v5587_v6  ;;  %v2157_v32 = vadd.f32 %v2093_v36, %v5577_v11 }
 0x24d   :  { %v3981_v21 = vpop.eup %3980  ;;  %v2032_v19 = vmul.f32 %v1968_v41, %v5607_v16  ;;  %v1887_v8 = vmul.f32 0.5, %v5460_v18  ;;  %v2095_v60 = vmul.f32 %v2031_v45, %v5596_v14  ;;  %3998 = vtanh.f32 %v2217_v10 }
 0x24e   :  { %3729 = vmatmul.mubr.msk.f32.gmra.mxu0 %vm100_vm0, %v2398_v38  ;;  %v2335_v34 = vadd.f32 1.0, %v3981_v21  ;;  %v2219_v47 = vmul.f32 0.7978846, %v2155_v28  ;;  %v2156_v17 = vadd.f32 %v2092_v13, %v5567_v58  ;;  %4000 = vtanh.f32 %v2216_v30 }
 0x24f   :  { %v2218_v5 = vmul.f32 0.7978846, %v2154_v2  ;;  %v1888_v53 = vmul.f32 0.5, %v5453_v59  ;;  %v2158_v4 = vadd.f32 %v2094_v43, %v5587_v6  ;;  %v2096_v18 = vmul.f32 %v2032_v19, %v5607_v16 }
 0x250   :  { %v3983_v37 = vpop.eup %3982  ;;  %v2399_v39 = vmul.f32 %v2335_v34, %v1887_v8  ;;  %v1889_v40 = vmul.f32 0.5, %v5475_v49  ;;  %v2159_v20 = vadd.f32 %v2095_v60, %v5596_v14  ;;  %4002 = vtanh.f32 %v2219_v47 }
 0x251   :  { %v3985_v35 = vpop.eup %3984  ;;  %v2336_v22 = vadd.f32 1.0, %v3983_v37  ;;  %v2221_v15 = vmul.f32 0.7978846, %v2157_v32  ;;  %4004 = vtanh.f32 %v2218_v5  ;;  %v2220_v46 = vmul.f32 0.7978846, %v2156_v17 }
 0x252   :  { %3731 = vmatprep.mubr.msk.f32.mxu0 %vm100_vm0, %v2399_v39  ;;  %v2337_v55 = vadd.f32 1.0, %v3985_v35  ;;  %v1890_v33 = vmul.f32 0.5, %v5465_v48  ;;  %v1891_v49 = vmul.f32 0.5, %v5496_v26  ;;  %v2160_v51 = vadd.f32 %v2096_v18, %v5607_v16 }
 0x253   :  { %v3987_v63 = vpop.eup %3986  ;;  %v2400_v44 = vmul.f32 %v2336_v22, %v1888_v53  ;;  %4006 = vtanh.f32 %v2221_v15  ;;  %v2222_v29 = vmul.f32 0.7978846, %v2158_v4  ;;  %v2223_v57 = vmul.f32 0.7978846, %v2159_v20 }
 0x254   :  { %v3989_v59 = vpop.eup %3988  ;;  %v2401_v1 = vmul.f32 %v2337_v55, %v1889_v40  ;;  %v2338_v23 = vadd.f32 1.0, %v3987_v63  ;;  %4008 = vtanh.f32 %v2220_v46  ;;  %v1893_v36 = vmul.f32 0.5, %v5504_v62 }
 0x255   :  { %3732 = vmatmul.mubr.msk.f32.gmra.mxu0 %vm100_vm0, %v2400_v44  ;;  %v2339_v12 = vadd.f32 1.0, %v3989_v59  ;;  %v1892_v26 = vmul.f32 0.5, %v5485_v7  ;;  %4010 = vtanh.f32 %v2223_v57  ;;  %v2224_v30 = vmul.f32 0.7978846, %v2160_v51 }
 0x256   :  { %v3991_v0 = vpop.eup %3990  ;;  %3734 = vmatprep.mubr.msk.f32.mxu0 %vm100_vm0, %v2401_v1  ;;  %v2402_v3 = vmul.f32 %v2338_v23, %v1890_v33  ;;  %4012 = vtanh.f32 %v2222_v29  ;;  %v1895_v38 = vmul.f32 0.5, %v5522_v50  ;;  %v1894_v62 = vmul.f32 0.5, %v5499_v61  ;;  %v5667_v33 = vld [vmem:[#allocation2] ss:$0 sm:$0xff] }
 0x257   :  { %v3993_v2 = vpop.eup %3992  ;;  %v2403_v24 = vmul.f32 %v2339_v12, %v1891_v49  ;;  %v2340_v54 = vadd.f32 1.0, %v3991_v0  ;;  %4014 = vtanh.f32 %v2224_v30  ;;  %v1897_v34 = vmul.f32 0.5, %v5548_v27 }
 0x258   :  { %v3995_v25 = vpop.eup %3994  ;;  %v2341_v48 = vadd.f32 1.0, %v3993_v2  ;;  %v1896_v60 = vmul.f32 0.5, %v5514_v56  ;;  %v1899_v39 = vmul.f32 0.5, %v5560_v52  ;;  %v1898_v53 = vmul.f32 0.5, %v5543_v31 }
 0x259   :  { %v3997_v41 = vpop.eup %3996  ;;  %3735 = vmatmul.mubr.msk.f32.gmra.mxu0 %vm100_vm0, %v2402_v3  ;;  %v2404_v45 = vmul.f32 %v2340_v54, %v1892_v26  ;;  %v2342_v13 = vadd.f32 1.0, %v3995_v25  ;;  %v1901_v40 = vmul.f32 0.5, %v5577_v11  ;;  %v1900_v20 = vmul.f32 0.5, %v5567_v58 }
 0x25a   :  { %3737 = vmatprep.mubr.msk.f32.mxu0 %vm100_vm0, %v2403_v24  ;;  %v2405_v9 = vmul.f32 %v2341_v48, %v1893_v36  ;;  %v2343_v28 = vadd.f32 1.0, %v3997_v41  ;;  %v3999_v42 = vpop.eup %3998  ;;  %v1903_v44 = vmul.f32 0.5, %v5596_v14  ;;  %v1902_v46 = vmul.f32 0.5, %v5587_v6 }
 0x25b   :  { %v4001_v10 = vpop.eup %4000  ;;  %v2345_v21 = vadd.f32 1.0, %v3999_v42  ;;  %v2406_v32 = vmul.f32 %v2342_v13, %v1894_v62  ;;  %v1904_v58 = vmul.f32 0.5, %v5607_v16 }
 0x25c   :  { %v2407_v7 = vmul.f32 %v2343_v28, %v1895_v38  ;;  %v2344_v19 = vadd.f32 1.0, %v4001_v10 }
 0x25d   :  { %3738 = vmatmul.mubr.msk.f32.gmra.mxu0 %vm100_vm0, %v2404_v45  ;;  %v4003_v43 = vpop.eup %4002  ;;  %v2409_v50 = vmul.f32 %v2345_v21, %v1897_v34 }
 0x25e   :  { %3740 = vmatprep.mubr.msk.f32.mxu0 %vm100_vm0, %v2405_v9  ;;  %v4005_v8 = vpop.eup %4004  ;;  %v2347_v47 = vadd.f32 1.0, %v4003_v43  ;;  %v2408_v17 = vmul.f32 %v2344_v19, %v1896_v60 }
 0x25f   :  { %v2346_v5 = vadd.f32 1.0, %v4005_v8 }
 0x260   :  { %v4007_v61 = vpop.eup %4006  ;;  %v2411_v27 = vmul.f32 %v2347_v47, %v1899_v39 }
 0x261   :  { %3741 = vmatmul.mubr.msk.f32.gmra.mxu0 %vm100_vm0, %v2406_v32  ;;  %v4009_v37 = vpop.eup %4008  ;;  %v2349_v35 = vadd.f32 1.0, %v4007_v61  ;;  %v2410_v56 = vmul.f32 %v2346_v5, %v1898_v53 }
 0x262   :  { %3743 = vmatprep.mubr.msk.f32.mxu0 %vm100_vm0, %v2407_v7  ;;  %v4011_v4 = vpop.eup %4010  ;;  %v2348_v18 = vadd.f32 1.0, %v4009_v37 }
 0x263   :  { %v4013_v22 = vpop.eup %4012  ;;  %v2413_v52 = vmul.f32 %v2349_v35, %v1901_v40  ;;  %v2351_v55 = vadd.f32 1.0, %v4011_v4 }
 0x264   :  { %v2412_v15 = vmul.f32 %v2348_v18, %v1900_v20  ;;  %v2350_v31 = vadd.f32 1.0, %v4013_v22  ;;  %v4015_v63 = vpop.eup %4014 }
 0x265   :  { %3744 = vmatmul.mubr.msk.f32.gmra.mxu0 %vm100_vm0, %v2408_v17  ;;  %v2415_v11 = vmul.f32 %v2351_v55, %v1903_v44  ;;  %v2352_v1 = vadd.f32 1.0, %v4015_v63 }
 0x266   :  { %3746 = vmatprep.mubr.msk.f32.mxu0 %vm100_vm0, %v2409_v50  ;;  %v2414_v59 = vmul.f32 %v2350_v31, %v1902_v46 }
 0x267   :  { %v2416_v23 = vmul.f32 %v2352_v1, %v1904_v58 }
 0x269   :  { %3747 = vmatmul.mubr.msk.f32.gmra.mxu0 %vm100_vm0, %v2410_v56 }
 0x26a   :  { %3749 = vmatprep.mubr.msk.f32.mxu0 %vm100_vm0, %v2411_v27 }
 0x26d   :  { %3750 = vmatmul.mubr.msk.f32.gmra.mxu0 %vm100_vm0, %v2412_v15 }
 0x26e   :  { %3752 = vmatprep.mubr.msk.f32.mxu0 %vm100_vm0, %v2413_v52 }
 0x271   :  { %3753 = vmatmul.mubr.msk.f32.gmra.mxu0 %vm100_vm0, %v2414_v59 }
 0x272   :  { %3755 = vmatprep.mubr.msk.f32.mxu0 %vm100_vm0, %v2415_v11 }
 0x275   :  { %3756 = vmatmul.mubr.msk.f32.gmra.mxu0 %vm100_vm0, %v2416_v23 }
 0x288   :  { %v3664_v14 = vpop.f32.mrf.mxu0 }
 0x289   :  { %v2689_v6 = vadd.f32 %v3664_v14, %v5667_v33 }
 0x28a   :  { %v2683_v49 = vpop.f32.mrf.mxu0 }
 0x28b   :  { %3004 = vst.msk [vmem:[%s5996_s7 + $0x8] sm:$0xff] %vm3002_vm2, %v2689_v6  ;;  %v2684_v12 = vadd.f32 %v5667_v33, %v2683_v49 }
 0x28c   :  { %v3667_v16 = vpop.f32.mrf.mxu0 }
 0x28d   :  { %3003 = vst.msk [vmem:[%s5996_s7] sm:$0xff] %vm3002_vm2, %v2684_v12  ;;  %v2699_v0 = vadd.f32 %v3667_v16, %v5667_v33 }
 0x28e   :  { %v2693_v51 = vpop.f32.mrf.mxu0 }
 0x28f   :  { %3006 = vst.msk [vmem:[%s5996_s7 + $0x18] sm:$0xff] %vm3002_vm2, %v2699_v0  ;;  %v2694_v29 = vadd.f32 %v5667_v33, %v2693_v51 }
 0x291   :  { %3005 = vst.msk [vmem:[%s5996_s7 + $0x10] sm:$0xff] %vm3002_vm2, %v2694_v29  ;;  %v3670_v57 = vpop.f32.mrf.mxu0 }
 0x292   :  { %v2709_v2 = vadd.f32 %v3670_v57, %v5667_v33 }
 0x293   :  { %v2703_v3 = vpop.f32.mrf.mxu0 }
 0x294   :  { %3008 = vst.msk [vmem:[%s5996_s7 + $0x28] sm:$0xff] %vm3002_vm2, %v2709_v2  ;;  %v2704_v24 = vadd.f32 %v5667_v33, %v2703_v3 }
 0x296   :  { %3007 = vst.msk [vmem:[%s5996_s7 + $0x20] sm:$0xff] %vm3002_vm2, %v2704_v24 }
 0x29a   :  { %v3673_v54 = vpop.f32.mrf.mxu0 }
 0x29b   :  { %v2719_v25 = vadd.f32 %v3673_v54, %v5667_v33 }
 0x29c   :  { %v2713_v36 = vpop.f32.mrf.mxu0 }
 0x29d   :  { %3010 = vst.msk [vmem:[%s5996_s7 + $0x38] sm:$0xff] %vm3002_vm2, %v2719_v25  ;;  %v2714_v48 = vadd.f32 %v5667_v33, %v2713_v36 }
 0x29f   :  { %3009 = vst.msk [vmem:[%s5996_s7 + $0x30] sm:$0xff] %vm3002_vm2, %v2714_v48 }
 0x2a5   :  { %v3676_v41 = vpop.f32.mrf.mxu0 }
 0x2a6   :  { %v2729_v26 = vadd.f32 %v3676_v41, %v5667_v33 }
 0x2a7   :  { %v2723_v9 = vpop.f32.mrf.mxu0 }
 0x2a8   :  { %3012 = vst.msk [vmem:[%s5996_s7 + $0x48] sm:$0xff] %vm3002_vm2, %v2729_v26  ;;  %v2724_v28 = vadd.f32 %v5667_v33, %v2723_v9 }
 0x2aa   :  { %3011 = vst.msk [vmem:[%s5996_s7 + $0x40] sm:$0xff] %vm3002_vm2, %v2724_v28 }
 0x2ac   :  { %v3679_v42 = vpop.f32.mrf.mxu0 }
 0x2ad   :  { %v2739_v45 = vadd.f32 %v3679_v42, %v5667_v33 }
 0x2ae   :  { %v2733_v13 = vpop.f32.mrf.mxu0 }
 0x2af   :  { %3014 = vst.msk [vmem:[%s5996_s7 + $0x58] sm:$0xff] %vm3002_vm2, %v2739_v45  ;;  %v2734_v30 = vadd.f32 %v5667_v33, %v2733_v13 }
 0x2b1   :  { %3013 = vst.msk [vmem:[%s5996_s7 + $0x50] sm:$0xff] %vm3002_vm2, %v2734_v30 }
 0x2b3   :  { %v3682_v10 = vpop.f32.mrf.mxu0 }
 0x2b4   :  { %v2749_v38 = vadd.f32 %v3682_v10, %v5667_v33 }
 0x2b5   :  { %v2743_v62 = vpop.f32.mrf.mxu0 }
 0x2b6   :  { %3016 = vst.msk [vmem:[%s5996_s7 + $0x68] sm:$0xff] %vm3002_vm2, %v2749_v38  ;;  %v2744_v7 = vadd.f32 %v5667_v33, %v2743_v62 }
 0x2b8   :  { %3015 = vst.msk [vmem:[%s5996_s7 + $0x60] sm:$0xff] %vm3002_vm2, %v2744_v7 }
 0x2ba   :  { %v3685_v21 = vpop.f32.mrf.mxu0 }
 0x2bb   :  { %v2759_v43 = vadd.f32 %v3685_v21, %v5667_v33 }
 0x2bc   :  { %v2753_v32 = vpop.f32.mrf.mxu0 }
 0x2bd   :  { %3018 = vst.msk [vmem:[%s5996_s7 + $0x78] sm:$0xff] %vm3002_vm2, %v2759_v43  ;;  %v2754_v19 = vadd.f32 %v5667_v33, %v2753_v32 }
 0x2be   :  { %v3688_v8 = vpop.f32.mrf.mxu0 }
 0x2bf   :  { %3017 = vst.msk [vmem:[%s5996_s7 + $0x70] sm:$0xff] %vm3002_vm2, %v2754_v19  ;;  %v2769_v34 = vadd.f32 %v3688_v8, %v5667_v33 }
 0x2c0   :  { %v2763_v60 = vpop.f32.mrf.mxu0 }
 0x2c1   :  { %3020 = vst.msk [vmem:[%s5996_s7 + $0x88] sm:$0xff] %vm3002_vm2, %v2769_v34  ;;  %v2764_v50 = vadd.f32 %v5667_v33, %v2763_v60 }
 0x2c3   :  { %3019 = vst.msk [vmem:[%s5996_s7 + $0x80] sm:$0xff] %vm3002_vm2, %v2764_v50 }
 0x2c4   :  { %v3691_v47 = vpop.f32.mrf.mxu0 }
 0x2c5   :  { %v2779_v61 = vadd.f32 %v3691_v47, %v5667_v33 }
 0x2c6   :  { %v2773_v17 = vpop.f32.mrf.mxu0 }
 0x2c7   :  { %3022 = vst.msk [vmem:[%s5996_s7 + $0x98] sm:$0xff] %vm3002_vm2, %v2779_v61  ;;  %v2774_v5 = vadd.f32 %v5667_v33, %v2773_v17 }
 0x2c9   :  { %3021 = vst.msk [vmem:[%s5996_s7 + $0x90] sm:$0xff] %vm3002_vm2, %v2774_v5 }
 0x2ca   :  { %v3694_v37 = vpop.f32.mrf.mxu0 }
 0x2cb   :  { %v2789_v39 = vadd.f32 %v3694_v37, %v5667_v33 }
 0x2cc   :  { %v2783_v53 = vpop.f32.mrf.mxu0 }
 0x2cd   :  { %3024 = vst.msk [vmem:[%s5996_s7 + $0xa8] sm:$0xff] %vm3002_vm2, %v2789_v39  ;;  %v2784_v27 = vadd.f32 %v5667_v33, %v2783_v53 }
 0x2ce   :  { %v3697_v35 = vpop.f32.mrf.mxu0 }
 0x2cf   :  { %3023 = vst.msk [vmem:[%s5996_s7 + $0xa0] sm:$0xff] %vm3002_vm2, %v2784_v27  ;;  %v2799_v4 = vadd.f32 %v3697_v35, %v5667_v33 }
 0x2d0   :  { %v2793_v56 = vpop.f32.mrf.mxu0 }
 0x2d1   :  { %3026 = vst.msk [vmem:[%s5996_s7 + $0xb8] sm:$0xff] %vm3002_vm2, %v2799_v4  ;;  %v2794_v18 = vadd.f32 %v5667_v33, %v2793_v56 }
 0x2d2   :  { %v3700_v22 = vpop.f32.mrf.mxu0 }
 0x2d3   :  { %3025 = vst.msk [vmem:[%s5996_s7 + $0xb0] sm:$0xff] %vm3002_vm2, %v2794_v18  ;;  %v2809_v40 = vadd.f32 %v3700_v22, %v5667_v33 }
 0x2d4   :  { %v2803_v20 = vpop.f32.mrf.mxu0 }
 0x2d5   :  { %3028 = vst.msk [vmem:[%s5996_s7 + $0xc8] sm:$0xff] %vm3002_vm2, %v2809_v40  ;;  %v2804_v52 = vadd.f32 %v5667_v33, %v2803_v20 }
 0x2d7   :  { %3027 = vst.msk [vmem:[%s5996_s7 + $0xc0] sm:$0xff] %vm3002_vm2, %v2804_v52 }
 0x2d8   :  { %v3703_v55 = vpop.f32.mrf.mxu0 }
 0x2d9   :  { %v2819_v15 = vadd.f32 %v3703_v55, %v5667_v33 }
 0x2da   :  { %v2813_v31 = vpop.f32.mrf.mxu0 }
 0x2db   :  { %3030 = vst.msk [vmem:[%s5996_s7 + $0xd8] sm:$0xff] %vm3002_vm2, %v2819_v15  ;;  %v2814_v63 = vadd.f32 %v5667_v33, %v2813_v31 }
 0x2dd   :  { %3029 = vst.msk [vmem:[%s5996_s7 + $0xd0] sm:$0xff] %vm3002_vm2, %v2814_v63 }
 0x2de   :  { %v3706_v44 = vpop.f32.mrf.mxu0 }
 0x2df   :  { %v2829_v46 = vadd.f32 %v3706_v44, %v5667_v33 }
 0x2e0   :  { %v2823_v11 = vpop.f32.mrf.mxu0 }
 0x2e1   :  { %3032 = vst.msk [vmem:[%s5996_s7 + $0xe8] sm:$0xff] %vm3002_vm2, %v2829_v46  ;;  %v2824_v59 = vadd.f32 %v5667_v33, %v2823_v11 }
 0x2e2   :  { %v3709_v1 = vpop.f32.mrf.mxu0 }
 0x2e3   :  { %3031 = vst.msk [vmem:[%s5996_s7 + $0xe0] sm:$0xff] %vm3002_vm2, %v2824_v59  ;;  %v2839_v58 = vadd.f32 %v3709_v1, %v5667_v33 }
 0x2e4   :  { %v2833_v23 = vpop.f32.mrf.mxu0 }
 0x2e5   :  { %3034 = vst.msk [vmem:[%s5996_s7 + $0xf8] sm:$0xff] %vm3002_vm2, %v2839_v58  ;;  %v2834_v14 = vadd.f32 %v5667_v33, %v2833_v23 }
 0x2e7   :  { %3033 = vst.msk [vmem:[%s5996_s7 + $0xf0] sm:$0xff] %vm3002_vm2, %v2834_v14 }
 0x2e8   :  { %v3712_v6 = vpop.f32.mrf.mxu0 }
 0x2e9   :  { %v2849_v49 = vadd.f32 %v3712_v6, %v5667_v33 }
 0x2ea   :  { %v2843_v12 = vpop.f32.mrf.mxu0 }
 0x2eb   :  { %3036 = vst.msk [vmem:[%s5996_s7 + $0x108] sm:$0xff] %vm3002_vm2, %v2849_v49  ;;  %v2844_v16 = vadd.f32 %v5667_v33, %v2843_v12 }
 0x2ed   :  { %3035 = vst.msk [vmem:[%s5996_s7 + $0x100] sm:$0xff] %vm3002_vm2, %v2844_v16 }
 0x2ee   :  { %v3715_v0 = vpop.f32.mrf.mxu0 }
 0x2ef   :  { %v2859_v51 = vadd.f32 %v3715_v0, %v5667_v33 }
 0x2f0   :  { %v2853_v29 = vpop.f32.mrf.mxu0 }
 0x2f1   :  { %3038 = vst.msk [vmem:[%s5996_s7 + $0x118] sm:$0xff] %vm3002_vm2, %v2859_v51  ;;  %v2854_v57 = vadd.f32 %v5667_v33, %v2853_v29 }
 0x2f3   :  { %3037 = vst.msk [vmem:[%s5996_s7 + $0x110] sm:$0xff] %vm3002_vm2, %v2854_v57 }
 0x2f4   :  { %v3718_v2 = vpop.f32.mrf.mxu0 }
 0x2f5   :  { %v2869_v3 = vadd.f32 %v3718_v2, %v5667_v33 }
 0x2f6   :  { %v2863_v24 = vpop.f32.mrf.mxu0 }
 0x2f7   :  { %3040 = vst.msk [vmem:[%s5996_s7 + $0x128] sm:$0xff] %vm3002_vm2, %v2869_v3  ;;  %v2864_v54 = vadd.f32 %v5667_v33, %v2863_v24 }
 0x2f9   :  { %3039 = vst.msk [vmem:[%s5996_s7 + $0x120] sm:$0xff] %vm3002_vm2, %v2864_v54 }
 0x2fc   :  { %v3721_v25 = vpop.f32.mrf.mxu0 }
 0x2fd   :  { %v2879_v36 = vadd.f32 %v3721_v25, %v5667_v33 }
 0x2fe   :  { %v2873_v48 = vpop.f32.mrf.mxu0 }
 0x2ff   :  { %3042 = vst.msk [vmem:[%s5996_s7 + $0x138] sm:$0xff] %vm3002_vm2, %v2879_v36  ;;  %v2874_v41 = vadd.f32 %v5667_v33, %v2873_v48 }
 0x301   :  { %3041 = vst.msk [vmem:[%s5996_s7 + $0x130] sm:$0xff] %vm3002_vm2, %v2874_v41 }
 0x302   :  { %v3724_v26 = vpop.f32.mrf.mxu0 }
 0x303   :  { %v2889_v9 = vadd.f32 %v3724_v26, %v5667_v33 }
 0x304   :  { %v2883_v28 = vpop.f32.mrf.mxu0 }
 0x305   :  { %3044 = vst.msk [vmem:[%s5996_s7 + $0x148] sm:$0xff] %vm3002_vm2, %v2889_v9  ;;  %v2884_v42 = vadd.f32 %v5667_v33, %v2883_v28 }
 0x307   :  { %3043 = vst.msk [vmem:[%s5996_s7 + $0x140] sm:$0xff] %vm3002_vm2, %v2884_v42 }
 0x308   :  { %v3727_v45 = vpop.f32.mrf.mxu0 }
 0x309   :  { %v2899_v13 = vadd.f32 %v3727_v45, %v5667_v33 }
 0x30a   :  { %v2893_v30 = vpop.f32.mrf.mxu0 }
 0x30b   :  { %3046 = vst.msk [vmem:[%s5996_s7 + $0x158] sm:$0xff] %vm3002_vm2, %v2899_v13  ;;  %v2894_v10 = vadd.f32 %v5667_v33, %v2893_v30 }
 0x30d   :  { %3045 = vst.msk [vmem:[%s5996_s7 + $0x150] sm:$0xff] %vm3002_vm2, %v2894_v10 }
 0x30e   :  { %v3730_v38 = vpop.f32.mrf.mxu0 }
 0x30f   :  { %v2909_v62 = vadd.f32 %v3730_v38, %v5667_v33 }
 0x310   :  { %v2903_v7 = vpop.f32.mrf.mxu0 }
 0x311   :  { %3048 = vst.msk [vmem:[%s5996_s7 + $0x168] sm:$0xff] %vm3002_vm2, %v2909_v62  ;;  %v2904_v21 = vadd.f32 %v5667_v33, %v2903_v7 }
 0x313   :  { %3047 = vst.msk [vmem:[%s5996_s7 + $0x160] sm:$0xff] %vm3002_vm2, %v2904_v21 }
 0x315   :  { %v3733_v43 = vpop.f32.mrf.mxu0 }
 0x316   :  { %v2919_v32 = vadd.f32 %v3733_v43, %v5667_v33 }
 0x317   :  { %v2913_v19 = vpop.f32.mrf.mxu0 }
 0x318   :  { %3050 = vst.msk [vmem:[%s5996_s7 + $0x178] sm:$0xff] %vm3002_vm2, %v2919_v32  ;;  %v2914_v8 = vadd.f32 %v5667_v33, %v2913_v19 }
 0x319   :  { %v3736_v34 = vpop.f32.mrf.mxu0 }
 0x31a   :  { %3049 = vst.msk [vmem:[%s5996_s7 + $0x170] sm:$0xff] %vm3002_vm2, %v2914_v8  ;;  %v2929_v60 = vadd.f32 %v3736_v34, %v5667_v33 }
 0x31b   :  { %v2923_v50 = vpop.f32.mrf.mxu0 }
 0x31c   :  { %3052 = vst.msk [vmem:[%s5996_s7 + $0x188] sm:$0xff] %vm3002_vm2, %v2929_v60  ;;  %v2924_v47 = vadd.f32 %v5667_v33, %v2923_v50 }
 0x31d   :  { %v3739_v61 = vpop.f32.mrf.mxu0 }
 0x31e   :  { %3051 = vst.msk [vmem:[%s5996_s7 + $0x180] sm:$0xff] %vm3002_vm2, %v2924_v47  ;;  %v2939_v17 = vadd.f32 %v3739_v61, %v5667_v33 }
 0x31f   :  { %v2933_v5 = vpop.f32.mrf.mxu0 }
 0x320   :  { %3054 = vst.msk [vmem:[%s5996_s7 + $0x198] sm:$0xff] %vm3002_vm2, %v2939_v17  ;;  %v2934_v37 = vadd.f32 %v5667_v33, %v2933_v5 }
 0x321   :  { %v3742_v39 = vpop.f32.mrf.mxu0 }
 0x322   :  { %3053 = vst.msk [vmem:[%s5996_s7 + $0x190] sm:$0xff] %vm3002_vm2, %v2934_v37  ;;  %v2949_v53 = vadd.f32 %v3742_v39, %v5667_v33 }
 0x323   :  { %v2943_v27 = vpop.f32.mrf.mxu0 }
 0x324   :  { %3056 = vst.msk [vmem:[%s5996_s7 + $0x1a8] sm:$0xff] %vm3002_vm2, %v2949_v53  ;;  %v2944_v35 = vadd.f32 %v5667_v33, %v2943_v27 }
 0x325   :  { %v3745_v4 = vpop.f32.mrf.mxu0 }
 0x326   :  { %3055 = vst.msk [vmem:[%s5996_s7 + $0x1a0] sm:$0xff] %vm3002_vm2, %v2944_v35  ;;  %v2959_v56 = vadd.f32 %v3745_v4, %v5667_v33 }
 0x327   :  { %v2953_v18 = vpop.f32.mrf.mxu0 }
 0x328   :  { %3058 = vst.msk [vmem:[%s5996_s7 + $0x1b8] sm:$0xff] %vm3002_vm2, %v2959_v56  ;;  %v2954_v22 = vadd.f32 %v5667_v33, %v2953_v18 }
 0x329   :  { %v3748_v40 = vpop.f32.mrf.mxu0 }
 0x32a   :  { %3057 = vst.msk [vmem:[%s5996_s7 + $0x1b0] sm:$0xff] %vm3002_vm2, %v2954_v22  ;;  %v2969_v20 = vadd.f32 %v3748_v40, %v5667_v33 }
 0x32b   :  { %v2963_v52 = vpop.f32.mrf.mxu0 }
 0x32c   :  { %3060 = vst.msk [vmem:[%s5996_s7 + $0x1c8] sm:$0xff] %vm3002_vm2, %v2969_v20  ;;  %v2964_v55 = vadd.f32 %v5667_v33, %v2963_v52 }
 0x32d   :  { %v3751_v15 = vpop.f32.mrf.mxu0 }
 0x32e   :  { %3059 = vst.msk [vmem:[%s5996_s7 + $0x1c0] sm:$0xff] %vm3002_vm2, %v2964_v55  ;;  %v2979_v31 = vadd.f32 %v3751_v15, %v5667_v33 }
 0x32f   :  { %v2973_v63 = vpop.f32.mrf.mxu0 }
 0x330   :  { %3062 = vst.msk [vmem:[%s5996_s7 + $0x1d8] sm:$0xff] %vm3002_vm2, %v2979_v31  ;;  %v2974_v44 = vadd.f32 %v5667_v33, %v2973_v63 }
 0x331   :  { %v3754_v46 = vpop.f32.mrf.mxu0 }
 0x332   :  { %3061 = vst.msk [vmem:[%s5996_s7 + $0x1d0] sm:$0xff] %vm3002_vm2, %v2974_v44  ;;  %v2989_v11 = vadd.f32 %v3754_v46, %v5667_v33 }
 0x333   :  { %v2983_v59 = vpop.f32.mrf.mxu0 }
 0x334   :  { %3064 = vst.msk [vmem:[%s5996_s7 + $0x1e8] sm:$0xff] %vm3002_vm2, %v2989_v11  ;;  %v2984_v1 = vadd.f32 %v5667_v33, %v2983_v59 }
 0x335   :  { %v3757_v58 = vpop.f32.mrf.mxu0 }
 0x336   :  { %3063 = vst.msk [vmem:[%s5996_s7 + $0x1e0] sm:$0xff] %vm3002_vm2, %v2984_v1  ;;  %v2999_v23 = vadd.f32 %v3757_v58, %v5667_v33 }
 0x337   :  { %v2993_v14 = vpop.f32.mrf.mxu0 }
 0x338   :  { %3066 = vst.msk [vmem:[%s5996_s7 + $0x1f8] sm:$0xff] %vm3002_vm2, %v2999_v23  ;;  %v2994_v6 = vadd.f32 %v5667_v33, %v2993_v14 }
 0x33a   :  { %3065 = vst.msk [vmem:[%s5996_s7 + $0x1f0] sm:$0xff] %vm3002_vm2, %v2994_v6 }

</bundles_post_ra>
